<compile_context>
chip_gen: v5e
topology: v5e:2x2
jax: 0.10.0
libtpu: 0.0.40
codegen_flags: <defaults>
</compile_context>

<pallas_src>
from math import sqrt

import jax
import jax.numpy as jnp
from jax.experimental import pallas as pl
from jax.experimental.pallas import tpu as pltpu

EMB = 128                  # dim_k == dim_v == embed_size
NUM_HEADS = 4              # stand-in for config.num_heads (128 % 4 == 0)
HEAD_DIM = EMB // NUM_HEADS
LN_EPS = 1e-5              # torch.nn.LayerNorm default
OUT_PAD = 128              # lane-dense padding of the scalar value output
_N_ATT_PARAMS = 16         # packed operands per attention layer


# ---------------------------------------------------------------------------
# Fused kernel: att1 -> att2 -> sum over seq -> Linear/ReLU/Linear head
# ---------------------------------------------------------------------------
def _layernorm(z, gamma, beta):
    m = jnp.mean(z, axis=-1, keepdims=True)
    v = jnp.mean((z - m) ** 2, axis=-1, keepdims=True)
    return (z - m) * jax.lax.rsqrt(v + LN_EPS) * gamma + beta


def _fused_critic_kernel(x_ref, *refs):
    out_ref = refs[-1]
    w = refs[:-1]
    layer_params = (w[0:_N_ATT_PARAMS], w[_N_ATT_PARAMS:2 * _N_ATT_PARAMS])
    hw1, hb1, hw2, hb2 = w[2 * _N_ATT_PARAMS:]

    bt, seq, d_in = x_ref.shape
    rows = bt * seq
    x = x_ref[...].reshape(rows, d_in)

    def mm(a, w_ref, b_ref):
        wm = w_ref[...]                             # bf16 (default) or f32
        return jnp.dot(a.astype(wm.dtype), wm,
                       preferred_element_type=jnp.float32) + b_ref[...]

    def stack_heads(t):
        """(rows, E) -> (H*bt, seq, HEAD_DIM), heads stacked on the batch axis."""
        t3 = t.reshape(bt, seq, EMB)
        return jnp.concatenate(
            [t3[:, :, h * HEAD_DIM:(h + 1) * HEAD_DIM] for h in range(NUM_HEADS)],
            axis=0)

    def unstack_heads(t):
        """(H*bt, seq, HEAD_DIM) -> (rows, E), heads back on lanes."""
        return jnp.concatenate(
            [t[h * bt:(h + 1) * bt] for h in range(NUM_HEADS)],
            axis=-1).reshape(rows, EMB)

    def attention_layer(z, p):
        (wqkv1, bqkv1, wq2, bq2, wk2, bk2, wv2, bv2,
         wf1, bf1, wf2, bf2, g1, be1, g2, be2) = p

        # Fused first projection layer for q/k/v: one (rows, 3E) matmul + ReLU.
        h = jnp.maximum(mm(z, wqkv1, bqkv1), 0.0)
        # Full-width (rows,128)x(128,128) second projections (MXU-friendly);
        # head h is already in columns h*32:(h+1)*32.  Slices below are
        # 128-lane aligned -> free.
        q = mm(h[:, 0 * EMB:1 * EMB], wq2, bq2)     # (rows, E) f32
        k = mm(h[:, 1 * EMB:2 * EMB], wk2, bk2)     # 1/sqrt(E) folded into wk2/bk2
        v = mm(h[:, 2 * EMB:3 * EMB], wv2, bv2)

        # Head-stacked attention: one einsum / softmax / einsum for all heads.
        qh, kh, vh = stack_heads(q), stack_heads(k), stack_heads(v)
        energy = jnp.einsum("bqd,bkd->bqk", qh, kh,
                            preferred_element_type=jnp.float32)
        energy = energy - jnp.max(energy, axis=-1, keepdims=True)
        e = jnp.exp(energy)
        att = e / jnp.sum(e, axis=-1, keepdims=True)
        attn = jnp.einsum("bqk,bkd->bqd", att, vh,
                          preferred_element_type=jnp.float32)
        attn_full = unstack_heads(attn)

        # "+ queries" residual once, full width (== per-head residual of ref).
        x1 = _layernorm(attn_full + q, g1[...], be1[...])
        ff = jnp.maximum(mm(x1, wf1, bf1), 0.0)
        ff = mm(ff, wf2, bf2)
        return _layernorm(x1 + ff, g2[...], be2[...])

    z = attention_layer(x, layer_params[0])
    z = attention_layer(z, layer_params[1])

    pooled = jnp.sum(z.reshape(bt, seq, EMB), axis=1)          # sum over seq
    hidden = jnp.maximum(mm(pooled, hw1, hb1), 0.0)
    out_ref[...] = mm(hidden, hw2, hb2).astype(out_ref.dtype)  # (bt, 128) lane-dense


# ---------------------------------------------------------------------------
# Parameter packing (done once, outside the kernel)
# ---------------------------------------------------------------------------
def _pack_attention_params(p, wdt):
    f32 = jnp.float32
    scale = 1.0 / sqrt(EMB)
    wqkv1 = jnp.concatenate([p["wq1"], p["wk1"], p["wv1"]], axis=1)   # (Din, 3E)
    bqkv1 = jnp.concatenate([p["bq1"], p["bk1"], p["bv1"]], axis=1)   # (1, 3E)
    return (
        wqkv1.astype(wdt), bqkv1.astype(f32),
        p["wq2"].astype(wdt), p["bq2"].astype(f32),
        (p["wk2"] * scale).astype(wdt), (p["bk2"] * scale).astype(f32),
        p["wv2"].astype(wdt), p["bv2"].astype(f32),
        p["wf1"].astype(wdt), p["bf1"].astype(f32),
        p["wf2"].astype(wdt), p["bf2"].astype(f32),
        p["g1"].astype(f32), p["be1"].astype(f32),
        p["g2"].astype(f32), p["be2"].astype(f32),
    )


def _pack_head_params(p, wdt):
    f32 = jnp.float32
    w2p = jnp.pad(p["w2"], ((0, 0), (0, OUT_PAD - p["w2"].shape[1])))
    b2p = jnp.pad(p["b2"], ((0, 0), (0, OUT_PAD - p["b2"].shape[1])))
    return (p["w1"].astype(wdt), p["b1"].astype(f32),
            w2p.astype(wdt), b2p.astype(f32))


def _pack_params(params, wdt):
    return (tuple(_pack_attention_params(params["att1"], wdt))
            + tuple(_pack_attention_params(params["att2"], wdt))
            + tuple(_pack_head_params(params["head"], wdt)))


# ---------------------------------------------------------------------------
# Wrapper
# ---------------------------------------------------------------------------
def _plan_tiles(batch, seq, target_rows, min_steps):
    """Pick (batch_tile, num_tiles).  bt is a multiple of 8 giving ~target_rows
    MXU rows per grid step; the batch is later zero-padded to bt*num_tiles, and
    we keep >= min_steps grid steps so the parallel axis can use both v7x TCs."""
    bt = max(8, ((max(1, target_rows // max(seq, 1))) // 8) * 8)
    n = max(1, -(-batch // bt))
    if n < min_steps:
        bt = max(8, ((-(-batch // min_steps) + 7) // 8) * 8)
        n = max(min_steps, -(-batch // bt))
    return bt, n


def _const_index_map(ndim):
    return lambda i, _n=ndim: (0,) * _n


def critic_network_forward(state, params, *, compute_dtype=jnp.bfloat16,
                           batch_tile=None, target_rows=512, min_grid_steps=2):
    """CriticNetwork forward. state: (B, S, input_size) -> (1, B, 1)."""
    B, S, D_in = state.shape
    flat = _pack_params(params, compute_dtype)

    if batch_tile is None:
        bt, n_tiles = _plan_tiles(B, S, target_rows, min_grid_steps)
    else:
        bt = batch_tile
        n_tiles = max(1, -(-B // bt))
    b_pad = bt * n_tiles
    if b_pad != B:
        state = jnp.pad(state, ((0, b_pad - B), (0, 0), (0, 0)))
    x = state.astype(compute_dtype)            # bf16 input halves state DMA

    in_specs = [pl.BlockSpec((bt, S, D_in), lambda i: (i, 0, 0))]
    # Weights: full blocks with constant index maps -> stay resident in VMEM
    # across grid steps (no per-step re-DMA).  Footprint is ~MBs, far below
    # even v7x's 64 MiB, so no vmem_limit override is needed.
    in_specs += [pl.BlockSpec(w.shape, _const_index_map(w.ndim)) for w in flat]
    out_spec = pl.BlockSpec((bt, OUT_PAD), lambda i: (i, 0))

    out = pl.pallas_call(
        _fused_critic_kernel,
        out_shape=jax.ShapeDtypeStruct((b_pad, OUT_PAD), jnp.float32),
        grid=(n_tiles,),
        in_specs=in_specs,
        out_specs=out_spec,
        compiler_params=pltpu.CompilerParams(
            dimension_semantics=("parallel",)),   # batch-tile axis -> megacore
    )(x, *flat)

    value = out[:B, :1]         # real value lives in lane 0 of the padded block
    return value[None]          # (1, B, 1) == torch unsqueeze(0)


# ---------------------------------------------------------------------------
# Deterministic parameter init (mimics torch.nn.Linear default init)
# ---------------------------------------------------------------------------
def _init_linear(key, fan_in, fan_out):
    kw, kb = jax.random.split(key)
    bound = 1.0 / sqrt(fan_in)
    w = jax.random.uniform(kw, (fan_in, fan_out), jnp.float32, -bound, bound)
    b = jax.random.uniform(kb, (1, fan_out), jnp.float32, -bound, bound)
    return w, b


def init_attention_params(key, input_size, emb):
    ks = jax.random.split(key, 8)
    p = {}
    p["wq1"], p["bq1"] = _init_linear(ks[0], input_size, emb)
    p["wq2"], p["bq2"] = _init_linear(ks[1], emb, emb)
    p["wk1"], p["bk1"] = _init_linear(ks[2], input_size, emb)
    p["wk2"], p["bk2"] = _init_linear(ks[3], emb, emb)
    p["wv1"], p["bv1"] = _init_linear(ks[4], input_size, emb)
    p["wv2"], p["bv2"] = _init_linear(ks[5], emb, emb)
    p["wf1"], p["bf1"] = _init_linear(ks[6], emb, 2 * emb)
    p["wf2"], p["bf2"] = _init_linear(ks[7], 2 * emb, emb)
    p["g1"] = jnp.ones((1, emb), jnp.float32)
    p["be1"] = jnp.zeros((1, emb), jnp.float32)
    p["g2"] = jnp.ones((1, emb), jnp.float32)
    p["be2"] = jnp.zeros((1, emb), jnp.float32)
    return p


def init_critic_params(key, input_size):
    k1, k2, k3, k4 = jax.random.split(key, 4)
    head = {}
    head["w1"], head["b1"] = _init_linear(k3, EMB, EMB)
    head["w2"], head["b2"] = _init_linear(k4, EMB, 1)
    return {
        "att1": init_attention_params(k1, input_size, EMB),
        "att2": init_attention_params(k2, EMB, EMB),
        "head": head,
    }


# ---------------------------------------------------------------------------
# Pure-JAX reference (highest matmul precision) for numerical sanity check
# ---------------------------------------------------------------------------
_P_HI = jax.lax.Precision.HIGHEST


def _ref_attention(x, p):
    def mlp2(z, w1, b1, w2, b2):
        h = jnp.maximum(jnp.matmul(z, w1, precision=_P_HI) + b1, 0.0)
        return jnp.matmul(h, w2, precision=_P_HI) + b2

    q = mlp2(x, p["wq1"], p["bq1"], p["wq2"], p["bq2"])
    k = mlp2(x, p["wk1"], p["bk1"], p["wk2"], p["bk2"])
    v = mlp2(x, p["wv1"], p["bv1"], p["wv2"], p["bv2"])
    n, s, _ = q.shape
    qh = q.reshape(n, s, NUM_HEADS, HEAD_DIM)
    kh = k.reshape(n, s, NUM_HEADS, HEAD_DIM)
    vh = v.reshape(n, s, NUM_HEADS, HEAD_DIM)
    energy = jnp.einsum("nqhd,nkhd->nhqk", qh, kh, precision=_P_HI) * (1.0 / sqrt(EMB))
    att = jax.nn.softmax(energy, axis=3)
    attn = jnp.einsum("nhql,nlhd->nqhd", att, vh, precision=_P_HI).reshape(n, s, EMB)

    def ln(z, g, b):
        m = jnp.mean(z, -1, keepdims=True)
        var = jnp.mean((z - m) ** 2, -1, keepdims=True)
        return (z - m) / jnp.sqrt(var + LN_EPS) * g + b

    x1 = ln(attn + q, p["g1"], p["be1"])
    ff = mlp2(x1, p["wf1"], p["bf1"], p["wf2"], p["bf2"])
    return ln(x1 + ff, p["g2"], p["be2"])


def _ref_forward(state, params):
    x = _ref_attention(state, params["att1"])
    x = _ref_attention(x, params["att2"])
    s = jnp.sum(x, axis=1)
    h = params["head"]
    hid = jnp.maximum(jnp.matmul(s, h["w1"], precision=_P_HI) + h["b1"], 0.0)
    v = jnp.matmul(hid, h["w2"], precision=_P_HI) + h["b2"]
    return v[None]


# ---------------------------------------------------------------------------
if __name__ == "__main__":
    BATCH, SEQ, INPUT_SIZE = 2, 8, 32

    root = jax.random.PRNGKey(0)
    k_param, k_data = jax.random.split(root)
    params = init_critic_params(k_param, INPUT_SIZE)
    state = jax.random.normal(k_data, (BATCH, SEQ, INPUT_SIZE), jnp.float32)

    ref = jax.block_until_ready(_ref_forward(state, params))

    # f32 debug/reference mode — strict check against the pure-JAX reference.
    value_f32 = jax.block_until_ready(
        critic_network_forward(state, params, compute_dtype=jnp.float32))
    assert value_f32.shape == (1, BATCH, 1), value_f32.shape
    assert jnp.allclose(value_f32, ref, atol=1e-3, rtol=1e-3), (value_f32, ref)

    # Default bf16-on-MXU path (v6e/v7x recommendation) — tightened check.
    value = jax.block_until_ready(critic_network_forward(state, params))
    assert value.shape == (1, BATCH, 1), value.shape
    assert bool(jnp.all(jnp.isfinite(value)))
    assert jnp.allclose(value, ref, atol=1.5e-1, rtol=2e-2), (value, ref)

    print("KERNEL_OK")
</pallas_src>

<mosaic_0001>
module attributes {stable_mosaic.version = 11 : i64} {
  func.func @_fused_critic_kernel(%arg0: i32, %arg1: memref<8x8x32xf32, #tpu.memory_space<vmem>>, %arg2: memref<32x384xf32, #tpu.memory_space<vmem>>, %arg3: memref<1x384xf32, #tpu.memory_space<vmem>>, %arg4: memref<128x128xf32, #tpu.memory_space<vmem>>, %arg5: memref<1x128xf32, #tpu.memory_space<vmem>>, %arg6: memref<128x128xf32, #tpu.memory_space<vmem>>, %arg7: memref<1x128xf32, #tpu.memory_space<vmem>>, %arg8: memref<128x128xf32, #tpu.memory_space<vmem>>, %arg9: memref<1x128xf32, #tpu.memory_space<vmem>>, %arg10: memref<128x256xf32, #tpu.memory_space<vmem>>, %arg11: memref<1x256xf32, #tpu.memory_space<vmem>>, %arg12: memref<256x128xf32, #tpu.memory_space<vmem>>, %arg13: memref<1x128xf32, #tpu.memory_space<vmem>>, %arg14: memref<1x128xf32, #tpu.memory_space<vmem>>, %arg15: memref<1x128xf32, #tpu.memory_space<vmem>>, %arg16: memref<1x128xf32, #tpu.memory_space<vmem>>, %arg17: memref<1x128xf32, #tpu.memory_space<vmem>>, %arg18: memref<128x384xf32, #tpu.memory_space<vmem>>, %arg19: memref<1x384xf32, #tpu.memory_space<vmem>>, %arg20: memref<128x128xf32, #tpu.memory_space<vmem>>, %arg21: memref<1x128xf32, #tpu.memory_space<vmem>>, %arg22: memref<128x128xf32, #tpu.memory_space<vmem>>, %arg23: memref<1x128xf32, #tpu.memory_space<vmem>>, %arg24: memref<128x128xf32, #tpu.memory_space<vmem>>, %arg25: memref<1x128xf32, #tpu.memory_space<vmem>>, %arg26: memref<128x256xf32, #tpu.memory_space<vmem>>, %arg27: memref<1x256xf32, #tpu.memory_space<vmem>>, %arg28: memref<256x128xf32, #tpu.memory_space<vmem>>, %arg29: memref<1x128xf32, #tpu.memory_space<vmem>>, %arg30: memref<1x128xf32, #tpu.memory_space<vmem>>, %arg31: memref<1x128xf32, #tpu.memory_space<vmem>>, %arg32: memref<1x128xf32, #tpu.memory_space<vmem>>, %arg33: memref<1x128xf32, #tpu.memory_space<vmem>>, %arg34: memref<128x128xf32, #tpu.memory_space<vmem>>, %arg35: memref<1x128xf32, #tpu.memory_space<vmem>>, %arg36: memref<128x128xf32, #tpu.memory_space<vmem>>, %arg37: memref<1x128xf32, #tpu.memory_space<vmem>>, %arg38: memref<8x128xf32, #tpu.memory_space<vmem>>) attributes {dimension_semantics = [#tpu.dimension_semantics<parallel>], iteration_bounds = array<i64: 2>, scalar_prefetch = 0 : i64, scratch_operands = 0 : i64, tpu.core_type = #tpu.core_type<tc>, window_params = [{transform_indices = @transform_0, window_bounds = array<i64: 8, 8, 32>}, {pipeline_mode = #tpu.pipeline_mode<synchronous>, transform_indices = @transform_1, window_bounds = array<i64: 32, 384>}, {pipeline_mode = #tpu.pipeline_mode<synchronous>, transform_indices = @transform_2, window_bounds = array<i64: 1, 384>}, {pipeline_mode = #tpu.pipeline_mode<synchronous>, transform_indices = @transform_3, window_bounds = array<i64: 128, 128>}, {pipeline_mode = #tpu.pipeline_mode<synchronous>, transform_indices = @transform_4, window_bounds = array<i64: 1, 128>}, {pipeline_mode = #tpu.pipeline_mode<synchronous>, transform_indices = @transform_5, window_bounds = array<i64: 128, 128>}, {pipeline_mode = #tpu.pipeline_mode<synchronous>, transform_indices = @transform_6, window_bounds = array<i64: 1, 128>}, {pipeline_mode = #tpu.pipeline_mode<synchronous>, transform_indices = @transform_7, window_bounds = array<i64: 128, 128>}, {pipeline_mode = #tpu.pipeline_mode<synchronous>, transform_indices = @transform_8, window_bounds = array<i64: 1, 128>}, {pipeline_mode = #tpu.pipeline_mode<synchronous>, transform_indices = @transform_9, window_bounds = array<i64: 128, 256>}, {pipeline_mode = #tpu.pipeline_mode<synchronous>, transform_indices = @transform_10, window_bounds = array<i64: 1, 256>}, {pipeline_mode = #tpu.pipeline_mode<synchronous>, transform_indices = @transform_11, window_bounds = array<i64: 256, 128>}, {pipeline_mode = #tpu.pipeline_mode<synchronous>, transform_indices = @transform_12, window_bounds = array<i64: 1, 128>}, {pipeline_mode = #tpu.pipeline_mode<synchronous>, transform_indices = @transform_13, window_bounds = array<i64: 1, 128>}, {pipeline_mode = #tpu.pipeline_mode<synchronous>, transform_indices = @transform_14, window_bounds = array<i64: 1, 128>}, {pipeline_mode = #tpu.pipeline_mode<synchronous>, transform_indices = @transform_15, window_bounds = array<i64: 1, 128>}, {pipeline_mode = #tpu.pipeline_mode<synchronous>, transform_indices = @transform_16, window_bounds = array<i64: 1, 128>}, {pipeline_mode = #tpu.pipeline_mode<synchronous>, transform_indices = @transform_17, window_bounds = array<i64: 128, 384>}, {pipeline_mode = #tpu.pipeline_mode<synchronous>, transform_indices = @transform_18, window_bounds = array<i64: 1, 384>}, {pipeline_mode = #tpu.pipeline_mode<synchronous>, transform_indices = @transform_19, window_bounds = array<i64: 128, 128>}, {pipeline_mode = #tpu.pipeline_mode<synchronous>, transform_indices = @transform_20, window_bounds = array<i64: 1, 128>}, {pipeline_mode = #tpu.pipeline_mode<synchronous>, transform_indices = @transform_21, window_bounds = array<i64: 128, 128>}, {pipeline_mode = #tpu.pipeline_mode<synchronous>, transform_indices = @transform_22, window_bounds = array<i64: 1, 128>}, {pipeline_mode = #tpu.pipeline_mode<synchronous>, transform_indices = @transform_23, window_bounds = array<i64: 128, 128>}, {pipeline_mode = #tpu.pipeline_mode<synchronous>, transform_indices = @transform_24, window_bounds = array<i64: 1, 128>}, {pipeline_mode = #tpu.pipeline_mode<synchronous>, transform_indices = @transform_25, window_bounds = array<i64: 128, 256>}, {pipeline_mode = #tpu.pipeline_mode<synchronous>, transform_indices = @transform_26, window_bounds = array<i64: 1, 256>}, {pipeline_mode = #tpu.pipeline_mode<synchronous>, transform_indices = @transform_27, window_bounds = array<i64: 256, 128>}, {pipeline_mode = #tpu.pipeline_mode<synchronous>, transform_indices = @transform_28, window_bounds = array<i64: 1, 128>}, {pipeline_mode = #tpu.pipeline_mode<synchronous>, transform_indices = @transform_29, window_bounds = array<i64: 1, 128>}, {pipeline_mode = #tpu.pipeline_mode<synchronous>, transform_indices = @transform_30, window_bounds = array<i64: 1, 128>}, {pipeline_mode = #tpu.pipeline_mode<synchronous>, transform_indices = @transform_31, window_bounds = array<i64: 1, 128>}, {pipeline_mode = #tpu.pipeline_mode<synchronous>, transform_indices = @transform_32, window_bounds = array<i64: 1, 128>}, {pipeline_mode = #tpu.pipeline_mode<synchronous>, transform_indices = @transform_33, window_bounds = array<i64: 128, 128>}, {pipeline_mode = #tpu.pipeline_mode<synchronous>, transform_indices = @transform_34, window_bounds = array<i64: 1, 128>}, {pipeline_mode = #tpu.pipeline_mode<synchronous>, transform_indices = @transform_35, window_bounds = array<i64: 128, 128>}, {pipeline_mode = #tpu.pipeline_mode<synchronous>, transform_indices = @transform_36, window_bounds = array<i64: 1, 128>}, {transform_indices = @transform_37, window_bounds = array<i64: 8, 128>}]} {
    %c0 = arith.constant 0 : index
    %c0_0 = arith.constant 0 : index
    %c0_1 = arith.constant 0 : index
    %0 = vector.load %arg1[%c0, %c0_0, %c0_1] : memref<8x8x32xf32, #tpu.memory_space<vmem>>, vector<8x8x32xf32>
    %1 = vector.shape_cast %0 : vector<8x8x32xf32> to vector<64x32xf32>
    %c0_2 = arith.constant 0 : index
    %c0_3 = arith.constant 0 : index
    %2 = vector.load %arg2[%c0_2, %c0_3] : memref<32x384xf32, #tpu.memory_space<vmem>>, vector<32x384xf32>
    %cst = arith.constant dense<0.000000e+00> : vector<64x384xf32>
    %3 = tpu.matmul %1, %2, %cst {dimension_numbers = #tpu.dot_dimension_numbers<[1], [0], [0], [1], [0, 0, 1, 1], [], []>} : vector<64x32xf32>, vector<32x384xf32>, vector<64x384xf32> -> vector<64x384xf32>
    %c0_4 = arith.constant 0 : index
    %c0_5 = arith.constant 0 : index
    %4 = vector.load %arg3[%c0_4, %c0_5] : memref<1x384xf32, #tpu.memory_space<vmem>>, vector<1x384xf32>
    %5 = vector.broadcast %4 : vector<1x384xf32> to vector<64x384xf32>
    %6 = arith.addf %3, %5 : vector<64x384xf32>
    %cst_6 = arith.constant 0.000000e+00 : f32
    %7 = vector.broadcast %cst_6 : f32 to vector<64x384xf32>
    %8 = arith.maximumf %6, %7 : vector<64x384xf32>
    %9 = vector.extract_strided_slice %8 {offsets = [0, 0], sizes = [64, 128], strides = [1, 1]} : vector<64x384xf32> to vector<64x128xf32>
    %c0_7 = arith.constant 0 : index
    %c0_8 = arith.constant 0 : index
    %10 = vector.load %arg4[%c0_7, %c0_8] : memref<128x128xf32, #tpu.memory_space<vmem>>, vector<128x128xf32>
    %cst_9 = arith.constant dense<0.000000e+00> : vector<64x128xf32>
    %11 = tpu.matmul %9, %10, %cst_9 {dimension_numbers = #tpu.dot_dimension_numbers<[1], [0], [0], [1], [0, 0, 1, 1], [], []>} : vector<64x128xf32>, vector<128x128xf32>, vector<64x128xf32> -> vector<64x128xf32>
    %c0_10 = arith.constant 0 : index
    %c0_11 = arith.constant 0 : index
    %12 = vector.load %arg5[%c0_10, %c0_11] : memref<1x128xf32, #tpu.memory_space<vmem>>, vector<1x128xf32>
    %13 = vector.broadcast %12 : vector<1x128xf32> to vector<64x128xf32>
    %14 = arith.addf %11, %13 : vector<64x128xf32>
    %15 = vector.extract_strided_slice %8 {offsets = [0, 128], sizes = [64, 128], strides = [1, 1]} : vector<64x384xf32> to vector<64x128xf32>
    %c0_12 = arith.constant 0 : index
    %c0_13 = arith.constant 0 : index
    %16 = vector.load %arg6[%c0_12, %c0_13] : memref<128x128xf32, #tpu.memory_space<vmem>>, vector<128x128xf32>
    %cst_14 = arith.constant dense<0.000000e+00> : vector<64x128xf32>
    %17 = tpu.matmul %15, %16, %cst_14 {dimension_numbers = #tpu.dot_dimension_numbers<[1], [0], [0], [1], [0, 0, 1, 1], [], []>} : vector<64x128xf32>, vector<128x128xf32>, vector<64x128xf32> -> vector<64x128xf32>
    %c0_15 = arith.constant 0 : index
    %c0_16 = arith.constant 0 : index
    %18 = vector.load %arg7[%c0_15, %c0_16] : memref<1x128xf32, #tpu.memory_space<vmem>>, vector<1x128xf32>
    %19 = vector.broadcast %18 : vector<1x128xf32> to vector<64x128xf32>
    %20 = arith.addf %17, %19 : vector<64x128xf32>
    %21 = vector.extract_strided_slice %8 {offsets = [0, 256], sizes = [64, 128], strides = [1, 1]} : vector<64x384xf32> to vector<64x128xf32>
    %c0_17 = arith.constant 0 : index
    %c0_18 = arith.constant 0 : index
    %22 = vector.load %arg8[%c0_17, %c0_18] : memref<128x128xf32, #tpu.memory_space<vmem>>, vector<128x128xf32>
    %cst_19 = arith.constant dense<0.000000e+00> : vector<64x128xf32>
    %23 = tpu.matmul %21, %22, %cst_19 {dimension_numbers = #tpu.dot_dimension_numbers<[1], [0], [0], [1], [0, 0, 1, 1], [], []>} : vector<64x128xf32>, vector<128x128xf32>, vector<64x128xf32> -> vector<64x128xf32>
    %c0_20 = arith.constant 0 : index
    %c0_21 = arith.constant 0 : index
    %24 = vector.load %arg9[%c0_20, %c0_21] : memref<1x128xf32, #tpu.memory_space<vmem>>, vector<1x128xf32>
    %25 = vector.broadcast %24 : vector<1x128xf32> to vector<64x128xf32>
    %26 = arith.addf %23, %25 : vector<64x128xf32>
    %27 = vector.shape_cast %14 : vector<64x128xf32> to vector<8x8x128xf32>
    %28 = vector.extract_strided_slice %27 {offsets = [0, 0, 0], sizes = [8, 8, 32], strides = [1, 1, 1]} : vector<8x8x128xf32> to vector<8x8x32xf32>
    %29 = vector.extract_strided_slice %27 {offsets = [0, 0, 32], sizes = [8, 8, 32], strides = [1, 1, 1]} : vector<8x8x128xf32> to vector<8x8x32xf32>
    %30 = vector.extract_strided_slice %27 {offsets = [0, 0, 64], sizes = [8, 8, 32], strides = [1, 1, 1]} : vector<8x8x128xf32> to vector<8x8x32xf32>
    %31 = vector.extract_strided_slice %27 {offsets = [0, 0, 96], sizes = [8, 8, 32], strides = [1, 1, 1]} : vector<8x8x128xf32> to vector<8x8x32xf32>
    %32 = tpu.concatenate %28, %29, %30, %31 in 0 : vector<8x8x32xf32>, vector<8x8x32xf32>, vector<8x8x32xf32>, vector<8x8x32xf32> -> vector<32x8x32xf32>
    %33 = vector.shape_cast %20 : vector<64x128xf32> to vector<8x8x128xf32>
    %34 = vector.extract_strided_slice %33 {offsets = [0, 0, 0], sizes = [8, 8, 32], strides = [1, 1, 1]} : vector<8x8x128xf32> to vector<8x8x32xf32>
    %35 = vector.extract_strided_slice %33 {offsets = [0, 0, 32], sizes = [8, 8, 32], strides = [1, 1, 1]} : vector<8x8x128xf32> to vector<8x8x32xf32>
    %36 = vector.extract_strided_slice %33 {offsets = [0, 0, 64], sizes = [8, 8, 32], strides = [1, 1, 1]} : vector<8x8x128xf32> to vector<8x8x32xf32>
    %37 = vector.extract_strided_slice %33 {offsets = [0, 0, 96], sizes = [8, 8, 32], strides = [1, 1, 1]} : vector<8x8x128xf32> to vector<8x8x32xf32>
    %38 = tpu.concatenate %34, %35, %36, %37 in 0 : vector<8x8x32xf32>, vector<8x8x32xf32>, vector<8x8x32xf32>, vector<8x8x32xf32> -> vector<32x8x32xf32>
    %39 = vector.shape_cast %26 : vector<64x128xf32> to vector<8x8x128xf32>
    %40 = vector.extract_strided_slice %39 {offsets = [0, 0, 0], sizes = [8, 8, 32], strides = [1, 1, 1]} : vector<8x8x128xf32> to vector<8x8x32xf32>
    %41 = vector.extract_strided_slice %39 {offsets = [0, 0, 32], sizes = [8, 8, 32], strides = [1, 1, 1]} : vector<8x8x128xf32> to vector<8x8x32xf32>
    %42 = vector.extract_strided_slice %39 {offsets = [0, 0, 64], sizes = [8, 8, 32], strides = [1, 1, 1]} : vector<8x8x128xf32> to vector<8x8x32xf32>
    %43 = vector.extract_strided_slice %39 {offsets = [0, 0, 96], sizes = [8, 8, 32], strides = [1, 1, 1]} : vector<8x8x128xf32> to vector<8x8x32xf32>
    %44 = tpu.concatenate %40, %41, %42, %43 in 0 : vector<8x8x32xf32>, vector<8x8x32xf32>, vector<8x8x32xf32>, vector<8x8x32xf32> -> vector<32x8x32xf32>
    "tpu.trace_start"() <{level = 10 : i32, message = "bqd,bkd->bqk"}> : () -> ()
    %cst_22 = arith.constant dense<0.000000e+00> : vector<32x8x8xf32>
    %45 = tpu.matmul %32, %38, %cst_22 {dimension_numbers = #tpu.dot_dimension_numbers<[2], [2], [1], [1], [0, 0, 0, 1, 1, 1], [0], [0]>} : vector<32x8x32xf32>, vector<32x8x32xf32>, vector<32x8x8xf32> -> vector<32x8x8xf32>
    "tpu.trace_stop"() : () -> ()
    %cst_23 = arith.constant dense<0xFF800000> : vector<32x8xf32>
    %46 = vector.multi_reduction <maximumf>, %45, %cst_23 [2] : vector<32x8x8xf32> to vector<32x8xf32>
    %47 = vector.shape_cast %46 : vector<32x8xf32> to vector<32x8x1xf32>
    %48 = vector.broadcast %47 : vector<32x8x1xf32> to vector<32x8x8xf32>
    %49 = arith.subf %45, %48 : vector<32x8x8xf32>
    %50 = math.exp %49 : vector<32x8x8xf32>
    %cst_24 = arith.constant dense<0.000000e+00> : vector<32x8xf32>
    %51 = vector.multi_reduction <add>, %50, %cst_24 [2] : vector<32x8x8xf32> to vector<32x8xf32>
    %52 = vector.shape_cast %51 : vector<32x8xf32> to vector<32x8x1xf32>
    %53 = vector.broadcast %52 : vector<32x8x1xf32> to vector<32x8x8xf32>
    %54 = arith.divf %50, %53 : vector<32x8x8xf32>
    "tpu.trace_start"() <{level = 10 : i32, message = "bqk,bkd->bqd"}> : () -> ()
    %cst_25 = arith.constant dense<0.000000e+00> : vector<32x8x32xf32>
    %55 = tpu.matmul %54, %44, %cst_25 {dimension_numbers = #tpu.dot_dimension_numbers<[2], [1], [1], [2], [0, 0, 0, 1, 1, 2], [0], [0]>} : vector<32x8x8xf32>, vector<32x8x32xf32>, vector<32x8x32xf32> -> vector<32x8x32xf32>
    "tpu.trace_stop"() : () -> ()
    %56 = vector.extract_strided_slice %55 {offsets = [0, 0, 0], sizes = [8, 8, 32], strides = [1, 1, 1]} : vector<32x8x32xf32> to vector<8x8x32xf32>
    %57 = vector.extract_strided_slice %55 {offsets = [8, 0, 0], sizes = [8, 8, 32], strides = [1, 1, 1]} : vector<32x8x32xf32> to vector<8x8x32xf32>
    %58 = vector.extract_strided_slice %55 {offsets = [16, 0, 0], sizes = [8, 8, 32], strides = [1, 1, 1]} : vector<32x8x32xf32> to vector<8x8x32xf32>
    %59 = vector.extract_strided_slice %55 {offsets = [24, 0, 0], sizes = [8, 8, 32], strides = [1, 1, 1]} : vector<32x8x32xf32> to vector<8x8x32xf32>
    %60 = tpu.concatenate %56, %57, %58, %59 in 2 : vector<8x8x32xf32>, vector<8x8x32xf32>, vector<8x8x32xf32>, vector<8x8x32xf32> -> vector<8x8x128xf32>
    %61 = vector.shape_cast %60 : vector<8x8x128xf32> to vector<64x128xf32>
    %62 = arith.addf %61, %14 : vector<64x128xf32>
    %c0_26 = arith.constant 0 : index
    %c0_27 = arith.constant 0 : index
    %63 = vector.load %arg14[%c0_26, %c0_27] : memref<1x128xf32, #tpu.memory_space<vmem>>, vector<1x128xf32>
    %c0_28 = arith.constant 0 : index
    %c0_29 = arith.constant 0 : index
    %64 = vector.load %arg15[%c0_28, %c0_29] : memref<1x128xf32, #tpu.memory_space<vmem>>, vector<1x128xf32>
    %cst_30 = arith.constant dense<0.000000e+00> : vector<64xf32>
    %65 = vector.multi_reduction <add>, %62, %cst_30 [1] : vector<64x128xf32> to vector<64xf32>
    %66 = vector.shape_cast %65 : vector<64xf32> to vector<64x1xf32>
    %cst_31 = arith.constant 1.280000e+02 : f32
    %67 = vector.broadcast %cst_31 : f32 to vector<64x1xf32>
    %68 = arith.divf %66, %67 : vector<64x1xf32>
    %69 = vector.broadcast %68 : vector<64x1xf32> to vector<64x128xf32>
    %70 = arith.subf %62, %69 : vector<64x128xf32>
    %71 = arith.mulf %70, %70 : vector<64x128xf32>
    %cst_32 = arith.constant dense<0.000000e+00> : vector<64xf32>
    %72 = vector.multi_reduction <add>, %71, %cst_32 [1] : vector<64x128xf32> to vector<64xf32>
    %73 = vector.shape_cast %72 : vector<64xf32> to vector<64x1xf32>
    %cst_33 = arith.constant 1.280000e+02 : f32
    %74 = vector.broadcast %cst_33 : f32 to vector<64x1xf32>
    %75 = arith.divf %73, %74 : vector<64x1xf32>
    %76 = vector.broadcast %68 : vector<64x1xf32> to vector<64x128xf32>
    %77 = arith.subf %62, %76 : vector<64x128xf32>
    %cst_34 = arith.constant 9.99999974E-6 : f32
    %78 = vector.broadcast %cst_34 : f32 to vector<64x1xf32>
    %79 = arith.addf %75, %78 : vector<64x1xf32>
    %80 = math.rsqrt %79 : vector<64x1xf32>
    %81 = vector.broadcast %80 : vector<64x1xf32> to vector<64x128xf32>
    %82 = arith.mulf %77, %81 : vector<64x128xf32>
    %83 = vector.broadcast %63 : vector<1x128xf32> to vector<64x128xf32>
    %84 = arith.mulf %82, %83 : vector<64x128xf32>
    %85 = vector.broadcast %64 : vector<1x128xf32> to vector<64x128xf32>
    %86 = arith.addf %84, %85 : vector<64x128xf32>
    %c0_35 = arith.constant 0 : index
    %c0_36 = arith.constant 0 : index
    %87 = vector.load %arg10[%c0_35, %c0_36] : memref<128x256xf32, #tpu.memory_space<vmem>>, vector<128x256xf32>
    %cst_37 = arith.constant dense<0.000000e+00> : vector<64x256xf32>
    %88 = tpu.matmul %86, %87, %cst_37 {dimension_numbers = #tpu.dot_dimension_numbers<[1], [0], [0], [1], [0, 0, 1, 1], [], []>} : vector<64x128xf32>, vector<128x256xf32>, vector<64x256xf32> -> vector<64x256xf32>
    %c0_38 = arith.constant 0 : index
    %c0_39 = arith.constant 0 : index
    %89 = vector.load %arg11[%c0_38, %c0_39] : memref<1x256xf32, #tpu.memory_space<vmem>>, vector<1x256xf32>
    %90 = vector.broadcast %89 : vector<1x256xf32> to vector<64x256xf32>
    %91 = arith.addf %88, %90 : vector<64x256xf32>
    %cst_40 = arith.constant 0.000000e+00 : f32
    %92 = vector.broadcast %cst_40 : f32 to vector<64x256xf32>
    %93 = arith.maximumf %91, %92 : vector<64x256xf32>
    %c0_41 = arith.constant 0 : index
    %c0_42 = arith.constant 0 : index
    %94 = vector.load %arg12[%c0_41, %c0_42] : memref<256x128xf32, #tpu.memory_space<vmem>>, vector<256x128xf32>
    %cst_43 = arith.constant dense<0.000000e+00> : vector<64x128xf32>
    %95 = tpu.matmul %93, %94, %cst_43 {dimension_numbers = #tpu.dot_dimension_numbers<[1], [0], [0], [1], [0, 0, 1, 1], [], []>} : vector<64x256xf32>, vector<256x128xf32>, vector<64x128xf32> -> vector<64x128xf32>
    %c0_44 = arith.constant 0 : index
    %c0_45 = arith.constant 0 : index
    %96 = vector.load %arg13[%c0_44, %c0_45] : memref<1x128xf32, #tpu.memory_space<vmem>>, vector<1x128xf32>
    %97 = vector.broadcast %96 : vector<1x128xf32> to vector<64x128xf32>
    %98 = arith.addf %95, %97 : vector<64x128xf32>
    %99 = arith.addf %86, %98 : vector<64x128xf32>
    %c0_46 = arith.constant 0 : index
    %c0_47 = arith.constant 0 : index
    %100 = vector.load %arg16[%c0_46, %c0_47] : memref<1x128xf32, #tpu.memory_space<vmem>>, vector<1x128xf32>
    %c0_48 = arith.constant 0 : index
    %c0_49 = arith.constant 0 : index
    %101 = vector.load %arg17[%c0_48, %c0_49] : memref<1x128xf32, #tpu.memory_space<vmem>>, vector<1x128xf32>
    %cst_50 = arith.constant dense<0.000000e+00> : vector<64xf32>
    %102 = vector.multi_reduction <add>, %99, %cst_50 [1] : vector<64x128xf32> to vector<64xf32>
    %103 = vector.shape_cast %102 : vector<64xf32> to vector<64x1xf32>
    %cst_51 = arith.constant 1.280000e+02 : f32
    %104 = vector.broadcast %cst_51 : f32 to vector<64x1xf32>
    %105 = arith.divf %103, %104 : vector<64x1xf32>
    %106 = vector.broadcast %105 : vector<64x1xf32> to vector<64x128xf32>
    %107 = arith.subf %99, %106 : vector<64x128xf32>
    %108 = arith.mulf %107, %107 : vector<64x128xf32>
    %cst_52 = arith.constant dense<0.000000e+00> : vector<64xf32>
    %109 = vector.multi_reduction <add>, %108, %cst_52 [1] : vector<64x128xf32> to vector<64xf32>
    %110 = vector.shape_cast %109 : vector<64xf32> to vector<64x1xf32>
    %cst_53 = arith.constant 1.280000e+02 : f32
    %111 = vector.broadcast %cst_53 : f32 to vector<64x1xf32>
    %112 = arith.divf %110, %111 : vector<64x1xf32>
    %113 = vector.broadcast %105 : vector<64x1xf32> to vector<64x128xf32>
    %114 = arith.subf %99, %113 : vector<64x128xf32>
    %cst_54 = arith.constant 9.99999974E-6 : f32
    %115 = vector.broadcast %cst_54 : f32 to vector<64x1xf32>
    %116 = arith.addf %112, %115 : vector<64x1xf32>
    %117 = math.rsqrt %116 : vector<64x1xf32>
    %118 = vector.broadcast %117 : vector<64x1xf32> to vector<64x128xf32>
    %119 = arith.mulf %114, %118 : vector<64x128xf32>
    %120 = vector.broadcast %100 : vector<1x128xf32> to vector<64x128xf32>
    %121 = arith.mulf %119, %120 : vector<64x128xf32>
    %122 = vector.broadcast %101 : vector<1x128xf32> to vector<64x128xf32>
    %123 = arith.addf %121, %122 : vector<64x128xf32>
    %c0_55 = arith.constant 0 : index
    %c0_56 = arith.constant 0 : index
    %124 = vector.load %arg18[%c0_55, %c0_56] : memref<128x384xf32, #tpu.memory_space<vmem>>, vector<128x384xf32>
    %cst_57 = arith.constant dense<0.000000e+00> : vector<64x384xf32>
    %125 = tpu.matmul %123, %124, %cst_57 {dimension_numbers = #tpu.dot_dimension_numbers<[1], [0], [0], [1], [0, 0, 1, 1], [], []>} : vector<64x128xf32>, vector<128x384xf32>, vector<64x384xf32> -> vector<64x384xf32>
    %c0_58 = arith.constant 0 : index
    %c0_59 = arith.constant 0 : index
    %126 = vector.load %arg19[%c0_58, %c0_59] : memref<1x384xf32, #tpu.memory_space<vmem>>, vector<1x384xf32>
    %127 = vector.broadcast %126 : vector<1x384xf32> to vector<64x384xf32>
    %128 = arith.addf %125, %127 : vector<64x384xf32>
    %cst_60 = arith.constant 0.000000e+00 : f32
    %129 = vector.broadcast %cst_60 : f32 to vector<64x384xf32>
    %130 = arith.maximumf %128, %129 : vector<64x384xf32>
    %131 = vector.extract_strided_slice %130 {offsets = [0, 0], sizes = [64, 128], strides = [1, 1]} : vector<64x384xf32> to vector<64x128xf32>
    %c0_61 = arith.constant 0 : index
    %c0_62 = arith.constant 0 : index
    %132 = vector.load %arg20[%c0_61, %c0_62] : memref<128x128xf32, #tpu.memory_space<vmem>>, vector<128x128xf32>
    %cst_63 = arith.constant dense<0.000000e+00> : vector<64x128xf32>
    %133 = tpu.matmul %131, %132, %cst_63 {dimension_numbers = #tpu.dot_dimension_numbers<[1], [0], [0], [1], [0, 0, 1, 1], [], []>} : vector<64x128xf32>, vector<128x128xf32>, vector<64x128xf32> -> vector<64x128xf32>
    %c0_64 = arith.constant 0 : index
    %c0_65 = arith.constant 0 : index
    %134 = vector.load %arg21[%c0_64, %c0_65] : memref<1x128xf32, #tpu.memory_space<vmem>>, vector<1x128xf32>
    %135 = vector.broadcast %134 : vector<1x128xf32> to vector<64x128xf32>
    %136 = arith.addf %133, %135 : vector<64x128xf32>
    %137 = vector.extract_strided_slice %130 {offsets = [0, 128], sizes = [64, 128], strides = [1, 1]} : vector<64x384xf32> to vector<64x128xf32>
    %c0_66 = arith.constant 0 : index
    %c0_67 = arith.constant 0 : index
    %138 = vector.load %arg22[%c0_66, %c0_67] : memref<128x128xf32, #tpu.memory_space<vmem>>, vector<128x128xf32>
    %cst_68 = arith.constant dense<0.000000e+00> : vector<64x128xf32>
    %139 = tpu.matmul %137, %138, %cst_68 {dimension_numbers = #tpu.dot_dimension_numbers<[1], [0], [0], [1], [0, 0, 1, 1], [], []>} : vector<64x128xf32>, vector<128x128xf32>, vector<64x128xf32> -> vector<64x128xf32>
    %c0_69 = arith.constant 0 : index
    %c0_70 = arith.constant 0 : index
    %140 = vector.load %arg23[%c0_69, %c0_70] : memref<1x128xf32, #tpu.memory_space<vmem>>, vector<1x128xf32>
    %141 = vector.broadcast %140 : vector<1x128xf32> to vector<64x128xf32>
    %142 = arith.addf %139, %141 : vector<64x128xf32>
    %143 = vector.extract_strided_slice %130 {offsets = [0, 256], sizes = [64, 128], strides = [1, 1]} : vector<64x384xf32> to vector<64x128xf32>
    %c0_71 = arith.constant 0 : index
    %c0_72 = arith.constant 0 : index
    %144 = vector.load %arg24[%c0_71, %c0_72] : memref<128x128xf32, #tpu.memory_space<vmem>>, vector<128x128xf32>
    %cst_73 = arith.constant dense<0.000000e+00> : vector<64x128xf32>
    %145 = tpu.matmul %143, %144, %cst_73 {dimension_numbers = #tpu.dot_dimension_numbers<[1], [0], [0], [1], [0, 0, 1, 1], [], []>} : vector<64x128xf32>, vector<128x128xf32>, vector<64x128xf32> -> vector<64x128xf32>
    %c0_74 = arith.constant 0 : index
    %c0_75 = arith.constant 0 : index
    %146 = vector.load %arg25[%c0_74, %c0_75] : memref<1x128xf32, #tpu.memory_space<vmem>>, vector<1x128xf32>
    %147 = vector.broadcast %146 : vector<1x128xf32> to vector<64x128xf32>
    %148 = arith.addf %145, %147 : vector<64x128xf32>
    %149 = vector.shape_cast %136 : vector<64x128xf32> to vector<8x8x128xf32>
    %150 = vector.extract_strided_slice %149 {offsets = [0, 0, 0], sizes = [8, 8, 32], strides = [1, 1, 1]} : vector<8x8x128xf32> to vector<8x8x32xf32>
    %151 = vector.extract_strided_slice %149 {offsets = [0, 0, 32], sizes = [8, 8, 32], strides = [1, 1, 1]} : vector<8x8x128xf32> to vector<8x8x32xf32>
    %152 = vector.extract_strided_slice %149 {offsets = [0, 0, 64], sizes = [8, 8, 32], strides = [1, 1, 1]} : vector<8x8x128xf32> to vector<8x8x32xf32>
    %153 = vector.extract_strided_slice %149 {offsets = [0, 0, 96], sizes = [8, 8, 32], strides = [1, 1, 1]} : vector<8x8x128xf32> to vector<8x8x32xf32>
    %154 = tpu.concatenate %150, %151, %152, %153 in 0 : vector<8x8x32xf32>, vector<8x8x32xf32>, vector<8x8x32xf32>, vector<8x8x32xf32> -> vector<32x8x32xf32>
    %155 = vector.shape_cast %142 : vector<64x128xf32> to vector<8x8x128xf32>
    %156 = vector.extract_strided_slice %155 {offsets = [0, 0, 0], sizes = [8, 8, 32], strides = [1, 1, 1]} : vector<8x8x128xf32> to vector<8x8x32xf32>
    %157 = vector.extract_strided_slice %155 {offsets = [0, 0, 32], sizes = [8, 8, 32], strides = [1, 1, 1]} : vector<8x8x128xf32> to vector<8x8x32xf32>
    %158 = vector.extract_strided_slice %155 {offsets = [0, 0, 64], sizes = [8, 8, 32], strides = [1, 1, 1]} : vector<8x8x128xf32> to vector<8x8x32xf32>
    %159 = vector.extract_strided_slice %155 {offsets = [0, 0, 96], sizes = [8, 8, 32], strides = [1, 1, 1]} : vector<8x8x128xf32> to vector<8x8x32xf32>
    %160 = tpu.concatenate %156, %157, %158, %159 in 0 : vector<8x8x32xf32>, vector<8x8x32xf32>, vector<8x8x32xf32>, vector<8x8x32xf32> -> vector<32x8x32xf32>
    %161 = vector.shape_cast %148 : vector<64x128xf32> to vector<8x8x128xf32>
    %162 = vector.extract_strided_slice %161 {offsets = [0, 0, 0], sizes = [8, 8, 32], strides = [1, 1, 1]} : vector<8x8x128xf32> to vector<8x8x32xf32>
    %163 = vector.extract_strided_slice %161 {offsets = [0, 0, 32], sizes = [8, 8, 32], strides = [1, 1, 1]} : vector<8x8x128xf32> to vector<8x8x32xf32>
    %164 = vector.extract_strided_slice %161 {offsets = [0, 0, 64], sizes = [8, 8, 32], strides = [1, 1, 1]} : vector<8x8x128xf32> to vector<8x8x32xf32>
    %165 = vector.extract_strided_slice %161 {offsets = [0, 0, 96], sizes = [8, 8, 32], strides = [1, 1, 1]} : vector<8x8x128xf32> to vector<8x8x32xf32>
    %166 = tpu.concatenate %162, %163, %164, %165 in 0 : vector<8x8x32xf32>, vector<8x8x32xf32>, vector<8x8x32xf32>, vector<8x8x32xf32> -> vector<32x8x32xf32>
    "tpu.trace_start"() <{level = 10 : i32, message = "bqd,bkd->bqk"}> : () -> ()
    %cst_76 = arith.constant dense<0.000000e+00> : vector<32x8x8xf32>
    %167 = tpu.matmul %154, %160, %cst_76 {dimension_numbers = #tpu.dot_dimension_numbers<[2], [2], [1], [1], [0, 0, 0, 1, 1, 1], [0], [0]>} : vector<32x8x32xf32>, vector<32x8x32xf32>, vector<32x8x8xf32> -> vector<32x8x8xf32>
    "tpu.trace_stop"() : () -> ()
    %cst_77 = arith.constant dense<0xFF800000> : vector<32x8xf32>
    %168 = vector.multi_reduction <maximumf>, %167, %cst_77 [2] : vector<32x8x8xf32> to vector<32x8xf32>
    %169 = vector.shape_cast %168 : vector<32x8xf32> to vector<32x8x1xf32>
    %170 = vector.broadcast %169 : vector<32x8x1xf32> to vector<32x8x8xf32>
    %171 = arith.subf %167, %170 : vector<32x8x8xf32>
    %172 = math.exp %171 : vector<32x8x8xf32>
    %cst_78 = arith.constant dense<0.000000e+00> : vector<32x8xf32>
    %173 = vector.multi_reduction <add>, %172, %cst_78 [2] : vector<32x8x8xf32> to vector<32x8xf32>
    %174 = vector.shape_cast %173 : vector<32x8xf32> to vector<32x8x1xf32>
    %175 = vector.broadcast %174 : vector<32x8x1xf32> to vector<32x8x8xf32>
    %176 = arith.divf %172, %175 : vector<32x8x8xf32>
    "tpu.trace_start"() <{level = 10 : i32, message = "bqk,bkd->bqd"}> : () -> ()
    %cst_79 = arith.constant dense<0.000000e+00> : vector<32x8x32xf32>
    %177 = tpu.matmul %176, %166, %cst_79 {dimension_numbers = #tpu.dot_dimension_numbers<[2], [1], [1], [2], [0, 0, 0, 1, 1, 2], [0], [0]>} : vector<32x8x8xf32>, vector<32x8x32xf32>, vector<32x8x32xf32> -> vector<32x8x32xf32>
    "tpu.trace_stop"() : () -> ()
    %178 = vector.extract_strided_slice %177 {offsets = [0, 0, 0], sizes = [8, 8, 32], strides = [1, 1, 1]} : vector<32x8x32xf32> to vector<8x8x32xf32>
    %179 = vector.extract_strided_slice %177 {offsets = [8, 0, 0], sizes = [8, 8, 32], strides = [1, 1, 1]} : vector<32x8x32xf32> to vector<8x8x32xf32>
    %180 = vector.extract_strided_slice %177 {offsets = [16, 0, 0], sizes = [8, 8, 32], strides = [1, 1, 1]} : vector<32x8x32xf32> to vector<8x8x32xf32>
    %181 = vector.extract_strided_slice %177 {offsets = [24, 0, 0], sizes = [8, 8, 32], strides = [1, 1, 1]} : vector<32x8x32xf32> to vector<8x8x32xf32>
    %182 = tpu.concatenate %178, %179, %180, %181 in 2 : vector<8x8x32xf32>, vector<8x8x32xf32>, vector<8x8x32xf32>, vector<8x8x32xf32> -> vector<8x8x128xf32>
    %183 = vector.shape_cast %182 : vector<8x8x128xf32> to vector<64x128xf32>
    %184 = arith.addf %183, %136 : vector<64x128xf32>
    %c0_80 = arith.constant 0 : index
    %c0_81 = arith.constant 0 : index
    %185 = vector.load %arg30[%c0_80, %c0_81] : memref<1x128xf32, #tpu.memory_space<vmem>>, vector<1x128xf32>
    %c0_82 = arith.constant 0 : index
    %c0_83 = arith.constant 0 : index
    %186 = vector.load %arg31[%c0_82, %c0_83] : memref<1x128xf32, #tpu.memory_space<vmem>>, vector<1x128xf32>
    %cst_84 = arith.constant dense<0.000000e+00> : vector<64xf32>
    %187 = vector.multi_reduction <add>, %184, %cst_84 [1] : vector<64x128xf32> to vector<64xf32>
    %188 = vector.shape_cast %187 : vector<64xf32> to vector<64x1xf32>
    %cst_85 = arith.constant 1.280000e+02 : f32
    %189 = vector.broadcast %cst_85 : f32 to vector<64x1xf32>
    %190 = arith.divf %188, %189 : vector<64x1xf32>
    %191 = vector.broadcast %190 : vector<64x1xf32> to vector<64x128xf32>
    %192 = arith.subf %184, %191 : vector<64x128xf32>
    %193 = arith.mulf %192, %192 : vector<64x128xf32>
    %cst_86 = arith.constant dense<0.000000e+00> : vector<64xf32>
    %194 = vector.multi_reduction <add>, %193, %cst_86 [1] : vector<64x128xf32> to vector<64xf32>
    %195 = vector.shape_cast %194 : vector<64xf32> to vector<64x1xf32>
    %cst_87 = arith.constant 1.280000e+02 : f32
    %196 = vector.broadcast %cst_87 : f32 to vector<64x1xf32>
    %197 = arith.divf %195, %196 : vector<64x1xf32>
    %198 = vector.broadcast %190 : vector<64x1xf32> to vector<64x128xf32>
    %199 = arith.subf %184, %198 : vector<64x128xf32>
    %cst_88 = arith.constant 9.99999974E-6 : f32
    %200 = vector.broadcast %cst_88 : f32 to vector<64x1xf32>
    %201 = arith.addf %197, %200 : vector<64x1xf32>
    %202 = math.rsqrt %201 : vector<64x1xf32>
    %203 = vector.broadcast %202 : vector<64x1xf32> to vector<64x128xf32>
    %204 = arith.mulf %199, %203 : vector<64x128xf32>
    %205 = vector.broadcast %185 : vector<1x128xf32> to vector<64x128xf32>
    %206 = arith.mulf %204, %205 : vector<64x128xf32>
    %207 = vector.broadcast %186 : vector<1x128xf32> to vector<64x128xf32>
    %208 = arith.addf %206, %207 : vector<64x128xf32>
    %c0_89 = arith.constant 0 : index
    %c0_90 = arith.constant 0 : index
    %209 = vector.load %arg26[%c0_89, %c0_90] : memref<128x256xf32, #tpu.memory_space<vmem>>, vector<128x256xf32>
    %cst_91 = arith.constant dense<0.000000e+00> : vector<64x256xf32>
    %210 = tpu.matmul %208, %209, %cst_91 {dimension_numbers = #tpu.dot_dimension_numbers<[1], [0], [0], [1], [0, 0, 1, 1], [], []>} : vector<64x128xf32>, vector<128x256xf32>, vector<64x256xf32> -> vector<64x256xf32>
    %c0_92 = arith.constant 0 : index
    %c0_93 = arith.constant 0 : index
    %211 = vector.load %arg27[%c0_92, %c0_93] : memref<1x256xf32, #tpu.memory_space<vmem>>, vector<1x256xf32>
    %212 = vector.broadcast %211 : vector<1x256xf32> to vector<64x256xf32>
    %213 = arith.addf %210, %212 : vector<64x256xf32>
    %cst_94 = arith.constant 0.000000e+00 : f32
    %214 = vector.broadcast %cst_94 : f32 to vector<64x256xf32>
    %215 = arith.maximumf %213, %214 : vector<64x256xf32>
    %c0_95 = arith.constant 0 : index
    %c0_96 = arith.constant 0 : index
    %216 = vector.load %arg28[%c0_95, %c0_96] : memref<256x128xf32, #tpu.memory_space<vmem>>, vector<256x128xf32>
    %cst_97 = arith.constant dense<0.000000e+00> : vector<64x128xf32>
    %217 = tpu.matmul %215, %216, %cst_97 {dimension_numbers = #tpu.dot_dimension_numbers<[1], [0], [0], [1], [0, 0, 1, 1], [], []>} : vector<64x256xf32>, vector<256x128xf32>, vector<64x128xf32> -> vector<64x128xf32>
    %c0_98 = arith.constant 0 : index
    %c0_99 = arith.constant 0 : index
    %218 = vector.load %arg29[%c0_98, %c0_99] : memref<1x128xf32, #tpu.memory_space<vmem>>, vector<1x128xf32>
    %219 = vector.broadcast %218 : vector<1x128xf32> to vector<64x128xf32>
    %220 = arith.addf %217, %219 : vector<64x128xf32>
    %221 = arith.addf %208, %220 : vector<64x128xf32>
    %c0_100 = arith.constant 0 : index
    %c0_101 = arith.constant 0 : index
    %222 = vector.load %arg32[%c0_100, %c0_101] : memref<1x128xf32, #tpu.memory_space<vmem>>, vector<1x128xf32>
    %c0_102 = arith.constant 0 : index
    %c0_103 = arith.constant 0 : index
    %223 = vector.load %arg33[%c0_102, %c0_103] : memref<1x128xf32, #tpu.memory_space<vmem>>, vector<1x128xf32>
    %cst_104 = arith.constant dense<0.000000e+00> : vector<64xf32>
    %224 = vector.multi_reduction <add>, %221, %cst_104 [1] : vector<64x128xf32> to vector<64xf32>
    %225 = vector.shape_cast %224 : vector<64xf32> to vector<64x1xf32>
    %cst_105 = arith.constant 1.280000e+02 : f32
    %226 = vector.broadcast %cst_105 : f32 to vector<64x1xf32>
    %227 = arith.divf %225, %226 : vector<64x1xf32>
    %228 = vector.broadcast %227 : vector<64x1xf32> to vector<64x128xf32>
    %229 = arith.subf %221, %228 : vector<64x128xf32>
    %230 = arith.mulf %229, %229 : vector<64x128xf32>
    %cst_106 = arith.constant dense<0.000000e+00> : vector<64xf32>
    %231 = vector.multi_reduction <add>, %230, %cst_106 [1] : vector<64x128xf32> to vector<64xf32>
    %232 = vector.shape_cast %231 : vector<64xf32> to vector<64x1xf32>
    %cst_107 = arith.constant 1.280000e+02 : f32
    %233 = vector.broadcast %cst_107 : f32 to vector<64x1xf32>
    %234 = arith.divf %232, %233 : vector<64x1xf32>
    %235 = vector.broadcast %227 : vector<64x1xf32> to vector<64x128xf32>
    %236 = arith.subf %221, %235 : vector<64x128xf32>
    %cst_108 = arith.constant 9.99999974E-6 : f32
    %237 = vector.broadcast %cst_108 : f32 to vector<64x1xf32>
    %238 = arith.addf %234, %237 : vector<64x1xf32>
    %239 = math.rsqrt %238 : vector<64x1xf32>
    %240 = vector.broadcast %239 : vector<64x1xf32> to vector<64x128xf32>
    %241 = arith.mulf %236, %240 : vector<64x128xf32>
    %242 = vector.broadcast %222 : vector<1x128xf32> to vector<64x128xf32>
    %243 = arith.mulf %241, %242 : vector<64x128xf32>
    %244 = vector.broadcast %223 : vector<1x128xf32> to vector<64x128xf32>
    %245 = arith.addf %243, %244 : vector<64x128xf32>
    %246 = vector.shape_cast %245 : vector<64x128xf32> to vector<8x8x128xf32>
    %cst_109 = arith.constant dense<0.000000e+00> : vector<8x128xf32>
    %247 = vector.multi_reduction <add>, %246, %cst_109 [1] : vector<8x8x128xf32> to vector<8x128xf32>
    %c0_110 = arith.constant 0 : index
    %c0_111 = arith.constant 0 : index
    %248 = vector.load %arg34[%c0_110, %c0_111] : memref<128x128xf32, #tpu.memory_space<vmem>>, vector<128x128xf32>
    %cst_112 = arith.constant dense<0.000000e+00> : vector<8x128xf32>
    %249 = tpu.matmul %247, %248, %cst_112 {dimension_numbers = #tpu.dot_dimension_numbers<[1], [0], [0], [1], [0, 0, 1, 1], [], []>} : vector<8x128xf32>, vector<128x128xf32>, vector<8x128xf32> -> vector<8x128xf32>
    %c0_113 = arith.constant 0 : index
    %c0_114 = arith.constant 0 : index
    %250 = vector.load %arg35[%c0_113, %c0_114] : memref<1x128xf32, #tpu.memory_space<vmem>>, vector<1x128xf32>
    %251 = vector.broadcast %250 : vector<1x128xf32> to vector<8x128xf32>
    %252 = arith.addf %249, %251 : vector<8x128xf32>
    %cst_115 = arith.constant 0.000000e+00 : f32
    %253 = vector.broadcast %cst_115 : f32 to vector<8x128xf32>
    %254 = arith.maximumf %252, %253 : vector<8x128xf32>
    %c0_116 = arith.constant 0 : index
    %c0_117 = arith.constant 0 : index
    %255 = vector.load %arg36[%c0_116, %c0_117] : memref<128x128xf32, #tpu.memory_space<vmem>>, vector<128x128xf32>
    %cst_118 = arith.constant dense<0.000000e+00> : vector<8x128xf32>
    %256 = tpu.matmul %254, %255, %cst_118 {dimension_numbers = #tpu.dot_dimension_numbers<[1], [0], [0], [1], [0, 0, 1, 1], [], []>} : vector<8x128xf32>, vector<128x128xf32>, vector<8x128xf32> -> vector<8x128xf32>
    %c0_119 = arith.constant 0 : index
    %c0_120 = arith.constant 0 : index
    %257 = vector.load %arg37[%c0_119, %c0_120] : memref<1x128xf32, #tpu.memory_space<vmem>>, vector<1x128xf32>
    %258 = vector.broadcast %257 : vector<1x128xf32> to vector<8x128xf32>
    %259 = arith.addf %256, %258 : vector<8x128xf32>
    %c0_121 = arith.constant 0 : index
    %c0_122 = arith.constant 0 : index
    %260 = vector.load %arg38[%c0_121, %c0_122] : memref<8x128xf32, #tpu.memory_space<vmem>>, vector<8x128xf32>
    tpu.vector_store %arg38[%c0_121, %c0_122], %259 {strides = array<i32>} : memref<8x128xf32, #tpu.memory_space<vmem>>, vector<8x128xf32>,
    return
  }
  func.func @transform_0(%arg0: i32) -> (i32, i32, i32) {
    %c0_i32 = arith.constant 0 : i32
    %c0_i32_0 = arith.constant 0 : i32
    %c0_i32_1 = arith.constant 0 : i32
    return %arg0, %c0_i32, %c0_i32_0 : i32, i32, i32
  }
  func.func @transform_1(%arg0: i32) -> (i32, i32) {
    %c0_i32 = arith.constant 0 : i32
    %c0_i32_0 = arith.constant 0 : i32
    %c0_i32_1 = arith.constant 0 : i32
    return %c0_i32, %c0_i32_0 : i32, i32
  }
  func.func @transform_2(%arg0: i32) -> (i32, i32) {
    %c0_i32 = arith.constant 0 : i32
    %c0_i32_0 = arith.constant 0 : i32
    %c0_i32_1 = arith.constant 0 : i32
    return %c0_i32, %c0_i32_0 : i32, i32
  }
  func.func @transform_3(%arg0: i32) -> (i32, i32) {
    %c0_i32 = arith.constant 0 : i32
    %c0_i32_0 = arith.constant 0 : i32
    %c0_i32_1 = arith.constant 0 : i32
    return %c0_i32, %c0_i32_0 : i32, i32
  }
  func.func @transform_4(%arg0: i32) -> (i32, i32) {
    %c0_i32 = arith.constant 0 : i32
    %c0_i32_0 = arith.constant 0 : i32
    %c0_i32_1 = arith.constant 0 : i32
    return %c0_i32, %c0_i32_0 : i32, i32
  }
  func.func @transform_5(%arg0: i32) -> (i32, i32) {
    %c0_i32 = arith.constant 0 : i32
    %c0_i32_0 = arith.constant 0 : i32
    %c0_i32_1 = arith.constant 0 : i32
    return %c0_i32, %c0_i32_0 : i32, i32
  }
  func.func @transform_6(%arg0: i32) -> (i32, i32) {
    %c0_i32 = arith.constant 0 : i32
    %c0_i32_0 = arith.constant 0 : i32
    %c0_i32_1 = arith.constant 0 : i32
    return %c0_i32, %c0_i32_0 : i32, i32
  }
  func.func @transform_7(%arg0: i32) -> (i32, i32) {
    %c0_i32 = arith.constant 0 : i32
    %c0_i32_0 = arith.constant 0 : i32
    %c0_i32_1 = arith.constant 0 : i32
    return %c0_i32, %c0_i32_0 : i32, i32
  }
  func.func @transform_8(%arg0: i32) -> (i32, i32) {
    %c0_i32 = arith.constant 0 : i32
    %c0_i32_0 = arith.constant 0 : i32
    %c0_i32_1 = arith.constant 0 : i32
    return %c0_i32, %c0_i32_0 : i32, i32
  }
  func.func @transform_9(%arg0: i32) -> (i32, i32) {
    %c0_i32 = arith.constant 0 : i32
    %c0_i32_0 = arith.constant 0 : i32
    %c0_i32_1 = arith.constant 0 : i32
    return %c0_i32, %c0_i32_0 : i32, i32
  }
  func.func @transform_10(%arg0: i32) -> (i32, i32) {
    %c0_i32 = arith.constant 0 : i32
    %c0_i32_0 = arith.constant 0 : i32
    %c0_i32_1 = arith.constant 0 : i32
    return %c0_i32, %c0_i32_0 : i32, i32
  }
  func.func @transform_11(%arg0: i32) -> (i32, i32) {
    %c0_i32 = arith.constant 0 : i32
    %c0_i32_0 = arith.constant 0 : i32
    %c0_i32_1 = arith.constant 0 : i32
    return %c0_i32, %c0_i32_0 : i32, i32
  }
  func.func @transform_12(%arg0: i32) -> (i32, i32) {
    %c0_i32 = arith.constant 0 : i32
    %c0_i32_0 = arith.constant 0 : i32
    %c0_i32_1 = arith.constant 0 : i32
    return %c0_i32, %c0_i32_0 : i32, i32
  }
  func.func @transform_13(%arg0: i32) -> (i32, i32) {
    %c0_i32 = arith.constant 0 : i32
    %c0_i32_0 = arith.constant 0 : i32
    %c0_i32_1 = arith.constant 0 : i32
    return %c0_i32, %c0_i32_0 : i32, i32
  }
  func.func @transform_14(%arg0: i32) -> (i32, i32) {
    %c0_i32 = arith.constant 0 : i32
    %c0_i32_0 = arith.constant 0 : i32
    %c0_i32_1 = arith.constant 0 : i32
    return %c0_i32, %c0_i32_0 : i32, i32
  }
  func.func @transform_15(%arg0: i32) -> (i32, i32) {
    %c0_i32 = arith.constant 0 : i32
    %c0_i32_0 = arith.constant 0 : i32
    %c0_i32_1 = arith.constant 0 : i32
    return %c0_i32, %c0_i32_0 : i32, i32
  }
  func.func @transform_16(%arg0: i32) -> (i32, i32) {
    %c0_i32 = arith.constant 0 : i32
    %c0_i32_0 = arith.constant 0 : i32
    %c0_i32_1 = arith.constant 0 : i32
    return %c0_i32, %c0_i32_0 : i32, i32
  }
  func.func @transform_17(%arg0: i32) -> (i32, i32) {
    %c0_i32 = arith.constant 0 : i32
    %c0_i32_0 = arith.constant 0 : i32
    %c0_i32_1 = arith.constant 0 : i32
    return %c0_i32, %c0_i32_0 : i32, i32
  }
  func.func @transform_18(%arg0: i32) -> (i32, i32) {
    %c0_i32 = arith.constant 0 : i32
    %c0_i32_0 = arith.constant 0 : i32
    %c0_i32_1 = arith.constant 0 : i32
    return %c0_i32, %c0_i32_0 : i32, i32
  }
  func.func @transform_19(%arg0: i32) -> (i32, i32) {
    %c0_i32 = arith.constant 0 : i32
    %c0_i32_0 = arith.constant 0 : i32
    %c0_i32_1 = arith.constant 0 : i32
    return %c0_i32, %c0_i32_0 : i32, i32
  }
  func.func @transform_20(%arg0: i32) -> (i32, i32) {
    %c0_i32 = arith.constant 0 : i32
    %c0_i32_0 = arith.constant 0 : i32
    %c0_i32_1 = arith.constant 0 : i32
    return %c0_i32, %c0_i32_0 : i32, i32
  }
  func.func @transform_21(%arg0: i32) -> (i32, i32) {
    %c0_i32 = arith.constant 0 : i32
    %c0_i32_0 = arith.constant 0 : i32
    %c0_i32_1 = arith.constant 0 : i32
    return %c0_i32, %c0_i32_0 : i32, i32
  }
  func.func @transform_22(%arg0: i32) -> (i32, i32) {
    %c0_i32 = arith.constant 0 : i32
    %c0_i32_0 = arith.constant 0 : i32
    %c0_i32_1 = arith.constant 0 : i32
    return %c0_i32, %c0_i32_0 : i32, i32
  }
  func.func @transform_23(%arg0: i32) -> (i32, i32) {
    %c0_i32 = arith.constant 0 : i32
    %c0_i32_0 = arith.constant 0 : i32
    %c0_i32_1 = arith.constant 0 : i32
    return %c0_i32, %c0_i32_0 : i32, i32
  }
  func.func @transform_24(%arg0: i32) -> (i32, i32) {
    %c0_i32 = arith.constant 0 : i32
    %c0_i32_0 = arith.constant 0 : i32
    %c0_i32_1 = arith.constant 0 : i32
    return %c0_i32, %c0_i32_0 : i32, i32
  }
  func.func @transform_25(%arg0: i32) -> (i32, i32) {
    %c0_i32 = arith.constant 0 : i32
    %c0_i32_0 = arith.constant 0 : i32
    %c0_i32_1 = arith.constant 0 : i32
    return %c0_i32, %c0_i32_0 : i32, i32
  }
  func.func @transform_26(%arg0: i32) -> (i32, i32) {
    %c0_i32 = arith.constant 0 : i32
    %c0_i32_0 = arith.constant 0 : i32
    %c0_i32_1 = arith.constant 0 : i32
    return %c0_i32, %c0_i32_0 : i32, i32
  }
  func.func @transform_27(%arg0: i32) -> (i32, i32) {
    %c0_i32 = arith.constant 0 : i32
    %c0_i32_0 = arith.constant 0 : i32
    %c0_i32_1 = arith.constant 0 : i32
    return %c0_i32, %c0_i32_0 : i32, i32
  }
  func.func @transform_28(%arg0: i32) -> (i32, i32) {
    %c0_i32 = arith.constant 0 : i32
    %c0_i32_0 = arith.constant 0 : i32
    %c0_i32_1 = arith.constant 0 : i32
    return %c0_i32, %c0_i32_0 : i32, i32
  }
  func.func @transform_29(%arg0: i32) -> (i32, i32) {
    %c0_i32 = arith.constant 0 : i32
    %c0_i32_0 = arith.constant 0 : i32
    %c0_i32_1 = arith.constant 0 : i32
    return %c0_i32, %c0_i32_0 : i32, i32
  }
  func.func @transform_30(%arg0: i32) -> (i32, i32) {
    %c0_i32 = arith.constant 0 : i32
    %c0_i32_0 = arith.constant 0 : i32
    %c0_i32_1 = arith.constant 0 : i32
    return %c0_i32, %c0_i32_0 : i32, i32
  }
  func.func @transform_31(%arg0: i32) -> (i32, i32) {
    %c0_i32 = arith.constant 0 : i32
    %c0_i32_0 = arith.constant 0 : i32
    %c0_i32_1 = arith.constant 0 : i32
    return %c0_i32, %c0_i32_0 : i32, i32
  }
  func.func @transform_32(%arg0: i32) -> (i32, i32) {
    %c0_i32 = arith.constant 0 : i32
    %c0_i32_0 = arith.constant 0 : i32
    %c0_i32_1 = arith.constant 0 : i32
    return %c0_i32, %c0_i32_0 : i32, i32
  }
  func.func @transform_33(%arg0: i32) -> (i32, i32) {
    %c0_i32 = arith.constant 0 : i32
    %c0_i32_0 = arith.constant 0 : i32
    %c0_i32_1 = arith.constant 0 : i32
    return %c0_i32, %c0_i32_0 : i32, i32
  }
  func.func @transform_34(%arg0: i32) -> (i32, i32) {
    %c0_i32 = arith.constant 0 : i32
    %c0_i32_0 = arith.constant 0 : i32
    %c0_i32_1 = arith.constant 0 : i32
    return %c0_i32, %c0_i32_0 : i32, i32
  }
  func.func @transform_35(%arg0: i32) -> (i32, i32) {
    %c0_i32 = arith.constant 0 : i32
    %c0_i32_0 = arith.constant 0 : i32
    %c0_i32_1 = arith.constant 0 : i32
    return %c0_i32, %c0_i32_0 : i32, i32
  }
  func.func @transform_36(%arg0: i32) -> (i32, i32) {
    %c0_i32 = arith.constant 0 : i32
    %c0_i32_0 = arith.constant 0 : i32
    %c0_i32_1 = arith.constant 0 : i32
    return %c0_i32, %c0_i32_0 : i32, i32
  }
  func.func @transform_37(%arg0: i32) -> (i32, i32) {
    %c0_i32 = arith.constant 0 : i32
    %c0_i32_0 = arith.constant 0 : i32
    return %arg0, %c0_i32 : i32, i32
  }
}

</mosaic_0001>

<bundles_post_ra>
// kernel: tpu_custom_call.1
= control target key start
LH: loop header
LB: loop body
LE: loop exit
PB: predicated region body
PF: predicated region fallthrough
CT: control target
= control target key end

     0   :  { %s10771_s6 = smov 1   ;;  %s10772_s10 = smov 2   ;;  %s14089_s0 = inlined_call_operand.smem [shape: u32[38], index: -1, kind: input, shape index: {}] }
   0x1   :  { %s10844_s5 = sld [smem:[%s14089_s0]]   ;;  %s10773_s14 = smov 3  }
   0x2   :  { %s10849_s9 = sld [smem:[%s14089_s0 + %s10771_s6]]   ;;  %s10774_s18 = smov 4  }
   0x3   :  { %s10854_s13 = sld [smem:[%s14089_s0 + %s10772_s10]]   ;;  %s10775_s22 = smov 5  }
   0x4   :  { %s10859_s17 = sld [smem:[%s14089_s0 + %s10773_s14]]   ;;  %s10776_s26 = smov 6  }
   0x5   :  { %s10864_s21 = sld [smem:[%s14089_s0 + %s10774_s18]]   ;;  %s10777_s30 = smov 7  }
   0x6   :  { %s10869_s25 = sld [smem:[%s14089_s0 + %s10775_s22]]   ;;  %s10778_s4 = smov 8  }
   0x7   :  { %14140 = sst [smem:[#allocation44_spill]] %s10844_s5  ;;  %s10779_s10 = smov 9  }
   0x8   :  { %14141 = sst [smem:[#allocation45_spill]] %s10849_s9  ;;  %s10780_s15 = smov 10  }
   0x9   :  { %14142 = sst [smem:[#allocation46_spill]] %s10854_s13  ;;  %s10781_s20 = smov 11  }
   0xa   :  { %14143 = sst [smem:[#allocation47_spill]] %s10859_s17  ;;  %s10783_s1 = smov 13  }
   0xb   :  { %s10874_s29 = sld [smem:[%s14089_s0 + %s10776_s26]]   ;;  %s10782_s26 = smov 12  }
   0xc   :  { %s10879_s3 = sld [smem:[%s14089_s0 + %s10777_s30]]   ;;  %s10784_s7 = smov 14  }
   0xd   :  { %s10884_s8 = sld [smem:[%s14089_s0 + %s10778_s4]]   ;;  %s10786_s22 = smov 16  }
   0xe   :  { %s10889_s14 = sld [smem:[%s14089_s0 + %s10779_s10]]   ;;  %s10787_s28 = smov 17  }
   0xf   :  { %s10894_s19 = sld [smem:[%s14089_s0 + %s10780_s15]]   ;;  %s10785_s15 = smov 15  }
  0x10   :  { %s10899_s24 = sld [smem:[%s14089_s0 + %s10781_s20]]  }
  0x11   :  { %s10904_s30 = sld [smem:[%s14089_s0 + %s10782_s26]]  }
  0x12   :  { %14144 = sst [smem:[#allocation48_spill]] %s10879_s3 }
  0x13   :  { %14145 = sst [smem:[#allocation49_spill]] %s10884_s8 }
  0x14   :  { %14146 = sst [smem:[#allocation50_spill]] %s10889_s14 }
  0x15   :  { %14147 = sst [smem:[#allocation51_spill]] %s10894_s19 }
  0x16   :  { %s10909_s6 = sld [smem:[%s14089_s0 + %s10783_s1]]  }
  0x17   :  { %14148 = sst [smem:[#allocation52_spill]] %s10904_s30 }
  0x18   :  { %s10914_s12 = sld [smem:[%s14089_s0 + %s10784_s7]]   ;;  %s10788_s7 = smov 18  }
  0x19   :  { %s10919_s20 = sld [smem:[%s14089_s0 + %s10785_s15]]   ;;  %s10789_s15 = smov 19  }
  0x1a   :  { %s10924_s27 = sld [smem:[%s14089_s0 + %s10786_s22]]   ;;  %s10790_s22 = smov 20  }
  0x1b   :  { %s10929_s4 = sld [smem:[%s14089_s0 + %s10787_s28]]   ;;  %s10791_s28 = smov 21  }
  0x1c   :  { %14149 = sst [smem:[#allocation53_spill]] %s10909_s6 }
  0x1d   :  { %s10934_s30 = sld [smem:[%s14089_s0 + %s10788_s7]]   ;;  %s10792_s7 = smov 22  }
  0x1e   :  { %14150 = sst [smem:[#allocation54_spill]] %s10914_s12 }
  0x1f   :  { %14151 = sst [smem:[#allocation55_spill]] %s10919_s20 }
  0x20   :  { %14152 = sst [smem:[#allocation56_spill]] %s10924_s27 }
  0x21   :  { %14153 = sst [smem:[#allocation57_spill]] %s10929_s4 }
  0x22   :  { %s10939_s20 = sld [smem:[%s14089_s0 + %s10789_s15]]   ;;  %s10793_s15 = smov 23  }
  0x23   :  { %14154 = sst [smem:[#allocation58_spill]] %s10934_s30 }
  0x24   :  { %s10944_s27 = sld [smem:[%s14089_s0 + %s10790_s22]]   ;;  %s10794_s22 = smov 24  }
  0x25   :  { %s10949_s19 = sld [smem:[%s14089_s0 + %s10791_s28]]   ;;  %s10795_s28 = smov 25  }
  0x26   :  { %s10954_s30 = sld [smem:[%s14089_s0 + %s10792_s7]]   ;;  %s10796_s7 = smov 26  }
  0x27   :  { %s10959_s12 = sld [smem:[%s14089_s0 + %s10793_s15]]   ;;  %s10797_s15 = smov 27  }
  0x28   :  { %14155 = sst [smem:[#allocation59_spill]] %s10939_s20 }
  0x29   :  { %s10969_s6 = sld [smem:[%s14089_s0 + %s10795_s28]]   ;;  %s10799_s28 = smov 29  }
  0x2a   :  { %14156 = sst [smem:[#allocation60_spill]] %s10944_s27 }
  0x2b   :  { %s10964_s27 = sld [smem:[%s14089_s0 + %s10794_s22]]   ;;  %s10798_s22 = smov 28  }
  0x2c   :  { %14157 = sst [smem:[#allocation61_spill]] %s10954_s30 }
  0x2d   :  { %14158 = sst [smem:[#allocation62_spill]] %s10959_s12 }
  0x2e   :  { %s10974_s30 = sld [smem:[%s14089_s0 + %s10796_s7]]   ;;  %s10800_s7 = smov 30  }
  0x2f   :  { %14160 = sst [smem:[#allocation64_spill]] %s10969_s6 }
  0x30   :  { %s10979_s5 = sld [smem:[%s14089_s0 + %s10797_s15]]   ;;  %s10801_s15 = smov 31  }
  0x31   :  { %14159 = sst [smem:[#allocation63_spill]] %s10964_s27 }
  0x32   :  { %s10984_s27 = sld [smem:[%s14089_s0 + %s10798_s22]]   ;;  %s10802_s22 = smov 32  }
  0x33   :  { %s10989_s12 = sld [smem:[%s14089_s0 + %s10799_s28]]   ;;  %s10803_s28 = smov 33  }
  0x34   :  { %14161 = sst [smem:[#allocation65_spill]] %s10974_s30 }
  0x35   :  { %s10994_s30 = sld [smem:[%s14089_s0 + %s10800_s7]]   ;;  %s10804_s7 = smov 34  }
  0x36   :  { %14162 = sst [smem:[#allocation66_spill]] %s10979_s5 }
  0x37   :  { %s10999_s5 = sld [smem:[%s14089_s0 + %s10801_s15]]   ;;  %s10805_s15 = smov 35  }
  0x38   :  { %14163 = sst [smem:[#allocation67_spill]] %s10984_s27 }
  0x39   :  { %14164 = sst [smem:[#allocation68_spill]] %s10989_s12 }
  0x3a   :  { %s11004_s27 = sld [smem:[%s14089_s0 + %s10802_s22]]   ;;  %s10806_s22 = smov 36  }
  0x3b   :  { %14165 = sst [smem:[#allocation69_spill]] %s10994_s30 }
  0x3c   :  { %s11009_s12 = sld [smem:[%s14089_s0 + %s10803_s28]]   ;;  %s10807_s28 = smov 37  }
  0x3d   :  { %14166 = sst [smem:[#allocation70_spill]] %s10999_s5 }
  0x3e   :  { %s11014_s30 = sld [smem:[%s14089_s0 + %s10804_s7]]  }
  0x3f   :  { %s11019_s5 = sld [smem:[%s14089_s0 + %s10805_s15]]  }
  0x40   :  { %14167 = sst [smem:[#allocation71_spill]] %s11004_s27 }
  0x41   :  { %s11024_s27 = sld [smem:[%s14089_s0 + %s10806_s22]]  }
  0x42   :  { %14168 = sst [smem:[#allocation72_spill]] %s11009_s12 }
  0x43   :  { %s11029_s20 = sld [smem:[%s14089_s0 + %s10807_s28]]  }
  0x44   :  { %14169 = sst [smem:[#allocation73_spill]] %s11014_s30 }
  0x45   :  { %14170 = sst [smem:[#allocation74_spill]] %s11019_s5 }
  0x47   :  { %14171 = sst [smem:[#allocation75_spill]] %s11024_s27 }
  0x49   :  { %14172 = sst [smem:[#allocation76_spill]] %s11029_s20 }
  0x4a   :  { %80 = vsyncpa [#allocation3], 0 }
  0x4b   :  { %82 = vsyncpa [#allocation3 + $0x1], 0 }
  0x4c   :  { %83 = vsyncpa [#allocation6], 0 }
  0x4d   :  { %84 = vsyncpa [#allocation9], 0 }
  0x4e   :  { %85 = vsyncpa [#allocation12], 0 }
  0x4f   :  { %86 = vsyncpa [#allocation15], 0 }
  0x50   :  { %87 = vsyncpa [#allocation18], 0 }
  0x51   :  { %88 = vsyncpa [#allocation21], 0 }
  0x52   :  { %89 = vsyncpa [#allocation24], 0 }
  0x53   :  { %90 = vsyncpa [#allocation27], 0 }
  0x54   :  { %91 = vsyncpa [#allocation30], 0 }
  0x55   :  { %92 = vsyncpa [#allocation4], 0 }
  0x56   :  { %94 = vsyncpa [#allocation4 + $0x1], 0  ;;  %s11031_s7 = smov 0   ;;  %s11033_s10 = smov 0  }
  0x57   :  { %s11035_s11 = smov 0   ;;  %s11037_s0 = smov 0  }
  0x58 LB: > { %s14173_s14 = sld [smem:[#allocation50_spill]]  ;;  %s11055_s16 = sadd.s32 4294967295, %s10769_s0   ;;  %s10761_s10 = sphi %s11033_s10, %s14326_s10   ;;  %s10757_s7 = sphi %s11031_s7, %s14325_s7   ;;  %s10769_s0 = sphi %s11037_s0, %s14328_s0   ;;  %s10765_s11 = sphi %s11035_s11, %s14327_s11  }
  0x59   : > { %s14174_s13 = sld [smem:[#allocation46_spill]]  ;;  %p9108_p0 = scmp.ge.s32.totalorder %s10769_s0, 1 }
  0x5a   : > { %s14175_s12 = sld [smem:[#allocation72_spill]]  ;;  %p14116_p1 = scmp.eq.s32.totalorder %s11055_s16, 0 }
  0x5b   : > { %s14176_s8 = sld [smem:[#allocation49_spill]]  ;;  %p913_p2 = scmp.lt.s32.totalorder %s10769_s0, 3 }
  0x5c   : > { %s14177_s5 = sld [smem:[#allocation74_spill]]  ;;  %s10808_s22 = smov [#allocation5]  }
  0x5d   : > { %s14178_s6 = sld [smem:[#allocation64_spill]]  ;;  %p11060_p3 = pnand %p9108_p0, %p913_p2 }
  0x5e   : > { %s14179_s4 = sld [smem:[#allocation57_spill]]  ;;  %s926_s23 = sshll.u32 %s10808_s22, 4  ;;  %s927_s23 = int_to_ptr.vmem [resolvable:$true] %s926_s23 }
  0x5f   : > { %s14180_s3 = sld [smem:[#allocation48_spill]]  ;;  %p9449_p4 = pneg %p11060_p3 }
  0x60   : > { %s14181_s17 = sld [smem:[#allocation47_spill]]  ;;  %s10809_s1 = smov [#allocation8]  }
  0x61   : > { %s14182_s9 = sld [smem:[#allocation45_spill]]  ;;  %p11070_p6 = pnand %p9449_p4, %p14116_p1 }
  0x62   : > { %s14183_s18 = scalar_select %p11060_p3, 1, 0 }
  0x63   : > { %s11076_s2 = sshll.u32 %s10809_s1, 4  ;;  %p11081_p8 = pneg %p11070_p6  ;;  %s953_s2 = int_to_ptr.vmem [resolvable:$true] %s11076_s2 }
  0x64   : > { %14184 = sst [smem:[#allocation77_spill]] %s14183_s18 }
  0x66   : > { %s950_s26 = sshll.u32 %s14181_s17, 4  ;;  %s11074_s26 = int_to_ptr.hbm [resolvable:$true] %s950_s26 }
  0x67   : > { %s924_s15 = sshll.u32 %s14182_s9, 4  ;;  %s10104_s30 = scalar_lea.hbm %s14182_s9, 96  ;;  %s11052_s15 = int_to_ptr.hbm [resolvable:$true] %s924_s15 }
  0x68   : > { %s10097_s27 = sshra.s32 %s11052_s15, 4  ;;  %s10098_s27 = int_to_ptr.hbm [resolvable:$true] %s10097_s27 }
  0x69   : > { %s10099_s22 = scalar_lea.hbm %s10098_s27, 96  ;;  %p10105_p11 = scmp.lt.s32.totalorder %s10098_s27, %s14182_s9 }
  0x6a   : > { %p10100_p7 = scmp.ne.s32.totalorder %s10098_s27, %s10099_s22  ;;  %p10106_p12 = scmp.lt.s32.totalorder %s10104_s30, %s10099_s22 }
  0x6c   : > { %p10102_p9 = pnand %p11081_p8, %p10100_p7  ;;  %p10107_p13 = por %p10106_p12, %p10105_p11 }
  0x6e   : > { %p10103_p10 = pneg %p10102_p9 }
  0x70   : > { %p10108_p0 = pnand %p10107_p13, %p10103_p10 }
  0x72   : > { %10111 = shalt.err (!%p10108_p0)
}
  0x73   : > { %s14097_s1 = smov 384   ;;  %s14098_s18 = smov 24  }
  0x74   : > { %9452 = dma.hbm_to_vmem [thread:$0]  (!%p11070_p6), %s11052_s15, 1536, %s927_s23, [#allocation6], %s14097_s1, %s14097_s1, %s14098_s18  }
  0x75   : > { %s10127_s27 = sshra.s32 %s11074_s26, 4  ;;  %s10134_s22 = scalar_lea.hbm %s14181_s17, 128  ;;  %s10128_s27 = int_to_ptr.hbm [resolvable:$true] %s10127_s27 }
  0x76   : > { %s10129_s30 = scalar_lea.hbm %s10128_s27, 128  ;;  %p10135_p9 = scmp.lt.s32.totalorder %s10128_s27, %s14181_s17 }
  0x77   : > { %p10130_p2 = scmp.ne.s32.totalorder %s10128_s27, %s10129_s30  ;;  %p10136_p10 = scmp.lt.s32.totalorder %s10134_s22, %s10129_s30 }
  0x79   : > { %p10132_p4 = pnand %p10130_p2, %p11081_p8  ;;  %p10137_p11 = por %p10136_p10, %p10135_p9 }
  0x7b   : > { %p10133_p7 = pneg %p10132_p4 }
  0x7d   : > { %p10138_p12 = pnand %p10137_p11, %p10133_p7 }
  0x7f   : > { %10141 = shalt.err (!%p10138_p12)
}
  0x80   : > { %s14101_s9 = smov 128   ;;  %s14105_s15 = smov 8  }
  0x81   : > { %9458 = dma.hbm_to_vmem [thread:$0]  (!%p11070_p6), %s11074_s26, 2048, %s953_s2, [#allocation9], %s14101_s9, %s14101_s9, %s14105_s15  }
  0x82   : > { %s976_s23 = sshll.u32 %s10869_s25, 4  ;;  %s10814_s27 = smov [#allocation11]   ;;  %s977_s23 = int_to_ptr.hbm [resolvable:$true] %s976_s23 }
  0x83   : > { %s978_s30 = sshll.u32 %s10814_s27, 4  ;;  %s1002_s22 = sshll.u32 %s14180_s3, 4  ;;  %s979_s30 = int_to_ptr.vmem [resolvable:$true] %s978_s30  ;;  %s1003_s22 = int_to_ptr.hbm [resolvable:$true] %s1002_s22 }
  0x84   : > { %s10157_s1 = sshra.s32 %s977_s23, 4  ;;  %s10164_s17 = scalar_lea.hbm %s10869_s25, 128  ;;  %s10158_s1 = int_to_ptr.hbm [resolvable:$true] %s10157_s1 }
  0x85   : > { %s10159_s18 = scalar_lea.hbm %s10158_s1, 128  ;;  %p10165_p4 = scmp.lt.s32.totalorder %s10158_s1, %s10869_s25 }
  0x86   : > { %p10160_p13 = scmp.ne.s32.totalorder %s10158_s1, %s10159_s18  ;;  %p10166_p7 = scmp.lt.s32.totalorder %s10164_s17, %s10159_s18 }
  0x88   : > { %p10162_p0 = pnand %p10160_p13, %p11081_p8  ;;  %p10167_p9 = por %p10166_p7, %p10165_p4 }
  0x8a   : > { %p10163_p2 = pneg %p10162_p0 }
  0x8c   : > { %p10168_p10 = pnand %p10167_p9, %p10163_p2 }
  0x8e   : > { %10171 = shalt.err (!%p10168_p10)
}
  0x8f   : > { %9464 = dma.hbm_to_vmem [thread:$0]  (!%p11070_p6), %s977_s23, 2048, %s979_s30, [#allocation12], %s14101_s9, %s14101_s9, %s14105_s15  }
  0x90   : > { %s10815_s26 = smov [#allocation14]   ;;  %s1028_s27 = sshll.u32 %s14173_s14, 4  ;;  %s11119_s27 = int_to_ptr.hbm [resolvable:$true] %s1028_s27 }
  0x91   : > { %s1004_s2 = sshll.u32 %s10815_s26, 4  ;;  %s10187_s17 = sshra.s32 %s1003_s22, 4  ;;  %s1005_s2 = int_to_ptr.vmem [resolvable:$true] %s1004_s2  ;;  %s10188_s17 = int_to_ptr.hbm [resolvable:$true] %s10187_s17 }
  0x92   : > { %s10189_s18 = scalar_lea.hbm %s10188_s17, 128  ;;  %s10194_s1 = scalar_lea.hbm %s14180_s3, 128 }
  0x93   : > { %p10190_p11 = scmp.ne.s32.totalorder %s10188_s17, %s10189_s18  ;;  %p10195_p0 = scmp.lt.s32.totalorder %s10188_s17, %s14180_s3 }
  0x94   : > { %p10196_p2 = scmp.lt.s32.totalorder %s10194_s1, %s10189_s18 }
  0x95   : > { %p10192_p12 = pnand %p10190_p11, %p11081_p8 }
  0x96   : > { %p10197_p4 = por %p10196_p2, %p10195_p0 }
  0x97   : > { %p10193_p13 = pneg %p10192_p12 }
  0x99   : > { %p10198_p7 = pnand %p10197_p4, %p10193_p13 }
  0x9b   : > { %10201 = shalt.err (!%p10198_p7)
}
  0x9c   : > { %9470 = dma.hbm_to_vmem [thread:$0]  (!%p11070_p6), %s1003_s22, 2048, %s1005_s2, [#allocation15], %s14101_s9, %s14101_s9, %s14105_s15  }
  0x9d   : > { %s10816_s23 = smov [#allocation17]   ;;  %s1074_s26 = sshll.u32 %s14179_s4, 4  ;;  %s1075_s26 = int_to_ptr.hbm [resolvable:$true] %s1074_s26 }
  0x9e   : > { %s1030_s30 = sshll.u32 %s10816_s23, 4  ;;  %s10217_s17 = sshra.s32 %s11119_s27, 4  ;;  %s1031_s30 = int_to_ptr.vmem [resolvable:$true] %s1030_s30  ;;  %s10218_s17 = int_to_ptr.hbm [resolvable:$true] %s10217_s17 }
  0x9f   : > { %s10219_s18 = scalar_lea.hbm %s10218_s17, 256  ;;  %s10224_s1 = scalar_lea.hbm %s14173_s14, 256 }
  0xa0   : > { %p10220_p9 = scmp.ne.s32.totalorder %s10218_s17, %s10219_s18  ;;  %p10225_p12 = scmp.lt.s32.totalorder %s10218_s17, %s14173_s14 }
  0xa1   : > { %p10226_p13 = scmp.lt.s32.totalorder %s10224_s1, %s10219_s18 }
  0xa2   : > { %p10222_p10 = pnand %p10220_p9, %p11081_p8 }
  0xa3   : > { %p10227_p0 = por %p10226_p13, %p10225_p12 }
  0xa4   : > { %p10223_p11 = pneg %p10222_p10 }
  0xa6   : > { %p10228_p2 = pnand %p10227_p0, %p10223_p11 }
  0xa8   : > { %10231 = shalt.err (!%p10228_p2)
}
  0xa9   : > { %s14103_s3 = smov 256   ;;  %s14104_s22 = smov 16  }
  0xaa   : > { %9476 = dma.hbm_to_vmem [thread:$0]  (!%p11070_p6), %s11119_s27, 4096, %s1031_s30, [#allocation18], %s14103_s3, %s14103_s3, %s14104_s22  }
  0xab   : > { %s10819_s2 = smov [#allocation20]   ;;  %s1108_s17 = sshll.u32 %s10949_s19, 4  ;;  %s11143_s17 = int_to_ptr.hbm [resolvable:$true] %s1108_s17 }
  0xac   : > { %s1076_s23 = sshll.u32 %s10819_s2, 4  ;;  %s10247_s18 = sshra.s32 %s1075_s26, 4  ;;  %s1077_s23 = int_to_ptr.vmem [resolvable:$true] %s1076_s23  ;;  %s10248_s18 = int_to_ptr.hbm [resolvable:$true] %s10247_s18 }
  0xad   : > { %s10249_s1 = scalar_lea.hbm %s10248_s18, 384  ;;  %s10254_s9 = scalar_lea.hbm %s14179_s4, 384 }
  0xae   : > { %p10250_p4 = scmp.ne.s32.totalorder %s10248_s18, %s10249_s1  ;;  %p10255_p10 = scmp.lt.s32.totalorder %s10248_s18, %s14179_s4 }
  0xaf   : > { %p10256_p11 = scmp.lt.s32.totalorder %s10254_s9, %s10249_s1 }
  0xb0   : > { %p10252_p7 = pnand %p10250_p4, %p11081_p8 }
  0xb1   : > { %p10257_p12 = por %p10256_p11, %p10255_p10 }
  0xb2   : > { %p10253_p9 = pneg %p10252_p7 }
  0xb4   : > { %p10258_p13 = pnand %p10257_p12, %p10253_p9 }
  0xb6   : > { %10261 = shalt.err (!%p10258_p13)
}
  0xb7   : > { %s14187_s27 = smov 24   ;;  %s14188_s30 = smov 384  }
  0xb8   : > { %9482 = dma.hbm_to_vmem [thread:$0]  (!%p11070_p6), %s1075_s26, 6144, %s1077_s23, [#allocation21], %s14188_s30, %s14188_s30, %s14187_s27  }
  0xb9   : > { %s1142_s2 = sshll.u32 %s14178_s6, 4  ;;  %s10820_s3 = smov [#allocation23]   ;;  %s11155_s2 = int_to_ptr.hbm [resolvable:$true] %s1142_s2 }
  0xba   : > { %s1110_s22 = sshll.u32 %s10820_s3, 4  ;;  %s10277_s9 = sshra.s32 %s11143_s17, 4  ;;  %s1111_s22 = int_to_ptr.vmem [resolvable:$true] %s1110_s22  ;;  %s10278_s9 = int_to_ptr.hbm [resolvable:$true] %s10277_s9 }
  0xbb   : > { %s10279_s18 = scalar_lea.hbm %s10278_s9, 128  ;;  %s10284_s1 = scalar_lea.hbm %s10949_s19, 128 }
  0xbc   : > { %p10280_p0 = scmp.ne.s32.totalorder %s10278_s9, %s10279_s18  ;;  %p10285_p7 = scmp.lt.s32.totalorder %s10278_s9, %s10949_s19 }
  0xbd   : > { %p10286_p9 = scmp.lt.s32.totalorder %s10284_s1, %s10279_s18 }
  0xbe   : > { %p10282_p2 = pnand %p10280_p0, %p11081_p8 }
  0xbf   : > { %p10287_p10 = por %p10286_p9, %p10285_p7 }
  0xc0   : > { %p10283_p4 = pneg %p10282_p2 }
  0xc2   : > { %p10288_p11 = pnand %p10287_p10, %p10283_p4 }
  0xc4   : > { %10291 = shalt.err (!%p10288_p11)
}
  0xc5   : > { %s14189_s3 = smov 128   ;;  %s10821_s26 = smov [#allocation26]  }
  0xc6   : > { %9488 = dma.hbm_to_vmem [thread:$0]  (!%p11070_p6), %s11143_s17, 2048, %s1111_s22, [#allocation24], %s14189_s3, %s14189_s3, %s14105_s15  }
  0xc7   : > { %s1144_s23 = sshll.u32 %s10821_s26, 4  ;;  %s1188_s27 = sshll.u32 %s14175_s12, 4  ;;  %s1145_s23 = int_to_ptr.vmem [resolvable:$true] %s1144_s23  ;;  %s11169_s27 = int_to_ptr.hbm [resolvable:$true] %s1188_s27 }
  0xc8   : > { %s10307_s30 = sshra.s32 %s11155_s2, 4  ;;  %s10314_s18 = scalar_lea.hbm %s14178_s6, 256  ;;  %s10308_s30 = int_to_ptr.hbm [resolvable:$true] %s10307_s30 }
  0xc9   : > { %s10309_s9 = scalar_lea.hbm %s10308_s30, 256  ;;  %p10315_p2 = scmp.lt.s32.totalorder %s10308_s30, %s14178_s6 }
  0xca   : > { %p10310_p12 = scmp.ne.s32.totalorder %s10308_s30, %s10309_s9  ;;  %p10316_p4 = scmp.lt.s32.totalorder %s10314_s18, %s10309_s9 }
  0xcc   : > { %p10312_p13 = pnand %p10310_p12, %p11081_p8  ;;  %p10317_p7 = por %p10316_p4, %p10315_p2 }
  0xce   : > { %p10313_p0 = pneg %p10312_p13 }
  0xd0   : > { %p10318_p9 = pnand %p10317_p7, %p10313_p0 }
  0xd2   : > { %10321 = shalt.err (!%p10318_p9)
}
  0xd3   : > { %s14190_s22 = smov 16   ;;  %s14191_s17 = smov 256  }
  0xd4   : > { %9494 = dma.hbm_to_vmem [thread:$0]  (!%p11070_p6), %s11155_s2, 4096, %s1145_s23, [#allocation27], %s14191_s17, %s14191_s17, %s14190_s22  }
  0xd5   : > { %s939_s1 = sshll.u32 %s14174_s13, 4  ;;  %s10822_s26 = smov [#allocation29]   ;;  %s11183_s1 = int_to_ptr.hbm [resolvable:$true] %s939_s1 }
  0xd6   : > { %s1190_s15 = sshll.u32 %s10822_s26, 4  ;;  %s10337_s30 = sshra.s32 %s11169_s27, 4  ;;  %s1191_s15 = int_to_ptr.vmem [resolvable:$true] %s1190_s15  ;;  %s10338_s30 = int_to_ptr.hbm [resolvable:$true] %s10337_s30 }
  0xd7   : > { %s10339_s9 = scalar_lea.hbm %s10338_s30, 128  ;;  %s10344_s18 = scalar_lea.hbm %s14175_s12, 128 }
  0xd8   : > { %p10340_p10 = scmp.ne.s32.totalorder %s10338_s30, %s10339_s9  ;;  %p10345_p13 = scmp.lt.s32.totalorder %s10338_s30, %s14175_s12 }
  0xd9   : > { %p10346_p0 = scmp.lt.s32.totalorder %s10344_s18, %s10339_s9 }
  0xda   : > { %p10342_p11 = pnand %p10340_p10, %p11081_p8 }
  0xdb   : > { %p10347_p2 = por %p10346_p0, %p10345_p13 }
  0xdc   : > { %p10343_p12 = pneg %p10342_p11 }
  0xde   : > { %p10348_p4 = pnand %p10347_p2, %p10343_p12 }
  0xe0   : > { %10351 = shalt.err (!%p10348_p4)
}
  0xe1   : > { %s14192_s2 = smov 8   ;;  %s10823_s23 = smov [#allocation7]  }
  0xe2   : > { %9500 = dma.hbm_to_vmem [thread:$0]  (!%p11070_p6), %s11169_s27, 2048, %s1191_s15, [#allocation30], %s14189_s3, %s14189_s3, %s14192_s2  }
  0xe3   : > { %s941_s22 = sshll.u32 %s10823_s23, 4  ;;  %s965_s17 = sshll.u32 %s10864_s21, 4  ;;  %s942_s22 = int_to_ptr.vmem [resolvable:$true] %s941_s22  ;;  %s11197_s17 = int_to_ptr.hbm [resolvable:$true] %s965_s17 }
  0xe4   : > { %s10367_s26 = sshra.s32 %s11183_s1, 4  ;;  %s10374_s9 = scalar_lea.hbm %s14174_s13, 3  ;;  %s10368_s26 = int_to_ptr.hbm [resolvable:$true] %s10367_s26 }
  0xe5   : > { %s10369_s30 = scalar_lea.hbm %s10368_s26, 3  ;;  %p10375_p11 = scmp.lt.s32.totalorder %s10368_s26, %s14174_s13 }
  0xe6   : > { %p10370_p7 = scmp.ne.s32.totalorder %s10368_s26, %s10369_s30  ;;  %p10376_p12 = scmp.lt.s32.totalorder %s10374_s9, %s10369_s30 }
  0xe8   : > { %p10372_p9 = pnand %p10370_p7, %p11081_p8  ;;  %p10377_p13 = por %p10376_p12, %p10375_p11 }
  0xea   : > { %p10373_p10 = pneg %p10372_p9 }
  0xec   : > { %p10378_p0 = pnand %p10377_p13, %p10373_p10 }
  0xee   : > { %10381 = shalt.err (!%p10378_p0)
}
  0xef   : > { %9455 = dma.hbm_to_vmem [thread:$0]  (!%p11070_p6), %s11183_s1, 48, %s942_s22, [#allocation6]  }
  0xf0   : > { %s991_s15 = sshll.u32 %s10874_s29, 4  ;;  %s10824_s27 = smov [#allocation10]   ;;  %s11208_s15 = int_to_ptr.hbm [resolvable:$true] %s991_s15 }
  0xf1   : > { %s967_s18 = sshll.u32 %s10824_s27, 4  ;;  %s10397_s23 = sshra.s32 %s11197_s17, 4  ;;  %s968_s18 = int_to_ptr.vmem [resolvable:$true] %s967_s18  ;;  %s10398_s23 = int_to_ptr.hbm [resolvable:$true] %s10397_s23 }
  0xf2   : > { %s10399_s26 = scalar_lea.hbm %s10398_s23, 1  ;;  %s10404_s30 = scalar_lea.hbm %s10864_s21, 1 }
  0xf3   : > { %p10400_p2 = scmp.ne.s32.totalorder %s10398_s23, %s10399_s26  ;;  %p10405_p9 = scmp.lt.s32.totalorder %s10398_s23, %s10864_s21 }
  0xf4   : > { %p10406_p10 = scmp.lt.s32.totalorder %s10404_s30, %s10399_s26 }
  0xf5   : > { %p10402_p4 = pnand %p10400_p2, %p11081_p8 }
  0xf6   : > { %p10407_p11 = por %p10406_p10, %p10405_p9 }
  0xf7   : > { %p10403_p7 = pneg %p10402_p4 }
  0xf9   : > { %p10408_p12 = pnand %p10407_p11, %p10403_p7 }
  0xfb   : > { %10411 = shalt.err (!%p10408_p12)
}
  0xfc   : > { %9461 = dma.hbm_to_vmem [thread:$0]  (!%p11070_p6), %s11197_s17, 16, %s968_s18, [#allocation9]  }
  0xfd   : > { %s10825_s1 = smov [#allocation13]   ;;  %s1017_s9 = sshll.u32 %s14176_s8, 4  ;;  %s11219_s9 = int_to_ptr.hbm [resolvable:$true] %s1017_s9 }
  0xfe   : > { %s993_s22 = sshll.u32 %s10825_s1, 4  ;;  %s10427_s27 = sshra.s32 %s11208_s15, 4  ;;  %s994_s22 = int_to_ptr.vmem [resolvable:$true] %s993_s22  ;;  %s10428_s27 = int_to_ptr.hbm [resolvable:$true] %s10427_s27 }
  0xff   : > { %s10429_s23 = scalar_lea.hbm %s10428_s27, 1  ;;  %s10434_s26 = scalar_lea.hbm %s10874_s29, 1 }
 0x100   : > { %p10430_p13 = scmp.ne.s32.totalorder %s10428_s27, %s10429_s23  ;;  %p10435_p4 = scmp.lt.s32.totalorder %s10428_s27, %s10874_s29 }
 0x101   : > { %p10436_p7 = scmp.lt.s32.totalorder %s10434_s26, %s10429_s23 }
 0x102   : > { %p10432_p0 = pnand %p10430_p13, %p11081_p8 }
 0x103   : > { %p10437_p9 = por %p10436_p7, %p10435_p4 }
 0x104   : > { %p10433_p2 = pneg %p10432_p0 }
 0x106   : > { %p10438_p10 = pnand %p10437_p9, %p10433_p2 }
 0x108   : > { %10441 = shalt.err (!%p10438_p10)
}
 0x109   : > { %9467 = dma.hbm_to_vmem [thread:$0]  (!%p11070_p6), %s11208_s15, 16, %s994_s22, [#allocation12]  }
 0x10a   : > { %s1045_s17 = sshll.u32 %s10899_s24, 4  ;;  %s10826_s18 = smov [#allocation16]   ;;  %s11230_s17 = int_to_ptr.hbm [resolvable:$true] %s1045_s17 }
 0x10b   : > { %s1019_s30 = sshll.u32 %s10826_s18, 4  ;;  %s10457_s1 = sshra.s32 %s11219_s9, 4  ;;  %s1020_s30 = int_to_ptr.vmem [resolvable:$true] %s1019_s30  ;;  %s10458_s1 = int_to_ptr.hbm [resolvable:$true] %s10457_s1 }
 0x10c   : > { %s10459_s27 = scalar_lea.hbm %s10458_s1, 1  ;;  %s10464_s23 = scalar_lea.hbm %s14176_s8, 1 }
 0x10d   : > { %p10460_p11 = scmp.ne.s32.totalorder %s10458_s1, %s10459_s27  ;;  %p10465_p0 = scmp.lt.s32.totalorder %s10458_s1, %s14176_s8 }
 0x10e   : > { %p10466_p2 = scmp.lt.s32.totalorder %s10464_s23, %s10459_s27 }
 0x10f   : > { %p10462_p12 = pnand %p10460_p11, %p11081_p8 }
 0x110   : > { %p10467_p4 = por %p10466_p2, %p10465_p0 }
 0x111   : > { %p10463_p13 = pneg %p10462_p12 }
 0x113   : > { %p10468_p7 = pnand %p10467_p4, %p10463_p13 }
 0x115   : > { %10471 = shalt.err (!%p10468_p7)
}
 0x116   : > { %s14193_s15 = sld [smem:[#allocation59_spill]]  ;;  %s10827_s22 = smov [#allocation19]  }
 0x117   : > { %9473 = dma.hbm_to_vmem [thread:$0]  (!%p11070_p6), %s11219_s9, 16, %s1020_s30, [#allocation15]  }
 0x118   : > { %s1047_s26 = sshll.u32 %s10827_s22, 4  ;;  %s10487_s1 = sshra.s32 %s11230_s17, 4  ;;  %s1048_s26 = int_to_ptr.vmem [resolvable:$true] %s1047_s26  ;;  %s10488_s1 = int_to_ptr.hbm [resolvable:$true] %s10487_s1 }
 0x119   : > { %s10489_s27 = scalar_lea.hbm %s10488_s1, 256  ;;  %s10494_s23 = scalar_lea.hbm %s10899_s24, 256 }
 0x11a   : > { %p10490_p9 = scmp.ne.s32.totalorder %s10488_s1, %s10489_s27  ;;  %p10495_p12 = scmp.lt.s32.totalorder %s10488_s1, %s10899_s24 }
 0x11b   : > { %p10496_p13 = scmp.lt.s32.totalorder %s10494_s23, %s10489_s27 }
 0x11c   : > { %s1091_s18 = sshll.u32 %s14193_s15, 4  ;;  %p10492_p10 = pnand %p10490_p9, %p11081_p8  ;;  %s11241_s18 = int_to_ptr.hbm [resolvable:$true] %s1091_s18 }
 0x11d   : > { %p10497_p0 = por %p10496_p13, %p10495_p12 }
 0x11e   : > { %p10493_p11 = pneg %p10492_p10 }
 0x120   : > { %p10498_p2 = pnand %p10497_p0, %p10493_p11 }
 0x122   : > { %10501 = shalt.err (!%p10498_p2)
}
 0x123   : > { %s14194_s9 = sld [smem:[#allocation62_spill]]  ;;  %s10828_s22 = smov [#allocation22]  }
 0x124   : > { %9479 = dma.hbm_to_vmem [thread:$0]  (!%p11070_p6), %s11230_s17, 4096, %s1048_s26, [#allocation18], %s14189_s3, %s14189_s3, %s14192_s2  }
 0x125   : > { %s1093_s4 = sshll.u32 %s10828_s22, 4  ;;  %s10517_s1 = sshra.s32 %s11241_s18, 4  ;;  %s1094_s4 = int_to_ptr.vmem [resolvable:$true] %s1093_s4  ;;  %s10518_s1 = int_to_ptr.hbm [resolvable:$true] %s10517_s1 }
 0x126   : > { %s10519_s27 = scalar_lea.hbm %s10518_s1, 128  ;;  %s10524_s23 = scalar_lea.hbm %s14193_s15, 128 }
 0x127   : > { %p10520_p4 = scmp.ne.s32.totalorder %s10518_s1, %s10519_s27  ;;  %p10525_p10 = scmp.lt.s32.totalorder %s10518_s1, %s14193_s15 }
 0x128   : > { %p10526_p11 = scmp.lt.s32.totalorder %s10524_s23, %s10519_s27 }
 0x129   : > { %s1125_s30 = sshll.u32 %s14194_s9, 4  ;;  %p10522_p7 = pnand %p10520_p4, %p11081_p8  ;;  %s11255_s30 = int_to_ptr.hbm [resolvable:$true] %s1125_s30 }
 0x12a   : > { %p10527_p12 = por %p10526_p11, %p10525_p10 }
 0x12b   : > { %p10523_p9 = pneg %p10522_p7 }
 0x12d   : > { %p10528_p13 = pnand %p10527_p12, %p10523_p9 }
 0x12f   : > { %10531 = shalt.err (!%p10528_p13)
}
 0x130   : > { %s14195_s17 = sld [smem:[#allocation66_spill]]  ;;  %s10829_s26 = smov [#allocation25]  }
 0x131   : > { %9485 = dma.hbm_to_vmem [thread:$0]  (!%p11070_p6), %s11241_s18, 2048, %s1094_s4, [#allocation21], %s14189_s3, %s14189_s3, %s14192_s2  }
 0x132   : > { %s1127_s22 = sshll.u32 %s10829_s26, 4  ;;  %s10547_s1 = sshra.s32 %s11255_s30, 4  ;;  %s1128_s22 = int_to_ptr.vmem [resolvable:$true] %s1127_s22  ;;  %s10548_s1 = int_to_ptr.hbm [resolvable:$true] %s10547_s1 }
 0x133   : > { %s10549_s27 = scalar_lea.hbm %s10548_s1, 128  ;;  %s10554_s23 = scalar_lea.hbm %s14194_s9, 128 }
 0x134   : > { %p10550_p0 = scmp.ne.s32.totalorder %s10548_s1, %s10549_s27  ;;  %p10555_p7 = scmp.lt.s32.totalorder %s10548_s1, %s14194_s9 }
 0x135   : > { %p10556_p9 = scmp.lt.s32.totalorder %s10554_s23, %s10549_s27 }
 0x136   : > { %s1159_s6 = sshll.u32 %s14195_s17, 4  ;;  %p10552_p2 = pnand %p10550_p0, %p11081_p8  ;;  %s11269_s6 = int_to_ptr.hbm [resolvable:$true] %s1159_s6 }
 0x137   : > { %p10557_p10 = por %p10556_p9, %p10555_p7 }
 0x138   : > { %p10553_p4 = pneg %p10552_p2 }
 0x13a   : > { %p10558_p11 = pnand %p10557_p10, %p10553_p4 }
 0x13c   : > { %10561 = shalt.err (!%p10558_p11)
}
 0x13d   : > { %9491 = dma.hbm_to_vmem [thread:$0]  (!%p11070_p6), %s11255_s30, 2048, %s1128_s22, [#allocation24], %s14189_s3, %s14189_s3, %s14192_s2  }
 0x13e   : > { %s1205_s4 = sshll.u32 %s14177_s5, 4  ;;  %s10830_s18 = smov [#allocation28]   ;;  %s11283_s4 = int_to_ptr.hbm [resolvable:$true] %s1205_s4 }
 0x13f   : > { %s1161_s26 = sshll.u32 %s10830_s18, 4  ;;  %s10577_s1 = sshra.s32 %s11269_s6, 4  ;;  %s1162_s26 = int_to_ptr.vmem [resolvable:$true] %s1161_s26  ;;  %s10578_s1 = int_to_ptr.hbm [resolvable:$true] %s10577_s1 }
 0x140   : > { %s10579_s27 = scalar_lea.hbm %s10578_s1, 256  ;;  %s10584_s23 = scalar_lea.hbm %s14195_s17, 256 }
 0x141   : > { %p10580_p12 = scmp.ne.s32.totalorder %s10578_s1, %s10579_s27  ;;  %p10585_p2 = scmp.lt.s32.totalorder %s10578_s1, %s14195_s17 }
 0x142   : > { %p10586_p4 = scmp.lt.s32.totalorder %s10584_s23, %s10579_s27 }
 0x143   : > { %p10582_p13 = pnand %p10580_p12, %p11081_p8 }
 0x144   : > { %p10587_p7 = por %p10586_p4, %p10585_p2 }
 0x145   : > { %p10583_p0 = pneg %p10582_p13 }
 0x147   : > { %p10588_p9 = pnand %p10587_p7, %p10583_p0 }
 0x149   : > { %10591 = shalt.err (!%p10588_p9)
}
 0x14a   : > { %9497 = dma.hbm_to_vmem [thread:$0]  (!%p11070_p6), %s11269_s6, 4096, %s1162_s26, [#allocation27], %s14189_s3, %s14189_s3, %s14192_s2  }
 0x14b   : > { %s10831_s30 = smov [#allocation31]   ;;  %s10607_s18 = sshra.s32 %s11283_s4, 4  ;;  %s10608_s18 = int_to_ptr.hbm [resolvable:$true] %s10607_s18 }
 0x14c   : > { %s1207_s22 = sshll.u32 %s10831_s30, 4  ;;  %s10609_s1 = scalar_lea.hbm %s10608_s18, 128  ;;  %s1208_s22 = int_to_ptr.vmem [resolvable:$true] %s1207_s22 }
 0x14d   : > { %p10610_p10 = scmp.ne.s32.totalorder %s10608_s18, %s10609_s1  ;;  %s10614_s27 = scalar_lea.hbm %s14177_s5, 128 }
 0x14e   : > { %p10615_p13 = scmp.lt.s32.totalorder %s10608_s18, %s14177_s5  ;;  %p10616_p0 = scmp.lt.s32.totalorder %s10614_s27, %s10609_s1 }
 0x14f   : > { %p10612_p11 = pnand %p10610_p10, %p11081_p8 }
 0x150   : > { %p10617_p2 = por %p10616_p0, %p10615_p13 }
 0x151   : > { %p10613_p12 = pneg %p10612_p11 }
 0x153   : > { %p10618_p4 = pnand %p10617_p2, %p10613_p12 }
 0x155   : > { %10621 = shalt.err (!%p10618_p4)
}
 0x156   : > { %9503 = dma.hbm_to_vmem [thread:$0]  (!%p11070_p6), %s11283_s4, 2048, %s1208_s22, [#allocation30], %s14189_s3, %s14189_s3, %s14192_s2  }
 0x157   : > { %s9107_s6 = sadd.s32 4294967294, %s10769_s0   ;;  %s11309_s20 = sadd.s32 1, %s10769_s0  }
 0x158   : > { %s104_s28 = ssub.s32 %s10769_s0, %s11309_s20  ;;  %s107_s26 = sadd.s32 1, %s10765_s11 }
 0x159   : > { %s14196_s23 = sld [smem:[#allocation44_spill]]  ;;  %p105_p8 = scmp.eq.s32.totalorder %s104_s28, 0 }
 0x15a   : > { %p114_p7 = scmp.ne.s32.totalorder %s10765_s11, %s10761_s10  ;;  %p115_p9 = scmp.eq.s32.totalorder %s10769_s0, 0 }
 0x15b   : > { %p120_p10 = scmp.ne.s32.totalorder %s10761_s10, %s10757_s7  ;;  %p900_p12 = scmp.eq.s32.totalorder %s11055_s16, 1 }
 0x15c   : > { %s11320_s30 = scalar_select %p105_p8, %s10765_s11, %s107_s26  }
 0x15d   : > { %p11322_p11 = por %p115_p9, %p114_p7  ;;  %p11328_p6 = por %p14116_p1, %p120_p10 }
 0x15e   : > { %p906_p13 = scmp.eq.s32.totalorder %s9107_s6, 1  ;;  %p9530_p0 = scmp.lt.s32.totalorder %s10769_s0, 2 }
 0x15f   : > { %s1224_s22 = sand.u32 1, %s10765_s11   ;;  %p11335_p2 = por %p900_p12, %p114_p7 }
 0x160   : > { %p11339_p4 = por %p906_p13, %p120_p10  ;;  %s9128_s28 = sshll.u32 %s1224_s22, 6 }
 0x161   : > { %s9372_s26 = sshll.u32 %s10769_s0, 6  ;;  %s1228_s8 = scalar_lea.vmem [#allocation2], %s9128_s28 }
 0x162   : > { %s14200_s27 = scalar_select %p11339_p4, 1, 0 }
 0x163   : > { %s1233_s5 = scalar_lea.hbm %s14196_s23, %s9372_s26  ;;  %s1236_s9 = sshll.u32 %s1228_s8, 4  ;;  %s1237_s9 = int_to_ptr.vmem [resolvable:$true] %s1236_s9 }
 0x164   : > { %s1234_s12 = sshll.u32 %s1233_s5, 4  ;;  %p11347_p8 = pnand %p9530_p0, %p11322_p11  ;;  %s1235_s12 = int_to_ptr.hbm [resolvable:$true] %s1234_s12 }
 0x165   : > { %s1225_s13 = scalar_lea.sflag [#allocation3], %s1224_s22  ;;  %s10637_s14 = sshra.s32 %s1235_s12, 4  ;;  %s10638_s14 = int_to_ptr.hbm [resolvable:$true] %s10637_s14 }
 0x166   : > { %s10639_s15 = scalar_lea.hbm %s10638_s14, 64  ;;  %p10641_p9 = pneg %p11347_p8 }
 0x167   : > { %p10640_p7 = scmp.ne.s32.totalorder %s10638_s14, %s10639_s15  ;;  %s10644_s28 = scalar_lea.hbm %s14196_s23, 128 }
 0x168   : > { %p10645_p13 = scmp.lt.s32.totalorder %s10638_s14, %s14196_s23  ;;  %p10646_p5 = scmp.lt.s32.totalorder %s10644_s28, %s10639_s15 }
 0x169   : > { %p10642_p10 = pnand %p10641_p9, %p10640_p7 }
 0x16a   : > { %p10647_p1 = por %p10646_p5, %p10645_p13 }
 0x16b   : > { %p10643_p12 = pneg %p10642_p10 }
 0x16d   : > { %p10648_p4 = pnand %p10647_p1, %p10643_p12 }
 0x16f   : > { %10651 = shalt.err (!%p10648_p4)
}
 0x170   : > { %9507 = dma.hbm_to_vmem [thread:$0]  (!%p11347_p8), %s1235_s12, 1024, %s1237_s9, %s1225_s13, %s14189_s3, %s14189_s3, %s14192_s2  }
 0x171   : > { %1248 = sbr.rel (%p11060_p3) target bundleno = 4813 (0x12cd), region = 168 }
 0x176   : > { %s11363_s8 = sand.u32 1, %s10761_s10  }
 0x177   : > { %s9132_s14 = sshll.u32 %s11363_s8, 6  ;;  %s1251_s15 = scalar_lea.sflag [#allocation3], %s11363_s8 }
 0x178   : > { %s11367_s18 = scalar_lea.vmem [#allocation2], %s9132_s14 }
 0x179   : > { %10712 = dma.done.wait (%p11328_p6), %s1251_s15, 1024  }
 0x17a   : > { %10714 = vsyncadd (%p11328_p6), %s1251_s15, 4294966272  ;;  %p14203_p1 = scmp.eq.s32.totalorder %s11055_s16, 0 }
 0x17c   : > { %10716 = dma.done.wait (%p14203_p1), [#allocation6], 1584   ;;  %p14204_p3 = pmov %p14203_p1 }
 0x17d   : > { %p14205_p5 = pmov %p14203_p1 }
 0x17e   : > { %10718 = vsyncadd (%p14204_p3), [#allocation6], 4294965712 }
 0x17f   : > { %10720 = dma.done.wait (%p14205_p5), [#allocation9], 2064   ;;  %p14206_p11 = pmov %p14203_p1 }
 0x180   : > { %p14207_p0 = pmov %p14203_p1 }
 0x181   : > { %10722 = vsyncadd (%p14206_p11), [#allocation9], 4294965232 }
 0x182   : > { %10724 = dma.done.wait (%p14207_p0), [#allocation12], 2064   ;;  %p14208_p4 = pmov %p14207_p0 }
 0x183   : > { %p14209_p6 = pmov %p14207_p0 }
 0x184   : > { %10726 = vsyncadd (%p14208_p4), [#allocation12], 4294965232 }
 0x185   : > { %10728 = dma.done.wait (%p14209_p6), [#allocation15], 2064   ;;  %p14210_p8 = pmov %p14207_p0 }
 0x186   : > { %p14211_p7 = pmov %p14207_p0 }
 0x187   : > { %10730 = vsyncadd (%p14210_p8), [#allocation15], 4294965232 }
 0x188   : > { %10732 = dma.done.wait (%p14211_p7), [#allocation18], 8192   ;;  %p14212_p9 = pmov %p14207_p0 }
 0x189   : > { %p14213_p10 = pmov %p14207_p0 }
 0x18a   : > { %10734 = vsyncadd (%p14212_p9), [#allocation18], 4294959104 }
 0x18b   : > { %10736 = dma.done.wait (%p14213_p10), [#allocation21], 8192   ;;  %p14214_p12 = pmov %p14207_p0 }
 0x18c   : > { %p14215_p13 = pmov %p14207_p0 }
 0x18d   : > { %10738 = vsyncadd (%p14214_p12), [#allocation21], 4294959104 }
 0x18e   : > { %10740 = dma.done.wait (%p14215_p13), [#allocation24], 4096   ;;  %p14216_p1 = pmov %p14207_p0 }
 0x18f   : > { %p14217_p3 = pmov %p14207_p0 }
 0x190   : > { %10742 = vsyncadd (%p14216_p1), [#allocation24], 4294963200 }
 0x191   : > { %10744 = dma.done.wait (%p14217_p3), [#allocation27], 8192   ;;  %p14218_p5 = pmov %p14207_p0 }
 0x192   : > { %p14219_p11 = pmov %p14207_p0 }
 0x193   : > { %10746 = vsyncadd (%p14218_p5), [#allocation27], 4294959104 }
 0x194   : > { %10748 = dma.done.wait (%p14219_p11), [#allocation30], 4096  }
 0x195   : > { %10750 = vsyncadd (%p14207_p0), [#allocation30], 4294963200  ;;  %v1454_v0 = vld [vmem:[#allocation5 + $0x48] sm:$0xff]  ;;  %v1455_v1 = vld [vmem:[#allocation5 + $0x50] sm:$0xff]  ;;  %vm1465_vm0 = vcmask 261120   ;;  %s10832_s13 = smov 32  }
 0x196   : > { %v1451_v2 = vld [vmem:[#allocation5 + $0x30] sm:$0xff]  ;;  %1502 = vmatpush.msra.mxu0 %v1454_v0  ;;  %1543 = vmatpush.msra.mxu1 %v1455_v1  ;;  %v1452_v3 = vld [vmem:[#allocation5 + $0x38] sm:$0xff]  ;;  %v1449_v5 = vld [vmem:[#allocation5 + $0x20] sm:$0xff]  ;;  %s10833_s12 = smov 64   ;;  %s10834_s3 = smov 96   ;;  %vm2780_vm1 = vcmask 64512  }
 0x197   : > { %v1448_v4 = vld [vmem:[#allocation5 + $0x18] sm:$0xff]  ;;  %v1445_v6 = vld [vmem:[#allocation5] sm:$0xff]  ;;  %v1446_v7 = vld [vmem:[#allocation5 + $0x8] sm:$0xff]  ;;  %s14265_s2 = sld [smem:[#allocation53_spill]] }
 0x198   : > { %1503 = vmatpush.msra.mxu0 %v1451_v2  ;;  %1544 = vmatpush.msra.mxu1 %v1452_v3  ;;  %v1437_v8 = vld [vmem:[%s11367_s18] sm:$0xff]  ;;  %v1438_v9 = vld [vmem:[%s11367_s18 + $0x8] sm:$0xff]  ;;  %v1439_v10 = vld [vmem:[%s11367_s18 + $0x10] sm:$0xff]  ;;  %s14266_s9 = sld [smem:[#allocation54_spill]] }
 0x199   : > { %v1456_v11 = vld [vmem:[#allocation5 + $0x58] sm:$0xff]  ;;  %v1453_v12 = vld [vmem:[#allocation5 + $0x40] sm:$0xff]  ;;  %v1450_v13 = vld [vmem:[#allocation5 + $0x28] sm:$0xff]  ;;  %s14267_s4 = sld [smem:[#allocation51_spill]] }
 0x19a   : > { %1504 = vmatpush.msra.mxu0 %v1448_v4  ;;  %1545 = vmatpush.msra.mxu1 %v1449_v5  ;;  %v1447_v14 = vld [vmem:[#allocation5 + $0x10] sm:$0xff]  ;;  %v1440_v15 = vld [vmem:[%s11367_s18 + $0x18] sm:$0xff]  ;;  %v1649_v22 = vld [vmem:[#allocation8 + $0x60] sm:$0xff]  ;;  %s14268_s22 = sld [smem:[#allocation52_spill]] }
 0x19b   : > { %1584 = vmatpush.msra.mxu2 %v1456_v11  ;;  %v1652_v16 = vld [vmem:[#allocation8 + $0x78] sm:$0xff]  ;;  %v1651_v18 = vld [vmem:[#allocation8 + $0x70] sm:$0xff]  ;;  %v1650_v20 = vld [vmem:[#allocation8 + $0x68] sm:$0xff]  ;;  %s14269_s26 = sld [smem:[#allocation55_spill]] }
 0x19c   : > { %1505 = vmatpush.msra.mxu0 %v1445_v6  ;;  %1546 = vmatpush.msra.mxu1 %v1446_v7  ;;  %v1713_v17 = vld [vmem:[#allocation11 + $0x78] sm:$0xff]  ;;  %v1712_v19 = vld [vmem:[#allocation11 + $0x70] sm:$0xff]  ;;  %v1711_v21 = vld [vmem:[#allocation11 + $0x68] sm:$0xff]  ;;  %s14270_s6 = sld [smem:[#allocation56_spill]] }
 0x19d   : > { %9152 = vmatmul.msk.f32.vlgmr.msra.gmra.mxu0 %vm1465_vm0, %v1437_v8  ;;  %9160 = vmatmul.msk.f32.vlgmr.msra.gmra.mxu1 %vm1465_vm0, %v1437_v8  ;;  %v1710_v23 = vld [vmem:[#allocation11 + $0x60] sm:$0xff]  ;;  %v1648_v25 = vld [vmem:[#allocation8 + $0x58] sm:$0xff]  ;;  %v1647_v27 = vld [vmem:[#allocation8 + $0x50] sm:$0xff]  ;;  %s14271_s28 = sld [smem:[#allocation58_spill]] }
 0x19e   : > { %1585 = vmatpush.msra.mxu2 %v1453_v12  ;;  %1657 = vmatpush.msra.mxu3 %v1652_v16  ;;  %v1441_v24 = vld [vmem:[%s11367_s18 + $0x20] sm:$0xff]  ;;  %v1708_v28 = vld [vmem:[#allocation11 + $0x50] sm:$0xff]  ;;  %v1646_v29 = vld [vmem:[#allocation8 + $0x48] sm:$0xff]  ;;  %s14272_s5 = sld [smem:[#allocation60_spill]] }
 0x19f   : > { %1718 = vmatpush.msrb.mxu0 %v1713_v17  ;;  %v1709_v26 = vld [vmem:[#allocation11 + $0x58] sm:$0xff]  ;;  %v1707_v30 = vld [vmem:[#allocation11 + $0x48] sm:$0xff]  ;;  %v1706_v32 = vld [vmem:[#allocation11 + $0x40] sm:$0xff]  ;;  %s14273_s14 = sld [smem:[#allocation61_spill]] }
 0x1a0   : > { %1586 = vmatpush.msra.mxu2 %v1450_v13  ;;  %1658 = vmatpush.msra.mxu3 %v1651_v18  ;;  %v1645_v31 = vld [vmem:[#allocation8 + $0x40] sm:$0xff]  ;;  %v1644_v34 = vld [vmem:[#allocation8 + $0x38] sm:$0xff]  ;;  %v1643_v36 = vld [vmem:[#allocation8 + $0x30] sm:$0xff]  ;;  %s14275_s15 = sld [smem:[#allocation63_spill]] }
 0x1a1   : > { %1719 = vmatpush.msrb.mxu0 %v1712_v19  ;;  %v1442_v33 = vld [vmem:[%s11367_s18 + $0x28] sm:$0xff]  ;;  %v1705_v35 = vld [vmem:[#allocation11 + $0x38] sm:$0xff]  ;;  %v1704_v37 = vld [vmem:[#allocation11 + $0x30] sm:$0xff] }
 0x1a2   : > { %1587 = vmatpush.msra.mxu2 %v1447_v14  ;;  %1659 = vmatpush.msra.mxu3 %v1650_v20  ;;  %v1642_v38 = vld [vmem:[#allocation8 + $0x28] sm:$0xff]  ;;  %v1641_v40 = vld [vmem:[#allocation8 + $0x20] sm:$0xff]  ;;  %v1640_v43 = vld [vmem:[#allocation8 + $0x18] sm:$0xff] }
 0x1a3   : > { %9168 = vmatmul.msk.f32.vlgmr.msra.gmra.mxu2 %vm1465_vm0, %v1437_v8  ;;  %1720 = vmatpush.msrb.mxu0 %v1711_v21  ;;  %v1703_v39 = vld [vmem:[#allocation11 + $0x28] sm:$0xff]  ;;  %v1702_v41 = vld [vmem:[#allocation11 + $0x20] sm:$0xff]  ;;  %v1701_v44 = vld [vmem:[#allocation11 + $0x18] sm:$0xff] }
 0x1a4   : > { %1660 = vmatpush.msra.mxu3 %v1649_v22  ;;  %v1443_v42 = vld [vmem:[%s11367_s18 + $0x30] sm:$0xff]  ;;  %v1444_v45 = vld [vmem:[%s11367_s18 + $0x38] sm:$0xff]  ;;  %v1637_v50 = vld [vmem:[#allocation8] sm:$0xff]  ;;  %s14300_s18 = sld [smem:[#allocation68_spill]] }
 0x1a5   : > { %9153 = vmatmul.msk.f32.gmra.mxu0 %vm1465_vm0, %v1438_v9  ;;  %9161 = vmatmul.msk.f32.gmra.mxu1 %vm1465_vm0, %v1438_v9  ;;  %v1639_v46 = vld [vmem:[#allocation8 + $0x10] sm:$0xff]  ;;  %v1638_v48 = vld [vmem:[#allocation8 + $0x8] sm:$0xff]  ;;  %v1457_v52 = vld [vmem:[#allocation7] sm:$0x7] }
 0x1a6   : > { %1721 = vmatpush.msrb.mxu0 %v1710_v23  ;;  %1661 = vmatpush.msra.mxu3 %v1648_v25  ;;  %v1700_v47 = vld [vmem:[#allocation11 + $0x10] sm:$0xff]  ;;  %v1699_v49 = vld [vmem:[#allocation11 + $0x8] sm:$0xff]  ;;  %v1698_v51 = vld [vmem:[#allocation11] sm:$0xff]  ;;  %v11441_v53 = vperm.slane %v1457_v52, 0  ;;  %v11443_v54 = vperm.slane %v1457_v52, 1 }
 0x1a7   : > { %v1774_v59 = vld [vmem:[#allocation14 + $0x78] sm:$0xff]  ;;  %v1773_v62 = vld [vmem:[#allocation14 + $0x70] sm:$0xff]  ;;  %v1772_v63 = vld [vmem:[#allocation14 + $0x68] sm:$0xff] }
 0x1a8   : > { %1722 = vmatpush.msrb.mxu0 %v1709_v26  ;;  %1662 = vmatpush.msra.mxu3 %v1647_v27  ;;  %v1771_v0 = vld [vmem:[#allocation14 + $0x60] sm:$0xff]  ;;  %v1770_v5 = vld [vmem:[#allocation14 + $0x58] sm:$0xff]  ;;  %v1769_v8 = vld [vmem:[#allocation14 + $0x50] sm:$0xff] }
 0x1a9   : > { %1779 = vmatpush.msrb.mxu1 %v1774_v59  ;;  %v1765_v18 = vld [vmem:[#allocation14 + $0x30] sm:$0xff]  ;;  %v1764_v19 = vld [vmem:[#allocation14 + $0x28] sm:$0xff]  ;;  %v1763_v20 = vld [vmem:[#allocation14 + $0x20] sm:$0xff] }
 0x1aa   : > { %1723 = vmatpush.msrb.mxu0 %v1708_v28  ;;  %1663 = vmatpush.msra.mxu3 %v1646_v29  ;;  %v1762_v25 = vld [vmem:[#allocation14 + $0x18] sm:$0xff]  ;;  %v11453_v28 = vperm.slane %v1457_v52, 2  ;;  %v1761_v29 = vld [vmem:[#allocation14 + $0x10] sm:$0xff] }
 0x1ab   : > { %9169 = vmatmul.msk.f32.gmra.mxu2 %vm1465_vm0, %v1438_v9  ;;  %1780 = vmatpush.msrb.mxu1 %v1773_v62  ;;  %v1768_v9 = vld [vmem:[#allocation14 + $0x48] sm:$0xff] }
 0x1ac   : > { %1724 = vmatpush.msrb.mxu0 %v1707_v30  ;;  %1664 = vmatpush.msra.mxu3 %v1645_v31 }
 0x1ad   : > { %9154 = vmatmul.msk.f32.gmra.mxu0 %vm1465_vm0, %v1439_v10  ;;  %9162 = vmatmul.msk.f32.gmra.mxu1 %vm1465_vm0, %v1439_v10 }
 0x1ae   : > { %1725 = vmatpush.msrb.mxu0 %v1706_v32  ;;  %1665 = vmatpush.msra.mxu3 %v1644_v34  ;;  %v1760_v32 = vld [vmem:[#allocation14 + $0x8] sm:$0xff] }
 0x1af   : > { %1781 = vmatpush.msrb.mxu1 %v1772_v63 }
 0x1b0   : > { %1726 = vmatpush.msrb.mxu0 %v1705_v35  ;;  %1666 = vmatpush.msra.mxu3 %v1643_v36 }
 0x1b1   : > { %1782 = vmatpush.msrb.mxu1 %v1771_v0 }
 0x1b2   : > { %1727 = vmatpush.msrb.mxu0 %v1704_v37  ;;  %1667 = vmatpush.msra.mxu3 %v1642_v38 }
 0x1b3   : > { %9170 = vmatmul.msk.f32.gmra.mxu2 %vm1465_vm0, %v1439_v10  ;;  %1783 = vmatpush.msrb.mxu1 %v1770_v5  ;;  %v1767_v10 = vld [vmem:[#allocation14 + $0x40] sm:$0xff] }
 0x1b4   : > { %1728 = vmatpush.msrb.mxu0 %v1703_v39  ;;  %1668 = vmatpush.msra.mxu3 %v1641_v40 }
 0x1b5   : > { %9155 = vmatmul.msk.f32.gmra.mxu0 %vm1465_vm0, %v1440_v15  ;;  %9163 = vmatmul.msk.f32.gmra.mxu1 %vm1465_vm0, %v1440_v15 }
 0x1b6   : > { %1729 = vmatpush.msrb.mxu0 %v1702_v41  ;;  %1669 = vmatpush.msra.mxu3 %v1640_v43 }
 0x1b7   : > { %1784 = vmatpush.msrb.mxu1 %v1769_v8 }
 0x1b8   : > { %1730 = vmatpush.msrb.mxu0 %v1701_v44  ;;  %1670 = vmatpush.msra.mxu3 %v1639_v46 }
 0x1b9   : > { %1785 = vmatpush.msrb.mxu1 %v1768_v9 }
 0x1ba   : > { %1731 = vmatpush.msrb.mxu0 %v1700_v47  ;;  %1671 = vmatpush.msra.mxu3 %v1638_v48 }
 0x1bb   : > { %9171 = vmatmul.msk.f32.gmra.mxu2 %vm1465_vm0, %v1440_v15  ;;  %1786 = vmatpush.msrb.mxu1 %v1767_v10  ;;  %v1766_v15 = vld [vmem:[#allocation14 + $0x38] sm:$0xff] }
 0x1bc   : > { %1732 = vmatpush.msrb.mxu0 %v1699_v49  ;;  %1672 = vmatpush.msra.mxu3 %v1637_v50 }
 0x1bd   : > { %9156 = vmatmul.msk.f32.gmra.mxu0 %vm1465_vm0, %v1441_v24  ;;  %9164 = vmatmul.msk.f32.gmra.mxu1 %vm1465_vm0, %v1441_v24 }
 0x1be   : > { %1733 = vmatpush.msrb.mxu0 %v1698_v51  ;;  %1787 = vmatpush.msrb.mxu1 %v1766_v15 }
 0x1c0   : > { %1788 = vmatpush.msrb.mxu1 %v1765_v18 }
 0x1c2   : > { %1789 = vmatpush.msrb.mxu1 %v1764_v19  ;;  %v11476_v19 = vld [vmem:[#allocation10] ss:$0 sm:$0xff] }
 0x1c3   : > { %9172 = vmatmul.msk.f32.gmra.mxu2 %vm1465_vm0, %v1441_v24 }
 0x1c4   : > { %1790 = vmatpush.msrb.mxu1 %v1763_v20 }
 0x1c5   : > { %9157 = vmatmul.msk.f32.gmra.mxu0 %vm1465_vm0, %v1442_v33  ;;  %9165 = vmatmul.msk.f32.gmra.mxu1 %vm1465_vm0, %v1442_v33 }
 0x1c6   : > { %1791 = vmatpush.msrb.mxu1 %v1762_v25 }
 0x1c8   : > { %1792 = vmatpush.msrb.mxu1 %v1761_v29 }
 0x1ca   : > { %1793 = vmatpush.msrb.mxu1 %v1760_v32 }
 0x1cb   : > { %9173 = vmatmul.msk.f32.gmra.mxu2 %vm1465_vm0, %v1442_v33  ;;  %v1759_v33 = vld [vmem:[#allocation14] sm:$0xff] }
 0x1cc   : > { %1794 = vmatpush.msrb.mxu1 %v1759_v33 }
 0x1cd   : > { %9158 = vmatmul.msk.f32.gmra.mxu0 %vm1465_vm0, %v1443_v42  ;;  %9166 = vmatmul.msk.f32.gmra.mxu1 %vm1465_vm0, %v1443_v42 }
 0x1d3   : > { %9174 = vmatmul.msk.f32.gmra.mxu2 %vm1465_vm0, %v1443_v42 }
 0x1d5   : > { %9159 = vmatmul.msk.f32.gmra.mxu0 %vm1465_vm0, %v1444_v45  ;;  %9167 = vmatmul.msk.f32.gmra.mxu1 %vm1465_vm0, %v1444_v45 }
 0x1db   : > { %9175 = vmatmul.msk.f32.gmra.mxu2 %vm1465_vm0, %v1444_v45 }
 0x21a   : > { %v1507_v55 = vpop.f32.mrf.mxu0  ;;  %v1548_v56 = vpop.f32.mrf.mxu1 }
 0x21b   : > { %v1508_v57 = vadd.f32 %v1507_v55, %v11441_v53  ;;  %v1549_v58 = vadd.f32 %v1548_v56, %v11443_v54 }
 0x21d   : > { %v1614_v60 = vmax.f32 %v1549_v58, 0.0  ;;  %v1613_v61 = vmax.f32 %v1508_v57, 0.0 }
 0x21f   : > { %1673 = vmatmul.f32.vlgmr.msra.gmra.mxu3 %v1613_v61  ;;  %1734 = vmatmul.f32.vlgmr.msrb.gmra.mxu0 %v1614_v60 }
 0x222   : > { %v1510_v1 = vpop.f32.mrf.mxu0  ;;  %v1551_v2 = vpop.f32.mrf.mxu1 }
 0x223   : > { %v1511_v3 = vadd.f32 %v1510_v1, %v11441_v53  ;;  %v1552_v4 = vadd.f32 %v1551_v2, %v11443_v54 }
 0x225   : > { %v1616_v6 = vmax.f32 %v1511_v3, 0.0  ;;  %v1617_v7 = vmax.f32 %v1552_v4, 0.0 }
 0x226   : > { %v1589_v30 = vpop.f32.mrf.mxu2 }
 0x227   : > { %1676 = vmatmul.f32.gmra.mxu3 %v1616_v6  ;;  %1737 = vmatmul.f32.gmra.mxu0 %v1617_v7  ;;  %v1590_v31 = vadd.f32 %v1589_v30, %v11453_v28 }
 0x229   : > { %v1615_v34 = vmax.f32 %v1590_v31, 0.0 }
 0x22a   : > { %v1513_v11 = vpop.f32.mrf.mxu0  ;;  %v1554_v12 = vpop.f32.mrf.mxu1 }
 0x22b   : > { %v1514_v13 = vadd.f32 %v1513_v11, %v11441_v53  ;;  %v1555_v14 = vadd.f32 %v1554_v12, %v11443_v54  ;;  %1795 = vmatmul.f32.vlgmr.msrb.gmra.mxu1 %v1615_v34 }
 0x22d   : > { %v1619_v16 = vmax.f32 %v1514_v13, 0.0  ;;  %v1620_v17 = vmax.f32 %v1555_v14, 0.0 }
 0x22e   : > { %v1592_v41 = vpop.f32.mrf.mxu2 }
 0x22f   : > { %1679 = vmatmul.f32.gmra.mxu3 %v1619_v16  ;;  %1740 = vmatmul.f32.gmra.mxu0 %v1620_v17  ;;  %v1593_v42 = vadd.f32 %v1592_v41, %v11453_v28  ;;  %v11471_v16 = vld [vmem:[#allocation13] ss:$0 sm:$0xff] }
 0x231   : > { %v1618_v43 = vmax.f32 %v1593_v42, 0.0 }
 0x232   : > { %v1516_v21 = vpop.f32.mrf.mxu0  ;;  %v1557_v22 = vpop.f32.mrf.mxu1 }
 0x233   : > { %v1517_v23 = vadd.f32 %v1516_v21, %v11441_v53  ;;  %v1558_v24 = vadd.f32 %v1557_v22, %v11443_v54  ;;  %1798 = vmatmul.f32.gmra.mxu1 %v1618_v43 }
 0x235   : > { %v1622_v26 = vmax.f32 %v1517_v23, 0.0  ;;  %v1623_v27 = vmax.f32 %v1558_v24, 0.0 }
 0x236   : > { %v1595_v50 = vpop.f32.mrf.mxu2 }
 0x237   : > { %1682 = vmatmul.f32.gmra.mxu3 %v1622_v26  ;;  %1743 = vmatmul.f32.gmra.mxu0 %v1623_v27  ;;  %v1596_v51 = vadd.f32 %v1595_v50, %v11453_v28 }
 0x239   : > { %v1621_v52 = vmax.f32 %v1596_v51, 0.0 }
 0x23a   : > { %v1519_v35 = vpop.f32.mrf.mxu0  ;;  %v1560_v36 = vpop.f32.mrf.mxu1 }
 0x23b   : > { %v1520_v37 = vadd.f32 %v1519_v35, %v11441_v53  ;;  %v1561_v38 = vadd.f32 %v1560_v36, %v11443_v54  ;;  %1801 = vmatmul.f32.gmra.mxu1 %v1621_v52 }
 0x23d   : > { %v1625_v39 = vmax.f32 %v1520_v37, 0.0  ;;  %v1626_v40 = vmax.f32 %v1561_v38, 0.0 }
 0x23e   : > { %v1598_v61 = vpop.f32.mrf.mxu2 }
 0x23f   : > { %1685 = vmatmul.f32.gmra.mxu3 %v1625_v39  ;;  %1746 = vmatmul.f32.gmra.mxu0 %v1626_v40  ;;  %v1599_v62 = vadd.f32 %v1598_v61, %v11453_v28 }
 0x241   : > { %v1624_v63 = vmax.f32 %v1599_v62, 0.0 }
 0x242   : > { %v1522_v44 = vpop.f32.mrf.mxu0  ;;  %v1563_v45 = vpop.f32.mrf.mxu1 }
 0x243   : > { %v1523_v46 = vadd.f32 %v1522_v44, %v11441_v53  ;;  %v1564_v47 = vadd.f32 %v1563_v45, %v11443_v54  ;;  %1804 = vmatmul.f32.gmra.mxu1 %v1624_v63 }
 0x245   : > { %v1628_v48 = vmax.f32 %v1523_v46, 0.0  ;;  %v1629_v49 = vmax.f32 %v1564_v47, 0.0 }
 0x246   : > { %v1601_v6 = vpop.f32.mrf.mxu2 }
 0x247   : > { %1688 = vmatmul.f32.gmra.mxu3 %v1628_v48  ;;  %1749 = vmatmul.f32.gmra.mxu0 %v1629_v49  ;;  %v1602_v7 = vadd.f32 %v1601_v6, %v11453_v28 }
 0x249   : > { %v1627_v8 = vmax.f32 %v1602_v7, 0.0 }
 0x24a   : > { %v1525_v55 = vpop.f32.mrf.mxu0  ;;  %v1566_v56 = vpop.f32.mrf.mxu1 }
 0x24b   : > { %v1526_v57 = vadd.f32 %v1525_v55, %v11441_v53  ;;  %v1567_v58 = vadd.f32 %v1566_v56, %v11443_v54  ;;  %1807 = vmatmul.f32.gmra.mxu1 %v1627_v8 }
 0x24d   : > { %v1631_v59 = vmax.f32 %v1526_v57, 0.0  ;;  %v1632_v60 = vmax.f32 %v1567_v58, 0.0  ;;  %v9759_v58 = vld [vmem:[#allocation16] ss:$0 sm:$0xff] }
 0x24e   : > { %v1604_v9 = vpop.f32.mrf.mxu2 }
 0x24f   : > { %1691 = vmatmul.f32.gmra.mxu3 %v1631_v59  ;;  %1752 = vmatmul.f32.gmra.mxu0 %v1632_v60  ;;  %v1605_v10 = vadd.f32 %v1604_v9, %v11453_v28 }
 0x251   : > { %v1630_v11 = vmax.f32 %v1605_v10, 0.0 }
 0x252   : > { %v1528_v0 = vpop.f32.mrf.mxu0  ;;  %v1569_v1 = vpop.f32.mrf.mxu1 }
 0x253   : > { %v1529_v2 = vadd.f32 %v1528_v0, %v11441_v53  ;;  %v1570_v3 = vadd.f32 %v1569_v1, %v11443_v54  ;;  %1810 = vmatmul.f32.gmra.mxu1 %v1630_v11 }
 0x255   : > { %v1634_v4 = vmax.f32 %v1529_v2, 0.0  ;;  %v1635_v5 = vmax.f32 %v1570_v3, 0.0 }
 0x256   : > { %v1607_v12 = vpop.f32.mrf.mxu2 }
 0x257   : > { %1694 = vmatmul.f32.gmra.mxu3 %v1634_v4  ;;  %1755 = vmatmul.f32.gmra.mxu0 %v1635_v5  ;;  %v1608_v53 = vadd.f32 %v1607_v12, %v11453_v28 }
 0x259   : > { %v1633_v13 = vmax.f32 %v1608_v53, 0.0 }
 0x25b   : > { %1813 = vmatmul.f32.gmra.mxu1 %v1633_v13 }
 0x25e   : > { %v1610_v54 = vpop.f32.mrf.mxu2 }
 0x25f   : > { %v1611_v14 = vadd.f32 %v1610_v54, %v11453_v28 }
 0x261   : > { %v1636_v15 = vmax.f32 %v1611_v14, 0.0 }
 0x263   : > { %1816 = vmatmul.f32.gmra.mxu1 %v1636_v15 }
 0x29c   : > { %v1735_v17 = vpop.f32.mrf.mxu0 }
 0x29d   : > { %v1736_v18 = vadd.f32 %v11471_v16, %v1735_v17 }
 0x29f   : > { %1916 = vrot.lane.b32.xlu2 %v1736_v18, %s10832_s13  ;;  %1900 = vrot.lane.b32.xlu1 %v1736_v18, %s10833_s12 }
 0x2a0   : > { %1884 = vrot.lane.b32.xlu0 %v1736_v18, %s10834_s3  ;;  %9176 = vmatpush.xpose.msk.msrb.mxu2 %vm1465_vm0, %v1736_v18 }
 0x2a2   : > { %v1674_v20 = vpop.f32.mrf.mxu3 }
 0x2a3   : > { %v11481_v21 = vadd.f32 %v11476_v19, %v1674_v20 }
 0x2a4   : > { %v1738_v22 = vpop.f32.mrf.mxu0 }
 0x2a5   : > { %14220 = vst [vmem:[#allocation78_spill] sm:$0xff] %v11481_v21  ;;  %v1739_v23 = vadd.f32 %v11471_v16, %v1738_v22  ;;  %9177 = vmatmul.msk.f32.vlgmr.msrb.gmra.mxu2 %vm1465_vm0, %v11481_v21 }
 0x2a7   : > { %9178 = vmatpush.xpose.msk.msra.mxu2 %vm1465_vm0, %v1739_v23  ;;  %1860 = vrot.lane.b32.xlu1 %v11481_v21, %s10832_s13 }
 0x2a8   : > { %1828 = vrot.lane.b32.xlu0 %v11481_v21, %s10834_s3  ;;  %v1796_v50 = vpop.f32.mrf.mxu1 }
 0x2a9   : > { %v11607_v62 = vadd.f32 %v9759_v58, %v1796_v50 }
 0x2aa   : > { %v1677_v24 = vpop.f32.mrf.mxu3 }
 0x2ab   : > { %v11492_v25 = vadd.f32 %v11476_v19, %v1677_v24 }
 0x2ac   : > { %v1741_v26 = vpop.f32.mrf.mxu0 }
 0x2ad   : > { %14221 = vst [vmem:[#allocation79_spill] sm:$0xff] %v11492_v25  ;;  %v11495_v27 = vadd.f32 %v11471_v16, %v1741_v26  ;;  %1830 = vrot.lane.b32.xlu2 %v11492_v25, %s10834_s3  ;;  %9179 = vmatmul.msk.f32.vlgmr.msra.gmra.mxu2 %vm1465_vm0, %v11492_v25 }
 0x2af   : > { %1888 = vrot.lane.b32.xlu1 %v11495_v27, %s10834_s3  ;;  %9180 = vmatpush.xpose.msk.msrb.mxu2 %vm1465_vm0, %v11495_v27 }
 0x2b0   : > { %1844 = vrot.lane.b32.xlu0 %v11481_v21, %s10833_s12  ;;  %v1799_v51 = vpop.f32.mrf.mxu1 }
 0x2b1   : > { %v11622_v7 = vadd.f32 %v9759_v58, %v1799_v51 }
 0x2b2   : > { %v1680_v28 = vpop.f32.mrf.mxu3 }
 0x2b3   : > { %v11508_v29 = vadd.f32 %v11476_v19, %v1680_v28  ;;  %v9672_v17 = vpack.i.bf16 %v11622_v7, %v11607_v62 }
 0x2b4   : > { %v1744_v30 = vpop.f32.mrf.mxu0 }
 0x2b5   : > { %14222 = vst [vmem:[#allocation80_spill] sm:$0xff] %v11508_v29  ;;  %v1745_v31 = vadd.f32 %v11471_v16, %v1744_v30  ;;  %1846 = vrot.lane.b32.xlu2 %v11492_v25, %s10833_s12  ;;  %9181 = vmatmul.msk.f32.vlgmr.msrb.gmra.mxu2 %vm1465_vm0, %v11508_v29 }
 0x2b7   : > { %1832 = vrot.lane.b32.xlu1 %v11508_v29, %s10834_s3  ;;  %9182 = vmatpush.xpose.msk.msra.mxu2 %vm1465_vm0, %v1745_v31 }
 0x2b8   : > { %1886 = vrot.lane.b32.xlu0 %v1739_v23, %s10834_s3  ;;  %v1802_v52 = vpop.f32.mrf.mxu1 }
 0x2b9   : > { %v11619_v4 = vadd.f32 %v9759_v58, %v1802_v52 }
 0x2ba   : > { %v1683_v32 = vpop.f32.mrf.mxu3 }
 0x2bb   : > { %v11520_v33 = vadd.f32 %v11476_v19, %v1683_v32  ;;  %v9667_v8 = vpack.i.bf16 %v11619_v4, %v11622_v7 }
 0x2bc   : > { %v1747_v34 = vpop.f32.mrf.mxu0 }
 0x2bd   : > { %14223 = vst [vmem:[#allocation81_spill] sm:$0xff] %v11520_v33  ;;  %v1748_v35 = vadd.f32 %v11471_v16, %v1747_v34  ;;  %1904 = vrot.lane.b32.xlu2 %v11495_v27, %s10833_s12  ;;  %9183 = vmatmul.msk.f32.vlgmr.msra.gmra.mxu2 %vm1465_vm0, %v11520_v33 }
 0x2bf   : > { %9184 = vmatpush.xpose.msk.msrb.mxu3 %vm1465_vm0, %v1748_v35  ;;  %1848 = vrot.lane.b32.xlu1 %v11508_v29, %s10833_s12 }
 0x2c0   : > { %1902 = vrot.lane.b32.xlu0 %v1739_v23, %s10833_s12  ;;  %v1805_v56 = vpop.f32.mrf.mxu1 }
 0x2c1   : > { %v11633_v13 = vadd.f32 %v9759_v58, %v1805_v56 }
 0x2c2   : > { %v1686_v36 = vpop.f32.mrf.mxu3 }
 0x2c3   : > { %v11532_v37 = vadd.f32 %v11476_v19, %v1686_v36 }
 0x2c4   : > { %v1750_v38 = vpop.f32.mrf.mxu0 }
 0x2c5   : > { %14224 = vst [vmem:[#allocation82_spill] sm:$0xff] %v11532_v37  ;;  %1892 = vrot.lane.b32.xlu2 %v1748_v35, %s10834_s3  ;;  %v1751_v39 = vadd.f32 %v11471_v16, %v1750_v38  ;;  %9185 = vmatmul.msk.f32.vlgmr.msrb.gmra.mxu3 %vm1465_vm0, %v11532_v37 }
 0x2c7   : > { %1890 = vrot.lane.b32.xlu1 %v1745_v31, %s10834_s3  ;;  %9186 = vmatpush.xpose.msk.msrb.mxu2 %vm1465_vm0, %v1751_v39 }
 0x2c8   : > { %1918 = vrot.lane.b32.xlu0 %v1739_v23, %s10832_s13  ;;  %v1808_v60 = vpop.f32.mrf.mxu1 }
 0x2c9   : > { %v11609_v0 = vadd.f32 %v9759_v58, %v1808_v60 }
 0x2ca   : > { %v1689_v40 = vpop.f32.mrf.mxu3 }
 0x2cb   : > { %v11542_v41 = vadd.f32 %v11476_v19, %v1689_v40  ;;  %14228 = vst [vmem:[#allocation86_spill] sm:$0xff] %v11609_v0  ;;  %v9657_v1 = vpack.i.bf16 %v11609_v0, %v11607_v62 }
 0x2cc   : > { %v1753_v42 = vpop.f32.mrf.mxu0 }
 0x2cd   : > { %14225 = vst [vmem:[#allocation83_spill] sm:$0xff] %v11542_v41  ;;  %1908 = vrot.lane.b32.xlu2 %v1748_v35, %s10833_s12  ;;  %v1754_v43 = vadd.f32 %v11471_v16, %v1753_v42  ;;  %9187 = vmatmul.msk.f32.vlgmr.msrb.gmra.mxu2 %vm1465_vm0, %v11542_v41 }
 0x2cf   : > { %1850 = vrot.lane.b32.xlu1 %v11520_v33, %s10833_s12  ;;  %9188 = vmatpush.xpose.msk.msra.mxu3 %vm1465_vm0, %v1754_v43 }
 0x2d0   : > { %1906 = vrot.lane.b32.xlu0 %v1745_v31, %s10833_s12  ;;  %v1811_v6 = vpop.f32.mrf.mxu1 }
 0x2d1   : > { %v11630_v10 = vadd.f32 %v9759_v58, %v1811_v6 }
 0x2d2   : > { %v1692_v44 = vpop.f32.mrf.mxu3 }
 0x2d3   : > { %v11553_v45 = vadd.f32 %v11476_v19, %v1692_v44  ;;  %v9662_v54 = vpack.i.bf16 %v11633_v13, %v11630_v10 }
 0x2d4   : > { %v1756_v46 = vpop.f32.mrf.mxu0 }
 0x2d5   : > { %14226 = vst [vmem:[#allocation84_spill] sm:$0xff] %v11553_v45  ;;  %1836 = vrot.lane.b32.xlu2 %v11532_v37, %s10834_s3  ;;  %v1757_v47 = vadd.f32 %v11471_v16, %v1756_v46  ;;  %9189 = vmatmul.msk.f32.vlgmr.msra.gmra.mxu3 %vm1465_vm0, %v11553_v45 }
 0x2d7   : > { %1852 = vrot.lane.b32.xlu1 %v11532_v37, %s10833_s12  ;;  %9190 = vmatpush.xpose.msk.msra.mxu2 %vm1465_vm0, %v1757_v47 }
 0x2d8   : > { %1834 = vrot.lane.b32.xlu0 %v11520_v33, %s10834_s3  ;;  %v1814_v53 = vpop.f32.mrf.mxu1 }
 0x2da   : > { %v1695_v48 = vpop.f32.mrf.mxu3 }
 0x2db   : > { %v11566_v49 = vadd.f32 %v11476_v19, %v1695_v48  ;;  %v11649_v19 = vadd.f32 %v9759_v58, %v1814_v53 }
 0x2dd   : > { %14227 = vst [vmem:[#allocation85_spill] sm:$0xff] %v11566_v49  ;;  %1894 = vrot.lane.b32.xlu2 %v1751_v39, %s10834_s3  ;;  %9191 = vmatmul.msk.f32.vlgmr.msra.gmra.mxu2 %vm1465_vm0, %v11566_v49 }
 0x2df   : > { %1840 = vrot.lane.b32.xlu1 %v11553_v45, %s10834_s3 }
 0x2e0   : > { %1910 = vrot.lane.b32.xlu0 %v1751_v39, %s10833_s12  ;;  %v1817_v18 = vpop.f32.mrf.mxu1 }
 0x2e1   : > { %v11652_v22 = vadd.f32 %v9759_v58, %v1817_v18 }
 0x2e3   : > { %v11658_v26 = vpack.i.bf16 %v11652_v22, %v11649_v19 }
 0x2e5   : > { %1854 = vrot.lane.b32.xlu2 %v11542_v41, %s10833_s12 }
 0x2e7   : > { %1898 = vrot.lane.b32.xlu1 %v1757_v47, %s10834_s3 }
 0x2e8   : > { %1838 = vrot.lane.b32.xlu0 %v11542_v41, %s10834_s3 }
 0x2ed   : > { %1896 = vrot.lane.b32.xlu2 %v1754_v43, %s10834_s3 }
 0x2ef   : > { %1856 = vrot.lane.b32.xlu1 %v11553_v45, %s10833_s12 }
 0x2f0   : > { %1922 = vrot.lane.b32.xlu0 %v1745_v31, %s10832_s13 }
 0x2f5   : > { %1912 = vrot.lane.b32.xlu2 %v1754_v43, %s10833_s12 }
 0x2f7   : > { %1858 = vrot.lane.b32.xlu1 %v11566_v49, %s10833_s12 }
 0x2f8   : > { %1914 = vrot.lane.b32.xlu0 %v1757_v47, %s10833_s12 }
 0x2f9   : > { %v11589_v55 = vpop.permute.xlu2 %1916 }
 0x2fd   : > { %1862 = vrot.lane.b32.xlu2 %v11492_v25, %s10832_s13 }
 0x2ff   : > { %1866 = vrot.lane.b32.xlu1 %v11520_v33, %s10832_s13 }
 0x300   : > { %1842 = vrot.lane.b32.xlu0 %v11566_v49, %s10834_s3 }
 0x305   : > { %1920 = vrot.lane.b32.xlu2 %v11495_v27, %s10832_s13 }
 0x307   : > { %v1831_v57 = vpop.permute.xlu2 %1830  ;;  %1924 = vrot.lane.b32.xlu1 %v1748_v35, %s10832_s13 }
 0x308   : > { %1864 = vrot.lane.b32.xlu0 %v11508_v29, %s10832_s13 }
 0x30d   : > { %1868 = vrot.lane.b32.xlu2 %v11532_v37, %s10832_s13 }
 0x30f   : > { %v11602_v59 = vpop.permute.xlu2 %1846  ;;  %1870 = vrot.lane.b32.xlu1 %v11542_v41, %s10832_s13 }
 0x310   : > { %1926 = vrot.lane.b32.xlu0 %v1751_v39, %s10832_s13 }
 0x311   : > { %v1901_v61 = vpop.permute.xlu1 %1900 }
 0x312   : > { %v1885_v63 = vpop.permute.xlu0 %1884 }
 0x313   : > { %9192 = vmatpush.xpose.msk.msrb.mxu3 %vm1465_vm0, %v1885_v63 }
 0x315   : > { %1930 = vrot.lane.b32.xlu2 %v1757_v47, %s10832_s13 }
 0x317   : > { %v1905_v2 = vpop.permute.xlu2 %1904  ;;  %1928 = vrot.lane.b32.xlu1 %v1754_v43, %s10832_s13 }
 0x318   : > { %9658 = vrot.lane.b32.xlu0 %v9657_v1, %s10833_s12 }
 0x319   : > { %v11617_v3 = vpop.permute.xlu1 %1860 }
 0x31a   : > { %v1829_v5 = vpop.permute.xlu0 %1828 }
 0x31b   : > { %9193 = vmatmul.msk.f32.vlgmr.msrb.gmra.mxu3 %vm1465_vm0, %v1829_v5 }
 0x31d   : > { %1872 = vrot.lane.b32.xlu2 %v11553_v45, %s10832_s13 }
 0x31f   : > { %v1893_v9 = vpop.permute.xlu2 %1892  ;;  %9648 = vrot.lane.b32.xlu1 %v9657_v1, %s10834_s3 }
 0x320   : > { %9668 = vrot.lane.b32.xlu0 %v9667_v8, %s10833_s12 }
 0x321   : > { %v1889_v11 = vpop.permute.xlu1 %1888 }
 0x322   : > { %v1845_v12 = vpop.permute.xlu0 %1844  ;;  %9196 = vmatpush.xpose.msk.msra.mxu3 %vm1465_vm0, %v1889_v11 }
 0x325   : > { %9653 = vrot.lane.b32.xlu2 %v9667_v8, %s10834_s3 }
 0x326   : > { %9200 = vmatpush.xpose.msk.msrb.mxu3 %vm1465_vm0, %v1893_v9 }
 0x327   : > { %v1909_v14 = vpop.permute.xlu2 %1908  ;;  %9663 = vrot.lane.b32.xlu1 %v9662_v54, %s10834_s3 }
 0x328   : > { %1874 = vrot.lane.b32.xlu0 %v11566_v49, %s10832_s13  ;;  %v11660_v27 = vpop.f32.mrf.mxu2 }
 0x329   : > { %v1833_v15 = vpop.permute.xlu1 %1832  ;;  %v2781_v47 = vsel %vm2780_vm1, %v11660_v27, -inf }
 0x32a   : > { %v1887_v16 = vpop.permute.xlu0 %1886  ;;  %9197 = vmatmul.msk.f32.vlgmr.msra.gmra.mxu3 %vm1465_vm0, %v1833_v15 }
 0x32b   : > { %9194 = vmatpush.xpose.msk.msrb.mxu2 %vm1465_vm0, %v1887_v16  ;;  %9208 = vmatpush.xpose.msk.msra.mxu3 %vm1465_vm0, %v1901_v61 }
 0x32d   : > { %9673 = vrot.lane.b32.xlu2 %v9672_v17, %s10832_s13 }
 0x32e   : > { %9195 = vmatmul.msk.f32.vlgmr.msrb.gmra.mxu2 %vm1465_vm0, %v1831_v57 }
 0x32f   : > { %v1837_v20 = vpop.permute.xlu2 %1836  ;;  %9678 = vrot.lane.b32.xlu1 %v9662_v54, %s10833_s12 }
 0x330   : > { %v11670_v32 = vpop.f32.mrf.mxu2 }
 0x331   : > { %v1849_v23 = vpop.permute.xlu1 %1848  ;;  %v2784_v60 = vsel %vm2780_vm1, %v11670_v32, -inf }
 0x332   : > { %v1903_v24 = vpop.permute.xlu0 %1902  ;;  %9201 = vmatmul.msk.f32.vlgmr.msrb.gmra.mxu3 %vm1465_vm0, %v1837_v20 }
 0x333   : > { %9216 = vmatpush.xpose.msk.msrb.mxu3 %vm1465_vm0, %v1909_v14 }
 0x335   : > { %9683 = vrot.lane.b32.xlu2 %v11658_v26, %s10834_s3 }
 0x337   : > { %v1895_v28 = vpop.permute.xlu2 %1894 }
 0x338   : > { %9202 = vmatpush.xpose.msk.msra.mxu0 %vm1465_vm0, %v1895_v28  ;;  %v11674_v38 = vpop.f32.mrf.mxu2 }
 0x339   : > { %v1891_v30 = vpop.permute.xlu1 %1890  ;;  %v2787_v57 = vsel %vm2780_vm1, %v11674_v38, -inf }
 0x33a   : > { %v1919_v31 = vpop.permute.xlu0 %1918  ;;  %9198 = vmatpush.xpose.msk.msra.mxu2 %vm1465_vm0, %v1891_v30  ;;  %9209 = vmatmul.msk.f32.vlgmr.msra.gmra.mxu3 %vm1465_vm0, %v1845_v12 }
 0x33b   : > { %9224 = vmatpush.xpose.msk.msra.mxu3 %vm1465_vm0, %v11589_v55 }
 0x33c   : > { %9210 = vmatpush.xpose.msk.msrb.mxu0 %vm1465_vm0, %v1903_v24 }
 0x33f   : > { %v1855_v34 = vpop.permute.xlu2 %1854 }
 0x340   : > { %v11680_v43 = vpop.f32.mrf.mxu2 }
 0x341   : > { %v11672_v35 = vpop.permute.xlu1 %1850  ;;  %v2790_v8 = vsel %vm2780_vm1, %v11680_v43, -inf }
 0x342   : > { %v1907_v36 = vpop.permute.xlu0 %1906 }
 0x347   : > { %v1897_v39 = vpop.permute.xlu2 %1896 }
 0x348   : > { %9204 = vmatpush.xpose.msk.msra.mxu1 %vm1465_vm0, %v1897_v39  ;;  %v11688_v50 = vpop.f32.mrf.mxu3 }
 0x349   : > { %v1853_v40 = vpop.permute.xlu1 %1852  ;;  %v2793_v52 = vsel %vm2780_vm1, %v11688_v50, -inf }
 0x34a   : > { %v1835_v42 = vpop.permute.xlu0 %1834  ;;  %9217 = vmatmul.msk.f32.vlgmr.msrb.gmra.mxu3 %vm1465_vm0, %v1853_v40 }
 0x34b   : > { %9199 = vmatmul.msk.f32.vlgmr.msra.gmra.mxu2 %vm1465_vm0, %v1835_v42 }
 0x34c   : > { %9212 = vmatpush.xpose.msk.msrb.mxu1 %vm1465_vm0, %v1905_v2 }
 0x34f   : > { %v1913_v44 = vpop.permute.xlu2 %1912 }
 0x350   : > { %v11690_v51 = vpop.f32.mrf.mxu2 }
 0x351   : > { %v1841_v46 = vpop.permute.xlu1 %1840  ;;  %v2796_v61 = vsel %vm2780_vm1, %v11690_v51, -inf }
 0x352   : > { %v1911_v48 = vpop.permute.xlu0 %1910  ;;  %2782 = vmax.xlane.f32.xlu0 %v2781_v47  ;;  %9205 = vmatmul.msk.f32.vlgmr.msra.gmra.mxu1 %vm1465_vm0, %v1841_v46 }
 0x353   : > { %9220 = vmatpush.xpose.msk.msra.mxu1 %vm1465_vm0, %v1913_v44  ;;  %9225 = vmatmul.msk.f32.vlgmr.msra.gmra.mxu3 %vm1465_vm0, %v11617_v3 }
 0x357   : > { %v1863_v55 = vpop.permute.xlu2 %1862 }
 0x358   : > { %v11712_v6 = vpop.f32.mrf.mxu3 }
 0x359   : > { %2794 = vmax.xlane.f32.xlu1 %v2793_v52  ;;  %v1899_v56 = vpop.permute.xlu1 %1898  ;;  %v2799_v9 = vsel %vm2780_vm1, %v11712_v6, -inf }
 0x35a   : > { %v1839_v58 = vpop.permute.xlu0 %1838  ;;  %2788 = vmax.xlane.f32.xlu0 %v2787_v57  ;;  %9206 = vmatpush.xpose.msk.msrb.mxu2 %vm1465_vm0, %v1899_v56 }
 0x35b   : > { %9203 = vmatmul.msk.f32.vlgmr.msra.gmra.mxu0 %vm1465_vm0, %v1839_v58  ;;  %9213 = vmatmul.msk.f32.vlgmr.msrb.gmra.mxu1 %vm1465_vm0, %v1849_v23 }
 0x35c   : > { %9218 = vmatpush.xpose.msk.msra.mxu0 %vm1465_vm0, %v1911_v48 }
 0x35e   : > { %9214 = vmatpush.xpose.msk.msra.mxu2 %vm1465_vm0, %v1907_v36  ;;  %2785 = vmax.xlane.f32.xlu2 %v2784_v60 }
 0x35f   : > { %v1921_v63 = vpop.permute.xlu2 %1920 }
 0x360   : > { %v11705_v1 = vpop.f32.mrf.mxu2  ;;  %9228 = vmatpush.xpose.msk.msrb.mxu1 %vm1465_vm0, %v1921_v63 }
 0x361   : > { %v1857_v2 = vpop.permute.xlu1 %1856  ;;  %2797 = vmax.xlane.f32.xlu1 %v2796_v61  ;;  %v2802_v3 = vsel %vm2780_vm1, %v11705_v1, -inf }
 0x362   : > { %v1923_v5 = vpop.permute.xlu0 %1922  ;;  %2803 = vmax.xlane.f32.xlu0 %v2802_v3 }
 0x363   : > { %9211 = vmatmul.msk.f32.vlgmr.msrb.gmra.mxu0 %vm1465_vm0, %v11602_v59  ;;  %9221 = vmatmul.msk.f32.vlgmr.msra.gmra.mxu1 %vm1465_vm0, %v1857_v2 }
 0x364   : > { %9226 = vmatpush.xpose.msk.msrb.mxu0 %vm1465_vm0, %v1919_v31 }
 0x366   : > { %2791 = vmax.xlane.f32.xlu2 %v2790_v8 }
 0x367   : > { %v1869_v54 = vpop.permute.xlu2 %1868 }
 0x369   : > { %v1859_v11 = vpop.permute.xlu1 %1858  ;;  %2800 = vmax.xlane.f32.xlu1 %v2799_v9 }
 0x36a   : > { %v1915_v12 = vpop.permute.xlu0 %1914 }
 0x36b   : > { %9219 = vmatmul.msk.f32.vlgmr.msra.gmra.mxu0 %vm1465_vm0, %v1855_v34 }
 0x36f   : > { %v1931_v17 = vpop.permute.xlu2 %1930 }
 0x371   : > { %v1867_v53 = vpop.permute.xlu1 %1866 }
 0x372   : > { %v1843_v59 = vpop.permute.xlu0 %1842 }
 0x373   : > { %9207 = vmatmul.msk.f32.vlgmr.msrb.gmra.mxu2 %vm1465_vm0, %v1843_v59  ;;  %9227 = vmatmul.msk.f32.vlgmr.msrb.gmra.mxu0 %vm1465_vm0, %v1863_v55 }
 0x374   : > { %9222 = vmatpush.xpose.msk.msrb.mxu2 %vm1465_vm0, %v1915_v12 }
 0x377   : > { %v1873_v23 = vpop.permute.xlu2 %1872 }
 0x379   : > { %v1925_v14 = vpop.permute.xlu1 %1924 }
 0x37a   : > { %v1865_v15 = vpop.permute.xlu0 %1864  ;;  %9232 = vmatpush.xpose.msk.msrb.mxu3 %vm1465_vm0, %v1925_v14 }
 0x37b   : > { %9215 = vmatmul.msk.f32.vlgmr.msra.gmra.mxu2 %vm1465_vm0, %v11672_v35  ;;  %9229 = vmatmul.msk.f32.vlgmr.msrb.gmra.mxu1 %vm1465_vm0, %v1865_v15 }
 0x37c   : > { %9230 = vmatpush.xpose.msk.msra.mxu2 %vm1465_vm0, %v1923_v5 }
 0x37d   : > { %9233 = vmatmul.msk.f32.vlgmr.msrb.gmra.mxu3 %vm1465_vm0, %v1869_v54 }
 0x37e   : > { %3567 = vmatpush.msra.mxu3 %v11607_v62 }
 0x37f   : > { %v11760_v35 = vpop.permute.xlu2 %9653 }
 0x380   : > { %3659 = vmatpush.msrb.mxu3 %v11609_v0 }
 0x381   : > { %v1871_v16 = vpop.permute.xlu1 %1870 }
 0x382   : > { %v1927_v18 = vpop.permute.xlu0 %1926 }
 0x383   : > { %9223 = vmatmul.msk.f32.vlgmr.msrb.gmra.mxu2 %vm1465_vm0, %v1859_v11  ;;  %9234 = vmatpush.xpose.msk.msra.mxu0 %vm1465_vm0, %v1927_v18 }
 0x384   : > { %9238 = vmatpush.xpose.msk.msrb.mxu2 %vm1465_vm0, %v1931_v17 }
 0x386   : > { %9235 = vmatmul.msk.f32.vlgmr.msra.gmra.mxu0 %vm1465_vm0, %v1871_v16 }
 0x387   : > { %3590 = vmatpush.msrb.mxu0 %v11622_v7  ;;  %v11768_v40 = vpop.permute.xlu2 %9673 }
 0x388   : > { %14229 = vst [vmem:[#allocation87_spill] sm:$0xff] %v11768_v40 }
 0x389   : > { %3682 = vmatpush.msra.mxu0 %v11630_v10  ;;  %v1929_v62 = vpop.permute.xlu1 %1928 }
 0x38a   : > { %v11738_v20 = vpop.permute.xlu0 %9658  ;;  %9236 = vmatpush.xpose.msk.msra.mxu1 %vm1465_vm0, %v1929_v62 }
 0x38b   : > { %9231 = vmatmul.msk.f32.vlgmr.msra.gmra.mxu2 %vm1465_vm0, %v1867_v53 }
 0x38c   : > { %3636 = vmatpush.msra.mxu2 %v11633_v13 }
 0x38d   : > { %9237 = vmatmul.msk.f32.vlgmr.msra.gmra.mxu1 %vm1465_vm0, %v1873_v23 }
 0x38e   : > { %3613 = vmatpush.msrb.mxu1 %v11619_v4 }
 0x38f   : > { %v11773_v48 = vpop.permute.xlu2 %9683 }
 0x390   : > { %3705 = vmatpush.msra.mxu1 %v11649_v19 }
 0x391   : > { %v11754_v31 = vpop.permute.xlu1 %9648 }
 0x392   : > { %v11746_v7 = vpop.permute.xlu0 %9668 }
 0x399   : > { %v11764_v39 = vpop.permute.xlu1 %9663 }
 0x39a   : > { %v1875_v24 = vpop.permute.xlu0 %1874 }
 0x39b   : > { %9239 = vmatmul.msk.f32.vlgmr.msrb.gmra.mxu2 %vm1465_vm0, %v1875_v24 }
 0x39c   : > { %3728 = vmatpush.msrb.mxu2 %v11652_v22 }
 0x39e   : > { %v11750_v28 = vpop.f32.mrf.mxu3 }
 0x39f   : > { %v2805_v30 = vsel %vm2780_vm1, %v11750_v28, -inf }
 0x3a0   : > { %2806 = vmax.xlane.f32.xlu2 %v2805_v30 }
 0x3a1   : > { %v11770_v42 = vpop.permute.xlu1 %9678 }
 0x3a2   : > { %14230 = vst [vmem:[#allocation88_spill] sm:$0xff] %v11770_v42 }
 0x3ad   : > { %v11762_v36 = vpop.f32.mrf.mxu3 }
 0x3ae   : > { %v2811_v22 = vsel %vm2780_vm1, %v11762_v36, -inf }
 0x3b1   : > { %v11756_v34 = vpop.f32.mrf.mxu2 }
 0x3b2   : > { %v2808_v19 = vsel %vm2780_vm1, %v11756_v34, -inf }
 0x3b3   : > { %2809 = vmax.xlane.f32.xlu2 %v2808_v19 }
 0x3b5   : > { %v11775_v52 = vpop.f32.mrf.mxu3 }
 0x3bb   : > { %2812 = vmax.xlane.f32.xlu2 %v2811_v22  ;;  %v2817_v22 = vsel %vm2780_vm1, %v11775_v52, -inf }
 0x3bd   : > { %v11784_v8 = vpop.f32.mrf.mxu3 }
 0x3c5   : > { %v2783_v44 = vpop.xlane.xlu0 %2782 }
 0x3c6   : > { %v2877_v46 = vsub.f32 %v11660_v27, %v2783_v44 }
 0x3c8   : > { %v2909_v47 = vmul.f32 1.442695, %v2877_v46  ;;  %v2829_v46 = vsel %vm2780_vm1, %v11784_v8, -inf }
 0x3ca   : > { %9775 = vpow2.f32 %v2909_v47 }
 0x3cc   : > { %v2795_v55 = vpop.xlane.xlu1 %2794 }
 0x3cd   : > { %v2881_v56 = vsub.f32 %v11688_v50, %v2795_v55  ;;  %v2789_v57 = vpop.xlane.xlu0 %2788  ;;  %v11800_v54 = vpop.f32.mrf.mxu3 }
 0x3ce   : > { %v2879_v61 = vsub.f32 %v11674_v38, %v2789_v57  ;;  %v11786_v9 = vpop.f32.mrf.mxu2  ;;  %v2841_v17 = vsel %vm2780_vm1, %v11800_v54, -inf }
 0x3cf   : > { %v2917_v58 = vmul.f32 1.442695, %v2881_v56  ;;  %v11796_v12 = vpop.f32.mrf.mxu1 }
 0x3d0   : > { %v11778_v60 = vpop.eup %9775  ;;  %v2913_v3 = vmul.f32 1.442695, %v2879_v61 }
 0x3d1   : > { %9777 = vpow2.f32 %v2917_v58  ;;  %v2786_v63 = vpop.xlane.xlu2 %2785  ;;  %v2973_v27 = vsel %vm2780_vm1, %v11778_v60, 0.0 }
 0x3d2   : > { %v2878_v2 = vsub.f32 %v11670_v32, %v2786_v63  ;;  %2974 = vadd.xlane.f32.xlu1 %v2973_v27  ;;  %v2814_v32 = vsel %vm2780_vm1, %v11786_v9, -inf }
 0x3d4   : > { %v2911_v5 = vmul.f32 1.442695, %v2878_v2  ;;  %v2798_v59 = vpop.xlane.xlu1 %2797 }
 0x3d5   : > { %v2882_v16 = vsub.f32 %v11690_v51, %v2798_v59 }
 0x3d6   : > { %9779 = vpow2.f32 %v2911_v5  ;;  %v11840_v2 = vpop.f32.mrf.mxu3 }
 0x3d7   : > { %v11788_v50 = vpop.eup %9777  ;;  %9781 = vpow2.f32 %v2913_v3  ;;  %v2919_v24 = vmul.f32 1.442695, %v2882_v16 }
 0x3d8   : > { %v11790_v11 = vpop.f32.mrf.mxu0  ;;  %v2985_v38 = vsel %vm2780_vm1, %v11788_v50, 0.0  ;;  %v11814_v19 = vpop.f32.mrf.mxu1 }
 0x3d9   : > { %2986 = vadd.xlane.f32.xlu2 %v2985_v38  ;;  %v2792_v18 = vpop.xlane.xlu2 %2791  ;;  %9783 = vpow2.f32 %v2919_v24  ;;  %v2835_v44 = vsel %vm2780_vm1, %v11814_v19, -inf  ;;  %v2820_v55 = vsel %vm2780_vm1, %v11790_v11, -inf  ;;  %v2823_v38 = vsel %vm2780_vm1, %v11796_v12, -inf }
 0x3da   : > { %2815 = vmax.xlane.f32.xlu1 %v2814_v32  ;;  %v2880_v30 = vsub.f32 %v11680_v43, %v2792_v18  ;;  %v2804_v18 = vpop.xlane.xlu0 %2803 }
 0x3dc   : > { %v11798_v53 = vpop.eup %9779  ;;  %v2915_v51 = vmul.f32 1.442695, %v2880_v30  ;;  %v2884_v30 = vsub.f32 %v11705_v1, %v2804_v18 }
 0x3dd   : > { %v2976_v14 = vsel %vm2780_vm1, %v11798_v53, 0.0  ;;  %v11804_v15 = vpop.eup %9781 }
 0x3de   : > { %2977 = vadd.xlane.f32.xlu0 %v2976_v14  ;;  %v2979_v62 = vsel %vm2780_vm1, %v11804_v15, 0.0  ;;  %9785 = vpow2.f32 %v2915_v51 }
 0x3df   : > { %v11824_v43 = vpop.eup %9783 }
 0x3e0   : > { %v11811_v23 = vpop.f32.mrf.mxu0  ;;  %v2988_v56 = vsel %vm2780_vm1, %v11824_v43, 0.0  ;;  %v11848_v32 = vpop.f32.mrf.mxu1 }
 0x3e1   : > { %2842 = vmax.xlane.f32.xlu2 %v2841_v17  ;;  %v2832_v57 = vsel %vm2780_vm1, %v11811_v23, -inf }
 0x3e2   : > { %2980 = vadd.xlane.f32.xlu1 %v2979_v62 }
 0x3e4   : > { %v11832_v58 = vpop.eup %9785 }
 0x3e5   : > { %v2982_v61 = vsel %vm2780_vm1, %v11832_v58, 0.0 }
 0x3e6   : > { %2818 = vmax.xlane.f32.xlu0 %v2817_v22  ;;  %v2801_v22 = vpop.xlane.xlu1 %2800 }
 0x3e8   : > { %v11822_v47 = vpop.f32.mrf.mxu0 }
 0x3e9   : > { %2836 = vmax.xlane.f32.xlu2 %v2835_v44  ;;  %v2844_v62 = vsel %vm2780_vm1, %v11822_v47, -inf  ;;  %v2923_v44 = vmul.f32 1.442695, %v2884_v30 }
 0x3ea   : > { %2830 = vmax.xlane.f32.xlu1 %v2829_v46  ;;  %v2883_v46 = vsub.f32 %v11712_v6, %v2801_v22  ;;  %v2847_v6 = vsel %vm2780_vm1, %v11848_v32, -inf }
 0x3eb   : > { %9787 = vpow2.f32 %v2923_v44 }
 0x3ee   : > { %2821 = vmax.xlane.f32.xlu0 %v2820_v55  ;;  %v2853_v55 = vsel %vm2780_vm1, %v11840_v2, -inf }
 0x3f0   : > { %v11836_v63 = vpop.f32.mrf.mxu0 }
 0x3f1   : > { %2989 = vadd.xlane.f32.xlu2 %v2988_v56  ;;  %v2856_v5 = vsel %vm2780_vm1, %v11836_v63, -inf }
 0x3f2   : > { %2833 = vmax.xlane.f32.xlu1 %v2832_v57  ;;  %v2921_v57 = vmul.f32 1.442695, %v2883_v46 }
 0x3f4   : > { %9789 = vpow2.f32 %v2921_v57 }
 0x3f6   : > { %v11838_v27 = vpop.f32.mrf.mxu2  ;;  %2983 = vadd.xlane.f32.xlu0 %v2982_v61 }
 0x3f7   : > { %v2826_v3 = vsel %vm2780_vm1, %v11838_v27, -inf }
 0x3f8   : > { %v11860_v24 = vpop.f32.mrf.mxu1 }
 0x3f9   : > { %2827 = vmax.xlane.f32.xlu2 %v2826_v3  ;;  %v2859_v51 = vsel %vm2780_vm1, %v11860_v24, -inf }
 0x3fa   : > { %2857 = vmax.xlane.f32.xlu1 %v2856_v5 }
 0x3fe   : > { %v11850_v59 = vpop.f32.mrf.mxu2  ;;  %2824 = vmax.xlane.f32.xlu0 %v2823_v38  ;;  %v11877_v38 = vpop.eup %9787 }
 0x3ff   : > { %v2838_v16 = vsel %vm2780_vm1, %v11850_v59, -inf  ;;  %v11881_v18 = vpop.eup %9789 }
 0x400   : > { %v11852_v14 = vpop.f32.mrf.mxu3 }
 0x401   : > { %v2865_v17 = vsel %vm2780_vm1, %v11852_v14, -inf }
 0x402   : > { %2839 = vmax.xlane.f32.xlu1 %v2838_v16  ;;  %2866 = vmax.xlane.f32.xlu2 %v2865_v17  ;;  %v2994_v17 = vsel %vm2780_vm1, %v11877_v38, 0.0 }
 0x403   : > { %v11868_v56 = vpop.f32.mrf.mxu0 }
 0x404   : > { %v2868_v61 = vsel %vm2780_vm1, %v11868_v56, -inf }
 0x406   : > { %2845 = vmax.xlane.f32.xlu0 %v2844_v62  ;;  %v11872_v3 = vpop.f32.mrf.mxu2  ;;  %v2991_v62 = vsel %vm2780_vm1, %v11881_v18, 0.0 }
 0x40a   : > { %2860 = vmax.xlane.f32.xlu2 %v2859_v51  ;;  %v2850_v51 = vsel %vm2780_vm1, %v11872_v3, -inf  ;;  %v11893_v44 = vpop.f32.mrf.mxu1 }
 0x40b   : > { %v2871_v46 = vsel %vm2780_vm1, %v11893_v44, -inf }
 0x40e   : > { %2854 = vmax.xlane.f32.xlu0 %v2853_v55 }
 0x412   : > { %2869 = vmax.xlane.f32.xlu2 %v2868_v61 }
 0x413   : > { %v2807_v1 = vpop.xlane.xlu2 %2806 }
 0x414   : > { %v2885_v5 = vsub.f32 %v11750_v28, %v2807_v1  ;;  %v11887_v28 = vpop.f32.mrf.mxu2 }
 0x416   : > { %v2925_v16 = vmul.f32 1.442695, %v2885_v5  ;;  %2848 = vmax.xlane.f32.xlu0 %v2847_v6  ;;  %v2862_v6 = vsel %vm2780_vm1, %v11887_v28, -inf }
 0x418   : > { %9791 = vpow2.f32 %v2925_v16 }
 0x41a   : > { %2995 = vadd.xlane.f32.xlu2 %v2994_v17 }
 0x41e   : > { %v11885_v30 = vpop.eup %9791  ;;  %2992 = vadd.xlane.f32.xlu0 %v2991_v62  ;;  %v11897_v55 = vpop.f32.mrf.mxu2 }
 0x41f   : > { %v2997_v22 = vsel %vm2780_vm1, %v11885_v30, 0.0  ;;  %14231 = vst [vmem:[#allocation89_spill] sm:$0xff] %v11897_v55  ;;  %v2874_v5 = vsel %vm2780_vm1, %v11897_v55, -inf  ;;  %v9650_v55 = vunpack.i.l.bf16 %v11754_v31 }
 0x420   : > { %2998 = vadd.xlane.f32.xlu1 %v2997_v22 }
 0x422   : > { %2851 = vmax.xlane.f32.xlu2 %v2850_v51 }
 0x426   : > { %v2810_v57 = vpop.xlane.xlu2 %2809  ;;  %2872 = vmax.xlane.f32.xlu0 %v2871_v46 }
 0x427   : > { %v2886_v61 = vsub.f32 %v11756_v34, %v2810_v57 }
 0x429   : > { %v2927_v1 = vmul.f32 1.442695, %v2886_v61 }
 0x42a   : > { %2875 = vmax.xlane.f32.xlu2 %v2874_v5 }
 0x42b   : > { %9793 = vpow2.f32 %v2927_v1 }
 0x42e   : > { %v2813_v16 = vpop.xlane.xlu2 %2812  ;;  %2863 = vmax.xlane.f32.xlu0 %v2862_v6 }
 0x42f   : > { %v2887_v17 = vsub.f32 %v11762_v36, %v2813_v16 }
 0x431   : > { %v11905_v62 = vpop.eup %9793  ;;  %v2929_v22 = vmul.f32 1.442695, %v2887_v17 }
 0x432   : > { %v3000_v51 = vsel %vm2780_vm1, %v11905_v62, 0.0 }
 0x433   : > { %9795 = vpow2.f32 %v2929_v22  ;;  %3001 = vadd.xlane.f32.xlu1 %v3000_v51 }
 0x439   : > { %v11909_v34 = vpop.eup %9795 }
 0x43a   : > { %v3003_v46 = vsel %vm2780_vm1, %v11909_v34, 0.0 }
 0x43b   : > { %3004 = vadd.xlane.f32.xlu2 %v3003_v46 }
 0x445   : > { %v2975_v57 = vpop.xlane.xlu1 %2974 }
 0x446   : > { %9797 = vrcp.f32 %v2975_v57  ;;  %v3080_v22 = vand.u32 2147483648, %v2975_v57  ;;  %v3078_v45 = vand.u32 2147483647, %v2975_v57  ;;  %vm3074_vm3 = vweird.f32 %v2975_v57 }
 0x448   : > { %vm3079_vm5 = vcmp.eq.f32.partialorder %v3078_v45, 8.507059e+37 }
 0x44c   : > { %v9798_v61 = vpop.eup %9797  ;;  %v2987_v1 = vpop.xlane.xlu2 %2986 }
 0x44d   : > { %v3070_v5 = vmul.f32 %v9798_v61, %v2975_v57  ;;  %9799 = vrcp.f32 %v2987_v1  ;;  %v2816_v36 = vpop.xlane.xlu1 %2815  ;;  %vm3075_vm2 = vweird.f32 %v9798_v61  ;;  %v3138_v57 = vand.u32 2147483647, %v2987_v1 }
 0x44e   : > { %v2888_v6 = vsub.f32 %v11786_v9, %v2816_v36  ;;  %vm3076_vm4 = vmor %vm3074_vm3, %vm3075_vm2  ;;  %v3081_v9 = vor.u32 1.1754944e-38, %v3080_v22  ;;  %vm3134_vm7 = vweird.f32 %v2987_v1 }
 0x44f   : > { %v3071_v16 = vsub.f32 1.0, %v3070_v5  ;;  %vm3139_vm9 = vcmp.eq.f32.partialorder %v3138_v57, 8.507059e+37 }
 0x450   : > { %v2931_v17 = vmul.f32 1.442695, %v2888_v6  ;;  %v3140_v6 = vand.u32 2147483648, %v2987_v1 }
 0x451   : > { %v3072_v49 = vmul.f32 %v9798_v61, %v3071_v16  ;;  %v11914_v51 = vpop.xlane.xlu0 %2977 }
 0x452   : > { %9801 = vpow2.f32 %v2931_v17  ;;  %v3093_v0 = vand.u32 2147483647, %v11914_v51  ;;  %vm3089_vm11 = vweird.f32 %v11914_v51 }
 0x453   : > { %v9800_v33 = vpop.eup %9799  ;;  %v3073_v46 = vadd.f32 %v9798_v61, %v3072_v49  ;;  %9803 = vrcp.f32 %v11914_v51 }
 0x454   : > { %v3130_v41 = vmul.f32 %v9800_v33, %v2987_v1  ;;  %v11917_v37 = vpop.xlane.xlu2 %2842  ;;  %vm3135_vm6 = vweird.f32 %v9800_v33  ;;  %v3095_v1 = vand.u32 2147483648, %v11914_v51  ;;  %vm3094_vm14 = vcmp.eq.f32.partialorder %v3093_v0, 8.507059e+37 }
 0x455   : > { %v3077_v29 = vsel %vm3076_vm4, %v9798_v61, %v3073_v46  ;;  %v11919_v5 = vpop.xlane.xlu1 %2980  ;;  %vm3136_vm8 = vmor %vm3134_vm7, %vm3135_vm6  ;;  %v3141_v46 = vor.u32 1.1754944e-38, %v3140_v6 }
 0x456   : > { %v3131_v36 = vsub.f32 1.0, %v3130_v41  ;;  %9805 = vrcp.f32 %v11919_v5  ;;  %v3082_v16 = vsel %vm3079_vm5, %v3081_v9, %v3077_v29  ;;  %v3096_v57 = vor.u32 1.1754944e-38, %v3095_v1 }
 0x457   : > { %v3083_v25 = vmul.f32 %v11778_v60, %v3082_v16  ;;  %vm3104_vm15 = vweird.f32 %v11919_v5 }
 0x458   : > { %v11922_v17 = vpop.eup %9801  ;;  %v3132_v49 = vmul.f32 %v9800_v33, %v3131_v36 }
 0x459   : > { %14232 = vst [vmem:[#allocation90_spill] sm:$0xff] %v11922_v17  ;;  %v9804_v21 = vpop.eup %9803  ;;  %v2819_v61 = vpop.xlane.xlu0 %2818  ;;  %v3006_v22 = vsel %vm2780_vm1, %v11922_v17, 0.0  ;;  %9240 = vmatmul.msk.f32.vlgmr.msra.gmra.mxu3 %vm2780_vm1, %v3083_v25 }
 0x45a   : > { %v3133_v45 = vadd.f32 %v9800_v33, %v3132_v49  ;;  %v3085_v41 = vmul.f32 %v9804_v21, %v11914_v51  ;;  %v2889_v29 = vsub.f32 %v11775_v52, %v2819_v61  ;;  %3007 = vadd.xlane.f32.xlu2 %v3006_v22  ;;  %3751 = vmatpush.msra.mxu3 %v9650_v55  ;;  %vm3090_vm10 = vweird.f32 %v9804_v21 }
 0x45b   : > { %vm3091_vm12 = vmor %vm3089_vm11, %vm3090_vm10  ;;  %v3110_v22 = vand.u32 2147483648, %v11919_v5 }
 0x45c   : > { %v9806_v60 = vpop.eup %9805  ;;  %v3137_v9 = vsel %vm3136_vm8, %v9800_v33, %v3133_v45  ;;  %v3086_v36 = vsub.f32 1.0, %v3085_v41  ;;  %v2933_v16 = vmul.f32 1.442695, %v2889_v29  ;;  %v2837_v40 = vpop.xlane.xlu2 %2836  ;;  %v9651_v33 = vunpack.i.h.bf16 %v11754_v31 }
 0x45d   : > { %v3100_v49 = vmul.f32 %v9806_v60, %v11919_v5  ;;  %v2831_v42 = vpop.xlane.xlu1 %2830  ;;  %v3142_v25 = vsel %vm3139_vm9, %v3141_v46, %v3137_v9  ;;  %vm3105_vm13 = vweird.f32 %v9806_v60  ;;  %v3108_v29 = vand.u32 2147483647, %v11919_v5 }
 0x45e   : > { %v3087_v17 = vmul.f32 %v9804_v21, %v3086_v36  ;;  %9807 = vpow2.f32 %v2933_v16  ;;  %v3143_v52 = vmul.f32 %v11788_v50, %v3142_v25  ;;  %vm11944_vm2 = vmor %vm3104_vm15, %vm3105_vm13  ;;  %v9655_v16 = vunpack.i.l.bf16 %v11760_v35 }
 0x45f   : > { %v3101_v55 = vsub.f32 1.0, %v3100_v49  ;;  %v3111_v5 = vor.u32 1.1754944e-38, %v3110_v22  ;;  %vm3109_vm3 = vcmp.eq.f32.partialorder %v3108_v29, 8.507059e+37 }
 0x460   : > { %v3088_v6 = vadd.f32 %v9804_v21, %v3087_v17 }
 0x461   : > { %v3102_v61 = vmul.f32 %v9806_v60, %v3101_v55  ;;  %v2822_v45 = vpop.xlane.xlu0 %2821  ;;  %9244 = vmatmul.msk.f32.vlgmr.msrb.gmra.mxu3 %vm2780_vm1, %v3143_v52  ;;  %v9656_v55 = vunpack.i.h.bf16 %v11760_v35 }
 0x462   : > { %v3092_v41 = vsel %vm3091_vm12, %v9804_v21, %v3088_v6  ;;  %v2890_v50 = vsub.f32 %v11790_v11, %v2822_v45  ;;  %3843 = vmatpush.msrb.mxu3 %v9651_v33  ;;  %v2893_v21 = vsub.f32 %v11784_v8, %v2831_v42  ;;  %v2895_v8 = vsub.f32 %v11814_v19, %v2837_v40 }
 0x463   : > { %v3103_v46 = vadd.f32 %v9806_v60, %v3102_v61  ;;  %v3097_v31 = vsel %vm3094_vm14, %v3096_v57, %v3092_v41 }
 0x464   : > { %v11942_v51 = vpop.eup %9807  ;;  %v2935_v0 = vmul.f32 1.442695, %v2890_v50  ;;  %v2990_v9 = vpop.xlane.xlu2 %2989  ;;  %v3098_v36 = vmul.f32 %v11798_v53, %v3097_v31  ;;  %v2941_v25 = vmul.f32 1.442695, %v2893_v21  ;;  %v2945_v6 = vmul.f32 1.442695, %v2895_v8 }
 0x465   : > { %v3107_v11 = vsel %vm11944_vm2, %v9806_v60, %v3103_v46  ;;  %9809 = vrcp.f32 %v2990_v9  ;;  %v2834_v1 = vpop.xlane.xlu1 %2833  ;;  %v3009_v42 = vsel %vm2780_vm1, %v11942_v51, 0.0  ;;  %v3155_v45 = vand.u32 2147483648, %v2990_v9 }
 0x466   : > { %9811 = vpow2.f32 %v2935_v0  ;;  %v2894_v49 = vsub.f32 %v11811_v23, %v2834_v1  ;;  %9241 = vmatmul.msk.f32.vlgmr.msrb.gmra.mxu0 %vm2780_vm1, %v3098_v36  ;;  %3010 = vadd.xlane.f32.xlu1 %v3009_v42  ;;  %v3112_v53 = vsel %vm3109_vm3, %v3111_v5, %v3107_v11  ;;  %v3153_v46 = vand.u32 2147483647, %v2990_v9 }
 0x467   : > { %3774 = vmatpush.msrb.mxu0 %v9655_v16  ;;  %v3113_v60 = vmul.f32 %v11804_v15, %v3112_v53  ;;  %vm3149_vm5 = vweird.f32 %v2990_v9  ;;  %v2897_v11 = vsub.f32 %v11800_v54, %v11917_v37  ;;  %v3156_v5 = vor.u32 1.1754944e-38, %v3155_v45 }
 0x468   : > { %v2943_v52 = vmul.f32 1.442695, %v2894_v49  ;;  %vm3154_vm7 = vcmp.eq.f32.partialorder %v3153_v46, 8.507059e+37  ;;  %v9666_v46 = vunpack.i.h.bf16 %v11764_v39 }
 0x469   : > { %v11960_v33 = vpop.xlane.xlu0 %2983  ;;  %9242 = vmatmul.msk.f32.vlgmr.msrb.gmra.mxu1 %vm2780_vm1, %v3113_v60 }
 0x46a   : > { %9813 = vpow2.f32 %v2943_v52  ;;  %3797 = vmatpush.msrb.mxu1 %v9656_v55  ;;  %v3125_v53 = vand.u32 2147483648, %v11960_v33  ;;  %v3123_v54 = vand.u32 2147483647, %v11960_v33  ;;  %vm3119_vm9 = vweird.f32 %v11960_v33 }
 0x46b   : > { %v9810_v23 = vpop.eup %9809  ;;  %9815 = vrcp.f32 %v11960_v33 }
 0x46c   : > { %v11964_v40 = vpop.eup %9811  ;;  %9817 = vpow2.f32 %v2941_v25  ;;  %v3145_v19 = vmul.f32 %v9810_v23, %v2990_v9  ;;  %v2828_v57 = vpop.xlane.xlu2 %2827  ;;  %vm3150_vm4 = vweird.f32 %v9810_v23  ;;  %vm3124_vm11 = vcmp.eq.f32.partialorder %v3123_v54, 8.507059e+37 }
 0x46d   : > { %v2858_v61 = vpop.xlane.xlu1 %2857  ;;  %v2892_v15 = vsub.f32 %v11838_v27, %v2828_v57  ;;  %v3012_v35 = vsel %vm2780_vm1, %v11964_v40, 0.0  ;;  %9819 = vpow2.f32 %v2945_v6  ;;  %vm3151_vm6 = vmor %vm3149_vm5, %vm3150_vm4  ;;  %v9665_v6 = vunpack.i.l.bf16 %v11764_v39 }
 0x46e   : > { %v3146_v22 = vsub.f32 1.0, %v3145_v19  ;;  %3013 = vadd.xlane.f32.xlu0 %v3012_v35  ;;  %v2902_v31 = vsub.f32 %v11836_v63, %v2858_v61  ;;  %v3126_v35 = vor.u32 1.1754944e-38, %v3125_v53 }
 0x46f   : > { %v2939_v41 = vmul.f32 1.442695, %v2892_v15  ;;  %v2949_v15 = vmul.f32 1.442695, %v2897_v11 }
 0x470   : > { %v11969_v29 = vpop.eup %9813  ;;  %v3147_v50 = vmul.f32 %v9810_v23, %v3146_v22  ;;  %v2959_v42 = vmul.f32 1.442695, %v2902_v31 }
 0x471   : > { %v9816_v17 = vpop.eup %9815  ;;  %9821 = vpow2.f32 %v2939_v41  ;;  %v2825_v21 = vpop.xlane.xlu0 %2824  ;;  %v3024_v27 = vsel %vm2780_vm1, %v11969_v29, 0.0 }
 0x472   : > { %v11974_v0 = vpop.eup %9817  ;;  %v3148_v36 = vadd.f32 %v9810_v23, %v3147_v50  ;;  %v3115_v16 = vmul.f32 %v9816_v17, %v11960_v33  ;;  %3025 = vadd.xlane.f32.xlu1 %v3024_v27  ;;  %v2891_v63 = vsub.f32 %v11796_v12, %v2825_v21  ;;  %vm3120_vm8 = vweird.f32 %v9816_v17 }
 0x473   : > { %v11980_v8 = vpop.eup %9819  ;;  %v3021_v60 = vsel %vm2780_vm1, %v11974_v0, 0.0  ;;  %vm3121_vm10 = vmor %vm3119_vm9, %vm3120_vm8 }
 0x474   : > { %v3152_v1 = vsel %vm3151_vm6, %v9810_v23, %v3148_v36  ;;  %v3116_v49 = vsub.f32 1.0, %v3115_v16  ;;  %v2937_v25 = vmul.f32 1.442695, %v2891_v63  ;;  %v3027_v22 = vsel %vm2780_vm1, %v11980_v8, 0.0 }
 0x475   : > { %v2840_v9 = vpop.xlane.xlu1 %2839  ;;  %v2867_v52 = vpop.xlane.xlu2 %2866  ;;  %v3157_v55 = vsel %vm3154_vm7, %v3156_v5, %v3152_v1 }
 0x476   : > { %v3117_v37 = vmul.f32 %v9816_v17, %v3116_v49  ;;  %3022 = vadd.xlane.f32.xlu0 %v3021_v60  ;;  %v3158_v12 = vmul.f32 %v11824_v43, %v3157_v55  ;;  %9823 = vpow2.f32 %v2937_v25  ;;  %v2896_v57 = vsub.f32 %v11850_v59, %v2840_v9 }
 0x477   : > { %v11987_v23 = vpop.eup %9821  ;;  %9825 = vpow2.f32 %v2959_v42 }
 0x478   : > { %v3118_v19 = vadd.f32 %v9816_v17, %v3117_v37  ;;  %9245 = vmatmul.msk.f32.vlgmr.msra.gmra.mxu0 %vm2780_vm1, %v3158_v12  ;;  %v3018_v61 = vsel %vm2780_vm1, %v11987_v23, 0.0  ;;  %v2947_v41 = vmul.f32 1.442695, %v2896_v57  ;;  %9827 = vpow2.f32 %v2949_v15 }
 0x479   : > { %3866 = vmatpush.msra.mxu0 %v9665_v6  ;;  %v2846_v43 = vpop.xlane.xlu0 %2845  ;;  %3019 = vadd.xlane.f32.xlu2 %v3018_v61 }
 0x47a   : > { %v3122_v33 = vsel %vm3121_vm10, %v9816_v17, %v3118_v19  ;;  %3028 = vadd.xlane.f32.xlu1 %v3027_v22  ;;  %v2898_v31 = vsub.f32 %v11822_v47, %v2846_v43  ;;  %9829 = vpow2.f32 %v2947_v41 }
 0x47b   : > { %v3127_v45 = vsel %vm3124_vm11, %v3126_v35, %v3122_v33 }
 0x47c   : > { %v3128_v59 = vmul.f32 %v11832_v58, %v3127_v45  ;;  %v11998_v50 = vpop.eup %9823  ;;  %v2905_v58 = vsub.f32 %v11852_v14, %v2867_v52  ;;  %v2951_v36 = vmul.f32 1.442695, %v2898_v31 }
 0x47d   : > { %v2861_v21 = vpop.xlane.xlu2 %2860  ;;  %v12002_v27 = vpop.eup %9825  ;;  %v3015_v17 = vsel %vm2780_vm1, %v11998_v50, 0.0 }
 0x47e   : > { %9243 = vmatmul.msk.f32.vlgmr.msra.gmra.mxu2 %vm2780_vm1, %v3128_v59  ;;  %3016 = vadd.xlane.f32.xlu0 %v3015_v17  ;;  %v3048_v39 = vsel %vm2780_vm1, %v12002_v27, 0.0  ;;  %v12010_v47 = vpop.eup %9827  ;;  %v2965_v11 = vmul.f32 1.442695, %v2905_v58  ;;  %9831 = vpow2.f32 %v2951_v36  ;;  %v2903_v14 = vsub.f32 %v11860_v24, %v2861_v21 }
 0x47f   : > { %3820 = vmatpush.msra.mxu2 %v9666_v46  ;;  %v3033_v49 = vsel %vm2780_vm1, %v12010_v47, 0.0 }
 0x480   : > { %v12015_v1 = vpop.eup %9829  ;;  %9833 = vpow2.f32 %v2965_v11  ;;  %v2961_v52 = vmul.f32 1.442695, %v2903_v14 }
 0x481   : > { %v2855_v16 = vpop.xlane.xlu0 %2854  ;;  %v3030_v25 = vsel %vm2780_vm1, %v12015_v1, 0.0 }
 0x482   : > { %3049 = vadd.xlane.f32.xlu1 %v3048_v39  ;;  %v2901_v5 = vsub.f32 %v11840_v2, %v2855_v16 }
 0x484   : > { %v2957_v42 = vmul.f32 1.442695, %v2901_v5  ;;  %v12023_v2 = vpop.eup %9831 }
 0x485   : > { %v12013_v63 = vpop.xlane.xlu2 %2869  ;;  %v3036_v24 = vsel %vm2780_vm1, %v12023_v2, 0.0 }
 0x486   : > { %3034 = vadd.xlane.f32.xlu0 %v3033_v49  ;;  %9835 = vpow2.f32 %v2957_v42  ;;  %v12025_v37 = vpop.eup %9833 }
 0x489   : > { %v2849_v53 = vpop.xlane.xlu0 %2848 }
 0x48a   : > { %v2899_v9 = vsub.f32 %v11848_v32, %v2849_v53  ;;  %3031 = vadd.xlane.f32.xlu1 %v3030_v25  ;;  %v3057_v32 = vsel %vm2780_vm1, %v12025_v37, 0.0 }
 0x48c   : > { %v2953_v60 = vmul.f32 1.442695, %v2899_v9  ;;  %v12031_v12 = vpop.eup %9835 }
 0x48d   : > { %v2996_v55 = vpop.xlane.xlu2 %2995  ;;  %v3045_v45 = vsel %vm2780_vm1, %v12031_v12, 0.0 }
 0x48e   : > { %9837 = vpow2.f32 %v2953_v60  ;;  %3037 = vadd.xlane.f32.xlu0 %v3036_v24  ;;  %v3183_v22 = vand.u32 2147483647, %v2996_v55  ;;  %v3185_v41 = vand.u32 2147483648, %v2996_v55  ;;  %vm3179_vm12 = vweird.f32 %v2996_v55 }
 0x48f   : > { %9839 = vrcp.f32 %v2996_v55 }
 0x490   : > { %9841 = vpow2.f32 %v2961_v52  ;;  %vm12047_vm14 = vcmp.eq.f32.partialorder %v3183_v22, 8.507059e+37  ;;  %v3186_v11 = vor.u32 1.1754944e-38, %v3185_v41 }
 0x491   : > { %v2993_v54 = vpop.xlane.xlu0 %2992 }
 0x492   : > { %9843 = vrcp.f32 %v2993_v54  ;;  %3058 = vadd.xlane.f32.xlu1 %v3057_v32  ;;  %vm3164_vm15 = vweird.f32 %v2993_v54  ;;  %v3168_v42 = vand.u32 2147483647, %v2993_v54  ;;  %v3170_v53 = vand.u32 2147483648, %v2993_v54 }
 0x493   : > { %v12033_v6 = vpop.xlane.xlu1 %2998 }
 0x494   : > { %v12035_v19 = vpop.eup %9837  ;;  %9845 = vrcp.f32 %v12033_v6  ;;  %v3198_v24 = vand.u32 2147483647, %v12033_v6  ;;  %vm3169_vm6 = vcmp.eq.f32.partialorder %v3168_v42, 8.507059e+37  ;;  %vm3194_vm7 = vweird.f32 %v12033_v6 }
 0x495   : > { %v9840_v57 = vpop.eup %9839  ;;  %v2852_v61 = vpop.xlane.xlu2 %2851  ;;  %v3039_v15 = vsel %vm2780_vm1, %v12035_v19, 0.0 }
 0x496   : > { %v12040_v35 = vpop.eup %9841  ;;  %v3175_v43 = vmul.f32 %v9840_v57, %v2996_v55  ;;  %v2900_v33 = vsub.f32 %v11872_v3, %v2852_v61  ;;  %3040 = vadd.xlane.f32.xlu2 %v3039_v15  ;;  %3046 = vadd.xlane.f32.xlu0 %v3045_v45  ;;  %vm3180_vm13 = vweird.f32 %v9840_v57  ;;  %v9686_v55 = vunpack.i.h.bf16 %v11773_v48 }
 0x497   : > { %v3051_v58 = vsel %vm2780_vm1, %v12040_v35, 0.0  ;;  %vm3181_vm2 = vmor %vm3179_vm12, %vm3180_vm13  ;;  %vm3199_vm9 = vcmp.eq.f32.partialorder %v3198_v24, 8.507059e+37  ;;  %v9670_v24 = vunpack.i.l.bf16 %v11746_v7 }
 0x498   : > { %v9844_v59 = vpop.eup %9843  ;;  %v3176_v46 = vsub.f32 1.0, %v3175_v43  ;;  %v2955_v21 = vmul.f32 1.442695, %v2900_v33  ;;  %v3171_v43 = vor.u32 1.1754944e-38, %v3170_v53 }
 0x499   : > { %v3160_v31 = vmul.f32 %v9844_v59, %v2993_v54  ;;  %v2873_v17 = vpop.xlane.xlu0 %2872  ;;  %vm3165_vm3 = vweird.f32 %v9844_v59 }
 0x49a   : > { %v9846_v36 = vpop.eup %9845  ;;  %v3177_v16 = vmul.f32 %v9840_v57, %v3176_v46  ;;  %v2907_v39 = vsub.f32 %v11893_v44, %v2873_v17  ;;  %9847 = vpow2.f32 %v2955_v21  ;;  %v3200_v44 = vand.u32 2147483648, %v12033_v6  ;;  %vm3166_vm5 = vmor %vm3164_vm15, %vm3165_vm3 }
 0x49b   : > { %v3161_v5 = vsub.f32 1.0, %v3160_v31  ;;  %v3190_v49 = vmul.f32 %v9846_v36, %v12033_v6  ;;  %vm3195_vm4 = vweird.f32 %v9846_v36 }
 0x49c   : > { %v3178_v14 = vadd.f32 %v9840_v57, %v3177_v16  ;;  %v2969_v25 = vmul.f32 1.442695, %v2907_v39  ;;  %vm3196_vm8 = vmor %vm3194_vm7, %vm3195_vm4  ;;  %v3201_v45 = vor.u32 1.1754944e-38, %v3200_v44 }
 0x49d   : > { %v3162_v9 = vmul.f32 %v9844_v59, %v3161_v5  ;;  %v3191_v52 = vsub.f32 1.0, %v3190_v49  ;;  %v12074_v16 = vpop.xlane.xlu2 %2875 }
 0x49e   : > { %v3182_v60 = vsel %vm3181_vm2, %v9840_v57, %v3178_v14  ;;  %9849 = vpow2.f32 %v2969_v25  ;;  %3052 = vadd.xlane.f32.xlu0 %v3051_v58  ;;  %v9660_v58 = vunpack.i.l.bf16 %v11738_v20 }
 0x49f   : > { %v3163_v32 = vadd.f32 %v9844_v59, %v3162_v9  ;;  %v3192_v61 = vmul.f32 %v9846_v36, %v3191_v52  ;;  %v3187_v15 = vsel %vm12047_vm14, %v3186_v11, %v3182_v60 }
 0x4a0   : > { %v3188_v22 = vmul.f32 %v11877_v38, %v3187_v15  ;;  %v12063_v46 = vpop.eup %9847  ;;  %v9685_v38 = vunpack.i.l.bf16 %v11773_v48  ;;  %v9692_v48 = vpack.i.bf16 %v11633_v13, %v11619_v4 }
 0x4a1   : > { %v3167_v57 = vsel %vm3166_vm5, %v9844_v59, %v3163_v32  ;;  %v3193_v33 = vadd.f32 %v9846_v36, %v3192_v61 }
 0x4a2   : > { %9247 = vmatmul.msk.f32.vlgmr.msrb.gmra.mxu2 %vm2780_vm1, %v3188_v22  ;;  %v3172_v41 = vsel %vm3169_vm6, %v3171_v43, %v3167_v57  ;;  %v9671_v57 = vunpack.i.h.bf16 %v11746_v7 }
 0x4a3   : > { %v3197_v31 = vsel %vm3196_vm8, %v9846_v36, %v3193_v33  ;;  %3912 = vmatpush.msrb.mxu2 %v9686_v55  ;;  %v3173_v54 = vmul.f32 %v11881_v18, %v3172_v41  ;;  %v3042_v18 = vsel %vm2780_vm1, %v12063_v46, 0.0  ;;  %v2864_v33 = vpop.xlane.xlu0 %2863 }
 0x4a4   : > { %v12066_v21 = vpop.eup %9849  ;;  %v3202_v59 = vsel %vm3199_vm9, %v3201_v45, %v3197_v31  ;;  %v2904_v45 = vsub.f32 %v11887_v28, %v2864_v33 }
 0x4a5   : > { %9246 = vmatmul.msk.f32.vlgmr.msra.gmra.mxu1 %vm2780_vm1, %v3173_v54  ;;  %v3063_v6 = vsel %vm2780_vm1, %v12066_v21, 0.0  ;;  %v3203_v17 = vmul.f32 %v11885_v30, %v3202_v59  ;;  %v2906_v54 = vsub.f32 %v11868_v56, %v12013_v63 }
 0x4a6   : > { %3889 = vmatpush.msra.mxu1 %v9685_v38  ;;  %v3002_v36 = vpop.xlane.xlu1 %3001  ;;  %3064 = vadd.xlane.f32.xlu1 %v3063_v6  ;;  %v2963_v41 = vmul.f32 1.442695, %v2904_v45 }
 0x4a7   : > { %9851 = vrcp.f32 %v3002_v36  ;;  %9248 = vmatmul.msk.f32.vlgmr.msra.gmra.mxu3 %vm2780_vm1, %v3203_v17  ;;  %3043 = vadd.xlane.f32.xlu0 %v3042_v18  ;;  %v3215_v5 = vand.u32 2147483648, %v3002_v36  ;;  %v3213_v14 = vand.u32 2147483647, %v3002_v36  ;;  %vm3209_vm11 = vweird.f32 %v3002_v36 }
 0x4a8   : > { %3935 = vmatpush.msra.mxu3 %v9660_v58 }
 0x4a9   : > { %v3216_v25 = vor.u32 1.1754944e-38, %v3215_v5  ;;  %vm3214_vm13 = vcmp.eq.f32.partialorder %v3213_v14, 8.507059e+37 }
 0x4ad   : > { %v9852_v3 = vpop.eup %9851 }
 0x4ae   : > { %v3205_v30 = vmul.f32 %v9852_v3, %v3002_v36  ;;  %v3005_v39 = vpop.xlane.xlu2 %3004  ;;  %9693 = vrot.lane.b32.xlu2 %v9692_v48, %s10832_s13  ;;  %vm3210_vm10 = vweird.f32 %v9852_v3 }
 0x4af   : > { %9853 = vrcp.f32 %v3005_v39  ;;  %vm3211_vm12 = vmor %vm3209_vm11, %vm3210_vm10  ;;  %v3230_v44 = vand.u32 2147483648, %v3005_v39  ;;  %v3228_v61 = vand.u32 2147483647, %v3005_v39  ;;  %vm3224_vm15 = vweird.f32 %v3005_v39 }
 0x4b0   : > { %v3206_v11 = vsub.f32 1.0, %v3205_v30  ;;  %9855 = vpow2.f32 %v2963_v41  ;;  %v9661_v41 = vunpack.i.h.bf16 %v11738_v20 }
 0x4b1   : > { %v3231_v55 = vor.u32 1.1754944e-38, %v3230_v44  ;;  %vm3229_vm3 = vcmp.eq.f32.partialorder %v3228_v61, 8.507059e+37 }
 0x4b2   : > { %v3207_v49 = vmul.f32 %v9852_v3, %v3206_v11  ;;  %v14238_v11 = vld [vmem:[#allocation88_spill] sm:$0xff] }
 0x4b3   : > { %v9681_v5 = vunpack.i.h.bf16 %v14238_v11 }
 0x4b4   : > { %v3208_v42 = vadd.f32 %v9852_v3, %v3207_v49 }
 0x4b5   : > { %v9854_v53 = vpop.eup %9853 }
 0x4b6   : > { %v3212_v9 = vsel %vm3211_vm12, %v9852_v3, %v3208_v42  ;;  %v3220_v52 = vmul.f32 %v9854_v53, %v3005_v39  ;;  %vm3225_vm14 = vweird.f32 %v9854_v53  ;;  %v12095_v38 = vpop.eup %9855  ;;  %v14237_v3 = vld [vmem:[#allocation90_spill] sm:$0xff] }
 0x4b7   : > { %v3217_v4 = vsel %vm3214_vm13, %v3216_v25, %v3212_v9  ;;  %vm3226_vm2 = vmor %vm3224_vm15, %vm3225_vm14  ;;  %v3054_v7 = vsel %vm2780_vm1, %v12095_v38, 0.0 }
 0x4b8   : > { %v3221_v13 = vsub.f32 1.0, %v3220_v52  ;;  %v3218_v60 = vmul.f32 %v11905_v62, %v3217_v4 }
 0x4ba   : > { %v3222_v32 = vmul.f32 %v9854_v53, %v3221_v13  ;;  %9249 = vmatmul.msk.f32.vlgmr.msrb.gmra.mxu0 %vm2780_vm1, %v3218_v60 }
 0x4bb   : > { %3958 = vmatpush.msrb.mxu0 %v9670_v24  ;;  %9688 = vrot.lane.b32.xlu0 %v11658_v26, %s10833_s12 }
 0x4bc   : > { %v3223_v15 = vadd.f32 %v9854_v53, %v3222_v32 }
 0x4be   : > { %v3227_v43 = vsel %vm3226_vm2, %v9854_v53, %v3223_v15 }
 0x4bf   : > { %1998 = vrot.lane.b32.xlu1 %v11630_v10, %s10832_s13  ;;  %v3232_v62 = vsel %vm3229_vm3, %v3231_v55, %v3227_v43 }
 0x4c0   : > { %v3233_v22 = vmul.f32 %v11909_v34, %v3232_v62  ;;  %v2967_v34 = vmul.f32 1.442695, %v2906_v54 }
 0x4c2   : > { %9250 = vmatmul.msk.f32.vlgmr.msrb.gmra.mxu1 %vm2780_vm1, %v3233_v22 }
 0x4c3   : > { %3981 = vmatpush.msrb.mxu1 %v9671_v57 }
 0x4cd   : > { %v3008_v31 = vpop.xlane.xlu2 %3007 }
 0x4ce   : > { %9857 = vrcp.f32 %v3008_v31  ;;  %v3245_v17 = vand.u32 2147483648, %v3008_v31  ;;  %v3243_v28 = vand.u32 2147483647, %v3008_v31  ;;  %vm3239_vm5 = vweird.f32 %v3008_v31 }
 0x4cf   : > { %9859 = vpow2.f32 %v2967_v34 }
 0x4d0   : > { %v3246_v56 = vor.u32 1.1754944e-38, %v3245_v17  ;;  %vm3244_vm7 = vcmp.eq.f32.partialorder %v3243_v28, 8.507059e+37 }
 0x4d4   : > { %v9858_v10 = vpop.eup %9857 }
 0x4d5   : > { %v3235_v59 = vmul.f32 %v9858_v10, %v3008_v31  ;;  %vm3240_vm4 = vweird.f32 %v9858_v10  ;;  %v12100_v39 = vpop.eup %9859 }
 0x4d6   : > { %vm3241_vm6 = vmor %vm3239_vm5, %vm3240_vm4  ;;  %v3060_v25 = vsel %vm2780_vm1, %v12100_v39, 0.0 }
 0x4d7   : > { %v3236_v6 = vsub.f32 1.0, %v3235_v59  ;;  %3055 = vadd.xlane.f32.xlu2 %v3054_v7 }
 0x4d9   : > { %v3237_v58 = vmul.f32 %v9858_v10, %v3236_v6  ;;  %v3011_v36 = vpop.xlane.xlu1 %3010 }
 0x4da   : > { %9861 = vrcp.f32 %v3011_v36  ;;  %v3260_v9 = vand.u32 2147483648, %v3011_v36  ;;  %v3258_v13 = vand.u32 2147483647, %v3011_v36  ;;  %vm3254_vm9 = vweird.f32 %v3011_v36 }
 0x4db   : > { %v3238_v18 = vadd.f32 %v9858_v10, %v3237_v58 }
 0x4dc   : > { %v3261_v44 = vor.u32 1.1754944e-38, %v3260_v9  ;;  %vm3259_vm11 = vcmp.eq.f32.partialorder %v3258_v13, 8.507059e+37 }
 0x4dd   : > { %v3242_v63 = vsel %vm3241_vm6, %v9858_v10, %v3238_v18 }
 0x4de   : > { %v3247_v48 = vsel %vm3244_vm7, %v3246_v56, %v3242_v63 }
 0x4df   : > { %v3248_v30 = vmul.f32 %v14237_v3, %v3247_v48 }
 0x4e0   : > { %v9862_v49 = vpop.eup %9861 }
 0x4e1   : > { %9251 = vmatmul.msk.f32.vlgmr.msra.gmra.mxu2 %vm2780_vm1, %v3248_v30  ;;  %v3014_v14 = vpop.xlane.xlu0 %3013  ;;  %v3250_v42 = vmul.f32 %v9862_v49, %v3011_v36  ;;  %vm3255_vm8 = vweird.f32 %v9862_v49 }
 0x4e2   : > { %4004 = vmatpush.msra.mxu2 %v9681_v5  ;;  %9863 = vrcp.f32 %v3014_v14  ;;  %vm3256_vm10 = vmor %vm3254_vm9, %vm3255_vm8  ;;  %v3273_v22 = vand.u32 2147483647, %v3014_v14  ;;  %v3275_v57 = vand.u32 2147483648, %v3014_v14  ;;  %vm3269_vm13 = vweird.f32 %v3014_v14 }
 0x4e3   : > { %v3251_v53 = vsub.f32 1.0, %v3250_v42  ;;  %v9680_v5 = vunpack.i.l.bf16 %v14238_v11 }
 0x4e4   : > { %vm3274_vm15 = vcmp.eq.f32.partialorder %v3273_v22, 8.507059e+37  ;;  %v3276_v7 = vor.u32 1.1754944e-38, %v3275_v57 }
 0x4e5   : > { %v12106_v52 = vpop.xlane.xlu1 %3025  ;;  %3061 = vadd.xlane.f32.xlu0 %v3060_v25  ;;  %v3252_v4 = vmul.f32 %v9862_v49, %v3251_v53 }
 0x4e6   : > { %9865 = vrcp.f32 %v12106_v52  ;;  %vm3329_vm3 = vweird.f32 %v12106_v52  ;;  %v3333_v36 = vand.u32 2147483647, %v12106_v52  ;;  %v3335_v18 = vand.u32 2147483648, %v12106_v52 }
 0x4e7   : > { %v3253_v24 = vadd.f32 %v9862_v49, %v3252_v4  ;;  %v14240_v4 = vld [vmem:[#allocation87_spill] sm:$0xff] }
 0x4e8   : > { %v9864_v60 = vpop.eup %9863  ;;  %v9676_v11 = vunpack.i.h.bf16 %v14240_v4  ;;  %vm3334_vm5 = vcmp.eq.f32.partialorder %v3333_v36, 8.507059e+37 }
 0x4e9   : > { %v3265_v32 = vmul.f32 %v9864_v60, %v3014_v14  ;;  %v12109_v61 = vpop.xlane.xlu0 %3022  ;;  %v3257_v15 = vsel %vm3256_vm10, %v9862_v49, %v3253_v24  ;;  %vm3270_vm12 = vweird.f32 %v9864_v60 }
 0x4ea   : > { %9867 = vrcp.f32 %v12109_v61  ;;  %v3262_v43 = vsel %vm3259_vm11, %v3261_v44, %v3257_v15  ;;  %vm3271_vm14 = vmor %vm3269_vm13, %vm3270_vm12  ;;  %v3318_v53 = vand.u32 2147483647, %v12109_v61  ;;  %v3320_v13 = vand.u32 2147483648, %v12109_v61 }
 0x4eb   : > { %v3266_v55 = vsub.f32 1.0, %v3265_v32  ;;  %v3263_v45 = vmul.f32 %v11942_v51, %v3262_v43  ;;  %v14239_v51 = vld [vmem:[#allocation86_spill] sm:$0xff]  ;;  %vm3314_vm7 = vweird.f32 %v12109_v61 }
 0x4ec   : > { %v9866_v62 = vpop.eup %9865  ;;  %v12112_v33 = vpop.xlane.xlu2 %3019  ;;  %vm12151_vm8 = vcmp.eq.f32.partialorder %v3318_v53, 8.507059e+37 }
 0x4ed   : > { %v3267_v31 = vmul.f32 %v9864_v60, %v3266_v55  ;;  %v3325_v54 = vmul.f32 %v9866_v62, %v12106_v52  ;;  %v12117_v10 = vpop.xlane.xlu1 %3028  ;;  %9252 = vmatmul.msk.f32.vlgmr.msrb.gmra.mxu3 %vm2780_vm1, %v3263_v45  ;;  %vm3330_vm2 = vweird.f32 %v9866_v62  ;;  %v3303_v55 = vand.u32 2147483647, %v12112_v33 }
 0x4ee   : > { %9869 = vrcp.f32 %v12117_v10  ;;  %4027 = vmatpush.msrb.mxu3 %v9661_v41  ;;  %vm3331_vm4 = vmor %vm3329_vm3, %vm3330_vm2  ;;  %v3305_v43 = vand.u32 2147483648, %v12112_v33  ;;  %vm3299_vm11 = vweird.f32 %v12112_v33  ;;  %v3350_v53 = vand.u32 2147483648, %v12117_v10 }
 0x4ef   : > { %v3268_v59 = vadd.f32 %v9864_v60, %v3267_v31  ;;  %v3326_v34 = vsub.f32 1.0, %v3325_v54  ;;  %9871 = vrcp.f32 %v12112_v33  ;;  %1996 = vrot.lane.b32.xlu2 %v14239_v51, %s10832_s13  ;;  %v3321_v31 = vor.u32 1.1754944e-38, %v3320_v13 }
 0x4f0   : > { %v12124_v20 = vpop.eup %9867  ;;  %vm3304_vm13 = vcmp.eq.f32.partialorder %v3303_v55, 8.507059e+37 }
 0x4f1   : > { %v3272_v6 = vsel %vm3271_vm14, %v9864_v60, %v3268_v59  ;;  %v3327_v17 = vmul.f32 %v9866_v62, %v3326_v34  ;;  %v3310_v58 = vmul.f32 %v12124_v20, %v12109_v61  ;;  %v12131_v56 = vpop.xlane.xlu0 %3016  ;;  %vm3315_vm6 = vweird.f32 %v12124_v20 }
 0x4f2   : > { %v3277_v28 = vsel %vm3274_vm15, %v3276_v7, %v3272_v6  ;;  %9873 = vrcp.f32 %v12131_v56  ;;  %vm12163_vm10 = vmor %vm3314_vm7, %vm3315_vm6  ;;  %v3288_v34 = vand.u32 2147483647, %v12131_v56  ;;  %v3290_v51 = vand.u32 2147483648, %v12131_v56 }
 0x4f3   : > { %v3278_v63 = vmul.f32 %v11964_v40, %v3277_v28  ;;  %v3328_v48 = vadd.f32 %v9866_v62, %v3327_v17  ;;  %v3311_v3 = vsub.f32 1.0, %v3310_v58  ;;  %v3336_v40 = vor.u32 1.1754944e-38, %v3335_v18 }
 0x4f4   : > { %v12135_v30 = vpop.eup %9869  ;;  %vm3284_vm15 = vweird.f32 %v12131_v56 }
 0x4f5   : > { %v9872_v49 = vpop.eup %9871  ;;  %v3332_v14 = vsel %vm3331_vm4, %v9866_v62, %v3328_v48  ;;  %v3312_v42 = vmul.f32 %v12124_v20, %v3311_v3  ;;  %v12140_v25 = vpop.xlane.xlu1 %3049  ;;  %9253 = vmatmul.msk.f32.vlgmr.msra.gmra.mxu0 %vm2780_vm1, %v3278_v63  ;;  %v3340_v9 = vmul.f32 %v12135_v30, %v12117_v10  ;;  %v14245_v63 = vld [vmem:[#allocation89_spill] sm:$0xff]  ;;  %vm3345_vm2 = vweird.f32 %v12135_v30 }
 0x4f6   : > { %v3295_v52 = vmul.f32 %v9872_v49, %v12112_v33  ;;  %4050 = vmatpush.msra.mxu0 %v9680_v5  ;;  %v3337_v60 = vsel %vm3334_vm5, %v3336_v40, %v3332_v14  ;;  %vm3300_vm9 = vweird.f32 %v9872_v49  ;;  %v2908_v48 = vsub.f32 %v14245_v63, %v12074_v16 }
 0x4f7   : > { %v3313_v24 = vadd.f32 %v12124_v20, %v3312_v42  ;;  %v3341_v62 = vsub.f32 1.0, %v3340_v9  ;;  %v3338_v61 = vmul.f32 %v11969_v29, %v3337_v60  ;;  %vm3301_vm12 = vmor %vm3299_vm11, %vm3300_vm9  ;;  %v3306_v29 = vor.u32 1.1754944e-38, %v3305_v43 }
 0x4f8   : > { %v3296_v44 = vsub.f32 1.0, %v3295_v52  ;;  %v9874_v32 = vpop.eup %9873  ;;  %vm3289_vm4 = vcmp.eq.f32.partialorder %v3288_v34, 8.507059e+37  ;;  %v3291_v3 = vor.u32 1.1754944e-38, %v3290_v51  ;;  %v9675_v16 = vunpack.i.l.bf16 %v14240_v4 }
 0x4f9   : > { %9698 = vrot.lane.b32.xlu0 %v11658_v26, %s10832_s13  ;;  %v3280_v57 = vmul.f32 %v9874_v32, %v12131_v56  ;;  %v12160_v45 = vpop.xlane.xlu0 %3034  ;;  %v3317_v26 = vsel %vm12163_vm10, %v12124_v20, %v3313_v24  ;;  %v3342_v33 = vmul.f32 %v12135_v30, %v3341_v62  ;;  %vm3285_vm14 = vweird.f32 %v9874_v32 }
 0x4fa   : > { %v3297_v22 = vmul.f32 %v9872_v49, %v3296_v44  ;;  %9875 = vrcp.f32 %v12160_v45  ;;  %v3322_v58 = vsel %vm12151_vm8, %v3321_v31, %v3317_v26  ;;  %vm3286_vm3 = vmor %vm3284_vm15, %vm3285_vm14  ;;  %vm3344_vm5 = vweird.f32 %v12117_v10 }
 0x4fb   : > { %v3281_v59 = vsub.f32 1.0, %v3280_v57  ;;  %9877 = vrcp.f32 %v12140_v25  ;;  %v3323_v14 = vmul.f32 %v11974_v0, %v3322_v58  ;;  %v3348_v9 = vand.u32 2147483647, %v12117_v10  ;;  %vm12207_vm6 = vmor %vm3344_vm5, %vm3345_vm2 }
 0x4fc   : > { %v3298_v54 = vadd.f32 %v9872_v49, %v3297_v22  ;;  %v2971_v60 = vmul.f32 1.442695, %v2908_v48  ;;  %v3351_v24 = vor.u32 1.1754944e-38, %v3350_v53  ;;  %v3378_v44 = vand.u32 2147483647, %v12160_v45 }
 0x4fd   : > { %v12175_v7 = vpop.xlane.xlu1 %3031  ;;  %9257 = vmatmul.msk.f32.vlgmr.msrb.gmra.mxu0 %vm2780_vm1, %v3338_v61  ;;  %v3282_v17 = vmul.f32 %v9874_v32, %v3281_v59  ;;  %9256 = vmatmul.msk.f32.vlgmr.msra.gmra.mxu3 %vm2780_vm1, %v3323_v14  ;;  %vm3349_vm7 = vcmp.eq.f32.partialorder %v3348_v9, 8.507059e+37  ;;  %v3380_v55 = vand.u32 2147483648, %v12160_v45  ;;  %vm3374_vm9 = vweird.f32 %v12160_v45 }
 0x4fe   : > { %v3302_v6 = vsel %vm3301_vm12, %v9872_v49, %v3298_v54  ;;  %4142 = vmatpush.msrb.mxu0 %v9676_v11  ;;  %9879 = vrcp.f32 %v12175_v7  ;;  %v3343_v49 = vadd.f32 %v12135_v30, %v3342_v33  ;;  %4119 = vmatpush.msra.mxu3 %v9675_v16  ;;  %v3363_v57 = vand.u32 2147483647, %v12175_v7 }
 0x4ff   : > { %v3307_v20 = vsel %vm3304_vm13, %v3306_v29, %v3302_v6  ;;  %v3283_v36 = vadd.f32 %v9874_v32, %v3282_v17  ;;  %v3365_v61 = vand.u32 2147483648, %v12175_v7  ;;  %vm12232_vm11 = vcmp.eq.f32.partialorder %v3378_v44, 8.507059e+37 }
 0x500   : > { %v3308_v28 = vmul.f32 %v11987_v23, %v3307_v20  ;;  %v12184_v18 = vpop.eup %9875  ;;  %v3381_v34 = vor.u32 1.1754944e-38, %v3380_v55  ;;  %vm3359_vm13 = vweird.f32 %v12175_v7  ;;  %vm3364_vm15 = vcmp.eq.f32.partialorder %v3363_v57, 8.507059e+37 }
 0x501   : > { %v12189_v5 = vpop.eup %9877  ;;  %v3287_v23 = vsel %vm3286_vm3, %v9874_v32, %v3283_v36  ;;  %v3370_v56 = vmul.f32 %v12184_v18, %v12160_v45  ;;  %v12196_v42 = vpop.xlane.xlu0 %3037  ;;  %vm3375_vm8 = vweird.f32 %v12184_v18  ;;  %v3366_v20 = vor.u32 1.1754944e-38, %v3365_v61 }
 0x502   : > { %9255 = vmatmul.msk.f32.vlgmr.msrb.gmra.mxu2 %vm2780_vm1, %v3308_v28  ;;  %v3292_v40 = vsel %vm3289_vm4, %v3291_v3, %v3287_v23  ;;  %9881 = vrcp.f32 %v12196_v42  ;;  %v3445_v4 = vmul.f32 %v12189_v5, %v12140_v25  ;;  %vm12228_vm10 = vmor %vm3374_vm9, %vm3375_vm8  ;;  %v3395_v58 = vand.u32 2147483648, %v12196_v42 }
 0x503   : > { %v3293_v52 = vmul.f32 %v11998_v50, %v3292_v40  ;;  %v3371_v11 = vsub.f32 1.0, %v3370_v56  ;;  %v3347_v50 = vsel %vm12207_vm6, %v12135_v30, %v3343_v49  ;;  %9883 = vpow2.f32 %v2971_v60 }
 0x504   : > { %v9880_v13 = vpop.eup %9879  ;;  %v3352_v43 = vsel %vm3349_vm7, %v3351_v24, %v3347_v50  ;;  %v3446_v62 = vsub.f32 1.0, %v3445_v4  ;;  %vm3389_vm3 = vweird.f32 %v12196_v42  ;;  %vm3450_vm4 = vweird.f32 %v12189_v5 }
 0x505   : > { %v3372_v10 = vmul.f32 %v12184_v18, %v3371_v11  ;;  %9254 = vmatmul.msk.f32.vlgmr.msra.gmra.mxu1 %vm2780_vm1, %v3293_v52  ;;  %v3355_v32 = vmul.f32 %v9880_v13, %v12175_v7  ;;  %vm3360_vm12 = vweird.f32 %v9880_v13  ;;  %v3353_v45 = vmul.f32 %v11980_v8, %v3352_v43  ;;  %v12295_v61 = vpop.xlane.xlu1 %3058 }
 0x506   : > { %v3447_v51 = vmul.f32 %v12189_v5, %v3446_v62  ;;  %vm3361_vm14 = vmor %vm3359_vm13, %vm3360_vm12  ;;  %v3393_v8 = vand.u32 2147483647, %v12196_v42  ;;  %v3396_v56 = vor.u32 1.1754944e-38, %v3395_v58  ;;  %vm3449_vm7 = vweird.f32 %v12140_v25 }
 0x507   : > { %v3373_v15 = vadd.f32 %v12184_v18, %v3372_v10  ;;  %v3356_v22 = vsub.f32 1.0, %v3355_v32  ;;  %vm12272_vm8 = vmor %vm3449_vm7, %vm3450_vm4 }
 0x508   : > { %v9882_v30 = vpop.eup %9881  ;;  %v3448_v16 = vadd.f32 %v12189_v5, %v3447_v51  ;;  %vm3394_vm6 = vcmp.eq.f32.partialorder %v3393_v8, 8.507059e+37  ;;  %v12307_v51 = vpop.f32.mrf.mxu0 }
 0x509   : > { %v12226_v41 = vpop.xlane.xlu0 %3046  ;;  %v3357_v54 = vmul.f32 %v9880_v13, %v3356_v22  ;;  %v3385_v59 = vmul.f32 %v9882_v30, %v12196_v42  ;;  %v3377_v29 = vsel %vm12228_vm10, %v12184_v18, %v3373_v15  ;;  %v12244_v17 = vpop.xlane.xlu2 %3040  ;;  %vm3390_vm2 = vweird.f32 %v9882_v30 }
 0x50a   : > { %9885 = vrcp.f32 %v12226_v41  ;;  %v3382_v18 = vsel %vm12232_vm11, %v3381_v34, %v3377_v29  ;;  %v12251_v63 = vpop.eup %9883  ;;  %vm3391_vm5 = vmor %vm3389_vm3, %vm3390_vm2  ;;  %v3455_v42 = vand.u32 2147483648, %v12140_v25  ;;  %v3452_v4 = vsel %vm12272_vm8, %v12189_v5, %v3448_v16 }
 0x50b   : > { %v3358_v33 = vadd.f32 %v9880_v13, %v3357_v54  ;;  %v3386_v6 = vsub.f32 1.0, %v3385_v59  ;;  %9887 = vrcp.f32 %v12244_v17  ;;  %v3383_v48 = vmul.f32 %v12010_v47, %v3382_v18 }
 0x50c   : > { %v3456_v60 = vor.u32 1.1754944e-38, %v3455_v42  ;;  %v3440_v50 = vand.u32 2147483648, %v12226_v41  ;;  %vm3434_vm11 = vweird.f32 %v12226_v41  ;;  %v3438_v5 = vand.u32 2147483647, %v12226_v41  ;;  %v12318_v42 = vpop.f32.mrf.mxu1 }
 0x50d   : > { %9258 = vmatmul.msk.f32.vlgmr.msrb.gmra.mxu1 %vm2780_vm1, %v3353_v45  ;;  %v3362_v28 = vsel %vm3361_vm14, %v9880_v13, %v3358_v33  ;;  %v3387_v36 = vmul.f32 %v9882_v30, %v3386_v6  ;;  %9260 = vmatmul.msk.f32.vlgmr.msrb.gmra.mxu3 %vm2780_vm1, %v3383_v48  ;;  %v3410_v29 = vand.u32 2147483648, %v12244_v17  ;;  %v3408_v33 = vand.u32 2147483647, %v12244_v17 }
 0x50e   : > { %v3367_v7 = vsel %vm3364_vm15, %v3366_v20, %v3362_v28  ;;  %v3441_v55 = vor.u32 1.1754944e-38, %v3440_v50  ;;  %vm3439_vm13 = vcmp.eq.f32.partialorder %v3438_v5, 8.507059e+37  ;;  %vm3404_vm15 = vweird.f32 %v12244_v17 }
 0x50f   : > { %v3368_v3 = vmul.f32 %v12015_v1, %v3367_v7  ;;  %v3388_v49 = vadd.f32 %v9882_v30, %v3387_v36  ;;  %v3453_v1 = vand.u32 2147483647, %v12140_v25  ;;  %v12282_v25 = vpop.f32.mrf.mxu3  ;;  %v3411_v18 = vor.u32 1.1754944e-38, %v3410_v29 }
 0x510   : > { %v9886_v23 = vpop.eup %9885 }
 0x511   : > { %v12259_v14 = vpop.xlane.xlu0 %3052  ;;  %v3392_v53 = vsel %vm3391_vm5, %v9882_v30, %v3388_v49  ;;  %v3430_v47 = vmul.f32 %v9886_v23, %v12226_v41  ;;  %9259 = vmatmul.msk.f32.vlgmr.msra.gmra.mxu2 %vm2780_vm1, %v3368_v3  ;;  %v12268_v11 = vpop.eup %9887  ;;  %vm3435_vm9 = vweird.f32 %v9886_v23  ;;  %vm3454_vm10 = vcmp.eq.f32.partialorder %v3453_v1, 8.507059e+37 }
 0x512   : > { %v3397_v40 = vsel %vm3394_vm6, %v3396_v56, %v3392_v53  ;;  %9889 = vrcp.f32 %v12259_v14  ;;  %v3400_v24 = vmul.f32 %v12268_v11, %v12244_v17  ;;  %v3457_v44 = vsel %vm3454_vm10, %v3456_v60, %v3452_v4  ;;  %vm3436_vm12 = vmor %vm3434_vm11, %vm3435_vm9  ;;  %v9694_v56 = vpop.permute.xlu2 %9693 }
 0x513   : > { %v3398_v9 = vmul.f32 %v12023_v2, %v3397_v40  ;;  %v3431_v52 = vsub.f32 1.0, %v3430_v47  ;;  %v3066_v2 = vsel %vm2780_vm1, %v12251_v63, 0.0  ;;  %v3458_v43 = vmul.f32 %v12002_v27, %v3457_v44  ;;  %v12320_v40 = vpop.f32.mrf.mxu0 }
 0x514   : > { %v3401_v62 = vsub.f32 1.0, %v3400_v24  ;;  %vm3405_vm14 = vweird.f32 %v12268_v11  ;;  %vm3409_vm6 = vcmp.eq.f32.partialorder %v3408_v33, 8.507059e+37  ;;  %v3470_v53 = vand.u32 2147483648, %v12259_v14 }
 0x515   : > { %v3432_v13 = vmul.f32 %v9886_v23, %v3431_v52  ;;  %9261 = vmatmul.msk.f32.vlgmr.msra.gmra.mxu0 %vm2780_vm1, %v3398_v9  ;;  %vm3406_vm3 = vmor %vm3404_vm15, %vm3405_vm14  ;;  %vm3464_vm9 = vweird.f32 %v12259_v14  ;;  %v3468_v52 = vand.u32 2147483647, %v12259_v14  ;;  %v9696_v4 = vunpack.i.h.bf16 %v9694_v56 }
 0x516   : > { %v3402_v41 = vmul.f32 %v12268_v11, %v3401_v62 }
 0x517   : > { %v3433_v10 = vadd.f32 %v9886_v23, %v3432_v13  ;;  %v12301_v27 = vpop.f32.mrf.mxu3  ;;  %v9695_v13 = vunpack.i.l.bf16 %v9694_v56  ;;  %vm3469_vm11 = vcmp.eq.f32.partialorder %v3468_v52, 8.507059e+37 }
 0x518   : > { %3067 = vadd.xlane.f32.xlu2 %v3066_v2  ;;  %v12291_v22 = vpop.eup %9889  ;;  %v3403_v59 = vadd.f32 %v12268_v11, %v3402_v41 }
 0x519   : > { %v3437_v15 = vsel %vm3436_vm12, %v9886_v23, %v3433_v10  ;;  %v3460_v31 = vmul.f32 %v12291_v22, %v12259_v14  ;;  %v12312_v28 = vpop.xlane.xlu1 %3064  ;;  %vm3465_vm8 = vweird.f32 %v12291_v22  ;;  %v3471_v14 = vor.u32 1.1754944e-38, %v3470_v53 }
 0x51a   : > { %v3044_v32 = vpop.xlane.xlu0 %3043  ;;  %v3442_v30 = vsel %vm3439_vm13, %v3441_v55, %v3437_v15  ;;  %v3407_v8 = vsel %vm3406_vm3, %v12268_v11, %v3403_v59  ;;  %vm12326_vm10 = vmor %vm3464_vm9, %vm3465_vm8  ;;  %vm3494_vm13 = vweird.f32 %v12295_v61  ;;  %vm3524_vm8 = vweird.f32 %v12312_v28 }
 0x51b   : > { %9891 = vrcp.f32 %v3044_v32  ;;  %v3443_v57 = vmul.f32 %v12031_v12, %v3442_v30  ;;  %v3461_v12 = vsub.f32 1.0, %v3460_v31  ;;  %v3425_v34 = vand.u32 2147483648, %v3044_v32 }
 0x51c   : > { %v3423_v20 = vand.u32 2147483647, %v3044_v32  ;;  %vm3419_vm4 = vweird.f32 %v3044_v32  ;;  %v3412_v17 = vsel %vm3409_vm6, %v3411_v18, %v3407_v8  ;;  %9893 = vrcp.f32 %v12295_v61 }
 0x51d   : > { %9265 = vmatmul.msk.f32.vlgmr.msrb.gmra.mxu0 %vm2780_vm1, %v3458_v43  ;;  %9264 = vmatmul.msk.f32.vlgmr.msra.gmra.mxu3 %vm2780_vm1, %v3443_v57  ;;  %v3462_v58 = vmul.f32 %v12291_v22, %v3461_v12  ;;  %v3426_v7 = vor.u32 1.1754944e-38, %v3425_v34  ;;  %v3413_v9 = vmul.f32 %v12035_v19, %v3412_v17  ;;  %v3500_v43 = vand.u32 2147483648, %v12295_v61 }
 0x51e   : > { %vm3424_vm7 = vcmp.eq.f32.partialorder %v3423_v20, 8.507059e+37  ;;  %v3528_v53 = vand.u32 2147483647, %v12312_v28 }
 0x51f   : > { %v3463_v23 = vadd.f32 %v12291_v22, %v3462_v58  ;;  %v3501_v30 = vor.u32 1.1754944e-38, %v3500_v43 }
 0x521   : > { %v9892_v26 = vpop.eup %9891  ;;  %v3467_v2 = vsel %vm12326_vm10, %v12291_v22, %v3463_v23  ;;  %v3530_v23 = vand.u32 2147483648, %v12312_v28 }
 0x522   : > { %v3415_v54 = vmul.f32 %v9892_v26, %v3044_v32  ;;  %vm3420_vm2 = vweird.f32 %v9892_v26  ;;  %v12337_v50 = vpop.f32.mrf.mxu1  ;;  %v9894_v5 = vpop.eup %9893 }
 0x523   : > { %vm3421_vm5 = vmor %vm3419_vm4, %vm3420_vm2  ;;  %v3490_v24 = vmul.f32 %v9894_v5, %v12295_v61  ;;  %vm3495_vm12 = vweird.f32 %v9894_v5 }
 0x524   : > { %v3416_v45 = vsub.f32 1.0, %v3415_v54  ;;  %vm3496_vm14 = vmor %vm3494_vm13, %vm3495_vm12  ;;  %vm3529_vm13 = vcmp.eq.f32.partialorder %v3528_v53, 8.507059e+37 }
 0x525   : > { %v3491_v32 = vsub.f32 1.0, %v3490_v24 }
 0x526   : > { %v3417_v6 = vmul.f32 %v9892_v26, %v3416_v45 }
 0x527   : > { %v3492_v15 = vmul.f32 %v9894_v5, %v3491_v32 }
 0x528   : > { %v3418_v36 = vadd.f32 %v9892_v26, %v3417_v6 }
 0x529   : > { %v3493_v55 = vadd.f32 %v9894_v5, %v3492_v15 }
 0x52a   : > { %v3753_v48 = vpop.f32.mrf.mxu3  ;;  %v3422_v3 = vsel %vm3421_vm5, %v9892_v26, %v3418_v36 }
 0x52b   : > { %4293 = vrot.lane.b32.xlu1 %v3753_v48, %s10832_s13  ;;  %v3427_v49 = vsel %vm3424_vm7, %v3426_v7, %v3422_v3  ;;  %v3497_v22 = vsel %vm3496_vm14, %v9894_v5, %v3493_v55 }
 0x52c   : > { %v3428_v11 = vmul.f32 %v12063_v46, %v3427_v49  ;;  %v3472_v46 = vsel %vm3469_vm11, %v3471_v14, %v3467_v2 }
 0x52d   : > { %v9689_v16 = vpop.permute.xlu0 %9688  ;;  %v3473_v60 = vmul.f32 %v12040_v35, %v3472_v46  ;;  %v3498_v35 = vand.u32 2147483647, %v12295_v61 }
 0x52e   : > { %v9691_v47 = vunpack.i.h.bf16 %v9689_v16  ;;  %v9690_v1 = vunpack.i.l.bf16 %v9689_v16 }
 0x52f   : > { %vm3499_vm15 = vcmp.eq.f32.partialorder %v3498_v35, 8.507059e+37 }
 0x530   : > { %4073 = vmatpush.msra.mxu1 %v9690_v1  ;;  %4096 = vmatpush.msrb.mxu2 %v9691_v47  ;;  %v3502_v57 = vsel %vm3499_vm15, %v3501_v30, %v3497_v22 }
 0x531   : > { %9262 = vmatmul.msk.f32.vlgmr.msra.gmra.mxu1 %vm2780_vm1, %v3413_v9  ;;  %9263 = vmatmul.msk.f32.vlgmr.msrb.gmra.mxu2 %vm2780_vm1, %v3428_v11  ;;  %v1999_v19 = vpop.permute.xlu1 %1998  ;;  %v3503_v31 = vmul.f32 %v12025_v37, %v3502_v57  ;;  %v3531_v9 = vor.u32 1.1754944e-38, %v3530_v23  ;;  %v14256_v23 = vld [vmem:[#allocation78_spill] sm:$0xff] }
 0x532   : > { %4165 = vmatpush.msrb.mxu1 %v9695_v13  ;;  %4188 = vmatpush.msra.mxu2 %v9696_v4 }
 0x533   : > { %4234 = vmatpush.msra.mxu0 %v1999_v19 }
 0x537   : > { %v3776_v10 = vpop.f32.mrf.mxu0 }
 0x538   : > { %4295 = vrot.lane.b32.xlu0 %v3776_v10, %s10832_s13 }
 0x539   : > { %9266 = vmatmul.msk.f32.vlgmr.msrb.gmra.mxu1 %vm2780_vm1, %v3473_v60 }
 0x53f   : > { %v3799_v44 = vpop.f32.mrf.mxu1 }
 0x540   : > { %4297 = vrot.lane.b32.xlu1 %v3799_v44, %s10832_s13 }
 0x54a   : > { %v3056_v62 = vpop.xlane.xlu2 %3055 }
 0x54b   : > { %9895 = vrcp.f32 %v3056_v62  ;;  %v3485_v61 = vand.u32 2147483648, %v3056_v62  ;;  %v3483_v29 = vand.u32 2147483647, %v3056_v62  ;;  %vm3479_vm3 = vweird.f32 %v3056_v62 }
 0x54c   : > { %9897 = vrcp.f32 %v12312_v28 }
 0x54d   : > { %v3486_v20 = vor.u32 1.1754944e-38, %v3485_v61  ;;  %vm3484_vm5 = vcmp.eq.f32.partialorder %v3483_v29, 8.507059e+37 }
 0x551   : > { %v9896_v41 = vpop.eup %9895 }
 0x552   : > { %v3475_v26 = vmul.f32 %v9896_v41, %v3056_v62  ;;  %v1997_v54 = vpop.permute.xlu2 %1996  ;;  %v9898_v59 = vpop.eup %9897  ;;  %vm3480_vm2 = vweird.f32 %v9896_v41 }
 0x553   : > { %4211 = vmatpush.msrb.mxu3 %v1997_v54  ;;  %v3520_v34 = vmul.f32 %v9898_v59, %v12312_v28  ;;  %vm3481_vm4 = vmor %vm3479_vm3, %vm3480_vm2  ;;  %vm3525_vm6 = vweird.f32 %v9898_v59 }
 0x554   : > { %v3476_v12 = vsub.f32 1.0, %v3475_v26  ;;  %9268 = vmatmul.msk.f32.vlgmr.msrb.gmra.mxu3 %vm2780_vm1, %v3503_v31  ;;  %vm3526_vm9 = vmor %vm3524_vm8, %vm3525_vm6 }
 0x555   : > { %v3521_v8 = vsub.f32 1.0, %v3520_v34 }
 0x556   : > { %v3477_v45 = vmul.f32 %v9896_v41, %v3476_v12 }
 0x557   : > { %v3522_v7 = vmul.f32 %v9898_v59, %v3521_v8 }
 0x558   : > { %v3478_v33 = vadd.f32 %v9896_v41, %v3477_v45  ;;  %v3062_v6 = vpop.xlane.xlu0 %3061 }
 0x559   : > { %9899 = vrcp.f32 %v3062_v6  ;;  %v3523_v17 = vadd.f32 %v9898_v59, %v3522_v7  ;;  %v3515_v49 = vand.u32 2147483648, %v3062_v6  ;;  %v3513_v16 = vand.u32 2147483647, %v3062_v6 }
 0x55a   : > { %v3482_v37 = vsel %vm3481_vm4, %v9896_v41, %v3478_v33  ;;  %vm3509_vm10 = vweird.f32 %v3062_v6  ;;  %vm4398_vm4 = vcmask 785408  }
 0x55b   : > { %v3487_v58 = vsel %vm3484_vm5, %v3486_v20, %v3482_v37  ;;  %v3527_v47 = vsel %vm3526_vm9, %v9898_v59, %v3523_v17  ;;  %v3516_v1 = vor.u32 1.1754944e-38, %v3515_v49  ;;  %vm3514_vm12 = vcmp.eq.f32.partialorder %v3513_v16, 8.507059e+37 }
 0x55c   : > { %v3488_v36 = vmul.f32 %v12095_v38, %v3487_v58  ;;  %v3532_v0 = vsel %vm3529_vm13, %v3531_v9, %v3527_v47  ;;  %vm4389_vm5 = vcmask 523264  }
 0x55d   : > { %v3533_v28 = vmul.f32 %v12066_v21, %v3532_v0  ;;  %v12362_v21 = vpop.f32.mrf.mxu2 }
 0x55e   : > { %9267 = vmatmul.msk.f32.vlgmr.msra.gmra.mxu2 %vm2780_vm1, %v3488_v36 }
 0x55f   : > { %v9900_v18 = vpop.eup %9899 }
 0x560   : > { %v3505_v48 = vmul.f32 %v9900_v18, %v3062_v6  ;;  %vm3510_vm7 = vweird.f32 %v9900_v18 }
 0x561   : > { %vm3511_vm11 = vmor %vm3509_vm10, %vm3510_vm7 }
 0x562   : > { %v3506_v3 = vsub.f32 1.0, %v3505_v48 }
 0x564   : > { %v3507_v56 = vmul.f32 %v9900_v18, %v3506_v3 }
 0x565   : > { %v12364_v57 = vpop.f32.mrf.mxu2 }
 0x566   : > { %v3508_v38 = vadd.f32 %v9900_v18, %v3507_v56 }
 0x568   : > { %v3512_v52 = vsel %vm3511_vm11, %v9900_v18, %v3508_v38 }
 0x569   : > { %v3517_v11 = vsel %vm3514_vm12, %v3516_v1, %v3512_v52 }
 0x56a   : > { %v3518_v4 = vmul.f32 %v12100_v39, %v3517_v11 }
 0x56b   : > { %v9699_v13 = vpop.permute.xlu0 %9698 }
 0x56c   : > { %v9701_v2 = vunpack.i.h.bf16 %v9699_v13  ;;  %v9700_v19 = vunpack.i.l.bf16 %v9699_v13  ;;  %9269 = vmatmul.msk.f32.vlgmr.msra.gmra.mxu0 %vm2780_vm1, %v3518_v4  ;;  %v14257_v13 = vld [vmem:[#allocation79_spill] sm:$0xff] }
 0x56d   : > { %v3822_v12 = vpop.f32.mrf.mxu2 }
 0x56e   : > { %4257 = vmatpush.msra.mxu1 %v9700_v19  ;;  %4280 = vmatpush.msrb.mxu2 %v9701_v2  ;;  %v14258_v19 = vld [vmem:[#allocation80_spill] sm:$0xff] }
 0x56f   : > { %9270 = vmatmul.msk.f32.vlgmr.msra.gmra.mxu1 %vm2780_vm1, %v3533_v28 }
 0x570   : > { %v3845_v60 = vpop.f32.mrf.mxu3 }
 0x572   : > { %v3868_v14 = vpop.f32.mrf.mxu0 }
 0x57a   : > { %v3960_v46 = vpop.f32.mrf.mxu0 }
 0x57b   : > { %4327 = vrot.lane.b32.xlu1 %v3960_v46, %s10833_s12 }
 0x580   : > { %v3937_v5 = vpop.f32.mrf.mxu3 }
 0x582   : > { %v3891_v10 = vpop.f32.mrf.mxu1 }
 0x583   : > { %4325 = vrot.lane.b32.xlu1 %v3937_v5, %s10833_s12 }
 0x585   : > { %v3914_v45 = vpop.f32.mrf.mxu2 }
 0x58a   : > { %v3983_v39 = vpop.f32.mrf.mxu1 }
 0x58b   : > { %v3068_v24 = vpop.xlane.xlu2 %3067  ;;  %4329 = vrot.lane.b32.xlu0 %v3983_v39, %s10833_s12 }
 0x58c   : > { %9901 = vrcp.f32 %v3068_v24  ;;  %v3545_v43 = vand.u32 2147483648, %v3068_v24  ;;  %v3543_v62 = vand.u32 2147483647, %v3068_v24  ;;  %vm3539_vm15 = vweird.f32 %v3068_v24 }
 0x58e   : > { %v3546_v30 = vor.u32 1.1754944e-38, %v3545_v43  ;;  %vm3544_vm3 = vcmp.eq.f32.partialorder %v3543_v62, 8.507059e+37 }
 0x590   : > { %v4029_v26 = vpop.f32.mrf.mxu3 }
 0x592   : > { %v9902_v44 = vpop.eup %9901  ;;  %v4052_v15 = vpop.f32.mrf.mxu0 }
 0x593   : > { %v3535_v32 = vmul.f32 %v9902_v44, %v3068_v24  ;;  %vm3540_vm14 = vweird.f32 %v9902_v44 }
 0x594   : > { %vm3541_vm2 = vmor %vm3539_vm15, %vm3540_vm14  ;;  %v4006_v34 = vpop.f32.mrf.mxu2 }
 0x595   : > { %v3536_v55 = vsub.f32 1.0, %v3535_v32 }
 0x597   : > { %v3537_v35 = vmul.f32 %v9902_v44, %v3536_v55 }
 0x599   : > { %v3538_v22 = vadd.f32 %v9902_v44, %v3537_v35  ;;  %v14259_v35 = vld [vmem:[#allocation82_spill] sm:$0xff] }
 0x59a   : > { %v4144_v54 = vpop.f32.mrf.mxu0 }
 0x59b   : > { %v3542_v41 = vsel %vm3541_vm2, %v9902_v44, %v3538_v22  ;;  %4359 = vrot.lane.b32.xlu0 %v4144_v54, %s10834_s3 }
 0x59c   : > { %v3547_v31 = vsel %vm3544_vm3, %v3546_v30, %v3542_v41 }
 0x59d   : > { %v3548_v59 = vmul.f32 %v12251_v63, %v3547_v31  ;;  %v4294_v33 = vpop.permute.xlu1 %4293 }
 0x59e   : > { %v4381_v48 = vsel %vm1465_vm0, %v12282_v25, %v4294_v33 }
 0x59f   : > { %9271 = vmatmul.msk.f32.vlgmr.msrb.gmra.mxu2 %vm2780_vm1, %v3548_v59 }
 0x5a0   : > { %v4121_v61 = vpop.f32.mrf.mxu3 }
 0x5a1   : > { %4357 = vrot.lane.b32.xlu2 %v4121_v61, %s10834_s3 }
 0x5a3   : > { %4333 = vrot.lane.b32.xlu0 %v4029_v26, %s10833_s12 }
 0x5a9   : > { %4299 = vrot.lane.b32.xlu2 %v3822_v12, %s10832_s13 }
 0x5aa   : > { %v4296_v16 = vpop.permute.xlu0 %4295 }
 0x5ab   : > { %4335 = vrot.lane.b32.xlu0 %v4052_v15, %s10833_s12  ;;  %v4382_v25 = vsel %vm1465_vm0, %v12307_v51, %v4296_v16 }
 0x5ae   : > { %v4075_v29 = vpop.f32.mrf.mxu1 }
 0x5b1   : > { %4301 = vrot.lane.b32.xlu2 %v3845_v60, %s10832_s13  ;;  %v10835_v60 = vmov 128.0  }
 0x5b2   : > { %v4298_v20 = vpop.permute.xlu1 %4297  ;;  %9903 = vrcp.f32 %v10835_v60  ;;  %v4631_v60 = vld [vmem:[#allocation17 + $0xc8] sm:$0xff] }
 0x5b3   : > { %4331 = vrot.lane.b32.xlu0 %v4006_v34, %s10833_s12  ;;  %v4383_v52 = vsel %vm1465_vm0, %v12318_v42, %v4298_v20  ;;  %v14261_v34 = vld [vmem:[#allocation81_spill] sm:$0xff] }
 0x5b4   : > { %v4098_v8 = vpop.f32.mrf.mxu2 }
 0x5b6   : > { %v4167_v63 = vpop.f32.mrf.mxu1 }
 0x5b7   : > { %4361 = vrot.lane.b32.xlu1 %v4167_v63, %s10834_s3 }
 0x5b8   : > { %v9904_v5 = vpop.eup %9903 }
 0x5b9   : > { %4303 = vrot.lane.b32.xlu2 %v3868_v14, %s10832_s13  ;;  %v4434_v15 = vmul.f32 128.0, %v9904_v5  ;;  %vm4438_vm6 = vweird.f32 %v9904_v5 }
 0x5bb   : > { %4305 = vrot.lane.b32.xlu0 %v3891_v10, %s10832_s13  ;;  %v4435_v22 = vsub.f32 1.0, %v4434_v15 }
 0x5bd   : > { %v4436_v59 = vmul.f32 %v9904_v5, %v4435_v22  ;;  %v4620_v22 = vld [vmem:[#allocation17 + $0x70] sm:$0xff] }
 0x5d7   : > { %v4213_v58 = vpop.f32.mrf.mxu3 }
 0x5e1   : > { %v4190_v18 = vpop.f32.mrf.mxu2 }
 0x5e9   : > { %v4236_v6 = vpop.f32.mrf.mxu0 }
 0x5ea   : > { %4367 = vrot.lane.b32.xlu1 %v4236_v6, %s10834_s3 }
 0x5ec   : > { %v4259_v37 = vpop.f32.mrf.mxu1 }
 0x5ed   : > { %4369 = vrot.lane.b32.xlu0 %v4259_v37, %s10834_s3  ;;  %v4328_v36 = vpop.permute.xlu1 %4327 }
 0x5ee   : > { %v4391_v1 = vsel %vm4389_vm5, %v4382_v25, %v4328_v36 }
 0x5f2   : > { %4365 = vrot.lane.b32.xlu1 %v4213_v58, %s10834_s3 }
 0x5f5   : > { %4307 = vrot.lane.b32.xlu0 %v3914_v45, %s10832_s13  ;;  %v4326_v7 = vpop.permute.xlu1 %4325  ;;  %v14260_v45 = vld [vmem:[#allocation83_spill] sm:$0xff] }
 0x5f6   : > { %v4390_v3 = vsel %vm4389_vm5, %v4381_v48, %v4326_v7 }
 0x5fa   : > { %4363 = vrot.lane.b32.xlu1 %v4190_v18, %s10834_s3  ;;  %v14263_v18 = vld [vmem:[#allocation84_spill] sm:$0xff] }
 0x5fb   : > { %v4358_v17 = vpop.permute.xlu2 %4357 }
 0x5fc   : > { %v4399_v49 = vsel %vm4398_vm4, %v4390_v3, %v4358_v17 }
 0x5fd   : > { %4339 = vrot.lane.b32.xlu0 %v4098_v8, %s10833_s12  ;;  %v4407_v56 = vadd.f32 %v4399_v49, %v14256_v23  ;;  %v4330_v53 = vpop.permute.xlu0 %4329 }
 0x5fe   : > { %v4392_v11 = vsel %vm4389_vm5, %v4383_v52, %v4330_v53 }
 0x5ff   : > { %4417 = vadd.xlane.f32.xlu2 %v4407_v56 }
 0x602   : > { %4337 = vrot.lane.b32.xlu1 %v4075_v29, %s10833_s12 }
 0x603   : > { %v4300_v14 = vpop.permute.xlu2 %4299 }
 0x60b   : > { %v4302_v10 = vpop.permute.xlu2 %4301 }
 0x60c   : > { %v4385_v39 = vsel %vm1465_vm0, %v12301_v27, %v4302_v10  ;;  %v4384_v27 = vsel %vm1465_vm0, %v12362_v21, %v4300_v14  ;;  %v4633_v14 = vld [vmem:[#allocation17 + $0xd8] sm:$0xff] }
 0x60d   : > { %v4360_v47 = vpop.permute.xlu0 %4359  ;;  %v4629_v10 = vld [vmem:[#allocation17 + $0xb8] sm:$0xff] }
 0x60e   : > { %v4400_v9 = vsel %vm4398_vm4, %v4391_v1, %v4360_v47 }
 0x60f   : > { %v4408_v2 = vadd.f32 %v4400_v9, %v14257_v13  ;;  %v4637_v13 = vld [vmem:[#allocation17 + $0xf8] sm:$0xff] }
 0x610   : > { %4685 = vmatpush.msrb.mxu0 %v4637_v13  ;;  %v12492_v13 = vld [vmem:[%s14266_s9] ss:$0 sm:$0xff]  ;;  %s14319_s9 = sld [smem:[#allocation71_spill]] }
 0x613   : > { %v4304_v43 = vpop.permute.xlu2 %4303 }
 0x614   : > { %v4386_v30 = vsel %vm1465_vm0, %v12320_v40, %v4304_v43  ;;  %v4437_v40 = vadd.f32 %v9904_v5, %v4436_v59  ;;  %v4623_v43 = vld [vmem:[#allocation17 + $0x88] sm:$0xff]  ;;  %v4616_v59 = vld [vmem:[#allocation17 + $0x50] sm:$0xff] }
 0x615   : > { %v4334_v51 = vpop.permute.xlu0 %4333 }
 0x616   : > { %v4394_v44 = vsel %vm4389_vm5, %v4385_v39, %v4334_v51  ;;  %v12430_v33 = vsel %vm4438_vm6, %v9904_v5, %v4437_v40  ;;  %v4632_v51 = vld [vmem:[#allocation17 + $0xd0] sm:$0xff]  ;;  %v4626_v5 = vld [vmem:[#allocation17 + $0xa0] sm:$0xff]  ;;  %v4627_v39 = vld [vmem:[#allocation17 + $0xa8] sm:$0xff] }
 0x617   : > { %14262 = vst [vmem:[#allocation90_spill] sm:$0xff] %v12430_v33  ;;  %v4615_v40 = vld [vmem:[#allocation17 + $0x48] sm:$0xff] }
 0x61d   : > { %v4336_v46 = vpop.permute.xlu0 %4335 }
 0x61e   : > { %v4395_v41 = vsel %vm4389_vm5, %v4386_v30, %v4336_v46  ;;  %v4630_v46 = vld [vmem:[#allocation17 + $0xc0] sm:$0xff]  ;;  %v4621_v30 = vld [vmem:[#allocation17 + $0x78] sm:$0xff] }
 0x622   : > { %v4282_v38 = vpop.f32.mrf.mxu2 }
 0x623   : > { %4371 = vrot.lane.b32.xlu0 %v4282_v38, %s10834_s3  ;;  %v14264_v38 = vld [vmem:[#allocation85_spill] sm:$0xff] }
 0x625   : > { %v4332_v24 = vpop.permute.xlu0 %4331 }
 0x626   : > { %v4393_v26 = vsel %vm4389_vm5, %v4384_v27, %v4332_v24 }
 0x629   : > { %v4362_v0 = vpop.permute.xlu1 %4361 }
 0x62a   : > { %v4401_v4 = vsel %vm4398_vm4, %v4392_v11, %v4362_v0 }
 0x62b   : > { %v12401_v28 = vadd.f32 %v4401_v4, %v14258_v19  ;;  %v4636_v4 = vld [vmem:[#allocation17 + $0xf0] sm:$0xff]  ;;  %v4634_v19 = vld [vmem:[#allocation17 + $0xe0] sm:$0xff] }
 0x62c   : > { %4419 = vadd.xlane.f32.xlu1 %v4408_v2  ;;  %4644 = vmatpush.msra.mxu3 %v4636_v4 }
 0x62d   : > { %4421 = vadd.xlane.f32.xlu2 %v12401_v28  ;;  %v4306_v12 = vpop.permute.xlu0 %4305 }
 0x62e   : > { %v4387_v21 = vsel %vm1465_vm0, %v12337_v50, %v4306_v12  ;;  %4645 = vmatpush.msra.mxu3 %v4634_v19  ;;  %v4617_v12 = vld [vmem:[#allocation17 + $0x58] sm:$0xff] }
 0x630   : > { %4646 = vmatpush.msra.mxu3 %v4632_v51 }
 0x632   : > { %4647 = vmatpush.msra.mxu3 %v4630_v46 }
 0x65c   : > { %v4368_v42 = vpop.permute.xlu1 %4367 }
 0x65d   : > { %v4404_v31 = vsel %vm4398_vm4, %v4395_v41, %v4368_v42 }
 0x65e   : > { %v12421_v29 = vadd.f32 %v4404_v31, %v14260_v45  ;;  %v4618_v31 = vld [vmem:[#allocation17 + $0x60] sm:$0xff] }
 0x65f   : > { %v4370_v20 = vpop.permute.xlu0 %4369 }
 0x664   : > { %v4366_v32 = vpop.permute.xlu1 %4365 }
 0x665   : > { %v4403_v55 = vsel %vm4398_vm4, %v4394_v44, %v4366_v32  ;;  %v4624_v44 = vld [vmem:[#allocation17 + $0x90] sm:$0xff]  ;;  %v4625_v32 = vld [vmem:[#allocation17 + $0x98] sm:$0xff] }
 0x666   : > { %v12409_v62 = vadd.f32 %v4403_v55, %v14259_v35  ;;  %v4622_v55 = vld [vmem:[#allocation17 + $0x80] sm:$0xff] }
 0x667   : > { %v4308_v3 = vpop.permute.xlu0 %4307 }
 0x668   : > { %4425 = vadd.xlane.f32.xlu2 %v12409_v62  ;;  %v4388_v49 = vsel %vm1465_vm0, %v12364_v57, %v4308_v3  ;;  %v4607_v3 = vld [vmem:[#allocation17 + $0x8] sm:$0xff] }
 0x66c   : > { %v4364_v54 = vpop.permute.xlu1 %4363 }
 0x66d   : > { %v4402_v61 = vsel %vm4398_vm4, %v4393_v26, %v4364_v54  ;;  %v4619_v26 = vld [vmem:[#allocation17 + $0x68] sm:$0xff] }
 0x66e   : > { %v12424_v63 = vadd.f32 %v4402_v61, %v14261_v34  ;;  %v4614_v34 = vld [vmem:[#allocation17 + $0x40] sm:$0xff] }
 0x66f   : > { %v4340_v17 = vpop.permute.xlu0 %4339 }
 0x670   : > { %4427 = vadd.xlane.f32.xlu2 %v12421_v29  ;;  %4423 = vadd.xlane.f32.xlu0 %v12424_v63  ;;  %v4397_v23 = vsel %vm4389_vm5, %v4388_v49, %v4340_v17 }
 0x672   : > { %v4418_v8 = vpop.xlane.xlu2 %4417 }
 0x673   : > { %v4440_v36 = vmul.f32 %v12430_v33, %v4418_v8  ;;  %v4611_v8 = vld [vmem:[#allocation17 + $0x28] sm:$0xff] }
 0x674   : > { %v4338_v6 = vpop.permute.xlu1 %4337 }
 0x675   : > { %v4396_v37 = vsel %vm4389_vm5, %v4387_v21, %v4338_v6  ;;  %v12438_v48 = vsub.f32 %v4407_v56, %v4440_v36  ;;  %v4609_v36 = vld [vmem:[#allocation17 + $0x18] sm:$0xff] }
 0x676   : > { %v4405_v58 = vsel %vm4398_vm4, %v4396_v37, %v4370_v20  ;;  %v4612_v20 = vld [vmem:[#allocation17 + $0x30] sm:$0xff]  ;;  %v4613_v37 = vld [vmem:[#allocation17 + $0x38] sm:$0xff] }
 0x677   : > { %v12436_v7 = vadd.f32 %v4405_v58, %v14263_v18  ;;  %v4456_v50 = vmul.f32 %v12438_v48, %v12438_v48  ;;  %v4608_v58 = vld [vmem:[#allocation17 + $0x10] sm:$0xff] }
 0x679   : > { %4429 = vadd.xlane.f32.xlu2 %v12436_v7  ;;  %4464 = vadd.xlane.f32.xlu1 %v4456_v50  ;;  %v4606_v50 = vld [vmem:[#allocation17] sm:$0xff] }
 0x695   : > { %v4372_v16 = vpop.permute.xlu0 %4371 }
 0x696   : > { %v4406_v53 = vsel %vm4398_vm4, %v4397_v23, %v4372_v16 }
 0x697   : > { %v12448_v47 = vadd.f32 %v4406_v53, %v14264_v38 }
 0x699   : > { %4431 = vadd.xlane.f32.xlu2 %v12448_v47 }
 0x69f   : > { %v4420_v56 = vpop.xlane.xlu1 %4419 }
 0x6a0   : > { %v4441_v25 = vmul.f32 %v12430_v33, %v4420_v56  ;;  %v4422_v1 = vpop.xlane.xlu2 %4421 }
 0x6a1   : > { %v4442_v52 = vmul.f32 %v12430_v33, %v4422_v1 }
 0x6a2   : > { %v12452_v9 = vsub.f32 %v4408_v2, %v4441_v25  ;;  %v4635_v2 = vld [vmem:[#allocation17 + $0xe8] sm:$0xff] }
 0x6a3   : > { %v12458_v11 = vsub.f32 %v12401_v28, %v4442_v52  ;;  %4686 = vmatpush.msrb.mxu0 %v4635_v2  ;;  %v4628_v28 = vld [vmem:[#allocation17 + $0xb0] sm:$0xff] }
 0x6a4   : > { %v4457_v57 = vmul.f32 %v12452_v9, %v12452_v9  ;;  %4648 = vmatpush.msra.mxu3 %v4628_v28 }
 0x6a5   : > { %v4458_v0 = vmul.f32 %v12458_v11, %v12458_v11  ;;  %4687 = vmatpush.msrb.mxu0 %v4633_v14 }
 0x6a6   : > { %4466 = vadd.xlane.f32.xlu1 %v4457_v57  ;;  %4649 = vmatpush.msra.mxu3 %v4626_v5  ;;  %v12488_v57 = vld [vmem:[%s14265_s2] ss:$0 sm:$0xff]  ;;  %s14312_s2 = sld [smem:[#allocation70_spill]] }
 0x6a7   : > { %4688 = vmatpush.msrb.mxu0 %v4631_v60 }
 0x6a8   : > { %4650 = vmatpush.msra.mxu3 %v4624_v44 }
 0x6a9   : > { %4689 = vmatpush.msrb.mxu0 %v4629_v10 }
 0x6aa   : > { %4651 = vmatpush.msra.mxu3 %v4622_v55 }
 0x6ab   : > { %4690 = vmatpush.msrb.mxu0 %v4627_v39 }
 0x6ac   : > { %4652 = vmatpush.msra.mxu3 %v4620_v22 }
 0x6ad   : > { %4691 = vmatpush.msrb.mxu0 %v4625_v32 }
 0x6ae   : > { %4468 = vadd.xlane.f32.xlu1 %v4458_v0  ;;  %4653 = vmatpush.msra.mxu3 %v4618_v31 }
 0x6af   : > { %4692 = vmatpush.msrb.mxu0 %v4623_v43 }
 0x6b0   : > { %4654 = vmatpush.msra.mxu3 %v4616_v59 }
 0x6b1   : > { %4693 = vmatpush.msrb.mxu0 %v4621_v30 }
 0x6b2   : > { %4655 = vmatpush.msra.mxu3 %v4614_v34 }
 0x6b3   : > { %4694 = vmatpush.msrb.mxu0 %v4619_v26 }
 0x6b4   : > { %4656 = vmatpush.msra.mxu3 %v4612_v20  ;;  %v4772_v20 = vld [vmem:[#allocation19 + $0xf0] sm:$0xff] }
 0x6b5   : > { %4695 = vmatpush.msrb.mxu0 %v4617_v12 }
 0x6b7   : > { %4696 = vmatpush.msrb.mxu0 %v4615_v40 }
 0x6b9   : > { %4697 = vmatpush.msrb.mxu0 %v4613_v37 }
 0x6bb   : > { %4698 = vmatpush.msrb.mxu0 %v4611_v8 }
 0x6bd   : > { %4699 = vmatpush.msrb.mxu0 %v4609_v36  ;;  %v4769_v36 = vld [vmem:[#allocation19 + $0xd8] sm:$0xff] }
 0x6bf   : > { %4700 = vmatpush.msrb.mxu0 %v4607_v3 }
 0x6db   : > { %v4426_v42 = vpop.xlane.xlu2 %4425 }
 0x6dc   : > { %v4444_v24 = vmul.f32 %v12430_v33, %v4426_v42 }
 0x6de   : > { %v12464_v15 = vsub.f32 %v12409_v62, %v4444_v24 }
 0x6e0   : > { %v4460_v35 = vmul.f32 %v12464_v15, %v12464_v15 }
 0x6e2   : > { %4472 = vadd.xlane.f32.xlu1 %v4460_v35 }
 0x6e3   : > { %v4428_v41 = vpop.xlane.xlu2 %4427  ;;  %v4424_v27 = vpop.xlane.xlu0 %4423 }
 0x6e4   : > { %v4445_v62 = vmul.f32 %v12430_v33, %v4428_v41  ;;  %v4443_v54 = vmul.f32 %v12430_v33, %v4424_v27 }
 0x6e6   : > { %v12471_v61 = vsub.f32 %v12421_v29, %v4445_v62  ;;  %v12474_v45 = vsub.f32 %v12424_v63, %v4443_v54  ;;  %v4610_v29 = vld [vmem:[#allocation17 + $0x20] sm:$0xff] }
 0x6e7   : > { %4657 = vmatpush.msra.mxu3 %v4610_v29  ;;  %v4771_v29 = vld [vmem:[#allocation19 + $0xe8] sm:$0xff] }
 0x6e8   : > { %v4461_v21 = vmul.f32 %v12471_v61, %v12471_v61  ;;  %v4459_v6 = vmul.f32 %v12474_v45, %v12474_v45 }
 0x6e9   : > { %4658 = vmatpush.msra.mxu3 %v4608_v58  ;;  %v4756_v58 = vld [vmem:[#allocation19 + $0x70] sm:$0xff] }
 0x6ea   : > { %4474 = vadd.xlane.f32.xlu0 %v4461_v21  ;;  %4470 = vadd.xlane.f32.xlu2 %v4459_v6  ;;  %v4773_v21 = vld [vmem:[#allocation19 + $0xf8] sm:$0xff] }
 0x6eb   : > { %4659 = vmatpush.msra.mxu3 %v4606_v50  ;;  %4819 = vmatpush.msra.mxu2 %v4773_v21  ;;  %v4768_v50 = vld [vmem:[#allocation19 + $0xd0] sm:$0xff] }
 0x6ec   : > { %v4430_v63 = vpop.xlane.xlu2 %4429  ;;  %v4465_v49 = vpop.xlane.xlu1 %4464 }
 0x6ed   : > { %v4446_v18 = vmul.f32 %v12430_v33, %v4430_v63  ;;  %v4480_v23 = vmul.f32 %v4465_v49, %v12430_v33  ;;  %4820 = vmatpush.msra.mxu2 %v4772_v20  ;;  %v4770_v63 = vld [vmem:[#allocation19 + $0xe0] sm:$0xff] }
 0x6ef   : > { %v12482_v17 = vsub.f32 %v12436_v7, %v4446_v18  ;;  %v4488_v53 = vadd.f32 1e-05, %v4480_v23  ;;  %4821 = vmatpush.msra.mxu2 %v4771_v29  ;;  %v4755_v18 = vld [vmem:[#allocation19 + $0x68] sm:$0xff]  ;;  %v4754_v23 = vld [vmem:[#allocation19 + $0x60] sm:$0xff] }
 0x6f0   : > { %v4758_v29 = vld [vmem:[#allocation19 + $0x80] sm:$0xff] }
 0x6f1   : > { %v4462_v16 = vmul.f32 %v12482_v17, %v12482_v17  ;;  %9905 = vrsqrt.f32 %v4488_v53  ;;  %vm4502_vm8 = vweird.f32 %v4488_v53  ;;  %4822 = vmatpush.msra.mxu2 %v4770_v63 }
 0x6f3   : > { %4476 = vadd.xlane.f32.xlu2 %v4462_v16  ;;  %4823 = vmatpush.msra.mxu2 %v4769_v36  ;;  %v4767_v16 = vld [vmem:[#allocation19 + $0xc8] sm:$0xff] }
 0x6f5   : > { %4824 = vmatpush.msra.mxu2 %v4768_v50 }
 0x6f7   : > { %v9906_v38 = vpop.eup %9905  ;;  %4825 = vmatpush.msra.mxu2 %v4767_v16  ;;  %v4742_v16 = vld [vmem:[#allocation19] sm:$0xff] }
 0x6f8   : > { %v4497_v56 = vmul.f32 %v9906_v38, %v4488_v53  ;;  %vm4503_vm7 = vweird.f32 %v9906_v38 }
 0x6f9   : > { %vm4504_vm9 = vmor %vm4502_vm8, %vm4503_vm7 }
 0x6fa   : > { %v4498_v25 = vmul.f32 %v9906_v38, %v4497_v56  ;;  %v4753_v56 = vld [vmem:[#allocation19 + $0x58] sm:$0xff] }
 0x6fc   : > { %v4499_v7 = vmul.f32 0.5, %v4498_v25  ;;  %v4766_v25 = vld [vmem:[#allocation19 + $0xc0] sm:$0xff] }
 0x6fd   : > { %4826 = vmatpush.msra.mxu2 %v4766_v25 }
 0x6fe   : > { %v4500_v1 = vsub.f32 1.5, %v4499_v7 }
 0x700   : > { %v4501_v52 = vmul.f32 %v9906_v38, %v4500_v1 }
 0x702   : > { %v4505_v0 = vsel %vm4504_vm9, %v9906_v38, %v4501_v52 }
 0x703   : > { %v4576_v4 = vmul.f32 %v4505_v0, %v12438_v48 }
 0x705   : > { %v4587_v19 = vmul.f32 %v12488_v57, %v4576_v4  ;;  %v4752_v4 = vld [vmem:[#allocation19 + $0x50] sm:$0xff] }
 0x707   : > { %v12496_v2 = vadd.f32 %v12492_v13, %v4587_v19  ;;  %v4765_v19 = vld [vmem:[#allocation19 + $0xb8] sm:$0xff] }
 0x708   : > { %4827 = vmatpush.msra.mxu2 %v4765_v19 }
 0x709   : > { %4660 = vmatmul.f32.vlgmr.msra.gmra.mxu3 %v12496_v2  ;;  %4701 = vmatmul.f32.vlgmr.msrb.gmra.mxu0 %v12496_v2 }
 0x70c   : > { %v4432_v51 = vpop.xlane.xlu2 %4431 }
 0x70d   : > { %v4447_v14 = vmul.f32 %v12430_v33, %v4432_v51  ;;  %v4751_v51 = vld [vmem:[#allocation19 + $0x48] sm:$0xff] }
 0x70f   : > { %v12502_v46 = vsub.f32 %v12448_v47, %v4447_v14  ;;  %v4764_v14 = vld [vmem:[#allocation19 + $0xb0] sm:$0xff] }
 0x710   : > { %4828 = vmatpush.msra.mxu2 %v4764_v14 }
 0x711   : > { %v4463_v48 = vmul.f32 %v12502_v46, %v12502_v46 }
 0x713   : > { %4478 = vadd.xlane.f32.xlu1 %v4463_v48 }
 0x719   : > { %v4467_v60 = vpop.xlane.xlu1 %4466 }
 0x71a   : > { %v4481_v28 = vmul.f32 %v4467_v60, %v12430_v33  ;;  %v4750_v60 = vld [vmem:[#allocation19 + $0x40] sm:$0xff] }
 0x71c   : > { %v4489_v10 = vadd.f32 1e-05, %v4481_v28  ;;  %v4763_v28 = vld [vmem:[#allocation19 + $0xa8] sm:$0xff] }
 0x71d   : > { %4829 = vmatpush.msra.mxu2 %v4763_v28 }
 0x71e   : > { %9907 = vrsqrt.f32 %v4489_v10  ;;  %vm4512_vm11 = vweird.f32 %v4489_v10 }
 0x721   : > { %v4469_v42 = vpop.xlane.xlu1 %4468 }
 0x722   : > { %v4482_v5 = vmul.f32 %v4469_v42, %v12430_v33 }
 0x724   : > { %v9908_v39 = vpop.eup %9907  ;;  %v4490_v24 = vadd.f32 1e-05, %v4482_v5  ;;  %v4749_v5 = vld [vmem:[#allocation19 + $0x38] sm:$0xff] }
 0x725   : > { %v4507_v44 = vmul.f32 %v9908_v39, %v4489_v10  ;;  %vm4513_vm10 = vweird.f32 %v9908_v39 }
 0x726   : > { %9909 = vrsqrt.f32 %v4490_v24  ;;  %vm4514_vm12 = vmor %vm4512_vm11, %vm4513_vm10  ;;  %vm4522_vm14 = vweird.f32 %v4490_v24 }
 0x727   : > { %v4508_v32 = vmul.f32 %v9908_v39, %v4507_v44 }
 0x729   : > { %v4509_v55 = vmul.f32 0.5, %v4508_v32 }
 0x72b   : > { %v4510_v47 = vsub.f32 1.5, %v4509_v55 }
 0x72c   : > { %v9910_v43 = vpop.eup %9909 }
 0x72d   : > { %v4511_v35 = vmul.f32 %v9908_v39, %v4510_v47  ;;  %v4517_v22 = vmul.f32 %v9910_v43, %v4490_v24  ;;  %vm4523_vm13 = vweird.f32 %v9910_v43 }
 0x72e   : > { %vm4524_vm15 = vmor %vm4522_vm14, %vm4523_vm13 }
 0x72f   : > { %v4518_v30 = vmul.f32 %v9910_v43, %v4517_v22  ;;  %v4515_v41 = vsel %vm4514_vm12, %v9908_v39, %v4511_v35  ;;  %v4762_v39 = vld [vmem:[#allocation19 + $0xa0] sm:$0xff]  ;;  %v4761_v35 = vld [vmem:[#allocation19 + $0x98] sm:$0xff] }
 0x730   : > { %v4577_v27 = vmul.f32 %v4515_v41, %v12452_v9  ;;  %4830 = vmatpush.msra.mxu2 %v4762_v39 }
 0x731   : > { %v4519_v31 = vmul.f32 0.5, %v4518_v30 }
 0x732   : > { %v4588_v26 = vmul.f32 %v12488_v57, %v4577_v27  ;;  %4831 = vmatpush.msra.mxu2 %v4761_v35 }
 0x733   : > { %v4520_v62 = vsub.f32 1.5, %v4519_v31 }
 0x734   : > { %v12511_v54 = vadd.f32 %v12492_v13, %v4588_v26  ;;  %v4747_v26 = vld [vmem:[#allocation19 + $0x28] sm:$0xff] }
 0x735   : > { %v4521_v59 = vmul.f32 %v9910_v43, %v4520_v62  ;;  %v4760_v62 = vld [vmem:[#allocation19 + $0x90] sm:$0xff] }
 0x736   : > { %4663 = vmatmul.f32.gmra.mxu3 %v12511_v54  ;;  %4704 = vmatmul.f32.gmra.mxu0 %v12511_v54 }
 0x737   : > { %v4525_v12 = vsel %vm4524_vm15, %v9910_v43, %v4521_v59  ;;  %v4748_v43 = vld [vmem:[#allocation19 + $0x30] sm:$0xff]  ;;  %4832 = vmatpush.msra.mxu2 %v4760_v62 }
 0x738   : > { %v4578_v34 = vmul.f32 %v4525_v12, %v12458_v11  ;;  %v4757_v11 = vld [vmem:[#allocation19 + $0x78] sm:$0xff]  ;;  %v4746_v12 = vld [vmem:[#allocation19 + $0x20] sm:$0xff] }
 0x739   : > { %4778 = vmatpush.msrb.mxu1 %v4757_v11 }
 0x73a   : > { %v4589_v9 = vmul.f32 %v12488_v57, %v4578_v34  ;;  %v4759_v34 = vld [vmem:[#allocation19 + $0x88] sm:$0xff] }
 0x73b   : > { %4779 = vmatpush.msrb.mxu1 %v4756_v58  ;;  %4833 = vmatpush.msra.mxu2 %v4759_v34  ;;  %v4744_v58 = vld [vmem:[#allocation19 + $0x10] sm:$0xff] }
 0x73c   : > { %v12518_v40 = vadd.f32 %v12492_v13, %v4589_v9 }
 0x73d   : > { %4780 = vmatpush.msrb.mxu1 %v4755_v18  ;;  %4834 = vmatpush.msra.mxu2 %v4758_v29 }
 0x73e   : > { %4666 = vmatmul.f32.gmra.mxu3 %v12518_v40  ;;  %4707 = vmatmul.f32.gmra.mxu0 %v12518_v40 }
 0x73f   : > { %4781 = vmatpush.msrb.mxu1 %v4754_v23 }
 0x741   : > { %4782 = vmatpush.msrb.mxu1 %v4753_v56 }
 0x743   : > { %4783 = vmatpush.msrb.mxu1 %v4752_v4 }
 0x745   : > { %4784 = vmatpush.msrb.mxu1 %v4751_v51 }
 0x747   : > { %4785 = vmatpush.msrb.mxu1 %v4750_v60 }
 0x749   : > { %4786 = vmatpush.msrb.mxu1 %v4749_v5 }
 0x74b   : > { %4787 = vmatpush.msrb.mxu1 %v4748_v43 }
 0x74d   : > { %4788 = vmatpush.msrb.mxu1 %v4747_v26 }
 0x74f   : > { %4789 = vmatpush.msrb.mxu1 %v4746_v12 }
 0x755   : > { %v4473_v6 = vpop.xlane.xlu1 %4472 }
 0x756   : > { %v4484_v37 = vmul.f32 %v4473_v6, %v12430_v33 }
 0x758   : > { %v12523_v8 = vadd.f32 1e-05, %v4484_v37  ;;  %v4745_v37 = vld [vmem:[#allocation19 + $0x18] sm:$0xff] }
 0x759   : > { %4790 = vmatpush.msrb.mxu1 %v4745_v37 }
 0x75a   : > { %9911 = vrsqrt.f32 %v12523_v8  ;;  %vm4542_vm8 = vweird.f32 %v12523_v8 }
 0x75b   : > { %4791 = vmatpush.msrb.mxu1 %v4744_v58 }
 0x75d   : > { %v4471_v3 = vpop.xlane.xlu2 %4470  ;;  %v4475_v49 = vpop.xlane.xlu0 %4474 }
 0x75e   : > { %v4483_v53 = vmul.f32 %v4471_v3, %v12430_v33  ;;  %v4485_v38 = vmul.f32 %v4475_v49, %v12430_v33  ;;  %v4743_v49 = vld [vmem:[#allocation19 + $0x8] sm:$0xff] }
 0x75f   : > { %4792 = vmatpush.msrb.mxu1 %v4743_v49 }
 0x760   : > { %v12528_v7 = vpop.eup %9911  ;;  %v4491_v1 = vadd.f32 1e-05, %v4483_v53  ;;  %v12530_v52 = vadd.f32 1e-05, %v4485_v38 }
 0x761   : > { %v4537_v0 = vmul.f32 %v12528_v7, %v12523_v8  ;;  %vm4543_vm3 = vweird.f32 %v12528_v7  ;;  %4793 = vmatpush.msrb.mxu1 %v4742_v16 }
 0x762   : > { %9913 = vrsqrt.f32 %v4491_v1  ;;  %vm4532_vm6 = vweird.f32 %v4491_v1  ;;  %vm4544_vm9 = vmor %vm4542_vm8, %vm4543_vm3  ;;  %vm4552_vm11 = vweird.f32 %v12530_v52 }
 0x763   : > { %9915 = vrsqrt.f32 %v12530_v52  ;;  %v4538_v48 = vmul.f32 %v12528_v7, %v4537_v0 }
 0x765   : > { %v4539_v32 = vmul.f32 0.5, %v4538_v48 }
 0x766   : > { %v4477_v10 = vpop.xlane.xlu2 %4476 }
 0x767   : > { %v4486_v42 = vmul.f32 %v4477_v10, %v12430_v33  ;;  %v4540_v41 = vsub.f32 1.5, %v4539_v32 }
 0x768   : > { %v9914_v24 = vpop.eup %9913 }
 0x769   : > { %v12537_v44 = vpop.eup %9915  ;;  %v4527_v55 = vmul.f32 %v9914_v24, %v4491_v1  ;;  %v12539_v47 = vadd.f32 1e-05, %v4486_v42  ;;  %vm4533_vm2 = vweird.f32 %v9914_v24  ;;  %v4541_v21 = vmul.f32 %v12528_v7, %v4540_v41 }
 0x76a   : > { %v4547_v22 = vmul.f32 %v12537_v44, %v12530_v52  ;;  %vm4534_vm7 = vmor %vm4532_vm6, %vm4533_vm2  ;;  %vm4553_vm10 = vweird.f32 %v12537_v44  ;;  %v4638_v52 = vld [vmem:[%s14267_s4] sm:$0x3]  ;;  %s14320_s4 = sld [smem:[#allocation73_spill]] }
 0x76b   : > { %v4528_v30 = vmul.f32 %v9914_v24, %v4527_v55  ;;  %9917 = vrsqrt.f32 %v12539_v47  ;;  %v4545_v3 = vsel %vm4544_vm9, %v12528_v7, %v4541_v21  ;;  %vm4554_vm12 = vmor %vm4552_vm11, %vm4553_vm10  ;;  %vm4562_vm14 = vweird.f32 %v12539_v47 }
 0x76c   : > { %v4548_v31 = vmul.f32 %v12537_v44, %v4547_v22  ;;  %v4580_v8 = vmul.f32 %v4545_v3, %v12464_v15  ;;  %v12574_v14 = vperm.slane %v4638_v52, 1 }
 0x76d   : > { %v4529_v27 = vmul.f32 0.5, %v4528_v30 }
 0x76e   : > { %v4549_v20 = vmul.f32 0.5, %v4548_v31  ;;  %v4591_v56 = vmul.f32 %v12488_v57, %v4580_v8 }
 0x76f   : > { %v4530_v59 = vsub.f32 1.5, %v4529_v27 }
 0x770   : > { %v4550_v18 = vsub.f32 1.5, %v4549_v20  ;;  %v12566_v15 = vadd.f32 %v12492_v13, %v4591_v56 }
 0x771   : > { %v9918_v9 = vpop.eup %9917  ;;  %v4531_v6 = vmul.f32 %v9914_v24, %v4530_v59 }
 0x772   : > { %v4557_v11 = vmul.f32 %v9918_v9, %v12539_v47  ;;  %v4551_v38 = vmul.f32 %v12537_v44, %v4550_v18  ;;  %vm4563_vm13 = vweird.f32 %v9918_v9 }
 0x773   : > { %v4535_v63 = vsel %vm4534_vm7, %v9914_v24, %v4531_v6  ;;  %vm4564_vm15 = vmor %vm4562_vm14, %vm4563_vm13  ;;  %v12585_v24 = vperm.slane %v4638_v52, 0  ;;  %v12611_v52 = vld [vmem:[%s14268_s22] ss:$0 sm:$0xff]  ;;  %s14321_s22 = sld [smem:[#allocation76_spill]] }
 0x774   : > { %v4579_v36 = vmul.f32 %v4535_v63, %v12474_v45  ;;  %v4558_v50 = vmul.f32 %v9918_v9, %v4557_v11  ;;  %v4555_v7 = vsel %vm4554_vm12, %v12537_v44, %v4551_v38 }
 0x775   : > { %v4581_v1 = vmul.f32 %v4555_v7, %v12471_v61 }
 0x776   : > { %v4590_v23 = vmul.f32 %v12488_v57, %v4579_v36  ;;  %v4559_v45 = vmul.f32 0.5, %v4558_v50 }
 0x777   : > { %v4592_v4 = vmul.f32 %v12488_v57, %v4581_v1 }
 0x778   : > { %v12555_v53 = vadd.f32 %v12492_v13, %v4590_v23  ;;  %v4560_v25 = vsub.f32 1.5, %v4559_v45 }
 0x779   : > { %v12578_v61 = vadd.f32 %v12492_v13, %v4592_v4 }
 0x77a   : > { %4669 = vmatmul.f32.gmra.mxu3 %v12555_v53  ;;  %4710 = vmatmul.f32.gmra.mxu0 %v12555_v53  ;;  %v4561_v0 = vmul.f32 %v9918_v9, %v4560_v25 }
 0x77c   : > { %v4565_v19 = vsel %vm4564_vm15, %v9918_v9, %v4561_v0 }
 0x77d   : > { %v4582_v60 = vmul.f32 %v4565_v19, %v12482_v17 }
 0x77f   : > { %v4593_v5 = vmul.f32 %v12488_v57, %v4582_v60 }
 0x781   : > { %v12588_v32 = vadd.f32 %v12492_v13, %v4593_v5 }
 0x782   : > { %4672 = vmatmul.f32.gmra.mxu3 %v12566_v15  ;;  %4713 = vmatmul.f32.gmra.mxu0 %v12566_v15 }
 0x786   : > { %v4479_v51 = vpop.xlane.xlu1 %4478  ;;  %v4702_v10 = vpop.f32.mrf.mxu0 }
 0x787   : > { %v4487_v48 = vmul.f32 %v4479_v51, %v12430_v33  ;;  %v4703_v42 = vadd.f32 %v4702_v10, %v12574_v14 }
 0x789   : > { %v4495_v28 = vadd.f32 1e-05, %v4487_v48  ;;  %v4727_v39 = vmax.f32 %v4703_v42, 0.0 }
 0x78a   : > { %4675 = vmatmul.f32.gmra.mxu3 %v12578_v61  ;;  %4716 = vmatmul.f32.gmra.mxu0 %v12578_v61 }
 0x78b   : > { %9919 = vrsqrt.f32 %v4495_v28  ;;  %4835 = vmatmul.f32.vlgmr.msra.gmra.mxu2 %v4727_v39  ;;  %vm4572_vm3 = vweird.f32 %v4495_v28 }
 0x78c   : > { %v4661_v44 = vpop.f32.mrf.mxu3 }
 0x78d   : > { %v4662_v55 = vadd.f32 %v4661_v44, %v12585_v24 }
 0x78f   : > { %v4726_v43 = vmax.f32 %v4662_v55, 0.0 }
 0x791   : > { %v9920_v17 = vpop.eup %9919  ;;  %4794 = vmatmul.f32.vlgmr.msrb.gmra.mxu1 %v4726_v43 }
 0x792   : > { %v4567_v47 = vmul.f32 %v9920_v17, %v4495_v28  ;;  %4678 = vmatmul.f32.gmra.mxu3 %v12588_v32  ;;  %4719 = vmatmul.f32.gmra.mxu0 %v12588_v32  ;;  %vm4573_vm2 = vweird.f32 %v9920_v17 }
 0x793   : > { %vm4574_vm6 = vmor %vm4572_vm3, %vm4573_vm2 }
 0x794   : > { %v4568_v35 = vmul.f32 %v9920_v17, %v4567_v47 }
 0x796   : > { %v4569_v22 = vmul.f32 0.5, %v4568_v35 }
 0x798   : > { %v4570_v30 = vsub.f32 1.5, %v4569_v22 }
 0x79a   : > { %v4571_v41 = vmul.f32 %v9920_v17, %v4570_v30 }
 0x79c   : > { %v4575_v27 = vsel %vm4574_vm6, %v9920_v17, %v4571_v41 }
 0x79d   : > { %v4583_v31 = vmul.f32 %v4575_v27, %v12502_v46 }
 0x79f   : > { %v4594_v26 = vmul.f32 %v12488_v57, %v4583_v31 }
 0x7a1   : > { %v12596_v62 = vadd.f32 %v12492_v13, %v4594_v26 }
 0x7a3   : > { %4681 = vmatmul.f32.gmra.mxu3 %v12596_v62  ;;  %4722 = vmatmul.f32.gmra.mxu0 %v12596_v62 }
 0x7b3   : > { %v4705_v59 = vpop.f32.mrf.mxu0 }
 0x7b4   : > { %v4706_v12 = vadd.f32 %v4705_v59, %v12574_v14 }
 0x7b6   : > { %v4729_v34 = vmax.f32 %v4706_v12, 0.0 }
 0x7b8   : > { %4838 = vmatmul.f32.gmra.mxu2 %v4729_v34 }
 0x7b9   : > { %v4664_v9 = vpop.f32.mrf.mxu3 }
 0x7ba   : > { %v4665_v21 = vadd.f32 %v4664_v9, %v12585_v24 }
 0x7bb   : > { %v4708_v6 = vpop.f32.mrf.mxu0 }
 0x7bc   : > { %v4728_v20 = vmax.f32 %v4665_v21, 0.0  ;;  %v4709_v46 = vadd.f32 %v4708_v6, %v12574_v14 }
 0x7be   : > { %v4731_v57 = vmax.f32 %v4709_v46, 0.0  ;;  %4797 = vmatmul.f32.gmra.mxu1 %v4728_v20 }
 0x7c0   : > { %4841 = vmatmul.f32.gmra.mxu2 %v4731_v57 }
 0x7c1   : > { %v4667_v13 = vpop.f32.mrf.mxu3 }
 0x7c2   : > { %v4668_v37 = vadd.f32 %v4667_v13, %v12585_v24 }
 0x7c4   : > { %v4730_v29 = vmax.f32 %v4668_v37, 0.0 }
 0x7c6   : > { %4800 = vmatmul.f32.gmra.mxu1 %v4730_v29 }
 0x7f7   : > { %v4711_v11 = vpop.f32.mrf.mxu0 }
 0x7f8   : > { %v4712_v63 = vadd.f32 %v4711_v11, %v12574_v14 }
 0x7fa   : > { %v4733_v58 = vmax.f32 %v4712_v63, 0.0 }
 0x7fc   : > { %4844 = vmatmul.f32.gmra.mxu2 %v4733_v58 }
 0x7fd   : > { %v4670_v36 = vpop.f32.mrf.mxu3 }
 0x7fe   : > { %v4671_v18 = vadd.f32 %v4670_v36, %v12585_v24 }
 0x7ff   : > { %v4714_v50 = vpop.f32.mrf.mxu0 }
 0x800   : > { %v4732_v3 = vmax.f32 %v4671_v18, 0.0  ;;  %v4715_v49 = vadd.f32 %v4714_v50, %v12574_v14 }
 0x802   : > { %v4735_v23 = vmax.f32 %v4715_v49, 0.0  ;;  %4803 = vmatmul.f32.gmra.mxu1 %v4732_v3 }
 0x804   : > { %4847 = vmatmul.f32.gmra.mxu2 %v4735_v23 }
 0x805   : > { %v4673_v16 = vpop.f32.mrf.mxu3 }
 0x806   : > { %v4674_v8 = vadd.f32 %v4673_v16, %v12585_v24 }
 0x807   : > { %v4717_v38 = vpop.f32.mrf.mxu0 }
 0x808   : > { %v4734_v45 = vmax.f32 %v4674_v8, 0.0  ;;  %v4718_v56 = vadd.f32 %v4717_v38, %v12574_v14 }
 0x80a   : > { %v4737_v25 = vmax.f32 %v4718_v56, 0.0  ;;  %4806 = vmatmul.f32.gmra.mxu1 %v4734_v45 }
 0x80c   : > { %4850 = vmatmul.f32.gmra.mxu2 %v4737_v25 }
 0x80d   : > { %v4676_v7 = vpop.f32.mrf.mxu3 }
 0x80e   : > { %v4677_v1 = vadd.f32 %v4676_v7, %v12585_v24  ;;  %v4795_v48 = vpop.f32.mrf.mxu1  ;;  %v4836_v28 = vpop.f32.mrf.mxu2 }
 0x80f   : > { %v4720_v0 = vpop.f32.mrf.mxu0  ;;  %v4796_v60 = vadd.f32 %v12611_v52, %v4795_v48  ;;  %v5099_v48 = vld [vmem:[#allocation20 + $0x178] sm:$0xff] }
 0x810   : > { %v4736_v4 = vmax.f32 %v4677_v1, 0.0  ;;  %v4721_v19 = vadd.f32 %v4720_v0, %v12574_v14  ;;  %5190 = vmatpush.msra.mxu1 %v5099_v48 }
 0x811   : > { %v4837_v10 = vadd.f32 %v4836_v28, %v4796_v60  ;;  %v5094_v60 = vld [vmem:[#allocation20 + $0x150] sm:$0xff]  ;;  %v5095_v28 = vld [vmem:[#allocation20 + $0x158] sm:$0xff] }
 0x812   : > { %v4739_v51 = vmax.f32 %v4721_v19, 0.0  ;;  %4809 = vmatmul.f32.gmra.mxu1 %v4736_v4  ;;  %v5097_v19 = vld [vmem:[#allocation20 + $0x168] sm:$0xff] }
 0x813   : > { %v4860_v39 = vadd.f32 %v4837_v10, %v12496_v2  ;;  %5108 = vmatpush.msrb.mxu3 %v5097_v19  ;;  %v5096_v10 = vld [vmem:[#allocation20 + $0x160] sm:$0xff] }
 0x814   : > { %4853 = vmatmul.f32.gmra.mxu2 %v4739_v51  ;;  %v5098_v51 = vld [vmem:[#allocation20 + $0x170] sm:$0xff]  ;;  %5191 = vmatpush.msra.mxu1 %v5096_v10 }
 0x815   : > { %v4679_v42 = vpop.f32.mrf.mxu3  ;;  %4870 = vadd.xlane.f32.xlu0 %v4860_v39  ;;  %5149 = vmatpush.msra.mxu0 %v5098_v51 }
 0x816   : > { %v4680_v5 = vadd.f32 %v4679_v42, %v12585_v24  ;;  %5109 = vmatpush.msrb.mxu3 %v5094_v60  ;;  %v5091_v42 = vld [vmem:[#allocation20 + $0x138] sm:$0xff] }
 0x817   : > { %5150 = vmatpush.msra.mxu0 %v5095_v28 }
 0x818   : > { %v4738_v44 = vmax.f32 %v4680_v5, 0.0  ;;  %v5092_v5 = vld [vmem:[#allocation20 + $0x140] sm:$0xff]  ;;  %5110 = vmatpush.msrb.mxu3 %v5091_v42 }
 0x819   : > { %5151 = vmatpush.msra.mxu0 %v5092_v5 }
 0x81a   : > { %4812 = vmatmul.f32.gmra.mxu1 %v4738_v44  ;;  %v5088_v44 = vld [vmem:[#allocation20 + $0x120] sm:$0xff] }
 0x81b   : > { %5111 = vmatpush.msrb.mxu3 %v5088_v44 }
 0x820   : > { %v4723_v17 = vpop.f32.mrf.mxu0 }
 0x821   : > { %v4724_v55 = vadd.f32 %v4723_v17, %v12574_v14  ;;  %v5089_v17 = vld [vmem:[#allocation20 + $0x128] sm:$0xff] }
 0x822   : > { %5152 = vmatpush.msra.mxu0 %v5089_v17 }
 0x823   : > { %v4741_v47 = vmax.f32 %v4724_v55, 0.0  ;;  %v5090_v55 = vld [vmem:[#allocation20 + $0x130] sm:$0xff] }
 0x825   : > { %4856 = vmatmul.f32.gmra.mxu2 %v4741_v47  ;;  %v5085_v47 = vld [vmem:[#allocation20 + $0x108] sm:$0xff] }
 0x826   : > { %v4682_v43 = vpop.f32.mrf.mxu3  ;;  %5112 = vmatpush.msrb.mxu3 %v5085_v47 }
 0x827   : > { %v4683_v35 = vadd.f32 %v4682_v43, %v12585_v24  ;;  %v5086_v43 = vld [vmem:[#allocation20 + $0x110] sm:$0xff] }
 0x828   : > { %5153 = vmatpush.msra.mxu0 %v5086_v43 }
 0x829   : > { %v4740_v22 = vmax.f32 %v4683_v35, 0.0  ;;  %v5087_v35 = vld [vmem:[#allocation20 + $0x118] sm:$0xff] }
 0x82b   : > { %4815 = vmatmul.f32.gmra.mxu1 %v4740_v22  ;;  %v5082_v22 = vld [vmem:[#allocation20 + $0xf0] sm:$0xff] }
 0x82c   : > { %5113 = vmatpush.msrb.mxu3 %v5082_v22  ;;  %v12689_v22 = vld [vmem:[%s14269_s26] ss:$0 sm:$0xff]  ;;  %s14322_s26 = sld [smem:[#allocation75_spill]] }
 0x83b   : > { %v4798_v30 = vpop.f32.mrf.mxu1  ;;  %v4839_v41 = vpop.f32.mrf.mxu2 }
 0x83c   : > { %v4799_v27 = vadd.f32 %v12611_v52, %v4798_v30  ;;  %v5083_v30 = vld [vmem:[#allocation20 + $0xf8] sm:$0xff] }
 0x83d   : > { %5154 = vmatpush.msra.mxu0 %v5083_v30 }
 0x83e   : > { %v4840_v31 = vadd.f32 %v4839_v41, %v4799_v27  ;;  %v5084_v41 = vld [vmem:[#allocation20 + $0x100] sm:$0xff]  ;;  %v5079_v27 = vld [vmem:[#allocation20 + $0xd8] sm:$0xff] }
 0x83f   : > { %5114 = vmatpush.msrb.mxu3 %v5079_v27  ;;  %v12693_v27 = vld [vmem:[%s14270_s6] ss:$0 sm:$0xff]  ;;  %s9151_s6 = sshll.u32 %s11363_s8, 3 }
 0x840   : > { %v4861_v2 = vadd.f32 %v4840_v31, %v12511_v54  ;;  %v5080_v31 = vld [vmem:[#allocation20 + $0xe0] sm:$0xff] }
 0x841   : > { %5155 = vmatpush.msra.mxu0 %v5080_v31 }
 0x842   : > { %4872 = vadd.xlane.f32.xlu2 %v4861_v2 }
 0x843   : > { %v4801_v26 = vpop.f32.mrf.mxu1  ;;  %v4842_v12 = vpop.f32.mrf.mxu2 }
 0x844   : > { %v4802_v59 = vadd.f32 %v12611_v52, %v4801_v26  ;;  %v5076_v26 = vld [vmem:[#allocation20 + $0xc0] sm:$0xff] }
 0x845   : > { %5115 = vmatpush.msrb.mxu3 %v5076_v26 }
 0x846   : > { %v4843_v14 = vadd.f32 %v4842_v12, %v4802_v59  ;;  %v5077_v59 = vld [vmem:[#allocation20 + $0xc8] sm:$0xff]  ;;  %v5078_v12 = vld [vmem:[#allocation20 + $0xd0] sm:$0xff] }
 0x847   : > { %5156 = vmatpush.msra.mxu0 %v5077_v59 }
 0x848   : > { %v4862_v34 = vadd.f32 %v4843_v14, %v12518_v40  ;;  %v5073_v14 = vld [vmem:[#allocation20 + $0xa8] sm:$0xff] }
 0x849   : > { %5116 = vmatpush.msrb.mxu3 %v5073_v14 }
 0x84a   : > { %4874 = vadd.xlane.f32.xlu1 %v4862_v34 }
 0x87f   : > { %v4804_v9 = vpop.f32.mrf.mxu1  ;;  %v4845_v24 = vpop.f32.mrf.mxu2 }
 0x880   : > { %v4805_v21 = vadd.f32 %v12611_v52, %v4804_v9  ;;  %v5075_v9 = vld [vmem:[#allocation20 + $0xb8] sm:$0xff] }
 0x882   : > { %v4846_v6 = vadd.f32 %v4845_v24, %v4805_v21  ;;  %v5070_v21 = vld [vmem:[#allocation20 + $0x90] sm:$0xff] }
 0x883   : > { %5117 = vmatpush.msrb.mxu3 %v5070_v21 }
 0x884   : > { %v12625_v20 = vadd.f32 %v4846_v6, %v12555_v53  ;;  %v5071_v6 = vld [vmem:[#allocation20 + $0x98] sm:$0xff] }
 0x886   : > { %4876 = vadd.xlane.f32.xlu0 %v12625_v20 }
 0x887   : > { %v4807_v54 = vpop.f32.mrf.mxu1  ;;  %v4848_v46 = vpop.f32.mrf.mxu2 }
 0x888   : > { %v4808_v57 = vadd.f32 %v12611_v52, %v4807_v54  ;;  %v4871_v40 = vpop.xlane.xlu0 %4870  ;;  %v5072_v54 = vld [vmem:[#allocation20 + $0xa0] sm:$0xff] }
 0x889   : > { %v4886_v29 = vmul.f32 %v4871_v40, %v12430_v33  ;;  %v5069_v40 = vld [vmem:[#allocation20 + $0x88] sm:$0xff] }
 0x88a   : > { %v4849_v13 = vadd.f32 %v4848_v46, %v4808_v57  ;;  %v5067_v57 = vld [vmem:[#allocation20 + $0x78] sm:$0xff] }
 0x88b   : > { %v12634_v11 = vsub.f32 %v4860_v39, %v4886_v29  ;;  %v5093_v39 = vld [vmem:[#allocation20 + $0x148] sm:$0xff]  ;;  %5118 = vmatpush.msrb.mxu3 %v5067_v57 }
 0x88c   : > { %v12630_v37 = vadd.f32 %v4849_v13, %v12566_v15  ;;  %5192 = vmatpush.msra.mxu1 %v5093_v39  ;;  %v5068_v13 = vld [vmem:[#allocation20 + $0x80] sm:$0xff] }
 0x88d   : > { %v4902_v36 = vmul.f32 %v12634_v11, %v12634_v11 }
 0x88e   : > { %4878 = vadd.xlane.f32.xlu2 %v12630_v37  ;;  %5193 = vmatpush.msra.mxu1 %v5090_v55 }
 0x88f   : > { %v4810_v63 = vpop.f32.mrf.mxu1  ;;  %v4851_v53 = vpop.f32.mrf.mxu2  ;;  %4910 = vadd.xlane.f32.xlu0 %v4902_v36 }
 0x890   : > { %v4811_v58 = vadd.f32 %v12611_v52, %v4810_v63  ;;  %5194 = vmatpush.msra.mxu1 %v5087_v35  ;;  %v5064_v63 = vld [vmem:[#allocation20 + $0x60] sm:$0xff] }
 0x891   : > { %5119 = vmatpush.msrb.mxu3 %v5064_v63 }
 0x892   : > { %v4852_v18 = vadd.f32 %v4851_v53, %v4811_v58  ;;  %5195 = vmatpush.msra.mxu1 %v5084_v41  ;;  %v5065_v53 = vld [vmem:[#allocation20 + $0x68] sm:$0xff]  ;;  %v5066_v58 = vld [vmem:[#allocation20 + $0x70] sm:$0xff] }
 0x894   : > { %v12640_v50 = vadd.f32 %v4852_v18, %v12578_v61  ;;  %v5061_v18 = vld [vmem:[#allocation20 + $0x48] sm:$0xff] }
 0x895   : > { %5120 = vmatpush.msrb.mxu3 %v5061_v18 }
 0x896   : > { %4880 = vadd.xlane.f32.xlu1 %v12640_v50 }
 0x897   : > { %v4813_v15 = vpop.f32.mrf.mxu1  ;;  %v4854_v49 = vpop.f32.mrf.mxu2 }
 0x898   : > { %v4814_v3 = vadd.f32 %v12611_v52, %v4813_v15  ;;  %v5062_v15 = vld [vmem:[#allocation20 + $0x50] sm:$0xff] }
 0x89a   : > { %v4855_v23 = vadd.f32 %v4854_v49, %v4814_v3  ;;  %v5063_v3 = vld [vmem:[#allocation20 + $0x58] sm:$0xff]  ;;  %v5058_v49 = vld [vmem:[#allocation20 + $0x30] sm:$0xff] }
 0x89b   : > { %5121 = vmatpush.msrb.mxu3 %v5058_v49 }
 0x89c   : > { %v12645_v16 = vadd.f32 %v4855_v23, %v12588_v32  ;;  %v5060_v23 = vld [vmem:[#allocation20 + $0x40] sm:$0xff] }
 0x89e   : > { %4882 = vadd.xlane.f32.xlu2 %v12645_v16 }
 0x8a8   : > { %v4816_v8 = vpop.f32.mrf.mxu1  ;;  %v4857_v45 = vpop.f32.mrf.mxu2 }
 0x8a9   : > { %v4817_v38 = vadd.f32 %v12611_v52, %v4816_v8 }
 0x8ab   : > { %v4858_v56 = vadd.f32 %v4857_v45, %v4817_v38  ;;  %v5055_v38 = vld [vmem:[#allocation20 + $0x18] sm:$0xff] }
 0x8ac   : > { %5122 = vmatpush.msrb.mxu3 %v5055_v38 }
 0x8ad   : > { %v12650_v61 = vadd.f32 %v4858_v56, %v12596_v62  ;;  %v5056_v56 = vld [vmem:[#allocation20 + $0x20] sm:$0xff] }
 0x8af   : > { %4884 = vadd.xlane.f32.xlu0 %v12650_v61 }
 0x8b5   : > { %v4873_v25 = vpop.xlane.xlu2 %4872 }
 0x8b6   : > { %v4887_v7 = vmul.f32 %v4873_v25, %v12430_v33  ;;  %v5057_v25 = vld [vmem:[#allocation20 + $0x28] sm:$0xff] }
 0x8b8   : > { %v12654_v1 = vsub.f32 %v4861_v2, %v4887_v7  ;;  %v5081_v2 = vld [vmem:[#allocation20 + $0xe8] sm:$0xff]  ;;  %v5052_v7 = vld [vmem:[#allocation20] sm:$0xff] }
 0x8b9   : > { %5196 = vmatpush.msra.mxu1 %v5081_v2  ;;  %5123 = vmatpush.msrb.mxu3 %v5052_v7  ;;  %v5268_v7 = vld [vmem:[#allocation22 + $0x68] sm:$0xff] }
 0x8ba   : > { %v4903_v32 = vmul.f32 %v12654_v1, %v12654_v1 }
 0x8bb   : > { %5197 = vmatpush.msra.mxu1 %v5078_v12 }
 0x8bc   : > { %4912 = vadd.xlane.f32.xlu1 %v4903_v32 }
 0x8bd   : > { %v4875_v0 = vpop.xlane.xlu1 %4874  ;;  %5198 = vmatpush.msra.mxu1 %v5075_v9 }
 0x8be   : > { %v4888_v4 = vmul.f32 %v4875_v0, %v12430_v33  ;;  %v5053_v0 = vld [vmem:[#allocation20 + $0x8] sm:$0xff] }
 0x8bf   : > { %5199 = vmatpush.msra.mxu1 %v5072_v54 }
 0x8c0   : > { %v12659_v52 = vsub.f32 %v4862_v34, %v4888_v4  ;;  %v5074_v34 = vld [vmem:[#allocation20 + $0xb0] sm:$0xff] }
 0x8c1   : > { %5157 = vmatpush.msra.mxu0 %v5074_v34  ;;  %5200 = vmatpush.msra.mxu1 %v5069_v40  ;;  %v5054_v4 = vld [vmem:[#allocation20 + $0x10] sm:$0xff] }
 0x8c2   : > { %v4904_v62 = vmul.f32 %v12659_v52, %v12659_v52 }
 0x8c3   : > { %5158 = vmatpush.msra.mxu0 %v5071_v6  ;;  %5201 = vmatpush.msra.mxu1 %v5066_v58 }
 0x8c4   : > { %4914 = vadd.xlane.f32.xlu2 %v4904_v62 }
 0x8c5   : > { %5159 = vmatpush.msra.mxu0 %v5068_v13  ;;  %5202 = vmatpush.msra.mxu1 %v5063_v3 }
 0x8c7   : > { %5160 = vmatpush.msra.mxu0 %v5065_v53  ;;  %5203 = vmatpush.msra.mxu1 %v5060_v23 }
 0x8c9   : > { %5161 = vmatpush.msra.mxu0 %v5062_v15  ;;  %5204 = vmatpush.msra.mxu1 %v5057_v25 }
 0x8cb   : > { %5205 = vmatpush.msra.mxu1 %v5054_v4  ;;  %v5267_v4 = vld [vmem:[#allocation22 + $0x60] sm:$0xff] }
 0x8f9   : > { %v4877_v24 = vpop.xlane.xlu0 %4876 }
 0x8fa   : > { %v4889_v46 = vmul.f32 %v4877_v24, %v12430_v33 }
 0x8fc   : > { %v12665_v29 = vsub.f32 %v12625_v20, %v4889_v46  ;;  %v5059_v20 = vld [vmem:[#allocation20 + $0x38] sm:$0xff] }
 0x8fd   : > { %5162 = vmatpush.msra.mxu0 %v5059_v20 }
 0x8fe   : > { %v4905_v36 = vmul.f32 %v12665_v29, %v12665_v29 }
 0x8ff   : > { %5163 = vmatpush.msra.mxu0 %v5056_v56  ;;  %v5269_v56 = vld [vmem:[#allocation22 + $0x70] sm:$0xff] }
 0x900   : > { %4916 = vadd.xlane.f32.xlu1 %v4905_v36 }
 0x901   : > { %v4879_v8 = vpop.xlane.xlu2 %4878  ;;  %5164 = vmatpush.msra.mxu0 %v5053_v0 }
 0x902   : > { %v4890_v45 = vmul.f32 %v4879_v8, %v12430_v33  ;;  %v4911_v62 = vpop.xlane.xlu0 %4910 }
 0x903   : > { %v4926_v51 = vmul.f32 %v4911_v62, %v12430_v33 }
 0x904   : > { %v12671_v32 = vsub.f32 %v12630_v37, %v4890_v45  ;;  %v5270_v45 = vld [vmem:[#allocation22 + $0x78] sm:$0xff] }
 0x905   : > { %v4934_v48 = vadd.f32 1e-05, %v4926_v51  ;;  %5275 = vmatpush.msrb.mxu2 %v5270_v45  ;;  %v5388_v45 = vld [vmem:[#allocation25 + $0x58] sm:$0xff] }
 0x906   : > { %v4906_v19 = vmul.f32 %v12671_v32, %v12671_v32 }
 0x907   : > { %9921 = vrsqrt.f32 %v4934_v48  ;;  %vm4948_vm8 = vweird.f32 %v4934_v48  ;;  %5276 = vmatpush.msrb.mxu2 %v5269_v56 }
 0x908   : > { %4918 = vadd.xlane.f32.xlu0 %v4906_v19  ;;  %v5265_v19 = vld [vmem:[#allocation22 + $0x50] sm:$0xff] }
 0x909   : > { %v4881_v60 = vpop.xlane.xlu1 %4880  ;;  %5277 = vmatpush.msrb.mxu2 %v5268_v7 }
 0x90a   : > { %v4891_v37 = vmul.f32 %v4881_v60, %v12430_v33 }
 0x90b   : > { %5278 = vmatpush.msrb.mxu2 %v5267_v4 }
 0x90c   : > { %v12678_v28 = vsub.f32 %v12640_v50, %v4891_v37  ;;  %v5263_v37 = vld [vmem:[#allocation22 + $0x40] sm:$0xff] }
 0x90d   : > { %v9922_v42 = vpop.eup %9921 }
 0x90e   : > { %v4907_v10 = vmul.f32 %v12678_v28, %v12678_v28  ;;  %v4943_v39 = vmul.f32 %v9922_v42, %v4934_v48  ;;  %vm4949_vm7 = vweird.f32 %v9922_v42  ;;  %v5264_v48 = vld [vmem:[#allocation22 + $0x48] sm:$0xff] }
 0x90f   : > { %vm4950_vm9 = vmor %vm4948_vm8, %vm4949_vm7 }
 0x910   : > { %4920 = vadd.xlane.f32.xlu2 %v4907_v10  ;;  %v4944_v17 = vmul.f32 %v9922_v42, %v4943_v39  ;;  %v5262_v39 = vld [vmem:[#allocation22 + $0x38] sm:$0xff] }
 0x911   : > { %v4883_v5 = vpop.xlane.xlu2 %4882 }
 0x912   : > { %v4892_v44 = vmul.f32 %v4883_v5, %v12430_v33  ;;  %v4945_v47 = vmul.f32 0.5, %v4944_v17 }
 0x914   : > { %v12684_v55 = vsub.f32 %v12645_v16, %v4892_v44  ;;  %v4946_v43 = vsub.f32 1.5, %v4945_v47  ;;  %v5261_v44 = vld [vmem:[#allocation22 + $0x30] sm:$0xff] }
 0x916   : > { %v4908_v50 = vmul.f32 %v12684_v55, %v12684_v55  ;;  %v4947_v35 = vmul.f32 %v9922_v42, %v4946_v43  ;;  %v5260_v43 = vld [vmem:[#allocation22 + $0x28] sm:$0xff] }
 0x918   : > { %4922 = vadd.xlane.f32.xlu1 %v4908_v50  ;;  %v4951_v30 = vsel %vm4950_vm9, %v9922_v42, %v4947_v35 }
 0x919   : > { %v5022_v41 = vmul.f32 %v4951_v30, %v12634_v11 }
 0x91b   : > { %v5033_v16 = vmul.f32 %v12689_v22, %v5022_v41  ;;  %v5259_v41 = vld [vmem:[#allocation22 + $0x20] sm:$0xff] }
 0x91d   : > { %v5044_v31 = vadd.f32 %v12693_v27, %v5033_v16 }
 0x91f   : > { %5124 = vmatmul.f32.vlgmr.msrb.gmra.mxu3 %v5044_v31  ;;  %5165 = vmatmul.f32.vlgmr.msra.gmra.mxu0 %v5044_v31 }
 0x920   : > { %5206 = vmatmul.f32.vlgmr.msra.gmra.mxu1 %v5044_v31 }
 0x922   : > { %v4885_v2 = vpop.xlane.xlu0 %4884 }
 0x923   : > { %v4893_v26 = vmul.f32 %v4885_v2, %v12430_v33 }
 0x925   : > { %v12699_v59 = vsub.f32 %v12650_v61, %v4893_v26 }
 0x927   : > { %v4909_v12 = vmul.f32 %v12699_v59, %v12699_v59 }
 0x929   : > { %4924 = vadd.xlane.f32.xlu0 %v4909_v12  ;;  %v5258_v12 = vld [vmem:[#allocation22 + $0x18] sm:$0xff] }
 0x92f   : > { %v4913_v11 = vpop.xlane.xlu1 %4912 }
 0x930   : > { %v4927_v14 = vmul.f32 %v4913_v11, %v12430_v33 }
 0x932   : > { %v4935_v34 = vadd.f32 1e-05, %v4927_v14 }
 0x934   : > { %9923 = vrsqrt.f32 %v4935_v34  ;;  %vm4958_vm11 = vweird.f32 %v4935_v34 }
 0x937   : > { %v4915_v9 = vpop.xlane.xlu2 %4914 }
 0x938   : > { %v4928_v24 = vmul.f32 %v4915_v9, %v12430_v33  ;;  %v5331_v9 = vld [vmem:[#allocation23 + $0x78] sm:$0xff] }
 0x939   : > { %5336 = vmatpush.msra.mxu3 %v5331_v9  ;;  %v5100_v9 = vld [vmem:[%s14271_s28] sm:$0x7]  ;;  %s9369_s28 = sshll.u32 %s11055_s16, 3  ;;  %s10687_s16 = scalar_lea.hbm %s14321_s22, 16 }
 0x93a   : > { %v9924_v21 = vpop.eup %9923  ;;  %v4936_v6 = vadd.f32 1e-05, %v4928_v24  ;;  %v5392_v24 = vld [vmem:[#allocation25 + $0x78] sm:$0xff] }
 0x93b   : > { %v4953_v54 = vmul.f32 %v9924_v21, %v4935_v34  ;;  %vm4959_vm10 = vweird.f32 %v9924_v21  ;;  %v5257_v34 = vld [vmem:[#allocation22 + $0x10] sm:$0xff]  ;;  %5397 = vmatpush.msrb.mxu0 %v5392_v24 }
 0x93c   : > { %9925 = vrsqrt.f32 %v4936_v6  ;;  %vm4960_vm12 = vmor %vm4958_vm11, %vm4959_vm10  ;;  %vm4968_vm14 = vweird.f32 %v4936_v6 }
 0x93d   : > { %v4954_v46 = vmul.f32 %v9924_v21, %v4953_v54 }
 0x93f   : > { %v4955_v57 = vmul.f32 0.5, %v4954_v46  ;;  %v5256_v46 = vld [vmem:[#allocation22 + $0x8] sm:$0xff] }
 0x941   : > { %v4956_v61 = vsub.f32 1.5, %v4955_v57  ;;  %v5330_v57 = vld [vmem:[#allocation23 + $0x70] sm:$0xff] }
 0x942   : > { %v9926_v13 = vpop.eup %9925  ;;  %5337 = vmatpush.msra.mxu3 %v5330_v57  ;;  %v5318_v57 = vld [vmem:[#allocation23 + $0x10] sm:$0xff] }
 0x943   : > { %v4957_v40 = vmul.f32 %v9924_v21, %v4956_v61  ;;  %v4963_v63 = vmul.f32 %v9926_v13, %v4936_v6  ;;  %vm4969_vm13 = vweird.f32 %v9926_v13  ;;  %v5391_v61 = vld [vmem:[#allocation25 + $0x70] sm:$0xff] }
 0x944   : > { %vm4970_vm15 = vmor %vm4968_vm14, %vm4969_vm13  ;;  %5398 = vmatpush.msrb.mxu0 %v5391_v61 }
 0x945   : > { %v4964_v53 = vmul.f32 %v9926_v13, %v4963_v63  ;;  %v4961_v58 = vsel %vm4960_vm12, %v9924_v21, %v4957_v40 }
 0x946   : > { %v5023_v36 = vmul.f32 %v4961_v58, %v12654_v1  ;;  %v5329_v58 = vld [vmem:[#allocation23 + $0x68] sm:$0xff] }
 0x947   : > { %v4965_v18 = vmul.f32 0.5, %v4964_v53  ;;  %v5255_v53 = vld [vmem:[#allocation22] sm:$0xff]  ;;  %5338 = vmatpush.msra.mxu3 %v5329_v58 }
 0x948   : > { %v5034_v15 = vmul.f32 %v12689_v22, %v5023_v36 }
 0x949   : > { %v4966_v3 = vsub.f32 1.5, %v4965_v18 }
 0x94a   : > { %v5045_v49 = vadd.f32 %v12693_v27, %v5034_v15 }
 0x94b   : > { %v4967_v20 = vmul.f32 %v9926_v13, %v4966_v3 }
 0x94c   : > { %5127 = vmatmul.f32.gmra.mxu3 %v5045_v49  ;;  %5168 = vmatmul.f32.gmra.mxu0 %v5045_v49 }
 0x94d   : > { %5209 = vmatmul.f32.gmra.mxu1 %v5045_v49  ;;  %v4971_v23 = vsel %vm4970_vm15, %v9926_v13, %v4967_v20  ;;  %v5328_v20 = vld [vmem:[#allocation23 + $0x60] sm:$0xff] }
 0x94e   : > { %v5024_v8 = vmul.f32 %v4971_v23, %v12659_v52  ;;  %v5266_v52 = vld [vmem:[#allocation22 + $0x58] sm:$0xff]  ;;  %v5389_v23 = vld [vmem:[#allocation25 + $0x60] sm:$0xff]  ;;  %5339 = vmatpush.msra.mxu3 %v5328_v20 }
 0x94f   : > { %5279 = vmatpush.msrb.mxu2 %v5266_v52 }
 0x950   : > { %v5035_v38 = vmul.f32 %v12689_v22, %v5024_v8  ;;  %v5327_v8 = vld [vmem:[#allocation23 + $0x58] sm:$0xff] }
 0x951   : > { %5280 = vmatpush.msrb.mxu2 %v5265_v19  ;;  %5340 = vmatpush.msra.mxu3 %v5327_v8 }
 0x952   : > { %v5046_v1 = vadd.f32 %v12693_v27, %v5035_v38 }
 0x953   : > { %5281 = vmatpush.msrb.mxu2 %v5264_v48  ;;  %v5386_v48 = vld [vmem:[#allocation25 + $0x48] sm:$0xff] }
 0x954   : > { %5130 = vmatmul.f32.gmra.mxu3 %v5046_v1  ;;  %5171 = vmatmul.f32.gmra.mxu0 %v5046_v1 }
 0x955   : > { %5212 = vmatmul.f32.gmra.mxu1 %v5046_v1  ;;  %5282 = vmatpush.msrb.mxu2 %v5263_v37  ;;  %v5324_v37 = vld [vmem:[#allocation23 + $0x40] sm:$0xff] }
 0x957   : > { %5283 = vmatpush.msrb.mxu2 %v5262_v39  ;;  %v5323_v39 = vld [vmem:[#allocation23 + $0x38] sm:$0xff] }
 0x959   : > { %5284 = vmatpush.msrb.mxu2 %v5261_v44 }
 0x95b   : > { %5285 = vmatpush.msrb.mxu2 %v5260_v43 }
 0x95d   : > { %5286 = vmatpush.msrb.mxu2 %v5259_v41 }
 0x95f   : > { %5287 = vmatpush.msrb.mxu2 %v5258_v12  ;;  %v5382_v12 = vld [vmem:[#allocation25 + $0x28] sm:$0xff] }
 0x961   : > { %5288 = vmatpush.msrb.mxu2 %v5257_v34  ;;  %v5381_v34 = vld [vmem:[#allocation25 + $0x20] sm:$0xff] }
 0x963   : > { %5289 = vmatpush.msrb.mxu2 %v5256_v46 }
 0x965   : > { %5290 = vmatpush.msrb.mxu2 %v5255_v53 }
 0x973   : > { %v4917_v25 = vpop.xlane.xlu1 %4916 }
 0x974   : > { %v4929_v0 = vmul.f32 %v4917_v25, %v12430_v33  ;;  %v5326_v25 = vld [vmem:[#allocation23 + $0x50] sm:$0xff] }
 0x975   : > { %5341 = vmatpush.msra.mxu3 %v5326_v25 }
 0x976   : > { %v4937_v62 = vadd.f32 1e-05, %v4929_v0  ;;  %v5387_v0 = vld [vmem:[#allocation25 + $0x50] sm:$0xff] }
 0x978   : > { %9927 = vrsqrt.f32 %v4937_v62  ;;  %vm4978_vm3 = vweird.f32 %v4937_v62 }
 0x97b   : > { %v4919_v51 = vpop.xlane.xlu0 %4918 }
 0x97c   : > { %v4930_v60 = vmul.f32 %v4919_v51, %v12430_v33 }
 0x97e   : > { %v9928_v10 = vpop.eup %9927  ;;  %v4938_v42 = vadd.f32 1e-05, %v4930_v60 }
 0x97f   : > { %v4973_v5 = vmul.f32 %v9928_v10, %v4937_v62  ;;  %vm4979_vm2 = vweird.f32 %v9928_v10  ;;  %v5325_v62 = vld [vmem:[#allocation23 + $0x48] sm:$0xff] }
 0x980   : > { %9929 = vrsqrt.f32 %v4938_v42  ;;  %vm4980_vm6 = vmor %vm4978_vm3, %vm4979_vm2  ;;  %vm4988_vm8 = vweird.f32 %v4938_v42  ;;  %5342 = vmatpush.msra.mxu3 %v5325_v62 }
 0x981   : > { %v4974_v17 = vmul.f32 %v9928_v10, %v4973_v5 }
 0x982   : > { %5343 = vmatpush.msra.mxu3 %v5324_v37 }
 0x983   : > { %v4975_v47 = vmul.f32 0.5, %v4974_v17  ;;  %v4921_v50 = vpop.xlane.xlu2 %4920  ;;  %v5384_v17 = vld [vmem:[#allocation25 + $0x38] sm:$0xff] }
 0x984   : > { %v4931_v35 = vmul.f32 %v4921_v50, %v12430_v33  ;;  %v5322_v50 = vld [vmem:[#allocation23 + $0x30] sm:$0xff]  ;;  %5344 = vmatpush.msra.mxu3 %v5323_v39 }
 0x985   : > { %v4976_v30 = vsub.f32 1.5, %v4975_v47 }
 0x986   : > { %v9930_v16 = vpop.eup %9929  ;;  %v12714_v31 = vadd.f32 1e-05, %v4931_v35  ;;  %5345 = vmatpush.msra.mxu3 %v5322_v50 }
 0x987   : > { %v4977_v2 = vmul.f32 %v9928_v10, %v4976_v30  ;;  %v4983_v26 = vmul.f32 %v9930_v16, %v4938_v42  ;;  %vm4989_vm7 = vweird.f32 %v9930_v16  ;;  %v5383_v30 = vld [vmem:[#allocation25 + $0x30] sm:$0xff] }
 0x988   : > { %9931 = vrsqrt.f32 %v12714_v31  ;;  %vm4990_vm9 = vmor %vm4988_vm8, %vm4989_vm7  ;;  %vm4998_vm11 = vweird.f32 %v12714_v31 }
 0x989   : > { %v4984_v11 = vmul.f32 %v9930_v16, %v4983_v26  ;;  %v4981_v14 = vsel %vm4980_vm6, %v9928_v10, %v4977_v2  ;;  %v5385_v10 = vld [vmem:[#allocation25 + $0x40] sm:$0xff] }
 0x98a   : > { %v5025_v21 = vmul.f32 %v4981_v14, %v12665_v29  ;;  %v5390_v29 = vld [vmem:[#allocation25 + $0x68] sm:$0xff] }
 0x98b   : > { %v4985_v6 = vmul.f32 0.5, %v4984_v11  ;;  %v4923_v54 = vpop.xlane.xlu1 %4922  ;;  %5399 = vmatpush.msrb.mxu0 %v5390_v29  ;;  %v5320_v11 = vld [vmem:[#allocation23 + $0x20] sm:$0xff]  ;;  %v5378_v29 = vld [vmem:[#allocation25 + $0x8] sm:$0xff] }
 0x98c   : > { %v4932_v13 = vmul.f32 %v4923_v54, %v12430_v33  ;;  %v5036_v40 = vmul.f32 %v12689_v22, %v5025_v21  ;;  %v5319_v21 = vld [vmem:[#allocation23 + $0x18] sm:$0xff] }
 0x98d   : > { %v4986_v63 = vsub.f32 1.5, %v4985_v6  ;;  %5400 = vmatpush.msrb.mxu0 %v5389_v23  ;;  %v12738_v6 = vperm.slane %v5100_v9, 0  ;;  %v5380_v54 = vld [vmem:[#allocation25 + $0x18] sm:$0xff] }
 0x98e   : > { %v9932_v36 = vpop.eup %9931  ;;  %v12720_v18 = vadd.f32 1e-05, %v4932_v13  ;;  %v5047_v15 = vadd.f32 %v12693_v27, %v5036_v40  ;;  %v5379_v40 = vld [vmem:[#allocation25 + $0x10] sm:$0xff] }
 0x98f   : > { %v4987_v3 = vmul.f32 %v9930_v16, %v4986_v63  ;;  %v4993_v49 = vmul.f32 %v9932_v36, %v12714_v31  ;;  %5401 = vmatpush.msrb.mxu0 %v5388_v45  ;;  %vm4999_vm10 = vweird.f32 %v9932_v36  ;;  %v12745_v45 = vperm.slane %v5100_v9, 1 }
 0x990   : > { %9933 = vrsqrt.f32 %v12720_v18  ;;  %5133 = vmatmul.f32.gmra.mxu3 %v5047_v15  ;;  %5174 = vmatmul.f32.gmra.mxu0 %v5047_v15  ;;  %vm5000_vm12 = vmor %vm4998_vm11, %vm4999_vm10  ;;  %vm5008_vm14 = vweird.f32 %v12720_v18 }
 0x991   : > { %v4994_v38 = vmul.f32 %v9932_v36, %v4993_v49  ;;  %5215 = vmatmul.f32.gmra.mxu1 %v5047_v15  ;;  %v4991_v1 = vsel %vm4990_vm9, %v9930_v16, %v4987_v3  ;;  %5402 = vmatpush.msrb.mxu0 %v5387_v0  ;;  %v5377_v3 = vld [vmem:[#allocation25] sm:$0xff] }
 0x992   : > { %v5026_v56 = vmul.f32 %v4991_v1, %v12671_v32 }
 0x993   : > { %v4995_v7 = vmul.f32 0.5, %v4994_v38  ;;  %5403 = vmatpush.msrb.mxu0 %v5386_v48 }
 0x994   : > { %v5037_v4 = vmul.f32 %v12689_v22, %v5026_v56  ;;  %v12747_v56 = vperm.slane %v5100_v9, 2 }
 0x995   : > { %v4996_v52 = vsub.f32 1.5, %v4995_v7  ;;  %5404 = vmatpush.msrb.mxu0 %v5385_v10 }
 0x996   : > { %v9934_v19 = vpop.eup %9933  ;;  %v5048_v51 = vadd.f32 %v12693_v27, %v5037_v4 }
 0x997   : > { %v4997_v60 = vmul.f32 %v9932_v36, %v4996_v52  ;;  %v5003_v32 = vmul.f32 %v9934_v19, %v12720_v18  ;;  %vm5009_vm13 = vweird.f32 %v9934_v19  ;;  %5405 = vmatpush.msrb.mxu0 %v5384_v17  ;;  %v5316_v18 = vld [vmem:[#allocation23] sm:$0xff] }
 0x998   : > { %5136 = vmatmul.f32.gmra.mxu3 %v5048_v51  ;;  %5177 = vmatmul.f32.gmra.mxu0 %v5048_v51  ;;  %vm5010_vm15 = vmor %vm5008_vm14, %vm5009_vm13 }
 0x999   : > { %v5004_v42 = vmul.f32 %v9934_v19, %v5003_v32  ;;  %5218 = vmatmul.f32.gmra.mxu1 %v5048_v51  ;;  %v5001_v5 = vsel %vm5000_vm12, %v9932_v36, %v4997_v60  ;;  %5406 = vmatpush.msrb.mxu0 %v5383_v30 }
 0x99a   : > { %v5027_v44 = vmul.f32 %v5001_v5, %v12678_v28  ;;  %v5321_v28 = vld [vmem:[#allocation23 + $0x28] sm:$0xff] }
 0x99b   : > { %v5005_v47 = vmul.f32 0.5, %v5004_v42  ;;  %5346 = vmatpush.msra.mxu3 %v5321_v28  ;;  %5407 = vmatpush.msrb.mxu0 %v5382_v12 }
 0x99c   : > { %v4925_v43 = vpop.xlane.xlu0 %4924  ;;  %v5038_v35 = vmul.f32 %v12689_v22, %v5027_v44  ;;  %v5166_v7 = vpop.f32.mrf.mxu0 }
 0x99d   : > { %v5006_v41 = vsub.f32 1.5, %v5005_v47  ;;  %v4933_v16 = vmul.f32 %v4925_v43, %v12430_v33  ;;  %5347 = vmatpush.msra.mxu3 %v5320_v11  ;;  %5408 = vmatpush.msrb.mxu0 %v5381_v34  ;;  %v5207_v0 = vpop.f32.mrf.mxu1  ;;  %v5167_v4 = vadd.f32 %v5166_v7, %v12745_v45 }
 0x99e   : > { %v5049_v31 = vadd.f32 %v12693_v27, %v5038_v35  ;;  %v5208_v62 = vadd.f32 %v5207_v0, %v12747_v56 }
 0x99f   : > { %v5007_v2 = vmul.f32 %v9934_v19, %v5006_v41  ;;  %v4941_v26 = vadd.f32 1e-05, %v4933_v16  ;;  %5348 = vmatpush.msra.mxu3 %v5319_v21  ;;  %5409 = vmatpush.msrb.mxu0 %v5380_v54  ;;  %v5232_v52 = vmax.f32 %v5167_v4, 0.0 }
 0x9a0   : > { %5139 = vmatmul.f32.gmra.mxu3 %v5049_v31  ;;  %5180 = vmatmul.f32.gmra.mxu0 %v5049_v31 }
 0x9a1   : > { %9935 = vrsqrt.f32 %v4941_v26  ;;  %5221 = vmatmul.f32.gmra.mxu1 %v5049_v31  ;;  %v5011_v14 = vsel %vm5010_vm15, %v9934_v19, %v5007_v2  ;;  %5349 = vmatpush.msra.mxu3 %v5318_v57  ;;  %vm5018_vm3 = vweird.f32 %v4941_v26  ;;  %v5233_v19 = vmax.f32 %v5208_v62, 0.0 }
 0x9a2   : > { %v5028_v24 = vmul.f32 %v5011_v14, %v12684_v55  ;;  %v5125_v61 = vpop.f32.mrf.mxu3  ;;  %v5317_v55 = vld [vmem:[#allocation23 + $0x8] sm:$0xff]  ;;  %5410 = vmatpush.msrb.mxu0 %v5379_v40 }
 0x9a3   : > { %v5126_v53 = vadd.f32 %v5125_v61, %v12738_v6  ;;  %5350 = vmatpush.msra.mxu3 %v5317_v55 }
 0x9a4   : > { %v5039_v46 = vmul.f32 %v12689_v22, %v5028_v24  ;;  %5411 = vmatpush.msrb.mxu0 %v5378_v29 }
 0x9a5   : > { %v5231_v36 = vmax.f32 %v5126_v53, 0.0  ;;  %5351 = vmatpush.msra.mxu3 %v5316_v18 }
 0x9a6   : > { %v5050_v13 = vadd.f32 %v12693_v27, %v5039_v46  ;;  %5412 = vmatpush.msrb.mxu0 %v5377_v3 }
 0x9a7   : > { %v9936_v63 = vpop.eup %9935  ;;  %5291 = vmatmul.f32.vlgmr.msrb.gmra.mxu2 %v5231_v36 }
 0x9a8   : > { %v5013_v58 = vmul.f32 %v9936_v63, %v4941_v26  ;;  %5142 = vmatmul.f32.gmra.mxu3 %v5050_v13  ;;  %5183 = vmatmul.f32.gmra.mxu0 %v5050_v13  ;;  %vm5019_vm2 = vweird.f32 %v9936_v63 }
 0x9a9   : > { %5224 = vmatmul.f32.gmra.mxu1 %v5050_v13  ;;  %vm5020_vm6 = vmor %vm5018_vm3, %vm5019_vm2 }
 0x9aa   : > { %v5014_v15 = vmul.f32 %v9936_v63, %v5013_v58 }
 0x9ac   : > { %v5015_v49 = vmul.f32 0.5, %v5014_v15 }
 0x9ae   : > { %v5016_v20 = vsub.f32 1.5, %v5015_v49 }
 0x9b0   : > { %v5017_v23 = vmul.f32 %v9936_v63, %v5016_v20 }
 0x9b2   : > { %v5021_v8 = vsel %vm5020_vm6, %v9936_v63, %v5017_v23 }
 0x9b3   : > { %v5029_v38 = vmul.f32 %v5021_v8, %v12699_v59 }
 0x9b5   : > { %v5040_v1 = vmul.f32 %v12689_v22, %v5029_v38 }
 0x9b7   : > { %v5051_v25 = vadd.f32 %v12693_v27, %v5040_v1  ;;  %v12770_v1 = vld [vmem:[%s14272_s5] ss:$0 sm:$0xff]  ;;  %s8824_s5 = scalar_lea.hbm %s14321_s22, %s9369_s28 }
 0x9b9   : > { %5145 = vmatmul.f32.gmra.mxu3 %v5051_v25  ;;  %5186 = vmatmul.f32.gmra.mxu0 %v5051_v25 }
 0x9ba   : > { %5227 = vmatmul.f32.gmra.mxu1 %v5051_v25 }
 0x9c1   : > { %5352 = vmatmul.f32.vlgmr.msra.gmra.mxu3 %v5232_v52  ;;  %5413 = vmatmul.f32.vlgmr.msrb.gmra.mxu0 %v5233_v19 }
 0x9c9   : > { %v5169_v22 = vpop.f32.mrf.mxu0 }
 0x9ca   : > { %v5170_v59 = vadd.f32 %v5169_v22, %v12745_v45  ;;  %v5210_v51 = vpop.f32.mrf.mxu1 }
 0x9cb   : > { %v5211_v48 = vadd.f32 %v5210_v51, %v12747_v56 }
 0x9cc   : > { %v5235_v27 = vmax.f32 %v5170_v59, 0.0 }
 0x9cd   : > { %v5236_v60 = vmax.f32 %v5211_v48, 0.0 }
 0x9ce   : > { %5355 = vmatmul.f32.gmra.mxu3 %v5235_v27 }
 0x9cf   : > { %5416 = vmatmul.f32.gmra.mxu0 %v5236_v60  ;;  %v5128_v32 = vpop.f32.mrf.mxu3 }
 0x9d0   : > { %v5129_v37 = vadd.f32 %v5128_v32, %v12738_v6  ;;  %v12782_v32 = vld [vmem:[%s14273_s14] ss:$0 sm:$0xff]  ;;  %s1435_s14 = scalar_lea.vmem [#allocation32], %s9151_s6 }
 0x9d1   : > { %v5172_v10 = vpop.f32.mrf.mxu0 }
 0x9d2   : > { %v5234_v42 = vmax.f32 %v5129_v37, 0.0  ;;  %v5173_v5 = vadd.f32 %v5172_v10, %v12745_v45  ;;  %v5213_v39 = vpop.f32.mrf.mxu1 }
 0x9d3   : > { %v5214_v44 = vadd.f32 %v5213_v39, %v12747_v56 }
 0x9d4   : > { %v5238_v17 = vmax.f32 %v5173_v5, 0.0  ;;  %5294 = vmatmul.f32.gmra.mxu2 %v5234_v42 }
 0x9d5   : > { %v5239_v47 = vmax.f32 %v5214_v44, 0.0 }
 0x9d6   : > { %5358 = vmatmul.f32.gmra.mxu3 %v5238_v17 }
 0x9d7   : > { %5419 = vmatmul.f32.gmra.mxu0 %v5239_v47  ;;  %v5131_v50 = vpop.f32.mrf.mxu3 }
 0x9d8   : > { %v5132_v43 = vadd.f32 %v5131_v50, %v12738_v6 }
 0x9da   : > { %v5237_v35 = vmax.f32 %v5132_v43, 0.0 }
 0x9dc   : > { %5297 = vmatmul.f32.gmra.mxu2 %v5237_v35 }
 0xa0d   : > { %v5175_v30 = vpop.f32.mrf.mxu0 }
 0xa0e   : > { %v5176_v41 = vadd.f32 %v5175_v30, %v12745_v45  ;;  %v5216_v16 = vpop.f32.mrf.mxu1 }
 0xa0f   : > { %v5217_v31 = vadd.f32 %v5216_v16, %v12747_v56 }
 0xa10   : > { %v5241_v28 = vmax.f32 %v5176_v41, 0.0 }
 0xa11   : > { %v5242_v2 = vmax.f32 %v5217_v31, 0.0 }
 0xa12   : > { %5361 = vmatmul.f32.gmra.mxu3 %v5241_v28 }
 0xa13   : > { %5422 = vmatmul.f32.gmra.mxu0 %v5242_v2  ;;  %v5134_v26 = vpop.f32.mrf.mxu3 }
 0xa14   : > { %v5135_v12 = vadd.f32 %v5134_v26, %v12738_v6 }
 0xa15   : > { %v5178_v11 = vpop.f32.mrf.mxu0 }
 0xa16   : > { %v5240_v14 = vmax.f32 %v5135_v12, 0.0  ;;  %v5179_v34 = vadd.f32 %v5178_v11, %v12745_v45  ;;  %v5219_v9 = vpop.f32.mrf.mxu1 }
 0xa17   : > { %v5220_v24 = vadd.f32 %v5219_v9, %v12747_v56 }
 0xa18   : > { %v5244_v21 = vmax.f32 %v5179_v34, 0.0  ;;  %5300 = vmatmul.f32.gmra.mxu2 %v5240_v14 }
 0xa19   : > { %v5245_v54 = vmax.f32 %v5220_v24, 0.0 }
 0xa1a   : > { %5364 = vmatmul.f32.gmra.mxu3 %v5244_v21 }
 0xa1b   : > { %5425 = vmatmul.f32.gmra.mxu0 %v5245_v54  ;;  %v5137_v46 = vpop.f32.mrf.mxu3 }
 0xa1c   : > { %v5138_v57 = vadd.f32 %v5137_v46, %v12738_v6 }
 0xa1d   : > { %v5181_v61 = vpop.f32.mrf.mxu0 }
 0xa1e   : > { %v5243_v13 = vmax.f32 %v5138_v57, 0.0  ;;  %v5182_v40 = vadd.f32 %v5181_v61, %v12745_v45  ;;  %v5222_v63 = vpop.f32.mrf.mxu1 }
 0xa1f   : > { %v5223_v53 = vadd.f32 %v5222_v63, %v12747_v56 }
 0xa20   : > { %v5247_v55 = vmax.f32 %v5182_v40, 0.0  ;;  %5303 = vmatmul.f32.gmra.mxu2 %v5243_v13 }
 0xa21   : > { %v5248_v58 = vmax.f32 %v5223_v53, 0.0 }
 0xa22   : > { %5367 = vmatmul.f32.gmra.mxu3 %v5247_v55 }
 0xa23   : > { %5428 = vmatmul.f32.gmra.mxu0 %v5248_v58  ;;  %v5140_v29 = vpop.f32.mrf.mxu3 }
 0xa24   : > { %v5141_v36 = vadd.f32 %v5140_v29, %v12738_v6 }
 0xa25   : > { %v5184_v18 = vpop.f32.mrf.mxu0 }
 0xa26   : > { %v5246_v15 = vmax.f32 %v5141_v36, 0.0  ;;  %v5185_v3 = vadd.f32 %v5184_v18, %v12745_v45  ;;  %v5225_v49 = vpop.f32.mrf.mxu1 }
 0xa27   : > { %v5226_v20 = vadd.f32 %v5225_v49, %v12747_v56 }
 0xa28   : > { %v5250_v23 = vmax.f32 %v5185_v3, 0.0  ;;  %5306 = vmatmul.f32.gmra.mxu2 %v5246_v15 }
 0xa29   : > { %v5251_v8 = vmax.f32 %v5226_v20, 0.0 }
 0xa2a   : > { %5370 = vmatmul.f32.gmra.mxu3 %v5250_v23  ;;  %v5292_v0 = vpop.f32.mrf.mxu2 }
 0xa2b   : > { %5431 = vmatmul.f32.gmra.mxu0 %v5251_v8  ;;  %v5143_v38 = vpop.f32.mrf.mxu3  ;;  %v12774_v4 = vadd.f32 %v12770_v1, %v5292_v0 }
 0xa2c   : > { %v5144_v25 = vadd.f32 %v5143_v38, %v12738_v6 }
 0xa2d   : > { %14274 = vst [vmem:[#allocation88_spill] sm:$0xff] %v12774_v4  ;;  %5478 = vrot.lane.b32.xlu0 %v12774_v4, %s10832_s13 }
 0xa2e   : > { %v5249_v7 = vmax.f32 %v5144_v25, 0.0 }
 0xa30   : > { %5309 = vmatmul.f32.gmra.mxu2 %v5249_v7 }
 0xa36   : > { %v5187_v62 = vpop.f32.mrf.mxu0 }
 0xa37   : > { %v5188_v52 = vadd.f32 %v5187_v62, %v12745_v45  ;;  %v5228_v19 = vpop.f32.mrf.mxu1  ;;  %v12789_v45 = vld [vmem:[%s14275_s15] ss:$0 sm:$0xff]  ;;  %s8826_s15 = sshll.u32 %s1435_s14, 4  ;;  %s8827_s15 = int_to_ptr.vmem [resolvable:$true] %s8826_s15 }
 0xa38   : > { %v5229_v22 = vadd.f32 %v5228_v19, %v12747_v56 }
 0xa39   : > { %v5253_v59 = vmax.f32 %v5188_v52, 0.0 }
 0xa3a   : > { %v5254_v51 = vmax.f32 %v5229_v22, 0.0 }
 0xa3b   : > { %5373 = vmatmul.f32.gmra.mxu3 %v5253_v59 }
 0xa3c   : > { %5434 = vmatmul.f32.gmra.mxu0 %v5254_v51  ;;  %v5146_v48 = vpop.f32.mrf.mxu3 }
 0xa3d   : > { %v5147_v27 = vadd.f32 %v5146_v48, %v12738_v6 }
 0xa3e   : > { %v5414_v37 = vpop.f32.mrf.mxu0 }
 0xa3f   : > { %v5252_v60 = vmax.f32 %v5147_v27, 0.0  ;;  %v12794_v56 = vadd.f32 %v12789_v45, %v5414_v37 }
 0xa41   : > { %5312 = vmatmul.f32.gmra.mxu2 %v5252_v60 }
 0xa44   : > { %v5353_v10 = vpop.f32.mrf.mxu3 }
 0xa45   : > { %v5354_v42 = vadd.f32 %v12782_v32, %v5353_v10 }
 0xa47   : > { %5518 = vrot.lane.b32.xlu1 %v5354_v42, %s10833_s12  ;;  %5502 = vrot.lane.b32.xlu2 %v5354_v42, %s10834_s3 }
 0xa48   : > { %9272 = vmatpush.xpose.msk.msrb.mxu1 %vm1465_vm0, %v5354_v42 }
 0xa4b   : > { %9273 = vmatmul.msk.f32.vlgmr.msrb.gmra.mxu1 %vm1465_vm0, %v12774_v4 }
 0xa4c   : > { %v5417_v6 = vpop.f32.mrf.mxu0 }
 0xa4d   : > { %v12797_v5 = vadd.f32 %v12789_v45, %v5417_v6 }
 0xa4f   : > { %5534 = vrot.lane.b32.xlu1 %v5354_v42, %s10832_s13  ;;  %v9702_v39 = vpack.i.bf16 %v12797_v5, %v12794_v56 }
 0xa51   : > { %9703 = vrot.lane.b32.xlu2 %v9702_v39, %s10832_s13  ;;  %v5356_v44 = vpop.f32.mrf.mxu3 }
 0xa52   : > { %v5357_v17 = vadd.f32 %v12782_v32, %v5356_v44 }
 0xa54   : > { %v5420_v47 = vpop.f32.mrf.mxu0  ;;  %5504 = vrot.lane.b32.xlu0 %v5357_v17, %s10834_s3  ;;  %9274 = vmatpush.xpose.msk.msra.mxu2 %vm1465_vm0, %v5357_v17 }
 0xa55   : > { %v12807_v50 = vadd.f32 %v12789_v45, %v5420_v47 }
 0xa57   : > { %v5295_v43 = vpop.f32.mrf.mxu2  ;;  %5446 = vrot.lane.b32.xlu1 %v12774_v4, %s10834_s3  ;;  %v9712_v16 = vpack.i.bf16 %v12807_v50, %v12797_v5 }
 0xa58   : > { %v12812_v35 = vadd.f32 %v12770_v1, %v5295_v43 }
 0xa59   : > { %5520 = vrot.lane.b32.xlu2 %v5357_v17, %s10833_s12  ;;  %v5359_v30 = vpop.f32.mrf.mxu3 }
 0xa5a   : > { %14276 = vst [vmem:[#allocation86_spill] sm:$0xff] %v12812_v35  ;;  %v5360_v41 = vadd.f32 %v12782_v32, %v5359_v30  ;;  %9275 = vmatmul.msk.f32.vlgmr.msra.gmra.mxu2 %vm1465_vm0, %v12812_v35 }
 0xa5c   : > { %9713 = vrot.lane.b32.xlu0 %v9712_v16, %s10833_s12  ;;  %9276 = vmatpush.xpose.msk.msra.mxu1 %vm1465_vm0, %v5360_v41 }
 0xa5f   : > { %v5298_v31 = vpop.f32.mrf.mxu2  ;;  %5462 = vrot.lane.b32.xlu1 %v12774_v4, %s10833_s12 }
 0xa60   : > { %v12825_v28 = vadd.f32 %v12770_v1, %v5298_v31 }
 0xa61   : > { %5536 = vrot.lane.b32.xlu2 %v5357_v17, %s10832_s13 }
 0xa62   : > { %14277 = vst [vmem:[#allocation87_spill] sm:$0xff] %v12825_v28  ;;  %9277 = vmatmul.msk.f32.vlgmr.msra.gmra.mxu1 %vm1465_vm0, %v12825_v28 }
 0xa64   : > { %5448 = vrot.lane.b32.xlu0 %v12812_v35, %s10834_s3 }
 0xa67   : > { %5464 = vrot.lane.b32.xlu1 %v12812_v35, %s10833_s12 }
 0xa69   : > { %9708 = vrot.lane.b32.xlu2 %v9712_v16, %s10834_s3 }
 0xa6c   : > { %5466 = vrot.lane.b32.xlu0 %v12825_v28, %s10833_s12 }
 0xa6f   : > { %5480 = vrot.lane.b32.xlu1 %v12812_v35, %s10832_s13 }
 0xa71   : > { %5506 = vrot.lane.b32.xlu2 %v5360_v41, %s10834_s3 }
 0xa77   : > { %5522 = vrot.lane.b32.xlu1 %v5360_v41, %s10833_s12 }
 0xa79   : > { %5482 = vrot.lane.b32.xlu2 %v12825_v28, %s10832_s13 }
 0xa7f   : > { %5538 = vrot.lane.b32.xlu1 %v5360_v41, %s10832_s13 }
 0xa87   : > { %5450 = vrot.lane.b32.xlu1 %v12825_v28, %s10834_s3 }
 0xa90   : > { %v5423_v2 = vpop.f32.mrf.mxu0 }
 0xa91   : > { %v12865_v57 = vadd.f32 %v12789_v45, %v5423_v2 }
 0xa95   : > { %v5362_v26 = vpop.f32.mrf.mxu3 }
 0xa96   : > { %v5363_v12 = vadd.f32 %v12782_v32, %v5362_v26 }
 0xa98   : > { %v5426_v11 = vpop.f32.mrf.mxu0  ;;  %9278 = vmatpush.xpose.msk.msrb.mxu2 %vm1465_vm0, %v5363_v12  ;;  %5508 = vrot.lane.b32.xlu2 %v5363_v12, %s10834_s3 }
 0xa99   : > { %v12850_v14 = vadd.f32 %v12789_v45, %v5426_v11 }
 0xa9b   : > { %v5301_v34 = vpop.f32.mrf.mxu2  ;;  %v9722_v9 = vpack.i.bf16 %v12850_v14, %v12794_v56 }
 0xa9c   : > { %v12855_v24 = vadd.f32 %v12770_v1, %v5301_v34 }
 0xa9d   : > { %9723 = vrot.lane.b32.xlu0 %v9722_v9, %s10833_s12  ;;  %9718 = vrot.lane.b32.xlu1 %v9722_v9, %s10834_s3  ;;  %v5365_v21 = vpop.f32.mrf.mxu3 }
 0xa9e   : > { %14278 = vst [vmem:[#allocation89_spill] sm:$0xff] %v12855_v24  ;;  %v5366_v54 = vadd.f32 %v12782_v32, %v5365_v21  ;;  %9279 = vmatmul.msk.f32.vlgmr.msrb.gmra.mxu2 %vm1465_vm0, %v12855_v24 }
 0xa9f   : > { %v12919_v25 = vpop.permute.xlu0 %5478 }
 0xaa0   : > { %v5429_v46 = vpop.f32.mrf.mxu0  ;;  %5524 = vrot.lane.b32.xlu2 %v5363_v12, %s10833_s12  ;;  %9280 = vmatpush.xpose.msk.msrb.mxu1 %vm1465_vm0, %v5366_v54 }
 0xaa1   : > { %v12868_v61 = vadd.f32 %v12789_v45, %v5429_v46  ;;  %v5503_v13 = vpop.permute.xlu2 %5502 }
 0xaa3   : > { %v5304_v40 = vpop.f32.mrf.mxu2  ;;  %v12872_v63 = vpack.i.bf16 %v12865_v57, %v12868_v61 }
 0xaa4   : > { %v12875_v53 = vadd.f32 %v12770_v1, %v5304_v40 }
 0xaa5   : > { %5468 = vrot.lane.b32.xlu0 %v12855_v24, %s10833_s12  ;;  %9728 = vrot.lane.b32.xlu1 %v12872_v63, %s10834_s3  ;;  %v5368_v55 = vpop.f32.mrf.mxu3 }
 0xaa6   : > { %14279 = vst [vmem:[#allocation78_spill] sm:$0xff] %v12875_v53  ;;  %v5369_v58 = vadd.f32 %v12782_v32, %v5368_v55  ;;  %9281 = vmatmul.msk.f32.vlgmr.msrb.gmra.mxu1 %vm1465_vm0, %v12875_v53 }
 0xaa8   : > { %5540 = vrot.lane.b32.xlu2 %v5363_v12, %s10832_s13  ;;  %9282 = vmatpush.xpose.msk.msra.mxu2 %vm1465_vm0, %v5369_v58  ;;  %v5432_v51 = vpop.f32.mrf.mxu0 }
 0xaa9   : > { %v12950_v10 = vadd.f32 %v12789_v45, %v5432_v51 }
 0xaab   : > { %v12886_v29 = vpop.permute.xlu2 %9703  ;;  %v5307_v36 = vpop.f32.mrf.mxu2 }
 0xaac   : > { %v12889_v18 = vadd.f32 %v12770_v1, %v5307_v36 }
 0xaad   : > { %5484 = vrot.lane.b32.xlu0 %v12855_v24, %s10832_s13  ;;  %5486 = vrot.lane.b32.xlu1 %v12875_v53, %s10832_s13  ;;  %v5371_v15 = vpop.f32.mrf.mxu3 }
 0xaae   : > { %14280 = vst [vmem:[#allocation79_spill] sm:$0xff] %v12889_v18  ;;  %v5372_v3 = vadd.f32 %v12782_v32, %v5371_v15  ;;  %9283 = vmatmul.msk.f32.vlgmr.msra.gmra.mxu2 %vm1465_vm0, %v12889_v18 }
 0xab0   : > { %5452 = vrot.lane.b32.xlu2 %v12855_v24, %s10834_s3  ;;  %9284 = vmatpush.xpose.msk.msra.mxu1 %vm1465_vm0, %v5372_v3 }
 0xab3   : > { %v5521_v49 = vpop.permute.xlu2 %5520  ;;  %v5310_v20 = vpop.f32.mrf.mxu2 }
 0xab4   : > { %9288 = vmatpush.xpose.msk.msrb.mxu1 %vm1465_vm0, %v5503_v13  ;;  %v12903_v23 = vadd.f32 %v12770_v1, %v5310_v20  ;;  %9306 = vmatpush.xpose.msk.msra.mxu0 %vm1465_vm0, %v5521_v49 }
 0xab5   : > { %5510 = vrot.lane.b32.xlu0 %v5366_v54, %s10834_s3  ;;  %5456 = vrot.lane.b32.xlu1 %v12889_v18, %s10834_s3 }
 0xab6   : > { %14281 = vst [vmem:[#allocation80_spill] sm:$0xff] %v12903_v23  ;;  %9285 = vmatmul.msk.f32.vlgmr.msra.gmra.mxu1 %vm1465_vm0, %v12903_v23 }
 0xab8   : > { %5470 = vrot.lane.b32.xlu2 %v12875_v53, %s10833_s12 }
 0xab9   : > { %v5519_v8 = vpop.permute.xlu1 %5518  ;;  %v5435_v60 = vpop.f32.mrf.mxu0 }
 0xaba   : > { %9304 = vmatpush.xpose.msk.msrb.mxu3 %vm1465_vm0, %v5519_v8  ;;  %v12946_v37 = vadd.f32 %v12789_v45, %v5435_v60 }
 0xabb   : > { %v12914_v38 = vpop.permute.xlu2 %5536 }
 0xabc   : > { %v12958_v6 = vpack.i.bf16 %v12946_v37, %v12950_v10 }
 0xabd   : > { %5526 = vrot.lane.b32.xlu0 %v5366_v54, %s10833_s12  ;;  %5472 = vrot.lane.b32.xlu1 %v12889_v18, %s10833_s12 }
 0xabe   : > { %v5374_v7 = vpop.f32.mrf.mxu3 }
 0xabf   : > { %v5375_v0 = vadd.f32 %v12782_v32, %v5374_v7 }
 0xac0   : > { %5512 = vrot.lane.b32.xlu2 %v5369_v58, %s10834_s3 }
 0xac1   : > { %v12923_v62 = vpop.permute.xlu1 %5534  ;;  %9286 = vmatpush.xpose.msk.msrb.mxu2 %vm1465_vm0, %v5375_v0 }
 0xac3   : > { %v12926_v52 = vpop.permute.xlu2 %9708 }
 0xac4   : > { %v5313_v19 = vpop.f32.mrf.mxu2  ;;  %v9710_v24 = vunpack.i.l.bf16 %v12926_v52 }
 0xac5   : > { %5542 = vrot.lane.b32.xlu0 %v5366_v54, %s10832_s13  ;;  %5514 = vrot.lane.b32.xlu1 %v5372_v3, %s10834_s3  ;;  %v12931_v22 = vadd.f32 %v12770_v1, %v5313_v19 }
 0xac6   : > { %v5505_v59 = vpop.permute.xlu0 %5504 }
 0xac7   : > { %14282 = vst [vmem:[#allocation82_spill] sm:$0xff] %v12931_v22  ;;  %9290 = vmatpush.xpose.msk.msra.mxu2 %vm1465_vm0, %v5505_v59 }
 0xac8   : > { %5528 = vrot.lane.b32.xlu2 %v5369_v58, %s10833_s12  ;;  %9287 = vmatmul.msk.f32.vlgmr.msrb.gmra.mxu2 %vm1465_vm0, %v12931_v22  ;;  %v13003_v21 = vpop.f32.mrf.mxu1 }
 0xac9   : > { %v5447_v48 = vpop.permute.xlu1 %5446  ;;  %v6398_v13 = vsel %vm2780_vm1, %v13003_v21, -inf }
 0xaca   : > { %9289 = vmatmul.msk.f32.vlgmr.msrb.gmra.mxu1 %vm1465_vm0, %v5447_v48 }
 0xacb   : > { %v5507_v27 = vpop.permute.xlu2 %5506 }
 0xacc   : > { %9292 = vmatpush.xpose.msk.msra.mxu1 %vm1465_vm0, %v5507_v27 }
 0xacd   : > { %5454 = vrot.lane.b32.xlu0 %v12875_v53, %s10834_s3  ;;  %5530 = vrot.lane.b32.xlu1 %v5372_v3, %s10833_s12 }
 0xace   : > { %v12942_v1 = vpop.permute.xlu0 %9713 }
 0xad0   : > { %5544 = vrot.lane.b32.xlu2 %v5369_v58, %s10832_s13 }
 0xad1   : > { %v5463_v32 = vpop.permute.xlu1 %5462 }
 0xad2   : > { %9305 = vmatmul.msk.f32.vlgmr.msrb.gmra.mxu3 %vm1465_vm0, %v5463_v32 }
 0xad3   : > { %v12975_v17 = vpop.permute.xlu2 %5482 }
 0xad5   : > { %5488 = vrot.lane.b32.xlu0 %v12889_v18, %s10832_s13  ;;  %5490 = vrot.lane.b32.xlu1 %v12903_v23, %s10832_s13 }
 0xad6   : > { %v5449_v42 = vpop.permute.xlu0 %5448 }
 0xad7   : > { %9291 = vmatmul.msk.f32.vlgmr.msra.gmra.mxu2 %vm1465_vm0, %v5449_v42 }
 0xad8   : > { %9733 = vrot.lane.b32.xlu2 %v12958_v6, %s10834_s3 }
 0xad9   : > { %v5465_v39 = vpop.permute.xlu1 %5464 }
 0xada   : > { %9307 = vmatmul.msk.f32.vlgmr.msra.gmra.mxu0 %vm1465_vm0, %v5465_v39 }
 0xadd   : > { %5546 = vrot.lane.b32.xlu0 %v5372_v3, %s10832_s13  ;;  %5548 = vrot.lane.b32.xlu1 %v5375_v0, %s10832_s13  ;;  %v12992_v31 = vpop.f32.mrf.mxu2 }
 0xade   : > { %v6401_v2 = vsel %vm2780_vm1, %v12992_v31, -inf  ;;  %v12996_v26 = vpop.permute.xlu0 %5466 }
 0xadf   : > { %v13018_v49 = vpop.f32.mrf.mxu1 }
 0xae0   : > { %5532 = vrot.lane.b32.xlu2 %v5375_v0, %s10833_s12  ;;  %v6404_v20 = vsel %vm2780_vm1, %v13018_v49, -inf }
 0xae1   : > { %v12967_v45 = vpop.permute.xlu1 %5480 }
 0xae5   : > { %5458 = vrot.lane.b32.xlu0 %v12903_v23, %s10834_s3 }
 0xae8   : > { %5460 = vrot.lane.b32.xlu2 %v12931_v22, %s10834_s3 }
 0xae9   : > { %v12973_v44 = vpop.permute.xlu1 %5522 }
 0xaed   : > { %5474 = vrot.lane.b32.xlu0 %v12903_v23, %s10833_s12 }
 0xaf0   : > { %5492 = vrot.lane.b32.xlu2 %v12931_v22, %s10832_s13 }
 0xaf1   : > { %v12981_v47 = vpop.permute.xlu1 %5538 }
 0xaf2   : > { %v5509_v43 = vpop.permute.xlu2 %5508 }
 0xaf3   : > { %9294 = vmatpush.xpose.msk.msrb.mxu2 %vm1465_vm0, %v5509_v43 }
 0xaf5   : > { %5516 = vrot.lane.b32.xlu0 %v5375_v0, %s10834_s3 }
 0xaf9   : > { %v5451_v30 = vpop.permute.xlu1 %5450 }
 0xafa   : > { %v12985_v41 = vpop.permute.xlu2 %5524  ;;  %9293 = vmatmul.msk.f32.vlgmr.msra.gmra.mxu1 %vm1465_vm0, %v5451_v30 }
 0xafd   : > { %5476 = vrot.lane.b32.xlu0 %v12931_v22, %s10833_s12 }
 0xb02   : > { %v12990_v16 = vpop.permute.xlu2 %5540 }
 0xb07   : > { %6402 = vmax.xlane.f32.xlu1 %v6401_v2 }
 0xb0a   : > { %v5453_v12 = vpop.permute.xlu2 %5452 }
 0xb0b   : > { %9295 = vmatmul.msk.f32.vlgmr.msrb.gmra.mxu2 %vm1465_vm0, %v5453_v12 }
 0xb0f   : > { %v12999_v11 = vpop.permute.xlu1 %9718  ;;  %v13001_v34 = vpop.permute.xlu0 %9723 }
 0xb12   : > { %v5471_v9 = vpop.permute.xlu2 %5470 }
 0xb17   : > { %v13005_v54 = vpop.permute.xlu1 %9728  ;;  %v13007_v46 = vpop.permute.xlu0 %5468 }
 0xb19   : > { %6399 = vmax.xlane.f32.xlu2 %v6398_v13 }
 0xb1a   : > { %v5513_v40 = vpop.permute.xlu2 %5512 }
 0xb1b   : > { %9298 = vmatpush.xpose.msk.msra.mxu2 %vm1465_vm0, %v5513_v40 }
 0xb1f   : > { %v5487_v55 = vpop.permute.xlu1 %5486  ;;  %v13012_v58 = vpop.permute.xlu0 %5484 }
 0xb21   : > { %v13014_v36 = vpop.f32.mrf.mxu2 }
 0xb22   : > { %v5529_v15 = vpop.permute.xlu2 %5528  ;;  %v6407_v3 = vsel %vm2780_vm1, %v13014_v36, -inf }
 0xb23   : > { %9314 = vmatpush.xpose.msk.msrb.mxu0 %vm1465_vm0, %v5529_v15  ;;  %6408 = vmax.xlane.f32.xlu2 %v6407_v3  ;;  %v13027_v0 = vpop.f32.mrf.mxu1 }
 0xb24   : > { %v6410_v19 = vsel %vm2780_vm1, %v13027_v0, -inf }
 0xb27   : > { %9322 = vmatpush.xpose.msk.msra.mxu0 %vm1465_vm0, %v12914_v38  ;;  %v5457_v8 = vpop.permute.xlu1 %5456  ;;  %6405 = vmax.xlane.f32.xlu0 %v6404_v20  ;;  %v5511_v7 = vpop.permute.xlu0 %5510 }
 0xb28   : > { %9296 = vmatpush.xpose.msk.msrb.mxu1 %vm1465_vm0, %v5511_v7  ;;  %9299 = vmatmul.msk.f32.vlgmr.msra.gmra.mxu2 %vm1465_vm0, %v5457_v8 }
 0xb2a   : > { %v5545_v48 = vpop.permute.xlu2 %5544 }
 0xb2f   : > { %v5473_v59 = vpop.permute.xlu1 %5472  ;;  %6411 = vmax.xlane.f32.xlu0 %v6410_v19  ;;  %v5527_v51 = vpop.permute.xlu0 %5526 }
 0xb30   : > { %9312 = vmatpush.xpose.msk.msra.mxu3 %vm1465_vm0, %v5527_v51  ;;  %9315 = vmatmul.msk.f32.vlgmr.msrb.gmra.mxu0 %vm1465_vm0, %v5473_v59 }
 0xb31   : > { %9330 = vmatpush.xpose.msk.msrb.mxu0 %vm1465_vm0, %v5545_v48  ;;  %v13036_v38 = vpop.f32.mrf.mxu2 }
 0xb32   : > { %v6413_v27 = vsel %vm2780_vm1, %v13036_v38, -inf  ;;  %v13070_v2 = vpop.permute.xlu2 %9733 }
 0xb33   : > { %9313 = vmatmul.msk.f32.vlgmr.msra.gmra.mxu3 %vm1465_vm0, %v5471_v9  ;;  %6414 = vmax.xlane.f32.xlu1 %v6413_v27  ;;  %v13041_v60 = vpop.f32.mrf.mxu1 }
 0xb34   : > { %9320 = vmatpush.xpose.msk.msrb.mxu3 %vm1465_vm0, %v12923_v62  ;;  %v6416_v62 = vsel %vm2780_vm1, %v13041_v60, -inf }
 0xb37   : > { %v5515_v32 = vpop.permute.xlu1 %5514  ;;  %v5543_v42 = vpop.permute.xlu0 %5542 }
 0xb38   : > { %9300 = vmatpush.xpose.msk.msra.mxu1 %vm1465_vm0, %v5515_v32  ;;  %9323 = vmatmul.msk.f32.vlgmr.msra.gmra.mxu0 %vm1465_vm0, %v12967_v45 }
 0xb39   : > { %9328 = vmatpush.xpose.msk.msra.mxu3 %vm1465_vm0, %v5543_v42  ;;  %7207 = vmatpush.msra.mxu0 %v12797_v5 }
 0xb3a   : > { %v5533_v8 = vpop.permute.xlu2 %5532 }
 0xb3b   : > { %9321 = vmatmul.msk.f32.vlgmr.msrb.gmra.mxu3 %vm1465_vm0, %v12919_v25  ;;  %6417 = vmax.xlane.f32.xlu1 %v6416_v62 }
 0xb3d   : > { %7184 = vmatpush.msrb.mxu3 %v12794_v56 }
 0xb3f   : > { %v5455_v39 = vpop.permute.xlu0 %5454  ;;  %v5531_v13 = vpop.permute.xlu1 %5530 }
 0xb40   : > { %9297 = vmatmul.msk.f32.vlgmr.msrb.gmra.mxu1 %vm1465_vm0, %v5455_v39 }
 0xb41   : > { %9308 = vmatpush.xpose.msk.msrb.mxu1 %vm1465_vm0, %v12973_v44 }
 0xb42   : > { %v5461_v59 = vpop.permute.xlu2 %5460 }
 0xb43   : > { %9329 = vmatmul.msk.f32.vlgmr.msra.gmra.mxu3 %vm1465_vm0, %v5487_v55 }
 0xb44   : > { %7276 = vmatpush.msra.mxu3 %v12850_v14 }
 0xb47   : > { %v5489_v5 = vpop.permute.xlu0 %5488  ;;  %v13059_v45 = vpop.f32.mrf.mxu1 }
 0xb48   : > { %9331 = vmatmul.msk.f32.vlgmr.msrb.gmra.mxu0 %vm1465_vm0, %v5489_v5  ;;  %v6422_v56 = vsel %vm2780_vm1, %v13059_v45, -inf  ;;  %v5491_v19 = vpop.permute.xlu1 %5490 }
 0xb49   : > { %7299 = vmatpush.msrb.mxu0 %v12868_v61  ;;  %6423 = vmax.xlane.f32.xlu2 %v6422_v56 }
 0xb4b   : > { %v13064_v25 = vpop.f32.mrf.mxu2 }
 0xb4c   : > { %v6419_v44 = vsel %vm2780_vm1, %v13064_v25, -inf }
 0xb4d   : > { %6420 = vmax.xlane.f32.xlu0 %v6419_v44 }
 0xb4f   : > { %v5547_v43 = vpop.permute.xlu0 %5546 }
 0xb55   : > { %v13068_v30 = vpop.f32.mrf.mxu3 }
 0xb56   : > { %v6446_v12 = vsel %vm2780_vm1, %v13068_v30, -inf }
 0xb57   : > { %v5459_v9 = vpop.permute.xlu0 %5458  ;;  %6447 = vmax.xlane.f32.xlu1 %v6446_v12  ;;  %v13078_v55 = vpop.f32.mrf.mxu0 }
 0xb58   : > { %9301 = vmatmul.msk.f32.vlgmr.msra.gmra.mxu1 %vm1465_vm0, %v5459_v9  ;;  %v6449_v3 = vsel %vm2780_vm1, %v13078_v55, -inf }
 0xb59   : > { %9316 = vmatpush.xpose.msk.msra.mxu1 %vm1465_vm0, %v5531_v13 }
 0xb5a   : > { %v13076_v40 = vpop.f32.mrf.mxu2 }
 0xb5b   : > { %v6425_v15 = vsel %vm2780_vm1, %v13076_v40, -inf }
 0xb5c   : > { %6426 = vmax.xlane.f32.xlu2 %v6425_v15 }
 0xb5f   : > { %v5475_v20 = vpop.permute.xlu0 %5474  ;;  %6450 = vmax.xlane.f32.xlu1 %v6449_v3 }
 0xb60   : > { %9309 = vmatmul.msk.f32.vlgmr.msrb.gmra.mxu1 %vm1465_vm0, %v12996_v26 }
 0xb61   : > { %9324 = vmatpush.xpose.msk.msrb.mxu1 %vm1465_vm0, %v12981_v47  ;;  %v5549_v47 = vpop.permute.xlu1 %5548 }
 0xb67   : > { %v5517_v7 = vpop.permute.xlu0 %5516 }
 0xb68   : > { %9302 = vmatpush.xpose.msk.msrb.mxu2 %vm1465_vm0, %v5517_v7  ;;  %9317 = vmatmul.msk.f32.vlgmr.msra.gmra.mxu1 %vm1465_vm0, %v5475_v20 }
 0xb69   : > { %9332 = vmatpush.xpose.msk.msra.mxu1 %vm1465_vm0, %v5547_v43 }
 0xb6b   : > { %9303 = vmatmul.msk.f32.vlgmr.msrb.gmra.mxu2 %vm1465_vm0, %v5461_v59 }
 0xb6c   : > { %9310 = vmatpush.xpose.msk.msra.mxu2 %vm1465_vm0, %v12985_v41 }
 0xb70   : > { %9318 = vmatpush.xpose.msk.msrb.mxu2 %vm1465_vm0, %v5533_v8  ;;  %9325 = vmatmul.msk.f32.vlgmr.msrb.gmra.mxu1 %vm1465_vm0, %v12975_v17  ;;  %v5477_v17 = vpop.permute.xlu0 %5476 }
 0xb71   : > { %7230 = vmatpush.msrb.mxu1 %v12807_v50 }
 0xb73   : > { %9311 = vmatmul.msk.f32.vlgmr.msra.gmra.mxu2 %vm1465_vm0, %v13007_v46 }
 0xb74   : > { %9326 = vmatpush.xpose.msk.msra.mxu2 %vm1465_vm0, %v12990_v16  ;;  %v5493_v16 = vpop.permute.xlu2 %5492 }
 0xb77   : > { %v13102_v26 = vpop.f32.mrf.mxu1 }
 0xb78   : > { %9333 = vmatmul.msk.f32.vlgmr.msra.gmra.mxu1 %vm1465_vm0, %v5491_v19  ;;  %v6428_v41 = vsel %vm2780_vm1, %v13102_v26, -inf }
 0xb79   : > { %7322 = vmatpush.msra.mxu1 %v12950_v10  ;;  %6429 = vmax.xlane.f32.xlu2 %v6428_v41 }
 0xb7a   : > { %v6403_v51 = vpop.xlane.xlu1 %6402 }
 0xb7b   : > { %v6495_v48 = vsub.f32 %v12992_v31, %v6403_v51  ;;  %9319 = vmatmul.msk.f32.vlgmr.msrb.gmra.mxu2 %vm1465_vm0, %v5477_v17 }
 0xb7c   : > { %9334 = vmatpush.xpose.msk.msrb.mxu2 %vm1465_vm0, %v5549_v47 }
 0xb7d   : > { %v6528_v46 = vmul.f32 1.442695, %v6495_v48 }
 0xb7f   : > { %9937 = vpow2.f32 %v6528_v46 }
 0xb83   : > { %9327 = vmatmul.msk.f32.vlgmr.msra.gmra.mxu2 %vm1465_vm0, %v13012_v58 }
 0xb84   : > { %7253 = vmatpush.msra.mxu2 %v12865_v57 }
 0xb85   : > { %v13114_v27 = vpop.eup %9937 }
 0xb86   : > { %v6593_v10 = vsel %vm2780_vm1, %v13114_v27, 0.0 }
 0xb87   : > { %6594 = vadd.xlane.f32.xlu0 %v6593_v10 }
 0xb8b   : > { %9335 = vmatmul.msk.f32.vlgmr.msrb.gmra.mxu2 %vm1465_vm0, %v5493_v16 }
 0xb8c   : > { %7345 = vmatpush.msrb.mxu2 %v12946_v37  ;;  %v6400_v31 = vpop.xlane.xlu2 %6399 }
 0xb8d   : > { %v6494_v32 = vsub.f32 %v13003_v21, %v6400_v31 }
 0xb8e   : > { %v13130_v21 = vpop.f32.mrf.mxu2 }
 0xb8f   : > { %v6526_v42 = vmul.f32 1.442695, %v6494_v32  ;;  %v6431_v13 = vsel %vm2780_vm1, %v13130_v21, -inf }
 0xb91   : > { %9939 = vpow2.f32 %v6526_v42 }
 0xb96   : > { %v6409_v7 = vpop.xlane.xlu2 %6408 }
 0xb97   : > { %v13121_v62 = vpop.eup %9939  ;;  %v6497_v19 = vsub.f32 %v13014_v36, %v6409_v7 }
 0xb98   : > { %v6590_v58 = vsel %vm2780_vm1, %v13121_v62, 0.0 }
 0xb99   : > { %6591 = vadd.xlane.f32.xlu1 %v6590_v58  ;;  %v6532_v51 = vmul.f32 1.442695, %v6497_v19 }
 0xb9a   : > { %v6406_v39 = vpop.xlane.xlu0 %6405 }
 0xb9b   : > { %v6496_v5 = vsub.f32 %v13018_v49, %v6406_v39 }
 0xb9d   : > { %v6530_v56 = vmul.f32 1.442695, %v6496_v5 }
 0xb9f   : > { %9941 = vpow2.f32 %v6530_v56 }
 0xba2   : > { %v6412_v43 = vpop.xlane.xlu0 %6411 }
 0xba3   : > { %v6498_v9 = vsub.f32 %v13027_v0, %v6412_v43 }
 0xba5   : > { %v13126_v44 = vpop.eup %9941  ;;  %v6534_v49 = vmul.f32 1.442695, %v6498_v9 }
 0xba6   : > { %v6596_v37 = vsel %vm2780_vm1, %v13126_v44, 0.0  ;;  %v6415_v31 = vpop.xlane.xlu1 %6414 }
 0xba7   : > { %6597 = vadd.xlane.f32.xlu1 %v6596_v37  ;;  %9943 = vpow2.f32 %v6534_v49  ;;  %v6499_v5 = vsub.f32 %v13036_v38, %v6415_v31 }
 0xba8   : > { %9945 = vpow2.f32 %v6532_v51 }
 0xbab   : > { %v13166_v32 = vpop.f32.mrf.mxu2 }
 0xbac   : > { %v6437_v58 = vsel %vm2780_vm1, %v13166_v32, -inf }
 0xbad   : > { %v13132_v12 = vpop.f32.mrf.mxu0  ;;  %v13145_v0 = vpop.eup %9943 }
 0xbae   : > { %v6602_v17 = vsel %vm2780_vm1, %v13145_v0, 0.0  ;;  %v6461_v46 = vsel %vm2780_vm1, %v13132_v12, -inf  ;;  %v13162_v16 = vpop.eup %9945  ;;  %v6418_v39 = vpop.xlane.xlu1 %6417 }
 0xbaf   : > { %6432 = vmax.xlane.f32.xlu1 %v6431_v13  ;;  %v6599_v10 = vsel %vm2780_vm1, %v13162_v16, 0.0  ;;  %v6500_v56 = vsub.f32 %v13041_v60, %v6418_v39  ;;  %v6536_v13 = vmul.f32 1.442695, %v6499_v5 }
 0xbb1   : > { %v6538_v49 = vmul.f32 1.442695, %v6500_v56  ;;  %9947 = vpow2.f32 %v6536_v13 }
 0xbb3   : > { %9949 = vpow2.f32 %v6538_v49 }
 0xbb5   : > { %v13137_v15 = vpop.f32.mrf.mxu0 }
 0xbb6   : > { %v13139_v3 = vpop.f32.mrf.mxu3  ;;  %v6473_v20 = vsel %vm2780_vm1, %v13137_v15, -inf }
 0xbb7   : > { %6474 = vmax.xlane.f32.xlu1 %v6473_v20  ;;  %v6458_v8 = vsel %vm2780_vm1, %v13139_v3, -inf  ;;  %v13188_v19 = vpop.eup %9947 }
 0xbb8   : > { %6459 = vmax.xlane.f32.xlu2 %v6458_v8 }
 0xbbd   : > { %v13148_v59 = vpop.f32.mrf.mxu1 }
 0xbbe   : > { %v13150_v47 = vpop.f32.mrf.mxu3  ;;  %v6434_v41 = vsel %vm2780_vm1, %v13148_v59, -inf }
 0xbbf   : > { %6435 = vmax.xlane.f32.xlu0 %v6434_v41  ;;  %v6470_v43 = vsel %vm2780_vm1, %v13150_v47, -inf  ;;  %v13190_v41 = vpop.eup %9949 }
 0xbc0   : > { %6603 = vadd.xlane.f32.xlu2 %v6602_v17  ;;  %v6424_v17 = vpop.xlane.xlu2 %6423  ;;  %v6421_v31 = vpop.xlane.xlu0 %6420 }
 0xbc1   : > { %v6502_v51 = vsub.f32 %v13059_v45, %v6424_v17  ;;  %v6501_v56 = vsub.f32 %v13064_v25, %v6421_v31 }
 0xbc3   : > { %v6542_v39 = vmul.f32 1.442695, %v6502_v51 }
 0xbc5   : > { %v13180_v20 = vpop.f32.mrf.mxu0  ;;  %9951 = vpow2.f32 %v6542_v39 }
 0xbc6   : > { %v13156_v48 = vpop.f32.mrf.mxu3  ;;  %v6485_v60 = vsel %vm2780_vm1, %v13180_v20, -inf }
 0xbc7   : > { %6462 = vmax.xlane.f32.xlu0 %v6461_v46  ;;  %v6482_v36 = vsel %vm2780_vm1, %v13156_v48, -inf }
 0xbc8   : > { %6483 = vmax.xlane.f32.xlu2 %v6482_v36  ;;  %v6608_v36 = vsel %vm2780_vm1, %v13190_v41, 0.0 }
 0xbca   : > { %v6448_v7 = vpop.xlane.xlu1 %6447 }
 0xbcf   : > { %6600 = vadd.xlane.f32.xlu0 %v6599_v10  ;;  %v6605_v10 = vsel %vm2780_vm1, %v13188_v19, 0.0  ;;  %v6427_v17 = vpop.xlane.xlu2 %6426 }
 0xbd2   : > { %v6451_v5 = vpop.xlane.xlu1 %6450 }
 0xbd3   : > { %v6511_v45 = vsub.f32 %v13078_v55, %v6451_v5  ;;  %v13213_v55 = vpop.eup %9951 }
 0xbd5   : > { %v13168_v42 = vpop.f32.mrf.mxu1 }
 0xbd6   : > { %v6440_v38 = vsel %vm2780_vm1, %v13168_v42, -inf }
 0xbd7   : > { %6438 = vmax.xlane.f32.xlu0 %v6437_v58 }
 0xbdd   : > { %v13174_v37 = vpop.f32.mrf.mxu1 }
 0xbde   : > { %v6452_v9 = vsel %vm2780_vm1, %v13174_v37, -inf }
 0xbdf   : > { %6471 = vmax.xlane.f32.xlu0 %v6470_v43  ;;  %6453 = vmax.xlane.f32.xlu2 %v6452_v9 }
 0xbe5   : > { %v13186_v8 = vpop.f32.mrf.mxu1 }
 0xbe6   : > { %v6464_v9 = vsel %vm2780_vm1, %v13186_v8, -inf }
 0xbe7   : > { %6441 = vmax.xlane.f32.xlu0 %v6440_v38  ;;  %6486 = vmax.xlane.f32.xlu2 %v6485_v60  ;;  %v6540_v38 = vmul.f32 1.442695, %v6501_v56  ;;  %v6560_v60 = vmul.f32 1.442695, %v6511_v45  ;;  %v6614_v56 = vsel %vm2780_vm1, %v13213_v55, 0.0 }
 0xbed   : > { %v13199_v58 = vpop.f32.mrf.mxu1 }
 0xbee   : > { %v13193_v46 = vpop.f32.mrf.mxu2  ;;  %v6476_v5 = vsel %vm2780_vm1, %v13199_v58, -inf }
 0xbef   : > { %6609 = vadd.xlane.f32.xlu0 %v6608_v36  ;;  %6606 = vadd.xlane.f32.xlu2 %v6605_v10  ;;  %v6443_v13 = vsel %vm2780_vm1, %v13193_v46, -inf  ;;  %v6510_v36 = vsub.f32 %v13068_v30, %v6448_v7  ;;  %v6503_v10 = vsub.f32 %v13076_v40, %v6427_v17 }
 0xbf1   : > { %v6544_v40 = vmul.f32 1.442695, %v6503_v10 }
 0xbf5   : > { %v13211_v51 = vpop.f32.mrf.mxu1 }
 0xbf6   : > { %v13203_v43 = vpop.f32.mrf.mxu2  ;;  %v6488_v39 = vsel %vm2780_vm1, %v13211_v51, -inf }
 0xbf7   : > { %6465 = vmax.xlane.f32.xlu0 %v6464_v9  ;;  %6444 = vmax.xlane.f32.xlu2 %v6443_v13  ;;  %v6455_v49 = vsel %vm2780_vm1, %v13203_v43, -inf  ;;  %v6558_v9 = vmul.f32 1.442695, %v6510_v36 }
 0xbf8   : > { %6456 = vmax.xlane.f32.xlu1 %v6455_v49 }
 0xbfa   : > { %v6595_v25 = vpop.xlane.xlu0 %6594 }
 0xbfb   : > { %9953 = vrcp.f32 %v6595_v25  ;;  %vm6706_vm8 = vweird.f32 %v6595_v25 }
 0xbfc   : > { %9955 = vpow2.f32 %v6540_v38  ;;  %v6712_v38 = vand.u32 2147483648, %v6595_v25 }
 0xbfd   : > { %9957 = vpow2.f32 %v6560_v60 }
 0xbfe   : > { %v13217_v31 = vpop.f32.mrf.mxu2  ;;  %9959 = vpow2.f32 %v6558_v9  ;;  %v6713_v9 = vor.u32 1.1754944e-38, %v6712_v38 }
 0xbff   : > { %6489 = vmax.xlane.f32.xlu0 %v6488_v39  ;;  %6477 = vmax.xlane.f32.xlu2 %v6476_v5  ;;  %9961 = vpow2.f32 %v6544_v40  ;;  %v6710_v39 = vand.u32 2147483647, %v6595_v25 }
 0xc00   : > { %6615 = vadd.xlane.f32.xlu1 %v6614_v56 }
 0xc01   : > { %v9954_v45 = vpop.eup %9953  ;;  %vm6711_vm10 = vcmp.eq.f32.partialorder %v6710_v39, 8.507059e+37 }
 0xc02   : > { %v13225_v30 = vpop.eup %9955  ;;  %v6702_v7 = vmul.f32 %v9954_v45, %v6595_v25  ;;  %vm6707_vm7 = vweird.f32 %v9954_v45  ;;  %v6467_v25 = vsel %vm2780_vm1, %v13217_v31, -inf }
 0xc03   : > { %v13227_v13 = vpop.eup %9957  ;;  %v6611_v60 = vsel %vm2780_vm1, %v13225_v30, 0.0  ;;  %vm6708_vm9 = vmor %vm6706_vm8, %vm6707_vm7 }
 0xc04   : > { %v6703_v49 = vsub.f32 1.0, %v6702_v7  ;;  %v6641_v10 = vsel %vm2780_vm1, %v13227_v13, 0.0  ;;  %v6430_v7 = vpop.xlane.xlu2 %6429 }
 0xc06   : > { %v6704_v17 = vmul.f32 %v9954_v45, %v6703_v49  ;;  %v13231_v5 = vpop.f32.mrf.mxu2  ;;  %v13237_v49 = vpop.eup %9959 }
 0xc07   : > { %6612 = vadd.xlane.f32.xlu2 %v6611_v60  ;;  %v6479_v36 = vsel %vm2780_vm1, %v13231_v5, -inf  ;;  %v13239_v23 = vpop.eup %9961 }
 0xc08   : > { %v6705_v56 = vadd.f32 %v9954_v45, %v6704_v17  ;;  %6480 = vmax.xlane.f32.xlu0 %v6479_v36  ;;  %6642 = vadd.xlane.f32.xlu1 %v6641_v10  ;;  %v6504_v17 = vsub.f32 %v13102_v26, %v6430_v7  ;;  %v6617_v38 = vsel %vm2780_vm1, %v13239_v23, 0.0 }
 0xc0a   : > { %v6709_v40 = vsel %vm6708_vm9, %v9954_v45, %v6705_v56  ;;  %v6638_v45 = vsel %vm2780_vm1, %v13237_v49, 0.0 }
 0xc0b   : > { %v6714_v22 = vsel %vm6711_vm10, %v6713_v9, %v6709_v40 }
 0xc0c   : > { %v6715_v60 = vmul.f32 %v13114_v27, %v6714_v22  ;;  %v6592_v33 = vpop.xlane.xlu1 %6591  ;;  %v6546_v22 = vmul.f32 1.442695, %v6504_v17 }
 0xc0d   : > { %9963 = vrcp.f32 %v6592_v33  ;;  %v6695_v9 = vand.u32 2147483647, %v6592_v33  ;;  %vm6691_vm12 = vweird.f32 %v6592_v33 }
 0xc0e   : > { %9337 = vmatmul.msk.f32.vlgmr.msra.gmra.mxu0 %vm2780_vm1, %v6715_v60  ;;  %v13251_v39 = vpop.f32.mrf.mxu2  ;;  %9965 = vpow2.f32 %v6546_v22 }
 0xc0f   : > { %7391 = vmatpush.msra.mxu0 %v9710_v24  ;;  %6468 = vmax.xlane.f32.xlu2 %v6467_v25  ;;  %v6491_v10 = vsel %vm2780_vm1, %v13251_v39, -inf  ;;  %v6697_v24 = vand.u32 2147483648, %v6592_v33  ;;  %vm6696_vm14 = vcmp.eq.f32.partialorder %v6695_v9, 8.507059e+37 }
 0xc10   : > { %6639 = vadd.xlane.f32.xlu0 %v6638_v45  ;;  %6618 = vadd.xlane.f32.xlu1 %v6617_v38 }
 0xc11   : > { %v6698_v17 = vor.u32 1.1754944e-38, %v6697_v24 }
 0xc13   : > { %v9964_v27 = vpop.eup %9963 }
 0xc14   : > { %v6687_v26 = vmul.f32 %v9964_v27, %v6592_v33  ;;  %vm6692_vm11 = vweird.f32 %v9964_v27  ;;  %v13255_v60 = vpop.eup %9965 }
 0xc15   : > { %vm6693_vm13 = vmor %vm6691_vm12, %vm6692_vm11  ;;  %v6620_v22 = vsel %vm2780_vm1, %v13255_v60, 0.0 }
 0xc16   : > { %v6688_v36 = vsub.f32 1.0, %v6687_v26  ;;  %v9720_v26 = vunpack.i.l.bf16 %v12999_v11 }
 0xc17   : > { %6492 = vmax.xlane.f32.xlu2 %v6491_v10 }
 0xc18   : > { %v6689_v56 = vmul.f32 %v9964_v27, %v6688_v36 }
 0xc1a   : > { %v6690_v7 = vadd.f32 %v9964_v27, %v6689_v56  ;;  %v6598_v40 = vpop.xlane.xlu1 %6597 }
 0xc1b   : > { %9967 = vrcp.f32 %v6598_v40  ;;  %vm6721_vm2 = vweird.f32 %v6598_v40 }
 0xc1c   : > { %v6694_v25 = vsel %vm6693_vm13, %v9964_v27, %v6690_v7  ;;  %v6727_v27 = vand.u32 2147483648, %v6598_v40 }
 0xc1d   : > { %v6699_v45 = vsel %vm6696_vm14, %v6698_v17, %v6694_v25 }
 0xc1e   : > { %v6700_v38 = vmul.f32 %v13121_v62, %v6699_v45  ;;  %v6725_v62 = vand.u32 2147483647, %v6598_v40  ;;  %v6728_v25 = vor.u32 1.1754944e-38, %v6727_v27 }
 0xc1f   : > { %6621 = vadd.xlane.f32.xlu2 %v6620_v22 }
 0xc20   : > { %9336 = vmatmul.msk.f32.vlgmr.msrb.gmra.mxu3 %vm2780_vm1, %v6700_v38  ;;  %vm6726_vm6 = vcmp.eq.f32.partialorder %v6725_v62, 8.507059e+37 }
 0xc21   : > { %v9968_v33 = vpop.eup %9967  ;;  %7368 = vmatpush.msrb.mxu3 %v9720_v26 }
 0xc22   : > { %v6717_v36 = vmul.f32 %v9968_v33, %v6598_v40  ;;  %v6433_v10 = vpop.xlane.xlu1 %6432  ;;  %vm6722_vm15 = vweird.f32 %v9968_v33 }
 0xc23   : > { %v6505_v24 = vsub.f32 %v13130_v21, %v6433_v10  ;;  %vm6723_vm3 = vmor %vm6721_vm2, %vm6722_vm15 }
 0xc24   : > { %v6718_v56 = vsub.f32 1.0, %v6717_v36  ;;  %v9711_v36 = vunpack.i.h.bf16 %v12926_v52 }
 0xc25   : > { %v6548_v9 = vmul.f32 1.442695, %v6505_v24 }
 0xc26   : > { %v6719_v7 = vmul.f32 %v9968_v33, %v6718_v56 }
 0xc27   : > { %9969 = vpow2.f32 %v6548_v9 }
 0xc28   : > { %v6720_v17 = vadd.f32 %v9968_v33, %v6719_v7 }
 0xc2a   : > { %v6724_v45 = vsel %vm6723_vm3, %v9968_v33, %v6720_v17 }
 0xc2b   : > { %v6729_v38 = vsel %vm6726_vm6, %v6728_v25, %v6724_v45  ;;  %v6460_v22 = vpop.xlane.xlu2 %6459 }
 0xc2c   : > { %v6730_v26 = vmul.f32 %v13126_v44, %v6729_v38  ;;  %v6514_v18 = vsub.f32 %v13139_v3, %v6460_v22 }
 0xc2d   : > { %v13265_v21 = vpop.eup %9969 }
 0xc2e   : > { %v6566_v10 = vmul.f32 1.442695, %v6514_v18  ;;  %9338 = vmatmul.msk.f32.vlgmr.msrb.gmra.mxu1 %vm2780_vm1, %v6730_v26  ;;  %v6623_v40 = vsel %vm2780_vm1, %v13265_v21, 0.0 }
 0xc2f   : > { %7414 = vmatpush.msrb.mxu1 %v9711_v36  ;;  %6624 = vadd.xlane.f32.xlu2 %v6623_v40 }
 0xc30   : > { %9971 = vpow2.f32 %v6566_v10 }
 0xc32   : > { %v6436_v33 = vpop.xlane.xlu0 %6435 }
 0xc33   : > { %v6506_v24 = vsub.f32 %v13148_v59, %v6436_v33  ;;  %v6604_v56 = vpop.xlane.xlu2 %6603  ;;  %v9721_v33 = vunpack.i.h.bf16 %v12999_v11 }
 0xc34   : > { %9973 = vrcp.f32 %v6604_v56  ;;  %v6757_v17 = vand.u32 2147483648, %v6604_v56  ;;  %v6755_v45 = vand.u32 2147483647, %v6604_v56  ;;  %vm6751_vm8 = vweird.f32 %v6604_v56 }
 0xc35   : > { %v6550_v44 = vmul.f32 1.442695, %v6506_v24 }
 0xc36   : > { %v13272_v3 = vpop.eup %9971  ;;  %v6758_v22 = vor.u32 1.1754944e-38, %v6757_v17  ;;  %vm6756_vm10 = vcmp.eq.f32.partialorder %v6755_v45, 8.507059e+37 }
 0xc37   : > { %9975 = vpow2.f32 %v6550_v44  ;;  %v6650_v18 = vsel %vm2780_vm1, %v13272_v3, 0.0 }
 0xc38   : > { %6651 = vadd.xlane.f32.xlu0 %v6650_v18 }
 0xc3a   : > { %v9974_v52 = vpop.eup %9973  ;;  %v13276_v27 = vpop.xlane.xlu0 %6462 }
 0xc3b   : > { %v6747_v9 = vmul.f32 %v9974_v52, %v6604_v56  ;;  %vm6752_vm7 = vweird.f32 %v9974_v52  ;;  %v13285_v44 = vpop.xlane.xlu2 %6483 }
 0xc3c   : > { %vm6753_vm9 = vmor %vm6751_vm8, %vm6752_vm7 }
 0xc3d   : > { %v13278_v7 = vpop.eup %9975  ;;  %v6748_v62 = vsub.f32 1.0, %v6747_v9 }
 0xc3e   : > { %v6626_v59 = vsel %vm2780_vm1, %v13278_v7, 0.0 }
 0xc3f   : > { %v6749_v25 = vmul.f32 %v9974_v52, %v6748_v62  ;;  %6627 = vadd.xlane.f32.xlu1 %v6626_v59 }
 0xc41   : > { %v6750_v38 = vadd.f32 %v9974_v52, %v6749_v25 }
 0xc42   : > { %v6601_v26 = vpop.xlane.xlu0 %6600 }
 0xc43   : > { %v6754_v36 = vsel %vm6753_vm9, %v9974_v52, %v6750_v38  ;;  %9977 = vrcp.f32 %v6601_v26  ;;  %v6742_v17 = vand.u32 2147483648, %v6601_v26  ;;  %v6740_v25 = vand.u32 2147483647, %v6601_v26 }
 0xc44   : > { %v6759_v10 = vsel %vm6756_vm10, %v6758_v22, %v6754_v36  ;;  %vm6736_vm12 = vweird.f32 %v6601_v26 }
 0xc45   : > { %v6760_v40 = vmul.f32 %v13145_v0, %v6759_v10  ;;  %v6743_v11 = vor.u32 1.1754944e-38, %v6742_v17  ;;  %vm6741_vm14 = vcmp.eq.f32.partialorder %v6740_v25, 8.507059e+37 }
 0xc47   : > { %9340 = vmatmul.msk.f32.vlgmr.msra.gmra.mxu3 %vm2780_vm1, %v6760_v40 }
 0xc48   : > { %7460 = vmatpush.msra.mxu3 %v9721_v33  ;;  %v9731_v33 = vunpack.i.h.bf16 %v13005_v54 }
 0xc49   : > { %v9978_v24 = vpop.eup %9977 }
 0xc4a   : > { %v6732_v18 = vmul.f32 %v9978_v24, %v6601_v26  ;;  %v6439_v9 = vpop.xlane.xlu0 %6438  ;;  %vm6737_vm11 = vweird.f32 %v9978_v24 }
 0xc4b   : > { %v6507_v56 = vsub.f32 %v13166_v32, %v6439_v9  ;;  %vm6738_vm13 = vmor %vm6736_vm12, %vm6737_vm11 }
 0xc4c   : > { %v6733_v62 = vsub.f32 1.0, %v6732_v18 }
 0xc4d   : > { %v6552_v52 = vmul.f32 1.442695, %v6507_v56 }
 0xc4e   : > { %v6734_v59 = vmul.f32 %v9978_v24, %v6733_v62 }
 0xc4f   : > { %9979 = vpow2.f32 %v6552_v52 }
 0xc50   : > { %v6735_v0 = vadd.f32 %v9978_v24, %v6734_v59 }
 0xc52   : > { %v6739_v45 = vsel %vm6738_vm13, %v9978_v24, %v6735_v0  ;;  %v6454_v38 = vpop.xlane.xlu2 %6453  ;;  %v6472_v22 = vpop.xlane.xlu0 %6471 }
 0xc53   : > { %v6744_v36 = vsel %vm6741_vm14, %v6743_v11, %v6739_v45  ;;  %v6518_v10 = vsub.f32 %v13150_v47, %v6472_v22  ;;  %v6512_v47 = vsub.f32 %v13174_v37, %v6454_v38 }
 0xc54   : > { %v6745_v32 = vmul.f32 %v13162_v16, %v6744_v36 }
 0xc55   : > { %v13290_v40 = vpop.eup %9979  ;;  %v6574_v18 = vmul.f32 1.442695, %v6518_v10  ;;  %v6562_v17 = vmul.f32 1.442695, %v6512_v47 }
 0xc56   : > { %9339 = vmatmul.msk.f32.vlgmr.msra.gmra.mxu2 %vm2780_vm1, %v6745_v32  ;;  %v6629_v26 = vsel %vm2780_vm1, %v13290_v40, 0.0 }
 0xc57   : > { %7437 = vmatpush.msra.mxu2 %v9731_v33  ;;  %6630 = vadd.xlane.f32.xlu0 %v6629_v26  ;;  %9981 = vpow2.f32 %v6574_v18 }
 0xc58   : > { %9738 = vrot.lane.b32.xlu1 %v12872_v63, %s10833_s12  ;;  %v13306_v63 = vpop.xlane.xlu1 %6474 }
 0xc5a   : > { %v13299_v24 = vpop.xlane.xlu2 %6486  ;;  %v6442_v16 = vpop.xlane.xlu0 %6441 }
 0xc5b   : > { %v6508_v9 = vsub.f32 %v13168_v42, %v6442_v16 }
 0xc5d   : > { %v6554_v56 = vmul.f32 1.442695, %v6508_v9  ;;  %v13302_v62 = vpop.eup %9981 }
 0xc5e   : > { %v6662_v52 = vsel %vm2780_vm1, %v13302_v62, 0.0 }
 0xc5f   : > { %9983 = vpow2.f32 %v6554_v56  ;;  %6663 = vadd.xlane.f32.xlu0 %v6662_v52 }
 0xc60   : > { %9985 = vpow2.f32 %v6562_v17 }
 0xc62   : > { %v6607_v59 = vpop.xlane.xlu2 %6606  ;;  %v6610_v25 = vpop.xlane.xlu0 %6609 }
 0xc63   : > { %9987 = vrcp.f32 %v6607_v59  ;;  %v6770_v47 = vand.u32 2147483647, %v6607_v59  ;;  %v6772_v16 = vand.u32 2147483648, %v6607_v59  ;;  %v6787_v52 = vand.u32 2147483648, %v6610_v25 }
 0xc64   : > { %9989 = vrcp.f32 %v6610_v25  ;;  %v6785_v28 = vand.u32 2147483647, %v6610_v25  ;;  %vm6766_vm3 = vweird.f32 %v6607_v59  ;;  %vm6781_vm7 = vweird.f32 %v6610_v25 }
 0xc65   : > { %v13308_v37 = vpop.eup %9983  ;;  %vm6771_vm8 = vcmp.eq.f32.partialorder %v6770_v47, 8.507059e+37  ;;  %v9735_v47 = vunpack.i.l.bf16 %v13070_v2 }
 0xc66   : > { %v6632_v42 = vsel %vm2780_vm1, %v13308_v37, 0.0  ;;  %v13312_v0 = vpop.eup %9985  ;;  %vm6786_vm10 = vcmp.eq.f32.partialorder %v6785_v28, 8.507059e+37  ;;  %v6519_v28 = vsub.f32 %v13137_v15, %v13306_v63 }
 0xc67   : > { %6633 = vadd.xlane.f32.xlu0 %v6632_v42  ;;  %v6644_v26 = vsel %vm2780_vm1, %v13312_v0, 0.0 }
 0xc69   : > { %v9988_v11 = vpop.eup %9987 }
 0xc6a   : > { %v9990_v45 = vpop.eup %9989  ;;  %v6762_v38 = vmul.f32 %v9988_v11, %v6607_v59  ;;  %v6445_v22 = vpop.xlane.xlu2 %6444  ;;  %vm6767_vm15 = vweird.f32 %v9988_v11 }
 0xc6b   : > { %v6777_v36 = vmul.f32 %v9990_v45, %v6610_v25  ;;  %v6509_v10 = vsub.f32 %v13193_v46, %v6445_v22  ;;  %v6466_v32 = vpop.xlane.xlu0 %6465  ;;  %v13315_v33 = vpop.xlane.xlu1 %6456  ;;  %vm6782_vm2 = vweird.f32 %v9990_v45  ;;  %v6515_v46 = vsub.f32 %v13132_v12, %v13276_v27  ;;  %vm6768_vm6 = vmor %vm6766_vm3, %vm6767_vm15 }
 0xc6c   : > { %v6763_v18 = vsub.f32 1.0, %v6762_v38  ;;  %v6516_v42 = vsub.f32 %v13186_v8, %v6466_v32  ;;  %v6773_v22 = vor.u32 1.1754944e-38, %v6772_v16  ;;  %vm6783_vm9 = vmor %vm6781_vm7, %vm6782_vm2  ;;  %v6576_v16 = vmul.f32 1.442695, %v6519_v28 }
 0xc6d   : > { %v6778_v9 = vsub.f32 1.0, %v6777_v36  ;;  %v6556_v56 = vmul.f32 1.442695, %v6509_v10  ;;  %v6788_v10 = vor.u32 1.1754944e-38, %v6787_v52  ;;  %v6568_v12 = vmul.f32 1.442695, %v6515_v46 }
 0xc6e   : > { %v6764_v17 = vmul.f32 %v9988_v11, %v6763_v18  ;;  %v6570_v18 = vmul.f32 1.442695, %v6516_v42 }
 0xc6f   : > { %v6779_v53 = vmul.f32 %v9990_v45, %v6778_v9  ;;  %9991 = vpow2.f32 %v6556_v56  ;;  %6645 = vadd.xlane.f32.xlu0 %v6644_v26 }
 0xc70   : > { %v6765_v38 = vadd.f32 %v9988_v11, %v6764_v17 }
 0xc71   : > { %v6780_v35 = vadd.f32 %v9990_v45, %v6779_v53  ;;  %v9730_v53 = vunpack.i.l.bf16 %v13005_v54 }
 0xc72   : > { %v6769_v36 = vsel %vm6768_vm6, %v9988_v11, %v6765_v38  ;;  %v6478_v8 = vpop.xlane.xlu2 %6477 }
 0xc73   : > { %v6774_v32 = vsel %vm6771_vm8, %v6773_v22, %v6769_v36  ;;  %v6784_v9 = vsel %vm6783_vm9, %v9990_v45, %v6780_v35  ;;  %v6520_v56 = vsub.f32 %v13199_v58, %v6478_v8  ;;  %v6616_v4 = vpop.xlane.xlu1 %6615  ;;  %v6513_v36 = vsub.f32 %v13203_v43, %v13315_v33 }
 0xc74   : > { %v6775_v27 = vmul.f32 %v13188_v19, %v6774_v32  ;;  %v6789_v59 = vsel %vm6786_vm10, %v6788_v10, %v6784_v9  ;;  %9993 = vrcp.f32 %v6616_v4  ;;  %v6817_v46 = vand.u32 2147483648, %v6616_v4 }
 0xc75   : > { %v13324_v26 = vpop.eup %9991  ;;  %v6790_v25 = vmul.f32 %v13190_v41, %v6789_v59  ;;  %v6578_v11 = vmul.f32 1.442695, %v6520_v56  ;;  %9995 = vpow2.f32 %v6570_v18  ;;  %v6815_v38 = vand.u32 2147483647, %v6616_v4 }
 0xc76   : > { %9341 = vmatmul.msk.f32.vlgmr.msrb.gmra.mxu0 %vm2780_vm1, %v6775_v27  ;;  %v6635_v35 = vsel %vm2780_vm1, %v13324_v26, 0.0  ;;  %vm6811_vm12 = vweird.f32 %v6616_v4  ;;  %v6818_v32 = vor.u32 1.1754944e-38, %v6817_v46 }
 0xc77   : > { %9997 = vpow2.f32 %v6578_v11  ;;  %9342 = vmatmul.msk.f32.vlgmr.msra.gmra.mxu1 %vm2780_vm1, %v6790_v25  ;;  %7483 = vmatpush.msrb.mxu0 %v9730_v53  ;;  %vm6816_vm14 = vcmp.eq.f32.partialorder %v6815_v38, 8.507059e+37  ;;  %v6564_v53 = vmul.f32 1.442695, %v6513_v36 }
 0xc78   : > { %9999 = vpow2.f32 %v6568_v12  ;;  %7506 = vmatpush.msra.mxu1 %v9735_v47  ;;  %6636 = vadd.xlane.f32.xlu2 %v6635_v35  ;;  %v9725_v35 = vunpack.i.l.bf16 %v13001_v34 }
 0xc7a   : > { %v9994_v54 = vpop.eup %9993  ;;  %v6613_v19 = vpop.xlane.xlu2 %6612 }
 0xc7b   : > { %v6807_v41 = vmul.f32 %v9994_v54, %v6616_v4  ;;  %10001 = vrcp.f32 %v6613_v19  ;;  %v13335_v58 = vpop.xlane.xlu1 %6642  ;;  %v13337_v45 = vpop.eup %9995  ;;  %vm6812_vm11 = vweird.f32 %v9994_v54  ;;  %v6802_v4 = vand.u32 2147483648, %v6613_v19 }
 0xc7c   : > { %v6656_v22 = vsel %vm2780_vm1, %v13337_v45, 0.0  ;;  %10003 = vpow2.f32 %v6576_v16  ;;  %vm6813_vm13 = vmor %vm6811_vm12, %vm6812_vm11  ;;  %vm6796_vm2 = vweird.f32 %v6613_v19 }
 0xc7d   : > { %v13339_v17 = vpop.eup %9997  ;;  %v6808_v52 = vsub.f32 1.0, %v6807_v41  ;;  %v6800_v41 = vand.u32 2147483647, %v6613_v19 }
 0xc7e   : > { %v13341_v42 = vpop.eup %9999  ;;  %v6668_v15 = vsel %vm2780_vm1, %v13339_v17, 0.0 }
 0xc7f   : > { %v6809_v63 = vmul.f32 %v9994_v54, %v6808_v52  ;;  %6669 = vadd.xlane.f32.xlu0 %v6668_v15  ;;  %v6653_v8 = vsel %vm2780_vm1, %v13341_v42, 0.0  ;;  %vm6801_vm6 = vcmp.eq.f32.partialorder %v6800_v41, 8.507059e+37 }
 0xc80   : > { %6657 = vadd.xlane.f32.xlu2 %v6656_v22 }
 0xc81   : > { %v10002_v10 = vpop.eup %10001  ;;  %v6810_v18 = vadd.f32 %v9994_v54, %v6809_v63 }
 0xc82   : > { %v6792_v9 = vmul.f32 %v10002_v10, %v6613_v19  ;;  %v6469_v56 = vpop.xlane.xlu2 %6468  ;;  %6654 = vadd.xlane.f32.xlu1 %v6653_v8  ;;  %v13353_v47 = vpop.eup %10003  ;;  %vm6797_vm15 = vweird.f32 %v10002_v10 }
 0xc83   : > { %v6814_v12 = vsel %vm6813_vm13, %v9994_v54, %v6810_v18  ;;  %v6517_v27 = vsub.f32 %v13217_v31, %v6469_v56  ;;  %v6619_v59 = vpop.xlane.xlu1 %6618  ;;  %v6522_v31 = vsub.f32 %v13156_v48, %v13285_v44  ;;  %vm6798_vm3 = vmor %vm6796_vm2, %vm6797_vm15  ;;  %v6665_v16 = vsel %vm2780_vm1, %v13353_v47, 0.0 }
 0xc84   : > { %v6819_v25 = vsel %vm6816_vm14, %v6818_v32, %v6814_v12  ;;  %v6793_v43 = vsub.f32 1.0, %v6792_v9  ;;  %10005 = vrcp.f32 %v6619_v59  ;;  %v9736_v44 = vunpack.i.h.bf16 %v13070_v2 }
 0xc85   : > { %v6820_v33 = vmul.f32 %v13213_v55, %v6819_v25  ;;  %v6572_v11 = vmul.f32 1.442695, %v6517_v27  ;;  %v6803_v55 = vor.u32 1.1754944e-38, %v6802_v4  ;;  %v6582_v22 = vmul.f32 1.442695, %v6522_v31 }
 0xc86   : > { %v6794_v28 = vmul.f32 %v10002_v10, %v6793_v43  ;;  %v6832_v8 = vand.u32 2147483648, %v6619_v59  ;;  %v6830_v9 = vand.u32 2147483647, %v6619_v59  ;;  %vm6826_vm8 = vweird.f32 %v6619_v59 }
 0xc87   : > { %10007 = vpow2.f32 %v6572_v11  ;;  %9344 = vmatmul.msk.f32.vlgmr.msrb.gmra.mxu3 %vm2780_vm1, %v6820_v33  ;;  %v13373_v33 = vpop.xlane.xlu0 %6489 }
 0xc88   : > { %10009 = vpow2.f32 %v6564_v53  ;;  %v6795_v54 = vadd.f32 %v10002_v10, %v6794_v28  ;;  %7552 = vmatpush.msrb.mxu3 %v9725_v35  ;;  %v6833_v12 = vor.u32 1.1754944e-38, %v6832_v8  ;;  %vm6831_vm10 = vcmp.eq.f32.partialorder %v6830_v9, 8.507059e+37 }
 0xc89   : > { %10011 = vpow2.f32 %v6582_v22 }
 0xc8a   : > { %v10006_v52 = vpop.eup %10005  ;;  %v6799_v46 = vsel %vm6798_vm3, %v10002_v10, %v6795_v54  ;;  %v6493_v15 = vpop.xlane.xlu2 %6492  ;;  %6666 = vadd.xlane.f32.xlu1 %v6665_v16 }
 0xc8b   : > { %v6804_v63 = vsel %vm6801_vm6, %v6803_v55, %v6799_v46  ;;  %v6822_v38 = vmul.f32 %v10006_v52, %v6619_v59  ;;  %vm6827_vm7 = vweird.f32 %v10006_v52  ;;  %v9747_v59 = vpack.i.bf16 %v12865_v57, %v12807_v50 }
 0xc8c   : > { %v6805_v36 = vmul.f32 %v13225_v30, %v6804_v63  ;;  %v6525_v30 = vsub.f32 %v13251_v39, %v6493_v15  ;;  %vm6828_vm9 = vmor %vm6826_vm8, %vm6827_vm7  ;;  %v9715_v39 = vunpack.i.l.bf16 %v12942_v1 }
 0xc8d   : > { %v13362_v48 = vpop.eup %10007  ;;  %v6823_v19 = vsub.f32 1.0, %v6822_v38 }
 0xc8e   : > { %v13365_v18 = vpop.eup %10009  ;;  %9343 = vmatmul.msk.f32.vlgmr.msrb.gmra.mxu2 %vm2780_vm1, %v6805_v36  ;;  %v6659_v10 = vsel %vm2780_vm1, %v13362_v48, 0.0  ;;  %v6588_v43 = vmul.f32 1.442695, %v6525_v30  ;;  %v9716_v36 = vunpack.i.h.bf16 %v12942_v1 }
 0xc8f   : > { %v6824_v32 = vmul.f32 %v10006_v52, %v6823_v19  ;;  %7529 = vmatpush.msrb.mxu2 %v9736_v44  ;;  %6660 = vadd.xlane.f32.xlu0 %v6659_v10  ;;  %v6647_v2 = vsel %vm2780_vm1, %v13365_v18, 0.0  ;;  %v13376_v11 = vpop.eup %10011  ;;  %v6481_v50 = vpop.xlane.xlu0 %6480 }
 0xc90   : > { %v6674_v28 = vsel %vm2780_vm1, %v13376_v11, 0.0 }
 0xc91   : > { %v6825_v56 = vadd.f32 %v10006_v52, %v6824_v32 }
 0xc92   : > { %v6622_v27 = vpop.xlane.xlu2 %6621  ;;  %6648 = vadd.xlane.f32.xlu1 %v6647_v2 }
 0xc93   : > { %v6829_v53 = vsel %vm6828_vm9, %v10006_v52, %v6825_v56  ;;  %10013 = vrcp.f32 %v6622_v27  ;;  %v6847_v31 = vand.u32 2147483648, %v6622_v27  ;;  %v6845_v16 = vand.u32 2147483647, %v6622_v27 }
 0xc94   : > { %v6834_v25 = vsel %vm6831_vm10, %v6833_v12, %v6829_v53  ;;  %10015 = vpow2.f32 %v6588_v43  ;;  %vm6841_vm12 = vweird.f32 %v6622_v27  ;;  %v6521_v56 = vsub.f32 %v13231_v5, %v6481_v50 }
 0xc95   : > { %v6835_v4 = vmul.f32 %v13239_v23, %v6834_v25  ;;  %v6848_v52 = vor.u32 1.1754944e-38, %v6847_v31  ;;  %vm6846_vm14 = vcmp.eq.f32.partialorder %v6845_v16, 8.507059e+37 }
 0xc96   : > { %v6580_v25 = vmul.f32 1.442695, %v6521_v56 }
 0xc97   : > { %9345 = vmatmul.msk.f32.vlgmr.msra.gmra.mxu0 %vm2780_vm1, %v6835_v4  ;;  %v13394_v19 = vpop.xlane.xlu0 %6639 }
 0xc98   : > { %9748 = vrot.lane.b32.xlu2 %v9747_v59, %s10832_s13  ;;  %7575 = vmatpush.msra.mxu0 %v9715_v39  ;;  %v6523_v59 = vsub.f32 %v13180_v20, %v13299_v24 }
 0xc99   : > { %v10014_v35 = vpop.eup %10013 }
 0xc9a   : > { %v6837_v41 = vmul.f32 %v10014_v35, %v6622_v27  ;;  %6675 = vadd.xlane.f32.xlu1 %v6674_v28  ;;  %v13385_v54 = vpop.eup %10015  ;;  %vm6842_vm11 = vweird.f32 %v10014_v35  ;;  %v6584_v31 = vmul.f32 1.442695, %v6523_v59 }
 0xc9b   : > { %vm6843_vm13 = vmor %vm6841_vm12, %vm6842_vm11  ;;  %v6683_v46 = vsel %vm2780_vm1, %v13385_v54, 0.0  ;;  %vm6931_vm12 = vweird.f32 %v13394_v19 }
 0xc9c   : > { %v6838_v23 = vsub.f32 1.0, %v6837_v41 }
 0xc9e   : > { %v6839_v55 = vmul.f32 %v10014_v35, %v6838_v23 }
 0xca0   : > { %v6840_v57 = vadd.f32 %v10014_v35, %v6839_v55 }
 0xca2   : > { %v6844_v15 = vsel %vm6843_vm13, %v10014_v35, %v6840_v57  ;;  %v6625_v63 = vpop.xlane.xlu2 %6624  ;;  %6684 = vadd.xlane.f32.xlu1 %v6683_v46 }
 0xca3   : > { %v6849_v38 = vsel %vm6846_vm14, %v6848_v52, %v6844_v15  ;;  %10017 = vrcp.f32 %v6625_v63  ;;  %9743 = vrot.lane.b32.xlu0 %v12958_v6, %s10833_s12  ;;  %v6862_v32 = vand.u32 2147483648, %v6625_v63  ;;  %v6860_v30 = vand.u32 2147483647, %v6625_v63 }
 0xca4   : > { %v6850_v22 = vmul.f32 %v13255_v60, %v6849_v38  ;;  %10019 = vrcp.f32 %v13394_v19  ;;  %vm6856_vm2 = vweird.f32 %v6625_v63  ;;  %v6937_v38 = vand.u32 2147483648, %v13394_v19 }
 0xca5   : > { %v6863_v1 = vor.u32 1.1754944e-38, %v6862_v32  ;;  %vm6861_vm6 = vcmp.eq.f32.partialorder %v6860_v30, 8.507059e+37 }
 0xca6   : > { %9346 = vmatmul.msk.f32.vlgmr.msrb.gmra.mxu1 %vm2780_vm1, %v6850_v22  ;;  %v6938_v30 = vor.u32 1.1754944e-38, %v6937_v38  ;;  %v6950_v38 = vand.u32 2147483647, %v13335_v58 }
 0xca7   : > { %7598 = vmatpush.msrb.mxu1 %v9716_v36  ;;  %v6935_v36 = vand.u32 2147483647, %v13394_v19 }
 0xca9   : > { %v10018_v44 = vpop.eup %10017  ;;  %vm6936_vm14 = vcmp.eq.f32.partialorder %v6935_v36, 8.507059e+37 }
 0xcaa   : > { %v6852_v8 = vmul.f32 %v10018_v44, %v6625_v63  ;;  %vm6857_vm15 = vweird.f32 %v10018_v44  ;;  %v10020_v60 = vpop.eup %10019 }
 0xcab   : > { %vm6858_vm3 = vmor %vm6856_vm2, %vm6857_vm15  ;;  %v13398_v27 = vpop.xlane.xlu0 %6651  ;;  %v6927_v39 = vmul.f32 %v10020_v60, %v13394_v19  ;;  %vm6932_vm9 = vweird.f32 %v10020_v60 }
 0xcac   : > { %v6853_v10 = vsub.f32 1.0, %v6852_v8  ;;  %v9726_v8 = vunpack.i.h.bf16 %v13001_v34  ;;  %vm6933_vm13 = vmor %vm6931_vm12, %vm6932_vm9  ;;  %v6997_v34 = vand.u32 2147483648, %v13398_v27  ;;  %vm6991_vm2 = vweird.f32 %v13398_v27 }
 0xcad   : > { %v6928_v35 = vsub.f32 1.0, %v6927_v39  ;;  %vm6946_vm12 = vweird.f32 %v13335_v58 }
 0xcae   : > { %v6854_v9 = vmul.f32 %v10018_v44, %v6853_v10 }
 0xcaf   : > { %v6929_v55 = vmul.f32 %v10020_v60, %v6928_v35 }
 0xcb0   : > { %v6855_v2 = vadd.f32 %v10018_v44, %v6854_v9 }
 0xcb1   : > { %v6930_v46 = vadd.f32 %v10020_v60, %v6929_v55 }
 0xcb2   : > { %v6859_v12 = vsel %vm6858_vm3, %v10018_v44, %v6855_v2  ;;  %v6628_v53 = vpop.xlane.xlu1 %6627 }
 0xcb3   : > { %v6864_v43 = vsel %vm6861_vm6, %v6863_v1, %v6859_v12  ;;  %10021 = vrcp.f32 %v6628_v53  ;;  %v6877_v16 = vand.u32 2147483648, %v6628_v53  ;;  %v6875_v52 = vand.u32 2147483647, %v6628_v53 }
 0xcb4   : > { %v6865_v4 = vmul.f32 %v13265_v21, %v6864_v43  ;;  %10023 = vrcp.f32 %v13398_v27  ;;  %vm6871_vm8 = vweird.f32 %v6628_v53  ;;  %v6934_v10 = vsel %vm6933_vm13, %v10020_v60, %v6930_v46 }
 0xcb5   : > { %10025 = vpow2.f32 %v6580_v25  ;;  %vm6876_vm11 = vcmp.eq.f32.partialorder %v6875_v52, 8.507059e+37  ;;  %v6939_v56 = vsel %vm6936_vm14, %v6938_v30, %v6934_v10  ;;  %v6995_v25 = vand.u32 2147483647, %v13398_v27 }
 0xcb6   : > { %9347 = vmatmul.msk.f32.vlgmr.msra.gmra.mxu2 %vm2780_vm1, %v6865_v4  ;;  %10027 = vpow2.f32 %v6584_v31  ;;  %v9705_v43 = vunpack.i.l.bf16 %v12886_v29 }
 0xcb7   : > { %10029 = vrcp.f32 %v13335_v58  ;;  %vm6996_vm6 = vcmp.eq.f32.partialorder %v6995_v25, 8.507059e+37 }
 0xcb9   : > { %v10022_v5 = vpop.eup %10021 }
 0xcba   : > { %v6867_v28 = vmul.f32 %v10022_v5, %v6628_v53  ;;  %v13406_v41 = vpop.eup %10023  ;;  %vm6872_vm7 = vweird.f32 %v10022_v5  ;;  %v6940_v53 = vmul.f32 %v13237_v49, %v6939_v56 }
 0xcbb   : > { %5616 = vrot.lane.b32.xlu1 %v12868_v61, %s10832_s13  ;;  %v13410_v21 = vpop.eup %10025  ;;  %v6987_v50 = vmul.f32 %v13406_v41, %v13398_v27  ;;  %vm6873_vm10 = vmor %vm6871_vm8, %vm6872_vm7  ;;  %v6878_v61 = vor.u32 1.1754944e-38, %v6877_v16  ;;  %vm6992_vm15 = vweird.f32 %v13406_v41 }
 0xcbc   : > { %v6868_v23 = vsub.f32 1.0, %v6867_v28  ;;  %v6671_v24 = vsel %vm2780_vm1, %v13410_v21, 0.0  ;;  %v13424_v9 = vpop.eup %10027  ;;  %vm6993_vm3 = vmor %vm6991_vm2, %vm6992_vm15  ;;  %vm6951_vm15 = vcmp.eq.f32.partialorder %v6950_v38, 8.507059e+37 }
 0xcbd   : > { %v6988_v15 = vsub.f32 1.0, %v6987_v50  ;;  %v6677_v60 = vsel %vm2780_vm1, %v13424_v9, 0.0  ;;  %v13431_v12 = vpop.eup %10029 }
 0xcbe   : > { %v6869_v57 = vmul.f32 %v10022_v5, %v6868_v23  ;;  %v6942_v39 = vmul.f32 %v13431_v12, %v13335_v58  ;;  %vm6947_vm9 = vweird.f32 %v13431_v12 }
 0xcbf   : > { %v6989_v32 = vmul.f32 %v13406_v41, %v6988_v15  ;;  %v6952_v15 = vand.u32 2147483648, %v13335_v58  ;;  %vm13454_vm13 = vmor %vm6946_vm12, %vm6947_vm9 }
 0xcc0   : > { %v6870_v20 = vadd.f32 %v10022_v5, %v6869_v57  ;;  %v6943_v35 = vsub.f32 1.0, %v6942_v39 }
 0xcc1   : > { %6672 = vadd.xlane.f32.xlu2 %v6671_v24  ;;  %v6990_v19 = vadd.f32 %v13406_v41, %v6989_v32  ;;  %v6953_v58 = vor.u32 1.1754944e-38, %v6952_v15 }
 0xcc2   : > { %v6874_v63 = vsel %vm6873_vm10, %v10022_v5, %v6870_v20  ;;  %v6998_v5 = vor.u32 1.1754944e-38, %v6997_v34 }
 0xcc3   : > { %v6879_v22 = vsel %vm6876_vm11, %v6878_v61, %v6874_v63  ;;  %v6994_v4 = vsel %vm6993_vm3, %v13406_v41, %v6990_v19  ;;  %v6944_v41 = vmul.f32 %v13431_v12, %v6943_v35 }
 0xcc4   : > { %v6880_v44 = vmul.f32 %v13278_v7, %v6879_v22  ;;  %v6999_v49 = vsel %vm6996_vm6, %v6998_v5, %v6994_v4 }
 0xcc5   : > { %v7000_v23 = vmul.f32 %v13272_v3, %v6999_v49  ;;  %v6945_v20 = vadd.f32 %v13431_v12, %v6944_v41  ;;  %v6524_v41 = vsub.f32 %v13211_v51, %v13373_v33 }
 0xcc6   : > { %9348 = vmatmul.msk.f32.vlgmr.msra.gmra.mxu3 %vm2780_vm1, %v6880_v44 }
 0xcc7   : > { %7644 = vmatpush.msra.mxu3 %v9726_v8  ;;  %v6949_v10 = vsel %vm13454_vm13, %v13431_v12, %v6945_v20  ;;  %v6586_v20 = vmul.f32 1.442695, %v6524_v41 }
 0xcc8   : > { %v6954_v19 = vsel %vm6951_vm15, %v6953_v58, %v6949_v10 }
 0xcc9   : > { %v6955_v12 = vmul.f32 %v13227_v13, %v6954_v19 }
 0xcca   : > { %v9739_v7 = vpop.permute.xlu1 %9738  ;;  %v6631_v1 = vpop.xlane.xlu0 %6630 }
 0xccb   : > { %v9741_v2 = vunpack.i.h.bf16 %v9739_v7  ;;  %10031 = vrcp.f32 %v6631_v1  ;;  %v6892_v55 = vand.u32 2147483648, %v6631_v1  ;;  %v6890_v50 = vand.u32 2147483647, %v6631_v1 }
 0xccc   : > { %vm6886_vm8 = vweird.f32 %v6631_v1  ;;  %v9740_v44 = vunpack.i.l.bf16 %v9739_v7 }
 0xccd   : > { %7621 = vmatpush.msra.mxu2 %v9741_v2  ;;  %6678 = vadd.xlane.f32.xlu0 %v6677_v60  ;;  %v6893_v3 = vor.u32 1.1754944e-38, %v6892_v55  ;;  %vm6891_vm11 = vcmp.eq.f32.partialorder %v6890_v50, 8.507059e+37 }
 0xcce   : > { %9352 = vmatmul.msk.f32.vlgmr.msrb.gmra.mxu3 %vm2780_vm1, %v6940_v53 }
 0xccf   : > { %7736 = vmatpush.msrb.mxu3 %v9705_v43  ;;  %v9706_v43 = vunpack.i.h.bf16 %v12886_v29 }
 0xcd1   : > { %v10032_v59 = vpop.eup %10031 }
 0xcd2   : > { %v6882_v27 = vmul.f32 %v10032_v59, %v6631_v1  ;;  %v6664_v28 = vpop.xlane.xlu0 %6663  ;;  %vm6887_vm7 = vweird.f32 %v10032_v59 }
 0xcd3   : > { %10033 = vrcp.f32 %v6664_v28  ;;  %vm6888_vm10 = vmor %vm6886_vm8, %vm6887_vm7  ;;  %v7057_v8 = vand.u32 2147483648, %v6664_v28  ;;  %v7055_v30 = vand.u32 2147483647, %v6664_v28  ;;  %vm7051_vm2 = vweird.f32 %v6664_v28 }
 0xcd4   : > { %v6883_v31 = vsub.f32 1.0, %v6882_v27 }
 0xcd5   : > { %v7058_v7 = vor.u32 1.1754944e-38, %v7057_v8  ;;  %vm7056_vm6 = vcmp.eq.f32.partialorder %v7055_v30, 8.507059e+37 }
 0xcd6   : > { %9356 = vmatmul.msk.f32.vlgmr.msra.gmra.mxu3 %vm2780_vm1, %v7000_v23  ;;  %v6884_v16 = vmul.f32 %v10032_v59, %v6883_v31 }
 0xcd8   : > { %v6885_v57 = vadd.f32 %v10032_v59, %v6884_v16 }
 0xcd9   : > { %5614 = vrot.lane.b32.xlu2 %v12850_v14, %s10832_s13  ;;  %v10034_v52 = vpop.eup %10033 }
 0xcda   : > { %v6889_v24 = vsel %vm6888_vm10, %v10032_v59, %v6885_v57  ;;  %v7047_v61 = vmul.f32 %v10034_v52, %v6664_v28  ;;  %v6634_v46 = vpop.xlane.xlu0 %6633  ;;  %vm7052_vm14 = vweird.f32 %v10034_v52 }
 0xcdb   : > { %v6894_v63 = vsel %vm6891_vm11, %v6893_v3, %v6889_v24  ;;  %10035 = vrcp.f32 %v6634_v46  ;;  %vm7053_vm3 = vmor %vm7051_vm2, %vm7052_vm14  ;;  %v6907_v4 = vand.u32 2147483648, %v6634_v46  ;;  %vm6901_vm8 = vweird.f32 %v6634_v46 }
 0xcdc   : > { %v6895_v14 = vmul.f32 %v13290_v40, %v6894_v63  ;;  %v7048_v22 = vsub.f32 1.0, %v7047_v61 }
 0xcdd   : > { %v6908_v59 = vor.u32 1.1754944e-38, %v6907_v4 }
 0xcde   : > { %v7049_v32 = vmul.f32 %v10034_v52, %v7048_v22  ;;  %9349 = vmatmul.msk.f32.vlgmr.msrb.gmra.mxu0 %vm2780_vm1, %v6895_v14  ;;  %v13477_v14 = vpop.f32.mrf.mxu3 }
 0xcdf   : > { %7667 = vmatpush.msrb.mxu0 %v9740_v44 }
 0xce0   : > { %v7050_v40 = vadd.f32 %v10034_v52, %v7049_v32 }
 0xce1   : > { %9753 = vrot.lane.b32.xlu0 %v12958_v6, %s10832_s13  ;;  %v10036_v56 = vpop.eup %10035  ;;  %v6905_v6 = vand.u32 2147483647, %v6634_v46 }
 0xce2   : > { %v7054_v34 = vsel %vm7053_vm3, %v10034_v52, %v7050_v40  ;;  %v6897_v2 = vmul.f32 %v10036_v56, %v6634_v46  ;;  %v6646_v1 = vpop.xlane.xlu0 %6645  ;;  %vm6902_vm7 = vweird.f32 %v10036_v56 }
 0xce3   : > { %v7059_v60 = vsel %vm7056_vm6, %v7058_v7, %v7054_v34  ;;  %10037 = vrcp.f32 %v6646_v1  ;;  %vm6903_vm9 = vmor %vm6901_vm8, %vm6902_vm7  ;;  %vm6906_vm10 = vcmp.eq.f32.partialorder %v6905_v6, 8.507059e+37  ;;  %v6967_v23 = vand.u32 2147483648, %v6646_v1 }
 0xce4   : > { %v7060_v53 = vmul.f32 %v13302_v62, %v7059_v60  ;;  %v6898_v25 = vsub.f32 1.0, %v6897_v2  ;;  %v6965_v55 = vand.u32 2147483647, %v6646_v1  ;;  %vm6961_vm12 = vweird.f32 %v6646_v1 }
 0xce5   : > { %v6968_v57 = vor.u32 1.1754944e-38, %v6967_v23 }
 0xce6   : > { %v6899_v39 = vmul.f32 %v10036_v56, %v6898_v25  ;;  %9353 = vmatmul.msk.f32.vlgmr.msra.gmra.mxu0 %vm2780_vm1, %v6955_v12  ;;  %9360 = vmatmul.msk.f32.vlgmr.msrb.gmra.mxu3 %vm2780_vm1, %v7060_v53  ;;  %vm6966_vm14 = vcmp.eq.f32.partialorder %v6965_v55, 8.507059e+37  ;;  %v13498_v25 = vpop.f32.mrf.mxu0 }
 0xce7   : > { %7759 = vmatpush.msra.mxu0 %v9706_v43 }
 0xce8   : > { %v6900_v5 = vadd.f32 %v10036_v56, %v6899_v39 }
 0xce9   : > { %v10038_v49 = vpop.eup %10037 }
 0xcea   : > { %v6904_v13 = vsel %vm6903_vm9, %v10036_v56, %v6900_v5  ;;  %v6957_v62 = vmul.f32 %v10038_v49, %v6646_v1  ;;  %vm6962_vm11 = vweird.f32 %v10038_v49  ;;  %v13490_v1 = vpop.f32.mrf.mxu3 }
 0xceb   : > { %v6637_v35 = vpop.xlane.xlu2 %6636  ;;  %v6909_v27 = vsel %vm6906_vm10, %v6908_v59, %v6904_v13  ;;  %vm6963_vm13 = vmor %vm6961_vm12, %vm6962_vm11 }
 0xcec   : > { %10039 = vrcp.f32 %v6637_v35  ;;  %v6910_v29 = vmul.f32 %v13308_v37, %v6909_v27  ;;  %v6958_v28 = vsub.f32 1.0, %v6957_v62  ;;  %v6922_v15 = vand.u32 2147483648, %v6637_v35 }
 0xced   : > { %v6920_v38 = vand.u32 2147483647, %v6637_v35  ;;  %vm6916_vm2 = vweird.f32 %v6637_v35 }
 0xcee   : > { %v6959_v31 = vmul.f32 %v10038_v49, %v6958_v28  ;;  %9350 = vmatmul.msk.f32.vlgmr.msra.gmra.mxu1 %vm2780_vm1, %v6910_v29  ;;  %v6923_v22 = vor.u32 1.1754944e-38, %v6922_v15 }
 0xcef   : > { %vm6921_vm6 = vcmp.eq.f32.partialorder %v6920_v38, 8.507059e+37 }
 0xcf0   : > { %v6960_v16 = vadd.f32 %v10038_v49, %v6959_v31 }
 0xcf2   : > { %v10040_v50 = vpop.eup %10039  ;;  %v6964_v52 = vsel %vm6963_vm13, %v10038_v49, %v6960_v16 }
 0xcf3   : > { %v6912_v3 = vmul.f32 %v10040_v50, %v6637_v35  ;;  %v6969_v37 = vsel %vm6966_vm14, %v6968_v57, %v6964_v52  ;;  %vm6917_vm15 = vweird.f32 %v10040_v50  ;;  %v13474_v51 = vpop.xlane.xlu2 %6657 }
 0xcf4   : > { %v6970_v24 = vmul.f32 %v13312_v0, %v6969_v37  ;;  %vm6918_vm3 = vmor %vm6916_vm2, %vm6917_vm15  ;;  %v13480_v0 = vpop.xlane.xlu0 %6669  ;;  %vm7021_vm2 = vweird.f32 %v13474_v51 }
 0xcf5   : > { %v6913_v61 = vsub.f32 1.0, %v6912_v3  ;;  %v6655_v46 = vpop.xlane.xlu1 %6654 }
 0xcf6   : > { %10041 = vrcp.f32 %v6655_v46  ;;  %9354 = vmatmul.msk.f32.vlgmr.msrb.gmra.mxu1 %vm2780_vm1, %v6970_v24  ;;  %v7012_v19 = vand.u32 2147483648, %v6655_v46  ;;  %v7010_v34 = vand.u32 2147483647, %v6655_v46  ;;  %vm7006_vm8 = vweird.f32 %v6655_v46 }
 0xcf7   : > { %v6914_v63 = vmul.f32 %v10040_v50, %v6913_v61  ;;  %10043 = vpow2.f32 %v6586_v20 }
 0xcf8   : > { %10045 = vrcp.f32 %v13474_v51  ;;  %v7013_v43 = vor.u32 1.1754944e-38, %v7012_v19  ;;  %vm7011_vm10 = vcmp.eq.f32.partialorder %v7010_v34, 8.507059e+37 }
 0xcf9   : > { %v6915_v33 = vadd.f32 %v10040_v50, %v6914_v63  ;;  %v7027_v63 = vand.u32 2147483648, %v13474_v51 }
 0xcfb   : > { %v6919_v36 = vsel %vm6918_vm3, %v10040_v50, %v6915_v33  ;;  %v13512_v50 = vpop.f32.mrf.mxu0  ;;  %v7025_v33 = vand.u32 2147483647, %v13474_v51 }
 0xcfc   : > { %v10042_v44 = vpop.eup %10041  ;;  %v6924_v8 = vsel %vm6921_vm6, %v6923_v22, %v6919_v36 }
 0xcfd   : > { %v6925_v10 = vmul.f32 %v13324_v26, %v6924_v8  ;;  %v7002_v32 = vmul.f32 %v10042_v44, %v6655_v46  ;;  %v6667_v30 = vpop.xlane.xlu1 %6666  ;;  %v13483_v58 = vpop.eup %10043  ;;  %vm7007_vm7 = vweird.f32 %v10042_v44 }
 0xcfe   : > { %10047 = vrcp.f32 %v6667_v30  ;;  %v13486_v56 = vpop.eup %10045  ;;  %v6680_v2 = vsel %vm2780_vm1, %v13483_v58, 0.0  ;;  %vm7008_vm9 = vmor %vm7006_vm8, %vm7007_vm7  ;;  %v7072_v35 = vand.u32 2147483648, %v6667_v30  ;;  %v7070_v28 = vand.u32 2147483647, %v6667_v30  ;;  %v13528_v8 = vpop.f32.mrf.mxu1 }
 0xcff   : > { %v7003_v40 = vsub.f32 1.0, %v7002_v32  ;;  %9351 = vmatmul.msk.f32.vlgmr.msrb.gmra.mxu2 %vm2780_vm1, %v6925_v10  ;;  %10049 = vrcp.f32 %v13480_v0  ;;  %v7017_v60 = vmul.f32 %v13486_v56, %v13474_v51  ;;  %vm7066_vm12 = vweird.f32 %v6667_v30 }
 0xd00   : > { %v7073_v57 = vor.u32 1.1754944e-38, %v7072_v35  ;;  %vm7071_vm14 = vcmp.eq.f32.partialorder %v7070_v28, 8.507059e+37  ;;  %vm7022_vm15 = vweird.f32 %v13486_v56 }
 0xd01   : > { %v7004_v7 = vmul.f32 %v10042_v44, %v7003_v40  ;;  %v7018_v49 = vsub.f32 1.0, %v7017_v60  ;;  %vm13523_vm6 = vmor %vm7021_vm2, %vm7022_vm15  ;;  %v9749_v60 = vpop.permute.xlu2 %9748 }
 0xd02   : > { %6681 = vadd.xlane.f32.xlu2 %v6680_v2  ;;  %v13493_v26 = vpop.xlane.xlu0 %6660  ;;  %v9751_v35 = vunpack.i.h.bf16 %v9749_v60 }
 0xd03   : > { %v7005_v12 = vadd.f32 %v10042_v44, %v7004_v7  ;;  %10051 = vrcp.f32 %v13493_v26  ;;  %v7019_v55 = vmul.f32 %v13486_v56, %v7018_v49 }
 0xd04   : > { %v10048_v53 = vpop.eup %10047 }
 0xd05   : > { %v7009_v4 = vsel %vm7008_vm9, %v10042_v44, %v7005_v12  ;;  %v7062_v39 = vmul.f32 %v10048_v53, %v6667_v30  ;;  %v6649_v6 = vpop.xlane.xlu1 %6648  ;;  %v13501_v62 = vpop.eup %10049  ;;  %vm7067_vm11 = vweird.f32 %v10048_v53  ;;  %v7020_v24 = vadd.f32 %v13486_v56, %v7019_v55 }
 0xd06   : > { %v7014_v5 = vsel %vm7011_vm10, %v7013_v43, %v7009_v4  ;;  %10053 = vrcp.f32 %v6649_v6  ;;  %vm7068_vm13 = vmor %vm7066_vm12, %vm7067_vm11  ;;  %v6982_v38 = vand.u32 2147483648, %v6649_v6  ;;  %v6980_v36 = vand.u32 2147483647, %v6649_v6 }
 0xd07   : > { %v7015_v59 = vmul.f32 %v13341_v42, %v7014_v5  ;;  %v7063_v13 = vsub.f32 1.0, %v7062_v39  ;;  %v7077_v42 = vmul.f32 %v13501_v62, %v13480_v0  ;;  %v7024_v10 = vsel %vm13523_vm6, %v13486_v56, %v7020_v24 }
 0xd08   : > { %vm6976_vm7 = vweird.f32 %v6649_v6  ;;  %v7028_v30 = vor.u32 1.1754944e-38, %v7027_v63  ;;  %v6983_v40 = vor.u32 1.1754944e-38, %v6982_v38  ;;  %vm7026_vm9 = vcmp.eq.f32.partialorder %v7025_v33, 8.507059e+37 }
 0xd09   : > { %v13503_v27 = vpop.eup %10051  ;;  %v7064_v29 = vmul.f32 %v10048_v53, %v7063_v13  ;;  %9357 = vmatmul.msk.f32.vlgmr.msrb.gmra.mxu0 %vm2780_vm1, %v7015_v59  ;;  %v7078_v61 = vsub.f32 1.0, %v7077_v42  ;;  %vm7082_vm10 = vweird.f32 %v13501_v62  ;;  %vm6981_vm11 = vcmp.eq.f32.partialorder %v6980_v36, 8.507059e+37 }
 0xd0a   : > { %v7032_v23 = vmul.f32 %v13503_v27, %v13493_v26  ;;  %v7370_v31 = vpop.f32.mrf.mxu3  ;;  %v7029_v2 = vsel %vm7026_vm9, %v7028_v30, %v7024_v10  ;;  %vm7037_vm12 = vweird.f32 %v13503_v27  ;;  %v7042_v43 = vand.u32 2147483648, %v13493_v26 }
 0xd0b   : > { %v7065_v41 = vadd.f32 %v10048_v53, %v7064_v29  ;;  %7910 = vrot.lane.b32.xlu1 %v7370_v31, %s10832_s13  ;;  %v7079_v51 = vmul.f32 %v13501_v62, %v7078_v61  ;;  %v7040_v5 = vand.u32 2147483647, %v13493_v26  ;;  %v7030_v59 = vmul.f32 %v13337_v45, %v7029_v2 }
 0xd0c   : > { %v10054_v16 = vpop.eup %10053  ;;  %v7033_v37 = vsub.f32 1.0, %v7032_v23  ;;  %v7085_v13 = vand.u32 2147483647, %v13480_v0  ;;  %v13564_v23 = vpop.f32.mrf.mxu1  ;;  %v7043_v31 = vor.u32 1.1754944e-38, %v7042_v43 }
 0xd0d   : > { %v7069_v52 = vsel %vm7068_vm13, %v10048_v53, %v7065_v41  ;;  %v6972_v3 = vmul.f32 %v10054_v16, %v6649_v6  ;;  %vm6977_vm3 = vweird.f32 %v10054_v16  ;;  %v7080_v53 = vadd.f32 %v13501_v62, %v7079_v51  ;;  %v6676_v28 = vpop.xlane.xlu1 %6675 }
 0xd0e   : > { %v7074_v20 = vsel %vm7071_vm14, %v7073_v57, %v7069_v52  ;;  %vm6978_vm8 = vmor %vm6976_vm7, %vm6977_vm3  ;;  %v7087_v6 = vand.u32 2147483648, %v13480_v0  ;;  %vm7036_vm13 = vweird.f32 %v13493_v26  ;;  %vm7081_vm14 = vweird.f32 %v13480_v0 }
 0xd0f   : > { %v7075_v46 = vmul.f32 %v13353_v47, %v7074_v20  ;;  %v6973_v15 = vsub.f32 1.0, %v6972_v3  ;;  %v7034_v47 = vmul.f32 %v13503_v27, %v7033_v37  ;;  %vm13547_vm15 = vmor %vm7036_vm13, %vm7037_vm12  ;;  %v9750_v26 = vunpack.i.l.bf16 %v9749_v60 }
 0xd10   : > { %vm13553_vm2 = vmor %vm7081_vm14, %vm7082_vm10  ;;  %v7088_v55 = vor.u32 1.1754944e-38, %v7087_v6  ;;  %vm7041_vm3 = vcmp.eq.f32.partialorder %v7040_v5, 8.507059e+37  ;;  %vm7086_vm6 = vcmp.eq.f32.partialorder %v7085_v13, 8.507059e+37  ;;  %10055 = vrcp.f32 %v6676_v28 }
 0xd11   : > { %v6974_v22 = vmul.f32 %v10054_v16, %v6973_v15  ;;  %9361 = vmatmul.msk.f32.vlgmr.msra.gmra.mxu0 %vm2780_vm1, %v7075_v46  ;;  %v7035_v56 = vadd.f32 %v13503_v27, %v7034_v47  ;;  %v7084_v0 = vsel %vm13553_vm2, %v13501_v62, %v7080_v53 }
 0xd13   : > { %v6975_v32 = vadd.f32 %v10054_v16, %v6974_v22  ;;  %v7039_v45 = vsel %vm13547_vm15, %v13503_v27, %v7035_v56  ;;  %v7089_v27 = vsel %vm7086_vm6, %v7088_v55, %v7084_v0 }
 0xd14   : > { %v7393_v19 = vpop.f32.mrf.mxu0  ;;  %v7044_v42 = vsel %vm7041_vm3, %v7043_v31, %v7039_v45 }
 0xd15   : > { %v6979_v7 = vsel %vm6978_vm8, %v10054_v16, %v6975_v32  ;;  %7912 = vrot.lane.b32.xlu0 %v7393_v19, %s10832_s13  ;;  %v9744_v34 = vpop.permute.xlu0 %9743  ;;  %v7045_v41 = vmul.f32 %v13362_v48, %v7044_v42  ;;  %v7090_v16 = vmul.f32 %v13339_v17, %v7089_v27  ;;  %v13572_v52 = vpop.xlane.xlu1 %6684  ;;  %v7117_v48 = vand.u32 2147483648, %v6676_v28 }
 0xd16   : > { %v6984_v12 = vsel %vm6981_vm11, %v6983_v40, %v6979_v7  ;;  %v9746_v39 = vunpack.i.h.bf16 %v9744_v34  ;;  %v9745_v49 = vunpack.i.l.bf16 %v9744_v34  ;;  %v10056_v62 = vpop.eup %10055  ;;  %vm7111_vm8 = vweird.f32 %v6676_v28 }
 0xd17   : > { %v6985_v4 = vmul.f32 %v13365_v18, %v6984_v12  ;;  %v7107_v3 = vmul.f32 %v10056_v62, %v6676_v28  ;;  %vm7112_vm7 = vweird.f32 %v10056_v62  ;;  %v7115_v17 = vand.u32 2147483647, %v6676_v28 }
 0xd18   : > { %7713 = vmatpush.msrb.mxu2 %v9746_v39  ;;  %7690 = vmatpush.msra.mxu1 %v9745_v49  ;;  %vm7113_vm9 = vmor %vm7111_vm8, %vm7112_vm7  ;;  %v7118_v63 = vor.u32 1.1754944e-38, %v7117_v48  ;;  %v7162_v49 = vand.u32 2147483648, %v13572_v52  ;;  %vm7156_vm3 = vweird.f32 %v13572_v52 }
 0xd19   : > { %9355 = vmatmul.msk.f32.vlgmr.msra.gmra.mxu2 %vm2780_vm1, %v6985_v4  ;;  %9358 = vmatmul.msk.f32.vlgmr.msra.gmra.mxu1 %vm2780_vm1, %v7030_v59  ;;  %v7108_v20 = vsub.f32 1.0, %v7107_v3  ;;  %vm7116_vm10 = vcmp.eq.f32.partialorder %v7115_v17, 8.507059e+37 }
 0xd1a   : > { %7805 = vmatpush.msra.mxu2 %v9751_v35  ;;  %7782 = vmatpush.msrb.mxu1 %v9750_v26  ;;  %v7160_v35 = vand.u32 2147483647, %v13572_v52  ;;  %v7163_v26 = vor.u32 1.1754944e-38, %v7162_v49 }
 0xd1b   : > { %v7109_v24 = vmul.f32 %v10056_v62, %v7108_v20 }
 0xd1d   : > { %v7110_v61 = vadd.f32 %v10056_v62, %v7109_v24 }
 0xd1f   : > { %v7114_v15 = vsel %vm7113_vm9, %v10056_v62, %v7110_v61 }
 0xd20   : > { %v7119_v38 = vsel %vm7116_vm10, %v7118_v63, %v7114_v15  ;;  %vm7161_vm10 = vcmp.eq.f32.partialorder %v7160_v35, 8.507059e+37 }
 0xd21   : > { %9359 = vmatmul.msk.f32.vlgmr.msrb.gmra.mxu2 %vm2780_vm1, %v7045_v41  ;;  %9362 = vmatmul.msk.f32.vlgmr.msrb.gmra.mxu1 %vm2780_vm1, %v7090_v16  ;;  %v7120_v36 = vmul.f32 %v13376_v11, %v7119_v38 }
 0xd23   : > { %v7416_v57 = vpop.f32.mrf.mxu1 }
 0xd24   : > { %7914 = vrot.lane.b32.xlu1 %v7416_v57, %s10832_s13  ;;  %v13588_v57 = vpop.f32.mrf.mxu2 }
 0xd2d   : > { %v5617_v37 = vpop.permute.xlu1 %5616 }
 0xd2e   : > { %7851 = vmatpush.msrb.mxu0 %v5617_v37 }
 0xd34   : > { %v6673_v46 = vpop.xlane.xlu2 %6672 }
 0xd35   : > { %10057 = vrcp.f32 %v6673_v46  ;;  %v7102_v32 = vand.u32 2147483648, %v6673_v46  ;;  %v7100_v40 = vand.u32 2147483647, %v6673_v46  ;;  %vm7096_vm12 = vweird.f32 %v6673_v46 }
 0xd36   : > { %10059 = vrcp.f32 %v13572_v52 }
 0xd37   : > { %v7103_v2 = vor.u32 1.1754944e-38, %v7102_v32  ;;  %vm7101_vm14 = vcmp.eq.f32.partialorder %v7100_v40, 8.507059e+37 }
 0xd3b   : > { %v10058_v33 = vpop.eup %10057 }
 0xd3c   : > { %v10060_v22 = vpop.eup %10059  ;;  %v7092_v44 = vmul.f32 %v10058_v33, %v6673_v46  ;;  %v5615_v47 = vpop.permute.xlu2 %5614  ;;  %vm7097_vm11 = vweird.f32 %v10058_v33 }
 0xd3d   : > { %7828 = vmatpush.msra.mxu3 %v5615_v47  ;;  %v7152_v51 = vmul.f32 %v10060_v22, %v13572_v52  ;;  %vm7098_vm13 = vmor %vm7096_vm12, %vm7097_vm11  ;;  %vm7157_vm15 = vweird.f32 %v10060_v22 }
 0xd3e   : > { %v7093_v10 = vsub.f32 1.0, %v7092_v44  ;;  %9364 = vmatmul.msk.f32.vlgmr.msra.gmra.mxu3 %vm2780_vm1, %v7120_v36  ;;  %vm7158_vm6 = vmor %vm7156_vm3, %vm7157_vm15 }
 0xd3f   : > { %v7153_v34 = vsub.f32 1.0, %v7152_v51 }
 0xd40   : > { %v7094_v30 = vmul.f32 %v10058_v33, %v7093_v10  ;;  %v6679_v19 = vpop.xlane.xlu0 %6678 }
 0xd41   : > { %10061 = vrcp.f32 %v6679_v19  ;;  %v7154_v53 = vmul.f32 %v10060_v22, %v7153_v34  ;;  %v7132_v5 = vand.u32 2147483648, %v6679_v19  ;;  %v7130_v13 = vand.u32 2147483647, %v6679_v19 }
 0xd42   : > { %v7095_v7 = vadd.f32 %v10058_v33, %v7094_v30  ;;  %vm7126_vm7 = vweird.f32 %v6679_v19 }
 0xd43   : > { %v7155_v6 = vadd.f32 %v10060_v22, %v7154_v53  ;;  %v7133_v18 = vor.u32 1.1754944e-38, %v7132_v5  ;;  %vm7131_vm9 = vcmp.eq.f32.partialorder %v7130_v13, 8.507059e+37  ;;  %v14291_v5 = vld [vmem:[#allocation88_spill] sm:$0xff] }
 0xd44   : > { %v7099_v11 = vsel %vm7098_vm13, %v10058_v33, %v7095_v7 }
 0xd45   : > { %v7104_v60 = vsel %vm7101_vm14, %v7103_v2, %v7099_v11  ;;  %v7159_v29 = vsel %vm7158_vm6, %v10060_v22, %v7155_v6 }
 0xd46   : > { %v7105_v56 = vmul.f32 %v13410_v21, %v7104_v60  ;;  %v7164_v31 = vsel %vm7161_vm10, %v7163_v26, %v7159_v29 }
 0xd47   : > { %v10062_v12 = vpop.eup %10061  ;;  %v7165_v16 = vmul.f32 %v13385_v54, %v7164_v31 }
 0xd48   : > { %v7122_v43 = vmul.f32 %v10062_v12, %v6679_v19  ;;  %9363 = vmatmul.msk.f32.vlgmr.msra.gmra.mxu2 %vm2780_vm1, %v7105_v56  ;;  %vm7127_vm2 = vweird.f32 %v10062_v12 }
 0xd49   : > { %v7462_v4 = vpop.f32.mrf.mxu3  ;;  %vm7128_vm8 = vmor %vm7126_vm7, %vm7127_vm2 }
 0xd4a   : > { %v7123_v39 = vsub.f32 1.0, %v7122_v43 }
 0xd4c   : > { %v7124_v59 = vmul.f32 %v10062_v12, %v7123_v39 }
 0xd4e   : > { %v7125_v21 = vadd.f32 %v10062_v12, %v7124_v59 }
 0xd50   : > { %v7129_v45 = vsel %vm7128_vm8, %v10062_v12, %v7125_v21 }
 0xd51   : > { %v7134_v28 = vsel %vm7131_vm9, %v7133_v18, %v7129_v45  ;;  %v7554_v0 = vpop.f32.mrf.mxu3  ;;  %v14292_v45 = vld [vmem:[#allocation86_spill] sm:$0xff] }
 0xd52   : > { %v7135_v55 = vmul.f32 %v13424_v9, %v7134_v28  ;;  %7942 = vrot.lane.b32.xlu2 %v7554_v0, %s10833_s12  ;;  %v13591_v9 = vpop.f32.mrf.mxu2 }
 0xd53   : > { %v9754_v42 = vpop.permute.xlu0 %9753 }
 0xd54   : > { %v9756_v27 = vunpack.i.h.bf16 %v9754_v42  ;;  %v9755_v41 = vunpack.i.l.bf16 %v9754_v42  ;;  %9365 = vmatmul.msk.f32.vlgmr.msrb.gmra.mxu0 %vm2780_vm1, %v7135_v55 }
 0xd56   : > { %7874 = vmatpush.msra.mxu1 %v9755_v41  ;;  %7897 = vmatpush.msrb.mxu2 %v9756_v27 }
 0xd57   : > { %9367 = vmatmul.msk.f32.vlgmr.msrb.gmra.mxu2 %vm2780_vm1, %v7165_v16 }
 0xd59   : > { %v7646_v52 = vpop.f32.mrf.mxu3 }
 0xd5a   : > { %v7439_v24 = vpop.f32.mrf.mxu2 }
 0xd5b   : > { %v7485_v62 = vpop.f32.mrf.mxu0 }
 0xd63   : > { %v7577_v3 = vpop.f32.mrf.mxu0 }
 0xd64   : > { %7944 = vrot.lane.b32.xlu1 %v7577_v3, %s10833_s12 }
 0xd69   : > { %v7738_v20 = vpop.f32.mrf.mxu3 }
 0xd6b   : > { %v7508_v37 = vpop.f32.mrf.mxu1 }
 0xd6c   : > { %7974 = vrot.lane.b32.xlu1 %v7738_v20, %s10834_s3 }
 0xd73   : > { %v7600_v61 = vpop.f32.mrf.mxu1 }
 0xd74   : > { %7946 = vrot.lane.b32.xlu0 %v7600_v61, %s10833_s12  ;;  %7916 = vrot.lane.b32.xlu1 %v7439_v24, %s10832_s13 }
 0xd75   : > { %v6682_v54 = vpop.xlane.xlu2 %6681 }
 0xd76   : > { %10063 = vrcp.f32 %v6682_v54  ;;  %v7147_v15 = vand.u32 2147483648, %v6682_v54  ;;  %v7145_v38 = vand.u32 2147483647, %v6682_v54  ;;  %vm7141_vm12 = vweird.f32 %v6682_v54 }
 0xd78   : > { %v7148_v22 = vor.u32 1.1754944e-38, %v7147_v15  ;;  %vm7146_vm14 = vcmp.eq.f32.partialorder %v7145_v38, 8.507059e+37  ;;  %v14295_v15 = vld [vmem:[#allocation79_spill] sm:$0xff] }
 0xd7c   : > { %v10064_v48 = vpop.eup %10063  ;;  %7950 = vrot.lane.b32.xlu0 %v7646_v52, %s10833_s12  ;;  %7918 = vrot.lane.b32.xlu1 %v7462_v4, %s10832_s13 }
 0xd7d   : > { %v7137_v17 = vmul.f32 %v10064_v48, %v6682_v54  ;;  %vm7142_vm11 = vweird.f32 %v10064_v48  ;;  %v7911_v7 = vpop.permute.xlu1 %7910 }
 0xd7e   : > { %vm7143_vm13 = vmor %vm7141_vm12, %vm7142_vm11  ;;  %v7998_v53 = vsel %vm1465_vm0, %v13477_v14, %v7911_v7 }
 0xd7f   : > { %v7138_v46 = vsub.f32 1.0, %v7137_v17  ;;  %v14294_v17 = vld [vmem:[#allocation78_spill] sm:$0xff] }
 0xd81   : > { %v7139_v63 = vmul.f32 %v10064_v48, %v7138_v46 }
 0xd82   : > { %v7531_v32 = vpop.f32.mrf.mxu2 }
 0xd83   : > { %v7140_v33 = vadd.f32 %v10064_v48, %v7139_v63 }
 0xd84   : > { %7920 = vrot.lane.b32.xlu1 %v7485_v62, %s10832_s13  ;;  %v14293_v62 = vld [vmem:[#allocation87_spill] sm:$0xff] }
 0xd85   : > { %v7144_v36 = vsel %vm7143_vm13, %v10064_v48, %v7140_v33 }
 0xd86   : > { %v7149_v44 = vsel %vm7146_vm14, %v7148_v22, %v7144_v36  ;;  %v7669_v47 = vpop.f32.mrf.mxu0  ;;  %v14296_v36 = vld [vmem:[#allocation89_spill] sm:$0xff] }
 0xd87   : > { %v7150_v10 = vmul.f32 %v13483_v58, %v7149_v44  ;;  %7952 = vrot.lane.b32.xlu0 %v7669_v47, %s10833_s12  ;;  %v7913_v43 = vpop.permute.xlu0 %7912 }
 0xd88   : > { %v7999_v29 = vsel %vm1465_vm0, %v13498_v25, %v7913_v43 }
 0xd89   : > { %9366 = vmatmul.msk.f32.vlgmr.msra.gmra.mxu1 %vm2780_vm1, %v7150_v10  ;;  %v14297_v10 = vld [vmem:[#allocation90_spill] sm:$0xff] }
 0xd8e   : > { %v7761_v51 = vpop.f32.mrf.mxu0 }
 0xd8f   : > { %7976 = vrot.lane.b32.xlu0 %v7761_v51, %s10834_s3 }
 0xd96   : > { %v7692_v40 = vpop.f32.mrf.mxu1  ;;  %v7915_v58 = vpop.permute.xlu1 %7914 }
 0xd97   : > { %v8000_v25 = vsel %vm1465_vm0, %v13528_v8, %v7915_v58 }
 0xd9c   : > { %v7623_v30 = vpop.f32.mrf.mxu2 }
 0xd9d   : > { %7948 = vrot.lane.b32.xlu0 %v7623_v30, %s10833_s12 }
 0xd9e   : > { %v7784_v34 = vpop.f32.mrf.mxu1 }
 0xda4   : > { %v7715_v2 = vpop.f32.mrf.mxu2 }
 0xda5   : > { %7922 = vrot.lane.b32.xlu0 %v7508_v37, %s10832_s13 }
 0xdac   : > { %v7943_v12 = vpop.permute.xlu2 %7942 }
 0xdad   : > { %v8006_v4 = vsel %vm4389_vm5, %v7998_v53, %v7943_v12 }
 0xdc1   : > { %v7830_v19 = vpop.f32.mrf.mxu3 }
 0xdc2   : > { %7982 = vrot.lane.b32.xlu2 %v7830_v19, %s10834_s3 }
 0xdca   : > { %7978 = vrot.lane.b32.xlu2 %v7784_v34, %s10834_s3 }
 0xdcb   : > { %v7807_v56 = vpop.f32.mrf.mxu2 }
 0xdd1   : > { %v7853_v11 = vpop.f32.mrf.mxu0 }
 0xdd2   : > { %7984 = vrot.lane.b32.xlu2 %v7853_v11, %s10834_s3 }
 0xdd6   : > { %v7945_v60 = vpop.permute.xlu1 %7944 }
 0xdd7   : > { %v8007_v14 = vsel %vm4389_vm5, %v7999_v29, %v7945_v60 }
 0xdda   : > { %7980 = vrot.lane.b32.xlu2 %v7807_v56, %s10834_s3  ;;  %v7899_v55 = vpop.f32.mrf.mxu2 }
 0xdde   : > { %v7975_v39 = vpop.permute.xlu1 %7974 }
 0xddf   : > { %v8014_v6 = vsel %vm4398_vm4, %v8006_v4, %v7975_v39 }
 0xde0   : > { %v8022_v49 = vadd.f32 %v8014_v6, %v14291_v5 }
 0xde2   : > { %7954 = vrot.lane.b32.xlu2 %v7692_v40, %s10833_s12  ;;  %8032 = vadd.xlane.f32.xlu1 %v8022_v49 }
 0xde6   : > { %v7947_v59 = vpop.permute.xlu0 %7946  ;;  %v7917_v0 = vpop.permute.xlu1 %7916 }
 0xde7   : > { %v8008_v27 = vsel %vm4389_vm5, %v8000_v25, %v7947_v59  ;;  %v8001_v33 = vsel %vm1465_vm0, %v13588_v57, %v7917_v0 }
 0xdee   : > { %v7951_v13 = vpop.permute.xlu0 %7950  ;;  %v7919_v42 = vpop.permute.xlu1 %7918 }
 0xdef   : > { %v8002_v3 = vsel %vm1465_vm0, %v13490_v1, %v7919_v42 }
 0xdf0   : > { %v8010_v37 = vsel %vm4389_vm5, %v8002_v3, %v7951_v13  ;;  %v8236_v3 = vld [vmem:[#allocation26 + $0xb0] sm:$0xff] }
 0xdf6   : > { %v7921_v20 = vpop.permute.xlu1 %7920 }
 0xdf7   : > { %v8003_v24 = vsel %vm1465_vm0, %v13512_v50, %v7921_v20  ;;  %v8237_v20 = vld [vmem:[#allocation26 + $0xb8] sm:$0xff] }
 0xdf9   : > { %v7953_v35 = vpop.permute.xlu0 %7952 }
 0xdfa   : > { %v8011_v8 = vsel %vm4389_vm5, %v8003_v24, %v7953_v35  ;;  %v8234_v24 = vld [vmem:[#allocation26 + $0xa0] sm:$0xff] }
 0xe01   : > { %v7977_v21 = vpop.permute.xlu0 %7976 }
 0xe02   : > { %v8015_v18 = vsel %vm4398_vm4, %v8007_v14, %v7977_v21 }
 0xe03   : > { %v8023_v28 = vadd.f32 %v8015_v18, %v14292_v45  ;;  %v8244_v18 = vld [vmem:[#allocation26 + $0xf0] sm:$0xff]  ;;  %v8242_v45 = vld [vmem:[#allocation26 + $0xe0] sm:$0xff] }
 0xe04   : > { %8252 = vmatpush.msrb.mxu3 %v8244_v18 }
 0xe06   : > { %v7876_v26 = vpop.f32.mrf.mxu1  ;;  %8253 = vmatpush.msrb.mxu3 %v8242_v45 }
 0xe07   : > { %7986 = vrot.lane.b32.xlu0 %v7876_v26, %s10834_s3  ;;  %v8245_v26 = vld [vmem:[#allocation26 + $0xf8] sm:$0xff] }
 0xe08   : > { %8293 = vmatpush.msra.mxu0 %v8245_v26 }
 0xe0b   : > { %8034 = vadd.xlane.f32.xlu2 %v8023_v28 }
 0xe0f   : > { %7924 = vrot.lane.b32.xlu0 %v7531_v32, %s10832_s13  ;;  %v7949_v1 = vpop.permute.xlu0 %7948  ;;  %s14301_s13 = sld [smem:[#allocation69_spill]] }
 0xe10   : > { %v8009_v50 = vsel %vm4389_vm5, %v8001_v33, %v7949_v1  ;;  %v8228_v1 = vld [vmem:[#allocation26 + $0x70] sm:$0xff]  ;;  %v8226_v33 = vld [vmem:[#allocation26 + $0x60] sm:$0xff] }
 0xe17   : > { %7956 = vrot.lane.b32.xlu0 %v7715_v2, %s10833_s12  ;;  %v7923_v40 = vpop.permute.xlu0 %7922  ;;  %v14298_v2 = vld [vmem:[#allocation80_spill] sm:$0xff]  ;;  %s14302_s12 = sld [smem:[#allocation65_spill]] }
 0xe18   : > { %v8004_v19 = vsel %vm1465_vm0, %v13564_v23, %v7923_v40  ;;  %v8218_v40 = vld [vmem:[#allocation26 + $0x20] sm:$0xff] }
 0xe1c   : > { %v7983_v31 = vpop.permute.xlu2 %7982 }
 0xe1d   : > { %v8018_v61 = vsel %vm4398_vm4, %v8010_v37, %v7983_v31  ;;  %v8243_v31 = vld [vmem:[#allocation26 + $0xe8] sm:$0xff] }
 0xe1e   : > { %v8026_v46 = vadd.f32 %v8018_v61, %v14294_v17  ;;  %8294 = vmatpush.msra.mxu0 %v8243_v31  ;;  %v8235_v61 = vld [vmem:[#allocation26 + $0xa8] sm:$0xff] }
 0xe1f   : > { %7988 = vrot.lane.b32.xlu0 %v7899_v55, %s10834_s3  ;;  %s14303_s3 = sld [smem:[#allocation67_spill]] }
 0xe24   : > { %v7979_v41 = vpop.permute.xlu2 %7978 }
 0xe25   : > { %v8016_v16 = vsel %vm4398_vm4, %v8008_v27, %v7979_v41  ;;  %v8240_v41 = vld [vmem:[#allocation26 + $0xd0] sm:$0xff] }
 0xe26   : > { %v8024_v52 = vadd.f32 %v8016_v16, %v14293_v62  ;;  %v8241_v16 = vld [vmem:[#allocation26 + $0xd8] sm:$0xff]  ;;  %8254 = vmatpush.msrb.mxu3 %v8240_v41  ;;  %v8238_v62 = vld [vmem:[#allocation26 + $0xc0] sm:$0xff] }
 0xe27   : > { %8295 = vmatpush.msra.mxu0 %v8241_v16 }
 0xe28   : > { %8036 = vadd.xlane.f32.xlu1 %v8024_v52  ;;  %8255 = vmatpush.msrb.mxu3 %v8238_v62 }
 0xe2a   : > { %8256 = vmatpush.msrb.mxu3 %v8236_v3 }
 0xe2c   : > { %v7985_v54 = vpop.permute.xlu2 %7984  ;;  %8257 = vmatpush.msrb.mxu3 %v8234_v24 }
 0xe2d   : > { %v8019_v48 = vsel %vm4398_vm4, %v8011_v8, %v7985_v54  ;;  %v8232_v54 = vld [vmem:[#allocation26 + $0x90] sm:$0xff] }
 0xe2e   : > { %v8027_v63 = vadd.f32 %v8019_v48, %v14295_v15  ;;  %v8233_v48 = vld [vmem:[#allocation26 + $0x98] sm:$0xff]  ;;  %8258 = vmatpush.msrb.mxu3 %v8232_v54  ;;  %v8231_v15 = vld [vmem:[#allocation26 + $0x88] sm:$0xff] }
 0xe30   : > { %8040 = vadd.xlane.f32.xlu1 %v8026_v46  ;;  %8042 = vadd.xlane.f32.xlu2 %v8027_v63 }
 0xe34   : > { %v7981_v38 = vpop.permute.xlu2 %7980 }
 0xe35   : > { %v8017_v22 = vsel %vm4398_vm4, %v8009_v50, %v7981_v38  ;;  %v8229_v38 = vld [vmem:[#allocation26 + $0x78] sm:$0xff]  ;;  %v8227_v50 = vld [vmem:[#allocation26 + $0x68] sm:$0xff] }
 0xe36   : > { %v13644_v44 = vadd.f32 %v8017_v22, %v14296_v36  ;;  %v8224_v22 = vld [vmem:[#allocation26 + $0x50] sm:$0xff]  ;;  %v8225_v36 = vld [vmem:[#allocation26 + $0x58] sm:$0xff] }
 0xe3c   : > { %v7955_v57 = vpop.permute.xlu2 %7954 }
 0xe3d   : > { %v8012_v7 = vsel %vm4389_vm5, %v8004_v19, %v7955_v57  ;;  %v8219_v57 = vld [vmem:[#allocation26 + $0x28] sm:$0xff]  ;;  %v8216_v19 = vld [vmem:[#allocation26 + $0x10] sm:$0xff] }
 0xe49   : > { %8038 = vadd.xlane.f32.xlu0 %v13644_v44 }
 0xe55   : > { %v8033_v47 = vpop.xlane.xlu1 %8032 }
 0xe56   : > { %v8048_v51 = vmul.f32 %v8033_v47, %v14297_v10  ;;  %v8223_v47 = vld [vmem:[#allocation26 + $0x48] sm:$0xff] }
 0xe58   : > { %v13648_v32 = vsub.f32 %v8022_v49, %v8048_v51  ;;  %v14299_v49 = vld [vmem:[#allocation82_spill] sm:$0xff] }
 0xe59   : > { %v8220_v51 = vld [vmem:[#allocation26 + $0x30] sm:$0xff] }
 0xe5a   : > { %v8064_v30 = vmul.f32 %v13648_v32, %v13648_v32 }
 0xe5c   : > { %8072 = vadd.xlane.f32.xlu1 %v8064_v30  ;;  %v8221_v30 = vld [vmem:[#allocation26 + $0x38] sm:$0xff] }
 0xe79   : > { %v7987_v34 = vpop.permute.xlu0 %7986 }
 0xe7a   : > { %v8020_v58 = vsel %vm4398_vm4, %v8012_v7, %v7987_v34  ;;  %v8217_v7 = vld [vmem:[#allocation26 + $0x18] sm:$0xff]  ;;  %v8214_v34 = vld [vmem:[#allocation26] sm:$0xff] }
 0xe7b   : > { %v13657_v11 = vadd.f32 %v8020_v58, %v14298_v2  ;;  %v8215_v58 = vld [vmem:[#allocation26 + $0x8] sm:$0xff] }
 0xe7d   : > { %8044 = vadd.xlane.f32.xlu2 %v13657_v11 }
 0xe7e   : > { %v8035_v60 = vpop.xlane.xlu2 %8034 }
 0xe7f   : > { %v8049_v56 = vmul.f32 %v8035_v60, %v14297_v10 }
 0xe81   : > { %v13661_v12 = vsub.f32 %v8023_v28, %v8049_v56  ;;  %v7925_v53 = vpop.permute.xlu0 %7924 }
 0xe82   : > { %v8005_v4 = vsel %vm1465_vm0, %v13591_v9, %v7925_v53 }
 0xe83   : > { %v8065_v43 = vmul.f32 %v13661_v12, %v13661_v12 }
 0xe85   : > { %8074 = vadd.xlane.f32.xlu1 %v8065_v43 }
 0xe89   : > { %v7957_v23 = vpop.permute.xlu0 %7956 }
 0xe8a   : > { %v8013_v39 = vsel %vm4389_vm5, %v8005_v4, %v7957_v23 }
 0xe91   : > { %v7989_v6 = vpop.permute.xlu0 %7988 }
 0xe92   : > { %v8021_v5 = vsel %vm4398_vm4, %v8013_v39, %v7989_v6 }
 0xe93   : > { %v13670_v59 = vadd.f32 %v8021_v5, %v14299_v49  ;;  %v13696_v5 = vld [vmem:[%s14300_s18] ss:$0 sm:$0xff]  ;;  %s8828_s18 = sshll.u32 %s8824_s5, 4  ;;  %s8829_s18 = int_to_ptr.hbm [resolvable:$true] %s8828_s18 }
 0xe95   : > { %8046 = vadd.xlane.f32.xlu2 %v13670_v59 }
 0xe9b   : > { %v8037_v13 = vpop.xlane.xlu1 %8036 }
 0xe9c   : > { %v8050_v35 = vmul.f32 %v8037_v13, %v14297_v10 }
 0xe9e   : > { %v13674_v21 = vsub.f32 %v8024_v52, %v8050_v35  ;;  %v8239_v52 = vld [vmem:[#allocation26 + $0xc8] sm:$0xff]  ;;  %v13700_v35 = vld [vmem:[%s14301_s13] ss:$0 sm:$0xff]  ;;  %s8814_s13 = scalar_lea.sflag [#allocation4], %s11363_s8 }
 0xe9f   : > { %8296 = vmatpush.msra.mxu0 %v8239_v52 }
 0xea0   : > { %v8066_v29 = vmul.f32 %v13674_v21, %v13674_v21 }
 0xea1   : > { %8297 = vmatpush.msra.mxu0 %v8237_v20 }
 0xea2   : > { %8076 = vadd.xlane.f32.xlu1 %v8066_v29 }
 0xea3   : > { %v8041_v9 = vpop.xlane.xlu1 %8040  ;;  %v8043_v14 = vpop.xlane.xlu2 %8042  ;;  %8298 = vmatpush.msra.mxu0 %v8235_v61 }
 0xea4   : > { %v8052_v28 = vmul.f32 %v8041_v9, %v14297_v10  ;;  %v8053_v0 = vmul.f32 %v8043_v14, %v14297_v10 }
 0xea5   : > { %8299 = vmatpush.msra.mxu0 %v8233_v48 }
 0xea6   : > { %v13680_v55 = vsub.f32 %v8026_v46, %v8052_v28  ;;  %v13682_v42 = vsub.f32 %v8027_v63, %v8053_v0  ;;  %v8230_v46 = vld [vmem:[#allocation26 + $0x80] sm:$0xff] }
 0xea7   : > { %8259 = vmatpush.msrb.mxu3 %v8230_v46  ;;  %8300 = vmatpush.msra.mxu0 %v8231_v15 }
 0xea8   : > { %v8068_v25 = vmul.f32 %v13680_v55, %v13680_v55  ;;  %v8069_v27 = vmul.f32 %v13682_v42, %v13682_v42 }
 0xea9   : > { %8260 = vmatpush.msrb.mxu3 %v8228_v1  ;;  %8301 = vmatpush.msra.mxu0 %v8229_v38 }
 0xeaa   : > { %8080 = vadd.xlane.f32.xlu1 %v8068_v25  ;;  %8082 = vadd.xlane.f32.xlu0 %v8069_v27 }
 0xeab   : > { %8261 = vmatpush.msrb.mxu3 %v8226_v33  ;;  %8302 = vmatpush.msra.mxu0 %v8227_v50 }
 0xead   : > { %8262 = vmatpush.msrb.mxu3 %v8224_v22  ;;  %8303 = vmatpush.msra.mxu0 %v8225_v36 }
 0xeaf   : > { %8304 = vmatpush.msra.mxu0 %v8223_v47  ;;  %v8380_v47 = vld [vmem:[#allocation28 + $0xf0] sm:$0xff] }
 0xeb1   : > { %8305 = vmatpush.msra.mxu0 %v8221_v30 }
 0xeb3   : > { %8306 = vmatpush.msra.mxu0 %v8219_v57 }
 0xeb5   : > { %8307 = vmatpush.msra.mxu0 %v8217_v7  ;;  %v8365_v7 = vld [vmem:[#allocation28 + $0x78] sm:$0xff] }
 0xeb6   : > { %8386 = vmatpush.msrb.mxu1 %v8365_v7  ;;  %v8352_v7 = vld [vmem:[#allocation28 + $0x10] sm:$0xff] }
 0xeb7   : > { %8308 = vmatpush.msra.mxu0 %v8215_v58  ;;  %v8364_v58 = vld [vmem:[#allocation28 + $0x70] sm:$0xff] }
 0xeb8   : > { %8387 = vmatpush.msrb.mxu1 %v8364_v58  ;;  %v8351_v58 = vld [vmem:[#allocation28 + $0x8] sm:$0xff] }
 0xebc   : > { %v8039_v37 = vpop.xlane.xlu0 %8038 }
 0xebd   : > { %v8051_v8 = vmul.f32 %v8039_v37, %v14297_v10 }
 0xebf   : > { %v13690_v17 = vsub.f32 %v13644_v44, %v8051_v8  ;;  %v8222_v44 = vld [vmem:[#allocation26 + $0x40] sm:$0xff] }
 0xec0   : > { %8263 = vmatpush.msrb.mxu3 %v8222_v44  ;;  %v8381_v44 = vld [vmem:[#allocation28 + $0xf8] sm:$0xff] }
 0xec1   : > { %v8067_v63 = vmul.f32 %v13690_v17, %v13690_v17  ;;  %8427 = vmatpush.msra.mxu2 %v8381_v44 }
 0xec2   : > { %8264 = vmatpush.msrb.mxu3 %v8220_v51 }
 0xec3   : > { %8078 = vadd.xlane.f32.xlu2 %v8067_v63  ;;  %8428 = vmatpush.msra.mxu2 %v8380_v47  ;;  %v8354_v47 = vld [vmem:[#allocation28 + $0x20] sm:$0xff] }
 0xec4   : > { %8265 = vmatpush.msrb.mxu3 %v8218_v40 }
 0xec6   : > { %8266 = vmatpush.msrb.mxu3 %v8216_v19 }
 0xec8   : > { %8267 = vmatpush.msrb.mxu3 %v8214_v34  ;;  %v8378_v34 = vld [vmem:[#allocation28 + $0xe0] sm:$0xff] }
 0xecf   : > { %v8073_v2 = vpop.xlane.xlu1 %8072 }
 0xed0   : > { %v8088_v60 = vmul.f32 %v8073_v2, %v14297_v10 }
 0xed2   : > { %v8096_v56 = vadd.f32 1e-05, %v8088_v60  ;;  %v8377_v60 = vld [vmem:[#allocation28 + $0xd8] sm:$0xff] }
 0xed4   : > { %10065 = vrsqrt.f32 %v8096_v56  ;;  %vm8110_vm1 = vweird.f32 %v8096_v56 }
 0xeda   : > { %v10066_v53 = vpop.eup %10065 }
 0xedb   : > { %v8105_v43 = vmul.f32 %v10066_v53, %v8096_v56  ;;  %vm8111_vm0 = vweird.f32 %v10066_v53  ;;  %v8363_v56 = vld [vmem:[#allocation28 + $0x68] sm:$0xff] }
 0xedc   : > { %vm8112_vm4 = vmor %vm8110_vm1, %vm8111_vm0  ;;  %8388 = vmatpush.msrb.mxu1 %v8363_v56 }
 0xedd   : > { %v8106_v23 = vmul.f32 %v10066_v53, %v8105_v43 }
 0xedf   : > { %v8107_v4 = vmul.f32 0.5, %v8106_v23 }
 0xee1   : > { %v8108_v39 = vsub.f32 1.5, %v8107_v4  ;;  %v8376_v4 = vld [vmem:[#allocation28 + $0xd0] sm:$0xff] }
 0xee3   : > { %v8109_v6 = vmul.f32 %v10066_v53, %v8108_v39 }
 0xee5   : > { %v8113_v49 = vsel %vm8112_vm4, %v10066_v53, %v8109_v6 }
 0xee6   : > { %v8184_v13 = vmul.f32 %v8113_v49, %v13648_v32  ;;  %v8362_v49 = vld [vmem:[#allocation28 + $0x60] sm:$0xff] }
 0xee7   : > { %8389 = vmatpush.msrb.mxu1 %v8362_v49 }
 0xee8   : > { %v8195_v29 = vmul.f32 %v13696_v5, %v8184_v13  ;;  %v8375_v13 = vld [vmem:[#allocation28 + $0xc8] sm:$0xff] }
 0xeea   : > { %v13704_v9 = vadd.f32 %v13700_v35, %v8195_v29  ;;  %v8361_v29 = vld [vmem:[#allocation28 + $0x58] sm:$0xff] }
 0xeeb   : > { %8390 = vmatpush.msrb.mxu1 %v8361_v29 }
 0xeec   : > { %8268 = vmatmul.f32.vlgmr.msrb.gmra.mxu3 %v13704_v9  ;;  %8309 = vmatmul.f32.vlgmr.msra.gmra.mxu0 %v13704_v9 }
 0xef0   : > { %v8045_v14 = vpop.xlane.xlu2 %8044 }
 0xef1   : > { %v8054_v18 = vmul.f32 %v8045_v14, %v14297_v10  ;;  %v8374_v14 = vld [vmem:[#allocation28 + $0xc0] sm:$0xff] }
 0xef3   : > { %v13710_v26 = vsub.f32 %v13657_v11, %v8054_v18  ;;  %v8360_v18 = vld [vmem:[#allocation28 + $0x50] sm:$0xff] }
 0xef4   : > { %8391 = vmatpush.msrb.mxu1 %v8360_v18 }
 0xef5   : > { %v8070_v32 = vmul.f32 %v13710_v26, %v13710_v26 }
 0xef7   : > { %8084 = vadd.xlane.f32.xlu2 %v8070_v32  ;;  %v8373_v32 = vld [vmem:[#allocation28 + $0xb8] sm:$0xff] }
 0xef8   : > { %v8075_v45 = vpop.xlane.xlu1 %8074 }
 0xef9   : > { %v8089_v28 = vmul.f32 %v8075_v45, %v14297_v10 }
 0xefb   : > { %v8097_v0 = vadd.f32 1e-05, %v8089_v28 }
 0xefd   : > { %10067 = vrsqrt.f32 %v8097_v0  ;;  %vm8120_vm15 = vweird.f32 %v8097_v0 }
 0xf03   : > { %v10068_v31 = vpop.eup %10067 }
 0xf04   : > { %v8115_v25 = vmul.f32 %v10068_v31, %v8097_v0  ;;  %vm8121_vm5 = vweird.f32 %v10068_v31  ;;  %v8359_v0 = vld [vmem:[#allocation28 + $0x48] sm:$0xff] }
 0xf05   : > { %vm8122_vm2 = vmor %vm8120_vm15, %vm8121_vm5  ;;  %8392 = vmatpush.msrb.mxu1 %v8359_v0 }
 0xf06   : > { %v8116_v27 = vmul.f32 %v10068_v31, %v8115_v25 }
 0xf08   : > { %v8117_v41 = vmul.f32 0.5, %v8116_v27  ;;  %v8047_v16 = vpop.xlane.xlu2 %8046 }
 0xf09   : > { %v8055_v62 = vmul.f32 %v8047_v16, %v14297_v10 }
 0xf0a   : > { %v8118_v52 = vsub.f32 1.5, %v8117_v41 }
 0xf0b   : > { %v13717_v11 = vsub.f32 %v13670_v59, %v8055_v62  ;;  %v8358_v62 = vld [vmem:[#allocation28 + $0x40] sm:$0xff] }
 0xf0c   : > { %v8119_v3 = vmul.f32 %v10068_v31, %v8118_v52  ;;  %v8371_v52 = vld [vmem:[#allocation28 + $0xa8] sm:$0xff]  ;;  %8393 = vmatpush.msrb.mxu1 %v8358_v62 }
 0xf0d   : > { %v8071_v20 = vmul.f32 %v13717_v11, %v13717_v11 }
 0xf0e   : > { %v8123_v37 = vsel %vm8122_vm2, %v10068_v31, %v8119_v3  ;;  %v8372_v31 = vld [vmem:[#allocation28 + $0xb0] sm:$0xff] }
 0xf0f   : > { %8086 = vadd.xlane.f32.xlu1 %v8071_v20  ;;  %v8185_v24 = vmul.f32 %v8123_v37, %v13661_v12  ;;  %v8357_v20 = vld [vmem:[#allocation28 + $0x38] sm:$0xff]  ;;  %v8370_v37 = vld [vmem:[#allocation28 + $0xa0] sm:$0xff] }
 0xf10   : > { %8394 = vmatpush.msrb.mxu1 %v8357_v20 }
 0xf11   : > { %v8196_v61 = vmul.f32 %v13696_v5, %v8185_v24  ;;  %v8356_v24 = vld [vmem:[#allocation28 + $0x30] sm:$0xff] }
 0xf12   : > { %8395 = vmatpush.msrb.mxu1 %v8356_v24 }
 0xf13   : > { %v13724_v8 = vadd.f32 %v13700_v35, %v8196_v61  ;;  %v8369_v61 = vld [vmem:[#allocation28 + $0x98] sm:$0xff] }
 0xf15   : > { %v8077_v54 = vpop.xlane.xlu1 %8076  ;;  %8271 = vmatmul.f32.gmra.mxu3 %v13724_v8  ;;  %8312 = vmatmul.f32.gmra.mxu0 %v13724_v8 }
 0xf16   : > { %v8090_v59 = vmul.f32 %v8077_v54, %v14297_v10 }
 0xf18   : > { %v8098_v48 = vadd.f32 1e-05, %v8090_v59 }
 0xf1a   : > { %10069 = vrsqrt.f32 %v8098_v48  ;;  %vm8130_vm6 = vweird.f32 %v8098_v48 }
 0xf1d   : > { %v8081_v38 = vpop.xlane.xlu1 %8080  ;;  %v8083_v30 = vpop.xlane.xlu0 %8082 }
 0xf1e   : > { %v8092_v50 = vmul.f32 %v8081_v38, %v14297_v10  ;;  %v8093_v19 = vmul.f32 %v8083_v30, %v14297_v10  ;;  %v8367_v30 = vld [vmem:[#allocation28 + $0x88] sm:$0xff] }
 0xf20   : > { %v10070_v46 = vpop.eup %10069  ;;  %v13731_v51 = vadd.f32 1e-05, %v8092_v50  ;;  %v13741_v2 = vadd.f32 1e-05, %v8093_v19 }
 0xf21   : > { %v8125_v15 = vmul.f32 %v10070_v46, %v8098_v48  ;;  %vm8131_vm3 = vweird.f32 %v10070_v46 }
 0xf22   : > { %vm8132_vm7 = vmor %vm8130_vm6, %vm8131_vm3  ;;  %10071 = vrsqrt.f32 %v13731_v51  ;;  %vm8150_vm12 = vweird.f32 %v13731_v51  ;;  %vm8160_vm0 = vweird.f32 %v13741_v2 }
 0xf23   : > { %v8126_v63 = vmul.f32 %v10070_v46, %v8125_v15  ;;  %10073 = vrsqrt.f32 %v13741_v2  ;;  %v8368_v15 = vld [vmem:[#allocation28 + $0x90] sm:$0xff] }
 0xf25   : > { %v8127_v1 = vmul.f32 0.5, %v8126_v63 }
 0xf27   : > { %v8128_v12 = vsub.f32 1.5, %v8127_v1 }
 0xf28   : > { %v13743_v43 = vpop.eup %10071 }
 0xf29   : > { %v8129_v33 = vmul.f32 %v10070_v46, %v8128_v12  ;;  %v8145_v6 = vmul.f32 %v13743_v43, %v13731_v51  ;;  %v13750_v28 = vpop.eup %10073  ;;  %vm8151_vm9 = vweird.f32 %v13743_v43 }
 0xf2a   : > { %v8155_v41 = vmul.f32 %v13750_v28, %v13741_v2  ;;  %vm8152_vm13 = vmor %vm8150_vm12, %vm8151_vm9  ;;  %vm8161_vm14 = vweird.f32 %v13750_v28 }
 0xf2b   : > { %v8133_v22 = vsel %vm8132_vm7, %v10070_v46, %v8129_v33  ;;  %v8146_v45 = vmul.f32 %v13743_v43, %v8145_v6  ;;  %v8355_v46 = vld [vmem:[#allocation28 + $0x28] sm:$0xff]  ;;  %vm8162_vm1 = vmor %vm8160_vm0, %vm8161_vm14 }
 0xf2c   : > { %v8186_v36 = vmul.f32 %v8133_v22, %v13674_v21  ;;  %v8379_v21 = vld [vmem:[#allocation28 + $0xe8] sm:$0xff]  ;;  %v8156_v59 = vmul.f32 %v13750_v28, %v8155_v41  ;;  %8396 = vmatpush.msrb.mxu1 %v8355_v46 }
 0xf2d   : > { %8429 = vmatpush.msra.mxu2 %v8379_v21  ;;  %v8147_v27 = vmul.f32 0.5, %v8146_v45  ;;  %v8353_v21 = vld [vmem:[#allocation28 + $0x18] sm:$0xff] }
 0xf2e   : > { %v8197_v40 = vmul.f32 %v13696_v5, %v8186_v36  ;;  %v8157_v38 = vmul.f32 0.5, %v8156_v59  ;;  %8397 = vmatpush.msrb.mxu1 %v8354_v47 }
 0xf2f   : > { %8430 = vmatpush.msra.mxu2 %v8378_v34  ;;  %v8148_v54 = vsub.f32 1.5, %v8147_v27 }
 0xf30   : > { %v13735_v57 = vadd.f32 %v13700_v35, %v8197_v40  ;;  %v8158_v36 = vsub.f32 1.5, %v8157_v38  ;;  %8398 = vmatpush.msrb.mxu1 %v8353_v21 }
 0xf31   : > { %8431 = vmatpush.msra.mxu2 %v8377_v60  ;;  %v8149_v1 = vmul.f32 %v13743_v43, %v8148_v54  ;;  %v8350_v60 = vld [vmem:[#allocation28] sm:$0xff] }
 0xf32   : > { %8274 = vmatmul.f32.gmra.mxu3 %v13735_v57  ;;  %8315 = vmatmul.f32.gmra.mxu0 %v13735_v57  ;;  %v8159_v51 = vmul.f32 %v13750_v28, %v8158_v36 }
 0xf33   : > { %8432 = vmatpush.msra.mxu2 %v8376_v4  ;;  %v8153_v22 = vsel %vm8152_vm13, %v13743_v43, %v8149_v1  ;;  %8399 = vmatpush.msrb.mxu1 %v8352_v7 }
 0xf34   : > { %v8188_v19 = vmul.f32 %v8153_v22, %v13680_v55  ;;  %v8163_v34 = vsel %vm8162_vm1, %v13750_v28, %v8159_v51 }
 0xf35   : > { %8433 = vmatpush.msra.mxu2 %v8375_v13  ;;  %8400 = vmatpush.msrb.mxu1 %v8351_v58 }
 0xf36   : > { %v8079_v53 = vpop.xlane.xlu2 %8078  ;;  %v8199_v55 = vmul.f32 %v13696_v5, %v8188_v19 }
 0xf37   : > { %v8091_v23 = vmul.f32 %v8079_v53, %v14297_v10  ;;  %8434 = vmatpush.msra.mxu2 %v8374_v14  ;;  %v8189_v53 = vmul.f32 %v8163_v34, %v13682_v42  ;;  %8401 = vmatpush.msrb.mxu1 %v8350_v60 }
 0xf38   : > { %v13773_v56 = vadd.f32 %v13700_v35, %v8199_v55 }
 0xf39   : > { %v8099_v39 = vadd.f32 1e-05, %v8091_v23  ;;  %8435 = vmatpush.msra.mxu2 %v8373_v32  ;;  %v8200_v2 = vmul.f32 %v13696_v5, %v8189_v53  ;;  %v8246_v23 = vld [vmem:[%s14302_s12] sm:$0x3]  ;;  %s10681_s12 = sshra.s32 %s8829_s18, 4  ;;  %s10682_s12 = int_to_ptr.hbm [resolvable:$true] %s10681_s12 }
 0xf3a   : > { %v13785_v4 = vperm.slane %v8246_v23, 1  ;;  %v13789_v14 = vperm.slane %v8246_v23, 0  ;;  %p10688_p7 = scmp.lt.s32.totalorder %s10682_s12, %s14321_s22 }
 0xf3b   : > { %10075 = vrsqrt.f32 %v8099_v39  ;;  %8436 = vmatpush.msra.mxu2 %v8372_v31  ;;  %vm8140_vm10 = vweird.f32 %v8099_v39  ;;  %v13780_v43 = vadd.f32 %v13700_v35, %v8200_v2 }
 0xf3d   : > { %8437 = vmatpush.msra.mxu2 %v8371_v52 }
 0xf3f   : > { %8438 = vmatpush.msra.mxu2 %v8370_v37 }
 0xf41   : > { %v10076_v25 = vpop.eup %10075  ;;  %8439 = vmatpush.msra.mxu2 %v8369_v61 }
 0xf42   : > { %v8135_v16 = vmul.f32 %v10076_v25, %v8099_v39  ;;  %vm8141_vm8 = vweird.f32 %v10076_v25 }
 0xf43   : > { %8440 = vmatpush.msra.mxu2 %v8368_v15  ;;  %vm8142_vm11 = vmor %vm8140_vm10, %vm8141_vm8 }
 0xf44   : > { %v8136_v3 = vmul.f32 %v10076_v25, %v8135_v16 }
 0xf45   : > { %8441 = vmatpush.msra.mxu2 %v8367_v30 }
 0xf46   : > { %v8137_v48 = vmul.f32 0.5, %v8136_v3 }
 0xf48   : > { %v8138_v63 = vsub.f32 1.5, %v8137_v48 }
 0xf4a   : > { %v8139_v12 = vmul.f32 %v10076_v25, %v8138_v63 }
 0xf4c   : > { %v8143_v33 = vsel %vm8142_vm11, %v10076_v25, %v8139_v12 }
 0xf4d   : > { %v8187_v50 = vmul.f32 %v8143_v33, %v13690_v17  ;;  %v8366_v17 = vld [vmem:[#allocation28 + $0x80] sm:$0xff] }
 0xf4e   : > { %8442 = vmatpush.msra.mxu2 %v8366_v17 }
 0xf4f   : > { %v8198_v44 = vmul.f32 %v13696_v5, %v8187_v50 }
 0xf51   : > { %v13762_v40 = vadd.f32 %v13700_v35, %v8198_v44 }
 0xf53   : > { %8277 = vmatmul.f32.gmra.mxu3 %v13762_v40  ;;  %8318 = vmatmul.f32.gmra.mxu0 %v13762_v40 }
 0xf5b   : > { %8280 = vmatmul.f32.gmra.mxu3 %v13773_v56  ;;  %8321 = vmatmul.f32.gmra.mxu0 %v13773_v56 }
 0xf63   : > { %8283 = vmatmul.f32.gmra.mxu3 %v13780_v43  ;;  %8324 = vmatmul.f32.gmra.mxu0 %v13780_v43 }
 0xf69   : > { %v8310_v6 = vpop.f32.mrf.mxu0 }
 0xf6a   : > { %v8085_v39 = vpop.xlane.xlu2 %8084  ;;  %v8311_v49 = vadd.f32 %v8310_v6, %v13785_v4 }
 0xf6b   : > { %v8094_v42 = vmul.f32 %v8085_v39, %v14297_v10 }
 0xf6c   : > { %v8335_v29 = vmax.f32 %v8311_v49, 0.0 }
 0xf6d   : > { %v8102_v13 = vadd.f32 1e-05, %v8094_v42 }
 0xf6e   : > { %8443 = vmatmul.f32.vlgmr.msra.gmra.mxu2 %v8335_v29 }
 0xf6f   : > { %10077 = vrsqrt.f32 %v8102_v13  ;;  %v8269_v18 = vpop.f32.mrf.mxu3  ;;  %vm8170_vm5 = vweird.f32 %v8102_v13 }
 0xf70   : > { %v8270_v32 = vadd.f32 %v8269_v18, %v13789_v14 }
 0xf72   : > { %v8334_v45 = vmax.f32 %v8270_v32, 0.0  ;;  %v13818_v32 = vld [vmem:[%s14303_s3] ss:$0 sm:$0xff]  ;;  %s10683_s3 = scalar_lea.hbm %s10682_s12, 8 }
 0xf73   : > { %p10684_p4 = scmp.ne.s32.totalorder %s10682_s12, %s10683_s3  ;;  %p10689_p9 = scmp.lt.s32.totalorder %s10687_s16, %s10683_s3 }
 0xf74   : > { %8402 = vmatmul.f32.vlgmr.msrb.gmra.mxu1 %v8334_v45 }
 0xf75   : > { %v10078_v28 = vpop.eup %10077  ;;  %p10685_p6 = pnand %p10684_p4, %p11335_p2  ;;  %p10690_p10 = por %p10689_p9, %p10688_p7 }
 0xf76   : > { %v8165_v0 = vmul.f32 %v10078_v28, %v8102_v13  ;;  %vm8171_vm4 = vweird.f32 %v10078_v28 }
 0xf77   : > { %vm8172_vm15 = vmor %vm8170_vm5, %vm8171_vm4  ;;  %p10686_p8 = pneg %p10685_p6 }
 0xf78   : > { %v8166_v31 = vmul.f32 %v10078_v28, %v8165_v0 }
 0xf79   : > { %p10691_p12 = pnand %p10690_p10, %p10686_p8 }
 0xf7a   : > { %v8167_v25 = vmul.f32 0.5, %v8166_v31 }
 0xf7c   : > { %v8168_v27 = vsub.f32 1.5, %v8167_v25 }
 0xf7e   : > { %v8169_v41 = vmul.f32 %v10078_v28, %v8168_v27 }
 0xf80   : > { %v8173_v16 = vsel %vm8172_vm15, %v10078_v28, %v8169_v41 }
 0xf81   : > { %v8190_v62 = vmul.f32 %v8173_v16, %v13710_v26 }
 0xf82   : > { %v8087_v52 = vpop.xlane.xlu1 %8086 }
 0xf83   : > { %v8095_v3 = vmul.f32 %v8087_v52, %v14297_v10  ;;  %v8201_v20 = vmul.f32 %v13696_v5, %v8190_v62 }
 0xf85   : > { %v8103_v37 = vadd.f32 1e-05, %v8095_v3  ;;  %v13796_v24 = vadd.f32 %v13700_v35, %v8201_v20 }
 0xf87   : > { %10079 = vrsqrt.f32 %v8103_v37  ;;  %8286 = vmatmul.f32.gmra.mxu3 %v13796_v24  ;;  %8327 = vmatmul.f32.gmra.mxu0 %v13796_v24  ;;  %vm8180_vm3 = vweird.f32 %v8103_v37 }
 0xf8d   : > { %v10080_v61 = vpop.eup %10079 }
 0xf8e   : > { %v8175_v54 = vmul.f32 %v10080_v61, %v8103_v37  ;;  %vm8181_vm2 = vweird.f32 %v10080_v61 }
 0xf8f   : > { %vm8182_vm6 = vmor %vm8180_vm3, %vm8181_vm2 }
 0xf90   : > { %v8176_v59 = vmul.f32 %v10080_v61, %v8175_v54 }
 0xf92   : > { %v8177_v48 = vmul.f32 0.5, %v8176_v59  ;;  %v8313_v46 = vpop.f32.mrf.mxu0 }
 0xf93   : > { %v8314_v26 = vadd.f32 %v8313_v46, %v13785_v4 }
 0xf94   : > { %v8178_v15 = vsub.f32 1.5, %v8177_v48 }
 0xf95   : > { %v8337_v63 = vmax.f32 %v8314_v26, 0.0 }
 0xf96   : > { %v8179_v1 = vmul.f32 %v10080_v61, %v8178_v15 }
 0xf97   : > { %8446 = vmatmul.f32.gmra.mxu2 %v8337_v63 }
 0xf98   : > { %v8183_v38 = vsel %vm8182_vm6, %v10080_v61, %v8179_v1  ;;  %v8272_v12 = vpop.f32.mrf.mxu3 }
 0xf99   : > { %v8273_v33 = vadd.f32 %v8272_v12, %v13789_v14  ;;  %v8191_v50 = vmul.f32 %v8183_v38, %v13717_v11 }
 0xf9b   : > { %v8336_v22 = vmax.f32 %v8273_v33, 0.0  ;;  %v8202_v36 = vmul.f32 %v13696_v5, %v8191_v50 }
 0xf9d   : > { %8405 = vmatmul.f32.gmra.mxu1 %v8336_v22  ;;  %v13805_v44 = vadd.f32 %v13700_v35, %v8202_v36 }
 0xf9f   : > { %8289 = vmatmul.f32.gmra.mxu3 %v13805_v44  ;;  %8330 = vmatmul.f32.gmra.mxu0 %v13805_v44 }
 0xfaf   : > { %v8316_v47 = vpop.f32.mrf.mxu0 }
 0xfb0   : > { %v8317_v30 = vadd.f32 %v8316_v47, %v13785_v4 }
 0xfb2   : > { %v8339_v19 = vmax.f32 %v8317_v30, 0.0 }
 0xfb4   : > { %8449 = vmatmul.f32.gmra.mxu2 %v8339_v19 }
 0xfb5   : > { %v8275_v51 = vpop.f32.mrf.mxu3 }
 0xfb6   : > { %v8276_v21 = vadd.f32 %v8275_v51, %v13789_v14 }
 0xfb8   : > { %v8338_v11 = vmax.f32 %v8276_v21, 0.0 }
 0xfba   : > { %8408 = vmatmul.f32.gmra.mxu1 %v8338_v11 }
 0xfd0   : > { %v8319_v17 = vpop.f32.mrf.mxu0 }
 0xfd1   : > { %v8320_v5 = vadd.f32 %v8319_v17, %v13785_v4 }
 0xfd3   : > { %v8341_v7 = vmax.f32 %v8320_v5, 0.0 }
 0xfd5   : > { %8452 = vmatmul.f32.gmra.mxu2 %v8341_v7 }
 0xfd6   : > { %v8278_v35 = vpop.f32.mrf.mxu3 }
 0xfd7   : > { %v8279_v55 = vadd.f32 %v8278_v35, %v13789_v14 }
 0xfd8   : > { %v8322_v34 = vpop.f32.mrf.mxu0 }
 0xfd9   : > { %v8340_v58 = vmax.f32 %v8279_v55, 0.0  ;;  %v8323_v60 = vadd.f32 %v8322_v34, %v13785_v4 }
 0xfdb   : > { %v8343_v53 = vmax.f32 %v8323_v60, 0.0  ;;  %8411 = vmatmul.f32.gmra.mxu1 %v8340_v58 }
 0xfdd   : > { %8455 = vmatmul.f32.gmra.mxu2 %v8343_v53 }
 0xfde   : > { %v8281_v2 = vpop.f32.mrf.mxu3 }
 0xfdf   : > { %v8282_v23 = vadd.f32 %v8281_v2, %v13789_v14 }
 0xfe0   : > { %v8325_v39 = vpop.f32.mrf.mxu0 }
 0xfe1   : > { %v8342_v6 = vmax.f32 %v8282_v23, 0.0  ;;  %v8326_v42 = vadd.f32 %v8325_v39, %v13785_v4 }
 0xfe3   : > { %v8345_v49 = vmax.f32 %v8326_v42, 0.0  ;;  %8414 = vmatmul.f32.gmra.mxu1 %v8342_v6 }
 0xfe5   : > { %8458 = vmatmul.f32.gmra.mxu2 %v8345_v49 }
 0xfe6   : > { %v8284_v13 = vpop.f32.mrf.mxu3 }
 0xfe7   : > { %v8285_v29 = vadd.f32 %v8284_v13, %v13789_v14 }
 0xfe9   : > { %v8344_v18 = vmax.f32 %v8285_v29, 0.0 }
 0xfeb   : > { %8417 = vmatmul.f32.gmra.mxu1 %v8344_v18 }
 0xff1   : > { %v8403_v45 = vpop.f32.mrf.mxu1  ;;  %v8444_v0 = vpop.f32.mrf.mxu2 }
 0xff2   : > { %v8404_v28 = vadd.f32 %v13818_v32, %v8403_v45 }
 0xff4   : > { %v8445_v31 = vadd.f32 %v8444_v0, %v8404_v28 }
 0xff6   : > { %v8468_v25 = vadd.f32 %v8445_v31, %v13704_v9 }
 0xff8   : > { %8478 = vadd.xlane.f32.xlu0 %v8468_v25 }
0x1004   : > { %v8328_v27 = vpop.f32.mrf.mxu0 }
0x1005   : > { %v8329_v41 = vadd.f32 %v8328_v27, %v13785_v4 }
0x1007   : > { %v8347_v16 = vmax.f32 %v8329_v41, 0.0 }
0x1009   : > { %8461 = vmatmul.f32.gmra.mxu2 %v8347_v16 }
0x100a   : > { %v8287_v62 = vpop.f32.mrf.mxu3 }
0x100b   : > { %v8288_v52 = vadd.f32 %v8287_v62, %v13789_v14 }
0x100d   : > { %v8346_v3 = vmax.f32 %v8288_v52, 0.0 }
0x100f   : > { %8420 = vmatmul.f32.gmra.mxu1 %v8346_v3 }
0x101a   : > { %v8406_v20 = vpop.f32.mrf.mxu1  ;;  %v8447_v61 = vpop.f32.mrf.mxu2 }
0x101b   : > { %v8407_v37 = vadd.f32 %v13818_v32, %v8406_v20 }
0x101c   : > { %v8331_v54 = vpop.f32.mrf.mxu0 }
0x101d   : > { %v8448_v59 = vadd.f32 %v8447_v61, %v8407_v37  ;;  %v8332_v48 = vadd.f32 %v8331_v54, %v13785_v4 }
0x101f   : > { %v8469_v9 = vadd.f32 %v8448_v59, %v13724_v8  ;;  %v8349_v46 = vmax.f32 %v8332_v48, 0.0 }
0x1021   : > { %8464 = vmatmul.f32.gmra.mxu2 %v8349_v46  ;;  %8480 = vadd.xlane.f32.xlu2 %v8469_v9 }
0x1022   : > { %v8290_v26 = vpop.f32.mrf.mxu3 }
0x1023   : > { %v8291_v15 = vadd.f32 %v8290_v26, %v13789_v14 }
0x1025   : > { %v8348_v63 = vmax.f32 %v8291_v15, 0.0 }
0x1027   : > { %8423 = vmatmul.f32.gmra.mxu1 %v8348_v63 }
0x1037   : > { %v8409_v1 = vpop.f32.mrf.mxu1  ;;  %v8450_v12 = vpop.f32.mrf.mxu2 }
0x1038   : > { %v8410_v38 = vadd.f32 %v13818_v32, %v8409_v1 }
0x103a   : > { %v8451_v33 = vadd.f32 %v8450_v12, %v8410_v38 }
0x103c   : > { %v8470_v50 = vadd.f32 %v8451_v33, %v13735_v57 }
0x103e   : > { %8482 = vadd.xlane.f32.xlu1 %v8470_v50 }
0x1058   : > { %v8412_v22 = vpop.f32.mrf.mxu1  ;;  %v8453_v4 = vpop.f32.mrf.mxu2 }
0x1059   : > { %v8413_v8 = vadd.f32 %v13818_v32, %v8412_v22 }
0x105b   : > { %v8454_v36 = vadd.f32 %v8453_v4, %v8413_v8 }
0x105d   : > { %v8471_v47 = vadd.f32 %v8454_v36, %v13762_v40 }
0x105f   : > { %8484 = vadd.xlane.f32.xlu0 %v8471_v47 }
0x1060   : > { %v8415_v30 = vpop.f32.mrf.mxu1  ;;  %v8456_v14 = vpop.f32.mrf.mxu2 }
0x1061   : > { %v8416_v19 = vadd.f32 %v13818_v32, %v8415_v30 }
0x1063   : > { %v8457_v51 = vadd.f32 %v8456_v14, %v8416_v19 }
0x1065   : > { %v8472_v21 = vadd.f32 %v8457_v51, %v13773_v56 }
0x1067   : > { %8486 = vadd.xlane.f32.xlu2 %v8472_v21 }
0x1068   : > { %v8418_v11 = vpop.f32.mrf.mxu1  ;;  %v8459_v17 = vpop.f32.mrf.mxu2 }
0x1069   : > { %v8419_v57 = vadd.f32 %v13818_v32, %v8418_v11 }
0x106b   : > { %v8460_v5 = vadd.f32 %v8459_v17, %v8419_v57  ;;  %v8479_v7 = vpop.xlane.xlu0 %8478 }
0x106c   : > { %v8494_v55 = vmul.f32 %v8479_v7, %v14297_v10 }
0x106d   : > { %v8473_v35 = vadd.f32 %v8460_v5, %v13780_v43 }
0x106e   : > { %v13837_v40 = vsub.f32 %v8468_v25, %v8494_v55 }
0x106f   : > { %8488 = vadd.xlane.f32.xlu1 %v8473_v35 }
0x1070   : > { %v8510_v34 = vmul.f32 %v13837_v40, %v13837_v40 }
0x1077   : > { %8518 = vadd.xlane.f32.xlu1 %v8510_v34 }
0x108c   : > { %v8421_v58 = vpop.f32.mrf.mxu1  ;;  %v8462_v60 = vpop.f32.mrf.mxu2 }
0x108d   : > { %v8422_v56 = vadd.f32 %v13818_v32, %v8421_v58 }
0x108f   : > { %v8463_v53 = vadd.f32 %v8462_v60, %v8422_v56 }
0x1091   : > { %v8474_v2 = vadd.f32 %v8463_v53, %v13796_v24 }
0x1093   : > { %8490 = vadd.xlane.f32.xlu0 %v8474_v2 }
0x1094   : > { %v8481_v23 = vpop.xlane.xlu2 %8480 }
0x1095   : > { %v8495_v43 = vmul.f32 %v8481_v23, %v14297_v10 }
0x1097   : > { %v13844_v39 = vsub.f32 %v8469_v9, %v8495_v43 }
0x1099   : > { %v8511_v6 = vmul.f32 %v13844_v39, %v13844_v39 }
0x109b   : > { %8520 = vadd.xlane.f32.xlu0 %v8511_v6 }
0x10a4   : > { %v8424_v42 = vpop.f32.mrf.mxu1  ;;  %v8465_v13 = vpop.f32.mrf.mxu2 }
0x10a5   : > { %v8425_v49 = vadd.f32 %v13818_v32, %v8424_v42 }
0x10a7   : > { %v8466_v29 = vadd.f32 %v8465_v13, %v8425_v49 }
0x10a9   : > { %v8475_v18 = vadd.f32 %v8466_v29, %v13805_v44 }
0x10ab   : > { %8492 = vadd.xlane.f32.xlu2 %v8475_v18 }
0x10b1   : > { %v8483_v45 = vpop.xlane.xlu1 %8482 }
0x10b2   : > { %v8496_v24 = vmul.f32 %v8483_v45, %v14297_v10 }
0x10b4   : > { %v13851_v28 = vsub.f32 %v8470_v50, %v8496_v24  ;;  %v8723_v24 = vld [vmem:[#allocation29 + $0x78] sm:$0xff] }
0x10b5   : > { %8751 = vmatpush.msra.mxu3 %v8723_v24 }
0x10b6   : > { %v8512_v0 = vmul.f32 %v13851_v28, %v13851_v28 }
0x10b8   : > { %8522 = vadd.xlane.f32.xlu2 %v8512_v0 }
0x10d2   : > { %v8485_v31 = vpop.xlane.xlu0 %8484 }
0x10d3   : > { %v8497_v25 = vmul.f32 %v8485_v31, %v14297_v10 }
0x10d5   : > { %v13856_v27 = vsub.f32 %v8471_v47, %v8497_v25 }
0x10d7   : > { %v8513_v32 = vmul.f32 %v13856_v27, %v13856_v27 }
0x10d9   : > { %8524 = vadd.xlane.f32.xlu1 %v8513_v32 }
0x10da   : > { %v8487_v44 = vpop.xlane.xlu2 %8486 }
0x10db   : > { %v8498_v41 = vmul.f32 %v8487_v44, %v14297_v10  ;;  %v8722_v44 = vld [vmem:[#allocation29 + $0x70] sm:$0xff] }
0x10dc   : > { %8752 = vmatpush.msra.mxu3 %v8722_v44  ;;  %v14039_v44 = vld [vmem:[%s14319_s9] ss:$0 sm:$0xff] }
0x10dd   : > { %v13861_v16 = vsub.f32 %v8472_v21, %v8498_v41 }
0x10df   : > { %v8514_v62 = vmul.f32 %v13861_v16, %v13861_v16 }
0x10e1   : > { %8526 = vadd.xlane.f32.xlu0 %v8514_v62 }
0x10e2   : > { %v8489_v52 = vpop.xlane.xlu1 %8488 }
0x10e3   : > { %v8499_v3 = vmul.f32 %v8489_v52, %v14297_v10 }
0x10e5   : > { %v13866_v20 = vsub.f32 %v8473_v35, %v8499_v3  ;;  %v8721_v3 = vld [vmem:[#allocation29 + $0x68] sm:$0xff] }
0x10e6   : > { %8753 = vmatpush.msra.mxu3 %v8721_v3  ;;  %v8710_v3 = vld [vmem:[#allocation29 + $0x10] sm:$0xff] }
0x10e7   : > { %v8515_v37 = vmul.f32 %v13866_v20, %v13866_v20 }
0x10e9   : > { %8528 = vadd.xlane.f32.xlu2 %v8515_v37 }
0x10ea   : > { %v8519_v63 = vpop.xlane.xlu1 %8518 }
0x10eb   : > { %v8534_v12 = vmul.f32 %v8519_v63, %v14297_v10 }
0x10ed   : > { %v13884_v47 = vadd.f32 1e-05, %v8534_v12 }
0x10ef   : > { %10081 = vrsqrt.f32 %v13884_v47  ;;  %vm8556_vm9 = vweird.f32 %v13884_v47 }
0x10f5   : > { %v13904_v17 = vpop.eup %10081 }
0x10f6   : > { %v8551_v60 = vmul.f32 %v13904_v17, %v13884_v47  ;;  %vm8557_vm7 = vweird.f32 %v13904_v17  ;;  %v8784_v47 = vld [vmem:[#allocation31 + $0x60] sm:$0xff] }
0x10f7   : > { %vm13950_vm11 = vmor %vm8556_vm9, %vm8557_vm7 }
0x10f8   : > { %v8552_v13 = vmul.f32 %v13904_v17, %v8551_v60 }
0x10fa   : > { %v8553_v25 = vmul.f32 0.5, %v8552_v13 }
0x1106   : > { %v8491_v61 = vpop.xlane.xlu0 %8490 }
0x1107   : > { %v8500_v54 = vmul.f32 %v8491_v61, %v14297_v10 }
0x1109   : > { %v13871_v59 = vsub.f32 %v8474_v2, %v8500_v54 }
0x110b   : > { %v8516_v48 = vmul.f32 %v13871_v59, %v13871_v59 }
0x110d   : > { %8530 = vadd.xlane.f32.xlu1 %v8516_v48  ;;  %v8554_v48 = vsub.f32 1.5, %v8553_v25 }
0x110e   : > { %v8521_v1 = vpop.xlane.xlu0 %8520 }
0x110f   : > { %v8535_v50 = vmul.f32 %v8521_v1, %v14297_v10 }
0x1111   : > { %v13887_v14 = vadd.f32 1e-05, %v8535_v50 }
0x1113   : > { %10083 = vrsqrt.f32 %v13887_v14  ;;  %vm8566_vm12 = vweird.f32 %v13887_v14 }
0x1119   : > { %v13906_v5 = vpop.eup %10083 }
0x111a   : > { %v8561_v34 = vmul.f32 %v13906_v5, %v13887_v14  ;;  %vm8567_vm8 = vweird.f32 %v13906_v5 }
0x111b   : > { %vm13959_vm14 = vmor %vm8566_vm12, %vm8567_vm8 }
0x111c   : > { %v8562_v42 = vmul.f32 %v13906_v5, %v8561_v34 }
0x111e   : > { %v8493_v9 = vpop.xlane.xlu2 %8492  ;;  %v8563_v0 = vmul.f32 0.5, %v8562_v42 }
0x111f   : > { %v8501_v46 = vmul.f32 %v8493_v9, %v14297_v10 }
0x1120   : > { %v8564_v37 = vsub.f32 1.5, %v8563_v0 }
0x1121   : > { %v13876_v26 = vsub.f32 %v8475_v18, %v8501_v46  ;;  %v8720_v46 = vld [vmem:[#allocation29 + $0x60] sm:$0xff] }
0x1122   : > { %8754 = vmatpush.msra.mxu3 %v8720_v46  ;;  %v8565_v12 = vmul.f32 %v13906_v5, %v8564_v37  ;;  %v8787_v46 = vld [vmem:[#allocation31 + $0x78] sm:$0xff] }
0x1123   : > { %v8517_v15 = vmul.f32 %v13876_v26, %v13876_v26  ;;  %8792 = vmatpush.msrb.mxu0 %v8787_v46 }
0x1124   : > { %v8569_v14 = vsel %vm13959_vm14, %v13906_v5, %v8565_v12  ;;  %v8708_v12 = vld [vmem:[#allocation29] sm:$0xff] }
0x1125   : > { %8532 = vadd.xlane.f32.xlu0 %v8517_v15 }
0x112b   : > { %v8523_v38 = vpop.xlane.xlu2 %8522 }
0x112c   : > { %v8536_v4 = vmul.f32 %v8523_v38, %v14297_v10  ;;  %v8719_v38 = vld [vmem:[#allocation29 + $0x58] sm:$0xff] }
0x112d   : > { %8755 = vmatpush.msra.mxu3 %v8719_v38 }
0x112e   : > { %v13890_v51 = vadd.f32 1e-05, %v8536_v4 }
0x1130   : > { %10085 = vrsqrt.f32 %v13890_v51  ;;  %vm8576_vm0 = vweird.f32 %v13890_v51 }
0x1136   : > { %v13908_v7 = vpop.eup %10085 }
0x1137   : > { %v8571_v53 = vmul.f32 %v13908_v7, %v13890_v51  ;;  %vm8577_vm10 = vweird.f32 %v13908_v7 }
0x1138   : > { %vm13969_vm4 = vmor %vm8576_vm0, %vm8577_vm10  ;;  %vm8736_vm0 = vcmask 1041409  }
0x1139   : > { %v8572_v29 = vmul.f32 %v13908_v7, %v8571_v53 }
0x113b   : > { %v8573_v32 = vmul.f32 0.5, %v8572_v29  ;;  %v14023_v29 = vld [vmem:[%s14312_s2] ss:$0 sm:$0xff] }
0x113d   : > { %v8574_v9 = vsub.f32 1.5, %v8573_v32  ;;  %v8712_v32 = vld [vmem:[#allocation29 + $0x20] sm:$0xff] }
0x113f   : > { %v8575_v4 = vmul.f32 %v13908_v7, %v8574_v9 }
0x1141   : > { %v8579_v51 = vsel %vm13969_vm4, %v13908_v7, %v8575_v4  ;;  %v8785_v4 = vld [vmem:[#allocation31 + $0x68] sm:$0xff]  ;;  %vm8740_vm4 = vcmask 1043459  }
0x1142   : > { %v8632_v13 = vmul.f32 %v8579_v51, %v13851_v28  ;;  %v8783_v51 = vld [vmem:[#allocation31 + $0x58] sm:$0xff] }
0x114c   : > { %v8525_v33 = vpop.xlane.xlu1 %8524 }
0x114d   : > { %v8537_v36 = vmul.f32 %v8525_v33, %v14297_v10 }
0x114f   : > { %v13892_v21 = vadd.f32 1e-05, %v8537_v36 }
0x1151   : > { %10087 = vrsqrt.f32 %v13892_v21  ;;  %vm8586_vm5 = vweird.f32 %v13892_v21 }
0x1154   : > { %v8527_v22 = vpop.xlane.xlu0 %8526 }
0x1155   : > { %v8538_v30 = vmul.f32 %v8527_v22, %v14297_v10  ;;  %v8555_v22 = vmul.f32 %v13904_v17, %v8554_v48  ;;  %v8709_v48 = vld [vmem:[#allocation29 + $0x8] sm:$0xff] }
0x1157   : > { %v13895_v11 = vadd.f32 1e-05, %v8538_v30  ;;  %v13910_v35 = vpop.eup %10087 }
0x1158   : > { %v8581_v23 = vmul.f32 %v13910_v35, %v13892_v21  ;;  %vm8587_vm13 = vweird.f32 %v13910_v35  ;;  %v8716_v21 = vld [vmem:[#allocation29 + $0x40] sm:$0xff] }
0x1159   : > { %10089 = vrsqrt.f32 %v13895_v11  ;;  %vm13981_vm2 = vmor %vm8586_vm5, %vm8587_vm13  ;;  %vm8596_vm3 = vweird.f32 %v13895_v11  ;;  %vm8742_vm5 = vcmask 1044484  }
0x115a   : > { %v8582_v18 = vmul.f32 %v13910_v35, %v8581_v23  ;;  %v8715_v23 = vld [vmem:[#allocation29 + $0x38] sm:$0xff] }
0x115c   : > { %v8529_v8 = vpop.xlane.xlu2 %8528  ;;  %v8583_v41 = vmul.f32 0.5, %v8582_v18 }
0x115d   : > { %v8539_v19 = vmul.f32 %v8529_v8, %v14297_v10  ;;  %v8718_v8 = vld [vmem:[#allocation29 + $0x50] sm:$0xff] }
0x115e   : > { %v8584_v15 = vsub.f32 1.5, %v8583_v41  ;;  %8756 = vmatpush.msra.mxu3 %v8718_v8 }
0x115f   : > { %v13898_v57 = vadd.f32 1e-05, %v8539_v19  ;;  %v13912_v55 = vpop.eup %10089 }
0x1160   : > { %v8591_v43 = vmul.f32 %v13912_v55, %v13895_v11  ;;  %v8585_v30 = vmul.f32 %v13910_v35, %v8584_v15  ;;  %vm8597_vm1 = vweird.f32 %v13912_v55  ;;  %v8631_v11 = vmul.f32 %v8569_v14, %v13844_v39  ;;  %v8786_v15 = vld [vmem:[#allocation31 + $0x70] sm:$0xff] }
0x1161   : > { %10091 = vrsqrt.f32 %v13898_v57  ;;  %vm13996_vm7 = vmor %vm8596_vm3, %vm8597_vm1  ;;  %vm8606_vm8 = vweird.f32 %v13898_v57  ;;  %8793 = vmatpush.msrb.mxu0 %v8786_v15  ;;  %v8775_v15 = vld [vmem:[#allocation31 + $0x18] sm:$0xff]  ;;  %vm8738_vm1 = vcmask 1042434   ;;  %vm8748_vm3 = vcmask 1047559  }
0x1162   : > { %v8592_v45 = vmul.f32 %v13912_v55, %v8591_v43  ;;  %v8559_v43 = vsel %vm13950_vm11, %v13904_v17, %v8555_v22  ;;  %v8589_v7 = vsel %vm13981_vm2, %v13910_v35, %v8585_v30  ;;  %v8714_v35 = vld [vmem:[#allocation29 + $0x30] sm:$0xff]  ;;  %v8642_v0 = vmul.f32 %v14023_v29, %v8631_v11 }
0x1163   : > { %v8633_v18 = vmul.f32 %v8589_v7, %v13856_v27  ;;  %8794 = vmatpush.msrb.mxu0 %v8785_v4  ;;  %vm8746_vm2 = vcmask 1046534  }
0x1164   : > { %v8593_v52 = vmul.f32 0.5, %v8592_v45  ;;  %v8713_v45 = vld [vmem:[#allocation29 + $0x28] sm:$0xff] }
0x1165   : > { %v8644_v41 = vmul.f32 %v14023_v29, %v8633_v18  ;;  %8795 = vmatpush.msrb.mxu0 %v8784_v47 }
0x1166   : > { %v8594_v1 = vsub.f32 1.5, %v8593_v52 }
0x1167   : > { %v13916_v56 = vpop.eup %10091  ;;  %8796 = vmatpush.msrb.mxu0 %v8783_v51  ;;  %v9773_v51 = vld [vmem:[%s14320_s4] ss:$0 sm:$0xff] }
0x1168   : > { %v8601_v49 = vmul.f32 %v13916_v56, %v13898_v57  ;;  %v8595_v34 = vmul.f32 %v13912_v55, %v8594_v1  ;;  %vm8607_vm15 = vweird.f32 %v13916_v56 }
0x1169   : > { %vm14007_vm9 = vmor %vm8606_vm8, %vm8607_vm15  ;;  %vm8744_vm15 = vcmask 1045509  }
0x116a   : > { %v8602_v31 = vmul.f32 %v13916_v56, %v8601_v49  ;;  %v8599_v49 = vsel %vm13996_vm7, %v13912_v55, %v8595_v34 }
0x116b   : > { %v8634_v24 = vmul.f32 %v8599_v49, %v13861_v16  ;;  %v8711_v16 = vld [vmem:[#allocation29 + $0x18] sm:$0xff] }
0x116c   : > { %v8603_v61 = vmul.f32 0.5, %v8602_v31 }
0x116e   : > { %v8604_v33 = vsub.f32 1.5, %v8603_v61 }
0x1170   : > { %v8605_v53 = vmul.f32 %v13916_v56, %v8604_v33 }
0x1172   : > { %v8609_v57 = vsel %vm14007_vm9, %v13916_v56, %v8605_v53 }
0x1173   : > { %v8635_v31 = vmul.f32 %v8609_v57, %v13866_v20  ;;  %v8653_v20 = vadd.f32 %v14039_v44, %v8642_v0  ;;  %v8779_v0 = vld [vmem:[#allocation31 + $0x38] sm:$0xff] }
0x1175   : > { %v8646_v52 = vmul.f32 %v14023_v29, %v8635_v31  ;;  %v8666_v1 = vrot.slane %v8653_v20, 4 }
0x1177   : > { %v8657_v38 = vadd.f32 %v14039_v44, %v8646_v52  ;;  %v8667_v34 = vadd.f32 %v8666_v1, %v8653_v20  ;;  %v8777_v52 = vld [vmem:[#allocation31 + $0x28] sm:$0xff] }
0x1179   : > { %v8668_v7 = vrot.slane %v8667_v34, 2 }
0x117b   : > { %v8669_v18 = vadd.f32 %v8668_v7, %v8667_v34 }
0x1180   : > { %v8531_v58 = vpop.xlane.xlu1 %8530 }
0x1181   : > { %v8540_v2 = vmul.f32 %v8531_v58, %v14297_v10  ;;  %v8717_v58 = vld [vmem:[#allocation29 + $0x48] sm:$0xff] }
0x1182   : > { %8757 = vmatpush.msra.mxu3 %v8717_v58  ;;  %v8690_v58 = vrot.slane %v8657_v38, 4 }
0x1183   : > { %v13927_v6 = vadd.f32 1e-05, %v8540_v2 }
0x1184   : > { %8758 = vmatpush.msra.mxu3 %v8716_v21  ;;  %v8691_v42 = vadd.f32 %v8690_v58, %v8657_v38 }
0x1185   : > { %10093 = vrsqrt.f32 %v13927_v6  ;;  %vm8616_vm10 = vweird.f32 %v13927_v6 }
0x1186   : > { %8759 = vmatpush.msra.mxu3 %v8715_v23 }
0x1188   : > { %8760 = vmatpush.msra.mxu3 %v8714_v35  ;;  %v8781_v35 = vld [vmem:[#allocation31 + $0x48] sm:$0xff] }
0x118a   : > { %8761 = vmatpush.msra.mxu3 %v8713_v45 }
0x118b   : > { %v13938_v62 = vpop.eup %10093 }
0x118c   : > { %v8611_v54 = vmul.f32 %v13938_v62, %v13927_v6  ;;  %vm8617_vm6 = vweird.f32 %v13938_v62  ;;  %v8630_v6 = vmul.f32 %v8559_v43, %v13837_v40  ;;  %v8643_v40 = vmul.f32 %v14023_v29, %v8632_v13  ;;  %8762 = vmatpush.msra.mxu3 %v8712_v32  ;;  %v8782_v43 = vld [vmem:[#allocation31 + $0x50] sm:$0xff] }
0x118d   : > { %vm14018_vm11 = vmor %vm8616_vm10, %vm8617_vm6  ;;  %8797 = vmatpush.msrb.mxu0 %v8782_v43 }
0x118e   : > { %v8612_v63 = vmul.f32 %v13938_v62, %v8611_v54  ;;  %8763 = vmatpush.msra.mxu3 %v8711_v16  ;;  %v8655_v54 = vadd.f32 %v14039_v44, %v8644_v41 }
0x118f   : > { %8798 = vmatpush.msrb.mxu0 %v8781_v35 }
0x1190   : > { %v8613_v50 = vmul.f32 0.5, %v8612_v63  ;;  %8764 = vmatpush.msra.mxu3 %v8710_v3  ;;  %v8678_v36 = vrot.slane %v8655_v54, 4 }
0x1192   : > { %v8614_v19 = vsub.f32 1.5, %v8613_v50  ;;  %8765 = vmatpush.msra.mxu3 %v8709_v48 }
0x1194   : > { %v8615_v5 = vmul.f32 %v13938_v62, %v8614_v19  ;;  %8766 = vmatpush.msra.mxu3 %v8708_v12 }
0x1196   : > { %v8619_v28 = vsel %vm14018_vm11, %v13938_v62, %v8615_v5  ;;  %v8645_v62 = vmul.f32 %v14023_v29, %v8634_v24  ;;  %v8679_v5 = vadd.f32 %v8678_v36, %v8655_v54 }
0x1197   : > { %v8636_v27 = vmul.f32 %v8619_v28, %v13871_v59  ;;  %v8654_v59 = vadd.f32 %v14039_v44, %v8643_v40  ;;  %v8692_v28 = vrot.slane %v8691_v42, 2 }
0x1198   : > { %v8533_v55 = vpop.xlane.xlu0 %8532  ;;  %v8656_v9 = vadd.f32 %v14039_v44, %v8645_v62  ;;  %v8680_v57 = vrot.slane %v8679_v5, 2 }
0x1199   : > { %v8541_v56 = vmul.f32 %v8533_v55, %v14297_v10  ;;  %v8641_v10 = vmul.f32 %v14023_v29, %v8630_v6  ;;  %v8647_v37 = vmul.f32 %v14023_v29, %v8636_v27  ;;  %v8672_v33 = vrot.slane %v8654_v59, 4  ;;  %v8780_v6 = vld [vmem:[#allocation31 + $0x40] sm:$0xff]  ;;  %v8778_v27 = vld [vmem:[#allocation31 + $0x30] sm:$0xff] }
0x119a   : > { %v8684_v30 = vrot.slane %v8656_v9, 4  ;;  %v8681_v32 = vadd.f32 %v8680_v57, %v8679_v5  ;;  %8799 = vmatpush.msrb.mxu0 %v8780_v6  ;;  %v8693_v16 = vadd.f32 %v8692_v28, %v8691_v42 }
0x119b   : > { %v14034_v25 = vadd.f32 1e-05, %v8541_v56  ;;  %v8652_v61 = vadd.f32 %v14039_v44, %v8641_v10  ;;  %v8658_v50 = vadd.f32 %v14039_v44, %v8647_v37  ;;  %v8673_v14 = vadd.f32 %v8672_v33, %v8654_v59 }
0x119c   : > { %v8685_v21 = vadd.f32 %v8684_v30, %v8656_v9  ;;  %v8670_v10 = vrot.slane %v8669_v18, 1  ;;  %8800 = vmatpush.msrb.mxu0 %v8779_v0  ;;  %v8682_v3 = vrot.slane %v8681_v32, 1  ;;  %v8694_v48 = vrot.slane %v8693_v16, 1 }
0x119d   : > { %10095 = vrsqrt.f32 %v14034_v25  ;;  %v8660_v8 = vrot.slane %v8652_v61, 4  ;;  %v8696_v60 = vrot.slane %v8658_v50, 4  ;;  %v8674_v11 = vrot.slane %v8673_v14, 2 }
0x119e   : > { %vm8626_vm13 = vweird.f32 %v14034_v25  ;;  %v8686_v39 = vrot.slane %v8685_v21, 2  ;;  %8801 = vmatpush.msrb.mxu0 %v8778_v27  ;;  %v8671_v54 = vadd.f32 %v8670_v10, %v8669_v18  ;;  %v8695_v12 = vadd.f32 %v8694_v48, %v8693_v16 }
0x119f   : > { %v8661_v2 = vadd.f32 %v8660_v8, %v8652_v61  ;;  %v8697_v49 = vadd.f32 %v8696_v60, %v8658_v50  ;;  %v8675_v45 = vadd.f32 %v8674_v11, %v8673_v14  ;;  %v8776_v61 = vld [vmem:[#allocation31 + $0x20] sm:$0xff]  ;;  %v8774_v14 = vld [vmem:[#allocation31 + $0x10] sm:$0xff]  ;;  %v8773_v60 = vld [vmem:[#allocation31 + $0x8] sm:$0xff] }
0x11a0   : > { %v8687_v40 = vadd.f32 %v8686_v39, %v8685_v21  ;;  %8802 = vmatpush.msrb.mxu0 %v8777_v52 }
0x11a1   : > { %v8662_v13 = vrot.slane %v8661_v2, 2  ;;  %v8698_v24 = vrot.slane %v8697_v49, 2  ;;  %v8676_v62 = vrot.slane %v8675_v45, 1 }
0x11a2   : > { %v8688_v37 = vrot.slane %v8687_v40, 1  ;;  %8803 = vmatpush.msrb.mxu0 %v8776_v61 }
0x11a3   : > { %v10096_v63 = vpop.eup %10095  ;;  %v8663_v31 = vadd.f32 %v8662_v13, %v8661_v2  ;;  %v8699_v20 = vadd.f32 %v8698_v24, %v8697_v49  ;;  %v8677_v9 = vadd.f32 %v8676_v62, %v8675_v45 }
0x11a4   : > { %v8621_v22 = vmul.f32 %v10096_v63, %v14034_v25  ;;  %vm8627_vm12 = vweird.f32 %v10096_v63  ;;  %v8689_v38 = vadd.f32 %v8688_v37, %v8687_v40  ;;  %8804 = vmatpush.msrb.mxu0 %v8775_v15 }
0x11a5   : > { %vm8628_vm14 = vmor %vm8626_vm13, %vm8627_vm12  ;;  %v8700_v46 = vrot.slane %v8699_v20, 1 }
0x11a6   : > { %v8622_v19 = vmul.f32 %v10096_v63, %v8621_v22  ;;  %8805 = vmatpush.msrb.mxu0 %v8774_v14 }
0x11a7   : > { %v8701_v22 = vadd.f32 %v8700_v46, %v8699_v20 }
0x11a8   : > { %v8623_v53 = vmul.f32 0.5, %v8622_v19  ;;  %8806 = vmatpush.msrb.mxu0 %v8773_v60 }
0x11aa   : > { %v8624_v23 = vsub.f32 1.5, %v8623_v53  ;;  %v8772_v53 = vld [vmem:[#allocation31] sm:$0xff] }
0x11ab   : > { %8807 = vmatpush.msrb.mxu0 %v8772_v53 }
0x11ac   : > { %v8625_v17 = vmul.f32 %v10096_v63, %v8624_v23  ;;  %v9774_v23 = vld [vmem:[%s14322_s26] ss:$0 sm:$0xff] }
0x11ae   : > { %v8629_v55 = vsel %vm8628_vm14, %v10096_v63, %v8625_v17  ;;  %v8683_v63 = vadd.f32 %v8682_v3, %v8681_v32 }
0x11af   : > { %v8637_v56 = vmul.f32 %v8629_v55, %v13876_v26  ;;  %v8664_v26 = vrot.slane %v8663_v31, 1 }
0x11b1   : > { %v8648_v25 = vmul.f32 %v14023_v29, %v8637_v56 }
0x11b3   : > { %v8659_v41 = vadd.f32 %v14039_v44, %v8648_v25  ;;  %v8665_v44 = vadd.f32 %v8664_v26, %v8663_v31 }
0x11b5   : > { %v8702_v59 = vrot.slane %v8659_v41, 4  ;;  %v8737_v50 = vsel %vm8736_vm0, %v8671_v54, %v8665_v44 }
0x11b6   : > { %v8739_v4 = vsel %vm8738_vm1, %v8677_v9, %v8737_v50 }
0x11b7   : > { %v8703_v29 = vadd.f32 %v8702_v59, %v8659_v41  ;;  %v8741_v36 = vsel %vm8740_vm4, %v8683_v63, %v8739_v4 }
0x11b8   : > { %v8743_v30 = vsel %vm8742_vm5, %v8689_v38, %v8741_v36 }
0x11b9   : > { %v8704_v1 = vrot.slane %v8703_v29, 2  ;;  %v8745_v47 = vsel %vm8744_vm15, %v8695_v12, %v8743_v30 }
0x11ba   : > { %v8747_v34 = vsel %vm8746_vm2, %v8701_v22, %v8745_v47 }
0x11bb   : > { %v8705_v33 = vadd.f32 %v8704_v1, %v8703_v29 }
0x11bd   : > { %v8706_v8 = vrot.slane %v8705_v33, 1 }
0x11bf   : > { %v8707_v19 = vadd.f32 %v8706_v8, %v8705_v33 }
0x11c1   : > { %v8749_v58 = vsel %vm8748_vm3, %v8707_v19, %v8747_v34 }
0x11c2   : > { %8767 = vmatmul.f32.vlgmr.msra.gmra.mxu3 %v8749_v58 }
0x1245   : > { %v8768_v2 = vpop.f32.mrf.mxu3 }
0x1246   : > { %v8769_v5 = vadd.f32 %v9773_v51, %v8768_v2 }
0x1248   : > { %v8771_v21 = vmax.f32 %v8769_v5, 0.0 }
0x124a   : > { %8808 = vmatmul.f32.vlgmr.msrb.gmra.mxu0 %v8771_v21 }
0x12c7   : > { %v8809_v43 = vpop.f32.mrf.mxu0 }
0x12c8   : > { %v8810_v7 = vadd.f32 %v9774_v23, %v8809_v43 }
0x12ca   : > { %8812 = vst [vmem:[%s1435_s14] sm:$0xff] %v8810_v7 }
0x12cb   : > { %10694 = shalt.err (!%p10691_p12)
}
0x12cc   : > { %9447 = dma.vmem_to_hbm [thread:$0]  (%p11335_p2), %s8827_s15, 128, %s8829_s18, %s8814_s13  }
0x12cd PF: > { %s8840_s8 = sand.u32 1, %s10757_s7   ;;  %p14323_p13 = scmp.ne.s32.totalorder %s14200_s27, 0 }
0x12ce   : > { %p14324_p1 = scmp.ge.s32.totalorder %s10769_s0, 2  ;;  %s8841_s2 = scalar_lea.sflag [#allocation4], %s8840_s8 }
0x12d0   : > { %p9509_p3 = pnand %p14324_p1, %p14323_p13 }
0x12d2   : > { %p9510_p5 = pneg %p9509_p3 }
0x12d4   : > { %10752 = dma.done.wait (%p9510_p5), %s8841_s2, 128  }
0x12d5   : > { %10754 = vsyncadd (%p9510_p5), %s8841_s2, 4294967168  ;;  %p97_p11 = scmp.ge.s32.totalorder %s11309_s20, 4   ;;  %s14325_s7 = smov %s10761_s10 }
0x12d6   : > { %s14326_s10 = smov %s10765_s11  ;;  %s14327_s11 = smov %s11320_s30 }
0x12d7   : > { %s14328_s0 = smov %s11309_s20  ;;  %99 = sbr.rel (!%p97_p11) target bundleno = 88 (0x58), region = 322 }
0x12dc   :  { %8847 = vsyncpa [#allocation3], 1 }
0x12dd   :  { %8849 = vsyncpa [#allocation3 + $0x1], 1 }
0x12de   :  { %8850 = vsyncpa [#allocation6], 1 }
0x12df   :  { %8851 = vsyncpa [#allocation9], 1 }
0x12e0   :  { %8852 = vsyncpa [#allocation12], 1 }
0x12e1   :  { %8853 = vsyncpa [#allocation15], 1 }
0x12e2   :  { %8854 = vsyncpa [#allocation18], 1 }
0x12e3   :  { %8855 = vsyncpa [#allocation21], 1 }
0x12e4   :  { %8856 = vsyncpa [#allocation24], 1 }
0x12e5   :  { %8857 = vsyncpa [#allocation27], 1 }
0x12e6   :  { %8858 = vsyncpa [#allocation30], 1 }
0x12e7   :  { %8859 = vsyncpa [#allocation4], 1 }
0x12e8   :  { %8861 = vsyncpa [#allocation4 + $0x1], 1 }

</bundles_post_ra>
